<compile_context>
chip_gen: v5e
topology: v5e:2x2
jax: 0.10.0
libtpu: 0.0.40
codegen_flags: <defaults>
</compile_context>

<pallas_src>
import functools

import jax
import jax.numpy as jnp
from jax.experimental import pallas as pl
from jax.experimental.pallas import tpu as pltpu


# ----------------------------------------------------------------------------
# Compiler params (generation-aware VMEM limit)
# ----------------------------------------------------------------------------
def _make_compiler_params():
    kwargs = dict(dimension_semantics=("parallel",))          # batch axis -> megacore
    try:
        cap = int(pltpu.get_tpu_info().vmem_capacity_bytes)
        kwargs["vmem_limit_bytes"] = cap * 3 // 4             # ~96 MiB v5e/v6e, ~48 MiB v7x
    except Exception:
        pass                                                  # fall back to compiler default
    return pltpu.CompilerParams(**kwargs)


_COMPILER_PARAMS = _make_compiler_params()


# ----------------------------------------------------------------------------
# In-kernel helpers.  Channel-major layout: activations are (C, L), L = H*W on lanes.
# ----------------------------------------------------------------------------
def _zero_halo(pad_ref, *, W, L):
    # Only the two (W+1)-wide halo strips ever need to be zero; the interior is fully
    # overwritten before every conv (no full-buffer clear, safe under megacore split).
    z = jnp.zeros((pad_ref.shape[0], W + 1), pad_ref.dtype)
    pad_ref[:, :W + 1] = z
    pad_ref[:, W + 1 + L:] = z


def _conv3x3_cl(pad_ref, x_cl, wt_ref, b_ref, *, H, W, relu):
    """3x3 same-padding conv, transposed (channel-major) orientation.

    x_cl:    (Cin, L) activation, L = H*W.
    pad_ref: (Cin, L + 2W + 2) bf16 staging scratch with a flat zero halo of W+1 on
             each side (emulates top/bottom zero padding); the nine (dy, dx) windows
             are contiguous lane-offset reads -> no re-pitched im2col copies.
    wt_ref:  (3, Cout, 3*Cin) weights with wt[dy, o, dx*Cin + c] = w[dy, dx, c, o].
    b_ref:   (Cout, 1) bias.
    Returns  (Cout, L) float32 = sum_dy bf16(wt[dy]) @ bf16(S_dy)  (f32 accumulation),
    where S_dy stacks the three dx-shifted windows along the K (sublane) axis.
    """
    Cin, L = x_cl.shape
    off = W + 1
    pad_ref[:, off:off + L] = x_cl.astype(pad_ref.dtype)

    lane = jax.lax.broadcasted_iota(jnp.int32, (1, L), 1)
    xx = lane % W
    not_left = xx != 0            # kill the x-1 neighbour on the left image edge
    not_right = xx != W - 1       # kill the x+1 neighbour on the right image edge

    acc = None
    for dy in range(3):
        oy = dy - 1
        parts = []
        for dx in range(3):
            ox = dx - 1
            k = off + oy * W + ox
            win = pad_ref[:, k:k + L]                         # (Cin, L) bf16 window
            if ox == -1:
                win = jnp.where(not_left, win, 0.0)
            elif ox == 1:
                win = jnp.where(not_right, win, 0.0)
            parts.append(win)
        s_dy = jnp.concatenate(parts, axis=0)                 # (3*Cin, L) bf16
        contrib = jnp.dot(wt_ref[dy].astype(jnp.bfloat16), s_dy,
                          preferred_element_type=jnp.float32)
        acc = contrib if acc is None else acc + contrib
    acc = acc + b_ref[...]                                    # (Cout, 1) broadcast on lanes
    if relu:
        acc = jnp.maximum(acc, 0.0)
    return acc


def _conv3x3_kernel(*refs, H, W, relu, add_skip):
    if add_skip:
        x_ref, skip_ref, wt_ref, b_ref, o_ref, pad_ref = refs
    else:
        x_ref, wt_ref, b_ref, o_ref, pad_ref = refs
        skip_ref = None
    L = x_ref.shape[2]
    _zero_halo(pad_ref, W=W, L=L)
    out = _conv3x3_cl(pad_ref, x_ref[0], wt_ref, b_ref, H=H, W=W, relu=relu)
    if add_skip:                                              # fused residual add (f32)
        out = out + skip_ref[0].astype(jnp.float32)
    o_ref[0] = out.astype(o_ref.dtype)


def _rcab_kernel(x_ref, w1_ref, b1_ref, w2_ref, b2_ref,
                 cw1_ref, cb1_ref, cw2t_ref, cb2_ref,
                 o_ref, pad_ref, *, H, W, res_scale):
    """Fused RCAB: conv3x3+ReLU -> conv3x3 -> channel attention -> residual add.
    Intermediate activation never leaves VMEM.  Channel attention runs on the
    VPU/XLU/EUP (broadcast-multiplies + reductions + sigmoid), not on the MXU."""
    L = x_ref.shape[2]
    _zero_halo(pad_ref, W=W, L=L)
    x = x_ref[0].astype(jnp.float32)                                     # (C, L)

    t = _conv3x3_cl(pad_ref, x, w1_ref, b1_ref, H=H, W=W, relu=True)
    t = _conv3x3_cl(pad_ref, t, w2_ref, b2_ref, H=H, W=W, relu=False)    # (C, L) f32

    # Channel attention: global avg pool -> 1x1 -> ReLU -> 1x1 -> sigmoid (all f32).
    pooled = jnp.mean(t, axis=1, keepdims=True)                          # (C, 1)
    h1 = jnp.sum(cw1_ref[...] * pooled, axis=0, keepdims=True) + cb1_ref[...]
    h1 = jnp.maximum(h1, 0.0)                                            # (1, Cr)
    att = jnp.sum(cw2t_ref[...] * h1, axis=1, keepdims=True) + cb2_ref[...]
    att = jax.nn.sigmoid(att)                                            # (C, 1)

    o_ref[0] = (x + res_scale * (t * att)).astype(o_ref.dtype)


# ----------------------------------------------------------------------------
# Pallas wrappers (activations in HBM as (B, C, H*W))
# ----------------------------------------------------------------------------
def _conv_weights(w, b):
    # w: (3, 3, Cin, Cout) -> (3, Cout, 3*Cin), columns ordered (dx, cin).
    kh, kw, cin, cout = w.shape
    wt = jnp.transpose(w, (0, 3, 1, 2)).reshape(kh, cout, kw * cin)
    return wt, b.reshape(cout, 1)


def conv3x3(x, w, b, *, H, W, relu=False, skip=None):
    """3x3 same-padding conv.  x: (B, Cin, H*W); w: (3,3,Cin,Cout); b: (Cout,).
    If `skip` (B, Cout, H*W) is given, stores conv(x) + skip (fused residual add)."""
    B, Cin, L = x.shape
    Cout = w.shape[-1]
    # Pad Cin to a multiple of 16 (bf16 sublane packing); zero channels contribute 0.
    pad_c = (-Cin) % 16
    if pad_c:
        x = jnp.pad(x, ((0, 0), (0, pad_c), (0, 0)))
        w = jnp.pad(w, ((0, 0), (0, 0), (0, pad_c), (0, 0)))
        Cin += pad_c
    wt, bcol = _conv_weights(w, b)
    add_skip = skip is not None

    inputs = [x]
    in_specs = [pl.BlockSpec((1, Cin, L), lambda bi: (bi, 0, 0))]
    if add_skip:
        inputs.append(skip)
        in_specs.append(pl.BlockSpec((1, Cout, L), lambda bi: (bi, 0, 0)))
    inputs += [wt, bcol]
    in_specs += [pl.BlockSpec((3, Cout, 3 * Cin), lambda bi: (0, 0, 0)),
                 pl.BlockSpec((Cout, 1), lambda bi: (0, 0))]

    kern = functools.partial(_conv3x3_kernel, H=H, W=W, relu=relu, add_skip=add_skip)
    flops = 2 * B * L * 9 * Cin * Cout
    bytes_accessed = 4 * (B * L * (Cin + Cout * (2 if add_skip else 1))
                          + 9 * Cin * Cout + Cout)
    return pl.pallas_call(
        kern,
        out_shape=jax.ShapeDtypeStruct((B, Cout, L), jnp.float32),
        grid=(B,),
        in_specs=in_specs,
        out_specs=pl.BlockSpec((1, Cout, L), lambda bi: (bi, 0, 0)),
        scratch_shapes=[pltpu.VMEM((Cin, L + 2 * W + 2), jnp.bfloat16)],
        compiler_params=_COMPILER_PARAMS,
        cost_estimate=pl.CostEstimate(flops=flops, transcendentals=0,
                                      bytes_accessed=bytes_accessed),
    )(*inputs)


def rcab_block(x, p, *, H, W, res_scale):
    """Fused RCAB block (one pallas_call).  x: (B, C, H*W)."""
    B, C, L = x.shape
    Cr = p['ca_w1'].shape[1]
    w1t, b1c = _conv_weights(p['w1'], p['b1'])
    w2t, b2c = _conv_weights(p['w2'], p['b2'])
    kern = functools.partial(_rcab_kernel, H=H, W=W, res_scale=float(res_scale))
    flops = 2 * (2 * B * L * 9 * C * C) + 4 * B * C * Cr
    bytes_accessed = 4 * (2 * B * L * C + 2 * 9 * C * C + 2 * C * Cr + 3 * C + Cr)
    return pl.pallas_call(
        kern,
        out_shape=jax.ShapeDtypeStruct((B, C, L), jnp.float32),
        grid=(B,),
        in_specs=[
            pl.BlockSpec((1, C, L), lambda bi: (bi, 0, 0)),
            pl.BlockSpec((3, C, 3 * C), lambda bi: (0, 0, 0)),
            pl.BlockSpec((C, 1), lambda bi: (0, 0)),
            pl.BlockSpec((3, C, 3 * C), lambda bi: (0, 0, 0)),
            pl.BlockSpec((C, 1), lambda bi: (0, 0)),
            pl.BlockSpec((C, Cr), lambda bi: (0, 0)),
            pl.BlockSpec((1, Cr), lambda bi: (0, 0)),
            pl.BlockSpec((C, Cr), lambda bi: (0, 0)),
            pl.BlockSpec((C, 1), lambda bi: (0, 0)),
        ],
        out_specs=pl.BlockSpec((1, C, L), lambda bi: (bi, 0, 0)),
        scratch_shapes=[pltpu.VMEM((C, L + 2 * W + 2), jnp.bfloat16)],
        compiler_params=_COMPILER_PARAMS,
        cost_estimate=pl.CostEstimate(flops=flops, transcendentals=B * C,
                                      bytes_accessed=bytes_accessed),
    )(x, w1t, b1c, w2t, b2c,
      p['ca_w1'], p['ca_b1'].reshape(1, Cr),
      p['ca_w2'].T, p['ca_b2'].reshape(C, 1))


# ----------------------------------------------------------------------------
# JAX glue (NCHW; pure reshapes / slicing)
# ----------------------------------------------------------------------------
def spatial2depth(x, scale):
    # NCHW, same (i, j) channel order as the PyTorch module.
    parts = [x[:, :, i::scale, j::scale] for i in range(scale) for j in range(scale)]
    return jnp.concatenate(parts, axis=1)


def pixel_shuffle_nchw(x, r):
    # out[:, c, h*r+i, w*r+j] = in[:, c*r*r + i*r + j, h, w]
    B, Cr2, H, W = x.shape
    C = Cr2 // (r * r)
    x = x.reshape(B, C, r, r, H, W)
    x = x.transpose(0, 1, 4, 2, 5, 3)       # B, C, H, r, W, r
    return x.reshape(B, C, H * r, W * r)


def pwc_placeholder(tgt, ref):
    # TODO(synk): Flow_PWC (pretrained PWC-Net optical flow + backward warping) has no
    # Pallas equivalent here; substitute identity flow (warp == reference frame).
    flow = jnp.zeros(ref.shape[:1] + (2,) + ref.shape[2:], ref.dtype)
    return ref, flow


# ----------------------------------------------------------------------------
# Parameters
# ----------------------------------------------------------------------------
def init_params(key, n_colors, scale, n_sequences, n_feats, n_resgroups,
                n_resblocks, reduction):
    keys = iter(jax.random.split(key, 256))

    def conv_p(cin, cout, ksize=3):
        w = jax.random.normal(next(keys), (ksize, ksize, cin, cout),
                              jnp.float32) * (1.0 / (ksize * ksize * cin) ** 0.5)
        b = jnp.zeros((cout,), jnp.float32)
        return w, b

    def lin_p(cin, cout):
        w = jax.random.normal(next(keys), (cin, cout), jnp.float32) * (1.0 / cin ** 0.5)
        b = jnp.zeros((cout,), jnp.float32)
        return w, b

    cin_head = n_sequences * (n_colors * (scale ** 2 + 1))
    params = {}
    params['head_w'], params['head_b'] = conv_p(cin_head, n_feats)

    groups = []
    for _ in range(n_resgroups):
        blocks = []
        for _ in range(n_resblocks):
            w1, b1 = conv_p(n_feats, n_feats)
            w2, b2 = conv_p(n_feats, n_feats)
            cw1, cb1 = lin_p(n_feats, n_feats // reduction)
            cw2, cb2 = lin_p(n_feats // reduction, n_feats)
            blocks.append(dict(w1=w1, b1=b1, w2=w2, b2=b2,
                               ca_w1=cw1, ca_b1=cb1, ca_w2=cw2, ca_b2=cb2))
        tw, tb = conv_p(n_feats, n_feats)
        groups.append(dict(blocks=blocks, tail_w=tw, tail_b=tb))
    params['groups'] = groups

    params['body_tail_w'], params['body_tail_b'] = conv_p(n_feats, n_feats)
    # Upsampler: conv to n_feats*scale^2 then pixel shuffle (single stage, scale 2/3).
    params['up_w'], params['up_b'] = conv_p(n_feats, n_feats * scale * scale)
    params['tail_w'], params['tail_b'] = conv_p(n_feats, n_colors)
    return params


# ----------------------------------------------------------------------------
# Forward pass (matches BASELINE_HR.forward semantics)
# ----------------------------------------------------------------------------
def baseline_hr_forward(params, x, x_bicubic, kernel, *, scale, n_resgroups,
                        n_resblocks, res_scale):
    _ = kernel[0]                       # kernel only inspected for its size in PyTorch
    if x.ndim != 5:
        raise Exception('x.ndimension must equal 5')
    B, N, C, H, W = x.shape
    L = H * W

    frames = [x[:, i] for i in range(N)]             # NCHW (B, C, H, W)
    bic = [x_bicubic[:, i] for i in range(N)]
    x_mid_bic = bic[N // 2]

    warp0_1, _f01 = pwc_placeholder(frames[1], frames[0])
    warp2_1, _f21 = pwc_placeholder(frames[1], frames[2])
    bic_warp0_1, _bf01 = pwc_placeholder(bic[1], bic[0])
    bic_warp2_1, _bf21 = pwc_placeholder(bic[1], bic[2])

    bw0_d = spatial2depth(bic_warp0_1, scale)
    bw2_d = spatial2depth(bic_warp2_1, scale)
    xmb_d = spatial2depth(x_mid_bic, scale)

    sr_input = jnp.concatenate(
        [bw0_d, warp0_1, xmb_d, frames[1], bw2_d, warp2_1], axis=1)   # (B, Cin_head, H, W)
    sr_flat = sr_input.reshape(B, sr_input.shape[1], L)              # lane-dense blocks

    head_out = conv3x3(sr_flat, params['head_w'], params['head_b'], H=H, W=W)

    h = head_out
    for g in range(n_resgroups):
        gp = params['groups'][g]
        gx = h
        for r in range(n_resblocks):
            gx = rcab_block(gx, gp['blocks'][r], H=H, W=W, res_scale=res_scale)
        # Group-tail conv with the group skip-add fused into its store.
        h = conv3x3(gx, gp['tail_w'], gp['tail_b'], H=H, W=W, skip=h)

    # Body-tail conv with the (body + head) skip-add fused into its store.
    feat = conv3x3(h, params['body_tail_w'], params['body_tail_b'], H=H, W=W,
                   skip=head_out)

    up = conv3x3(feat, params['up_w'], params['up_b'], H=H, W=W)
    up = pixel_shuffle_nchw(up.reshape(B, -1, H, W), scale)          # (B, nf, H*s, W*s)
    Hs, Ws = H * scale, W * scale
    out = conv3x3(up.reshape(B, -1, Hs * Ws), params['tail_w'], params['tail_b'],
                  H=Hs, W=Ws)
    return out.reshape(B, -1, Hs, Ws)                                # NCHW output


# ----------------------------------------------------------------------------
if __name__ == "__main__":
    key = jax.random.PRNGKey(0)
    k_x, k_bic, k_par = jax.random.split(key, 3)

    # Small, shape-consistent synthetic config (W chosen so H*W = 128: lane-dense).
    B, N, n_colors, H, W = 2, 3, 3, 8, 16
    scale = 2
    n_feats, n_resgroups, n_resblocks, reduction, res_scale = 32, 2, 2, 4, 1.0

    x = jax.random.normal(k_x, (B, N, n_colors, H, W), jnp.float32)
    x_bicubic = jax.random.normal(
        k_bic, (B, N, n_colors, H * scale, W * scale), jnp.float32)
    blur_kernel = jnp.ones((B, 13, 13), jnp.float32) / 169.0

    params = init_params(k_par, n_colors, scale, N, n_feats,
                         n_resgroups, n_resblocks, reduction)

    fwd = jax.jit(functools.partial(
        baseline_hr_forward, scale=scale, n_resgroups=n_resgroups,
        n_resblocks=n_resblocks, res_scale=res_scale))

    out = jax.block_until_ready(fwd(params, x, x_bicubic, blur_kernel))
    assert out.shape == (B, n_colors, H * scale, W * scale), out.shape
    print("KERNEL_OK")
</pallas_src>

<mosaic_0001>
module attributes {stable_mosaic.version = 11 : i64} {
  func.func @_conv3x3_kernel(%arg0: i32, %arg1: memref<1x48x128xf32, #tpu.memory_space<vmem>>, %arg2: memref<3x32x144xf32, #tpu.memory_space<vmem>>, %arg3: memref<32x1xf32, #tpu.memory_space<vmem>>, %arg4: memref<1x32x128xf32, #tpu.memory_space<vmem>>, %arg5: memref<48x162xbf16, #tpu.memory_space<vmem>>) attributes {dimension_semantics = [#tpu.dimension_semantics<parallel>], iteration_bounds = array<i64: 2>, scalar_prefetch = 0 : i64, scratch_operands = 1 : i64, tpu.core_type = #tpu.core_type<tc>, window_params = [{transform_indices = @transform_0, window_bounds = array<i64: 1, 48, 128>}, {pipeline_mode = #tpu.pipeline_mode<synchronous>, transform_indices = @transform_1, window_bounds = array<i64: 3, 32, 144>}, {pipeline_mode = #tpu.pipeline_mode<synchronous>, transform_indices = @transform_2, window_bounds = array<i64: 32, 1>}, {transform_indices = @transform_3, window_bounds = array<i64: 1, 32, 128>}]} {
    %cst = arith.constant 0.000000e+00 : bf16
    %0 = vector.broadcast %cst : bf16 to vector<48x17xbf16>
    %c0 = arith.constant 0 : index
    %c0_0 = arith.constant 0 : index
    %1 = vector.load %arg5[%c0, %c0_0] : memref<48x162xbf16, #tpu.memory_space<vmem>>, vector<48x17xbf16>
    tpu.vector_store %arg5[%c0, %c0_0], %0 {strides = array<i32>} : memref<48x162xbf16, #tpu.memory_space<vmem>>, vector<48x17xbf16>,
    %c0_1 = arith.constant 0 : index
    %c145 = arith.constant 145 : index
    %2 = vector.load %arg5[%c0_1, %c145] : memref<48x162xbf16, #tpu.memory_space<vmem>>, vector<48x17xbf16>
    tpu.vector_store %arg5[%c0_1, %c145], %0 {strides = array<i32>} : memref<48x162xbf16, #tpu.memory_space<vmem>>, vector<48x17xbf16>,
    %c0_2 = arith.constant 0 : index
    %c0_3 = arith.constant 0 : index
    %c0_4 = arith.constant 0 : index
    %3 = vector.load %arg1[%c0_2, %c0_3, %c0_4] : memref<1x48x128xf32, #tpu.memory_space<vmem>>, vector<1x48x128xf32>
    %4 = vector.shape_cast %3 : vector<1x48x128xf32> to vector<48x128xf32>
    %5 = arith.truncf %4 : vector<48x128xf32> to vector<48x128xbf16>
    %c0_5 = arith.constant 0 : index
    %c17 = arith.constant 17 : index
    %6 = vector.load %arg5[%c0_5, %c17] : memref<48x162xbf16, #tpu.memory_space<vmem>>, vector<48x128xbf16>
    tpu.vector_store %arg5[%c0_5, %c17], %5 {strides = array<i32>} : memref<48x162xbf16, #tpu.memory_space<vmem>>, vector<48x128xbf16>,
    %7 = tpu.iota {dimensions = array<i32: 1>} : vector<1x128xi32>
    %c16_i32 = arith.constant 16 : i32
    %c0_i32 = arith.constant 0 : i32
    %8 = arith.cmpi eq, %c16_i32, %c0_i32 : i32
    %c1_i32 = arith.constant 1 : i32
    %9 = arith.select %8, %c1_i32, %c16_i32 : i32
    %10 = vector.broadcast %9 : i32 to vector<1x128xi32>
    %11 = arith.remsi %7, %10 : vector<1x128xi32>
    %c0_i32_6 = arith.constant 0 : i32
    %12 = vector.broadcast %c0_i32_6 : i32 to vector<1x128xi32>
    %13 = arith.cmpi ne, %11, %12 : vector<1x128xi32>
    %c0_i32_7 = arith.constant 0 : i32
    %14 = vector.broadcast %c0_i32_7 : i32 to vector<1x128xi32>
    %15 = arith.cmpi slt, %11, %14 : vector<1x128xi32>
    %c0_i32_8 = arith.constant 0 : i32
    %16 = arith.cmpi slt, %9, %c0_i32_8 : i32
    %17 = vector.broadcast %16 : i1 to vector<1x128xi1>
    %18 = vector.broadcast %17 : vector<1x128xi1> to vector<1x128xi1>
    %19 = arith.xori %15, %18 : vector<1x128xi1>
    %20 = arith.andi %19, %13 : vector<1x128xi1>
    %21 = vector.broadcast %9 : i32 to vector<1x128xi32>
    %22 = arith.addi %11, %21 : vector<1x128xi32>
    %23 = arith.select %20, %22, %11 : vector<1x128xi1>, vector<1x128xi32>
    %c0_i32_9 = arith.constant 0 : i32
    %24 = vector.broadcast %c0_i32_9 : i32 to vector<1x128xi32>
    %25 = arith.cmpi ne, %23, %24 : vector<1x128xi32>
    %c15_i32 = arith.constant 15 : i32
    %26 = vector.broadcast %c15_i32 : i32 to vector<1x128xi32>
    %27 = arith.cmpi ne, %23, %26 : vector<1x128xi32>
    %c0_10 = arith.constant 0 : index
    %c0_11 = arith.constant 0 : index
    %28 = vector.load %arg5[%c0_10, %c0_11] : memref<48x162xbf16, #tpu.memory_space<vmem>>, vector<48x128xbf16>
    %cst_12 = arith.constant 0.000000e+00 : f32
    %29 = arith.truncf %cst_12 : f32 to bf16
    %30 = vector.shape_cast %25 : vector<1x128xi1> to vector<1x128xi1>
    %31 = vector.broadcast %30 : vector<1x128xi1> to vector<48x128xi1>
    %32 = vector.broadcast %29 : bf16 to vector<48x128xbf16>
    %33 = arith.select %31, %28, %32 : vector<48x128xi1>, vector<48x128xbf16>
    %c0_13 = arith.constant 0 : index
    %c1 = arith.constant 1 : index
    %34 = vector.load %arg5[%c0_13, %c1] : memref<48x162xbf16, #tpu.memory_space<vmem>>, vector<48x128xbf16>
    %c0_14 = arith.constant 0 : index
    %c2 = arith.constant 2 : index
    %35 = vector.load %arg5[%c0_14, %c2] : memref<48x162xbf16, #tpu.memory_space<vmem>>, vector<48x128xbf16>
    %cst_15 = arith.constant 0.000000e+00 : f32
    %36 = arith.truncf %cst_15 : f32 to bf16
    %37 = vector.shape_cast %27 : vector<1x128xi1> to vector<1x128xi1>
    %38 = vector.broadcast %37 : vector<1x128xi1> to vector<48x128xi1>
    %39 = vector.broadcast %36 : bf16 to vector<48x128xbf16>
    %40 = arith.select %38, %35, %39 : vector<48x128xi1>, vector<48x128xbf16>
    %41 = tpu.concatenate %33, %34, %40 in 0 : vector<48x128xbf16>, vector<48x128xbf16>, vector<48x128xbf16> -> vector<144x128xbf16>
    %c0_16 = arith.constant 0 : index
    %c0_17 = arith.constant 0 : index
    %c0_18 = arith.constant 0 : index
    %42 = vector.load %arg2[%c0_16, %c0_17, %c0_18] : memref<3x32x144xf32, #tpu.memory_space<vmem>>, vector<1x32x144xf32>
    %43 = vector.shape_cast %42 : vector<1x32x144xf32> to vector<32x144xf32>
    %44 = arith.truncf %43 : vector<32x144xf32> to vector<32x144xbf16>
    %cst_19 = arith.constant dense<0.000000e+00> : vector<32x128xf32>
    %45 = tpu.matmul %44, %41, %cst_19 {dimension_numbers = #tpu.dot_dimension_numbers<[1], [0], [0], [1], [0, 0, 1, 1], [], []>} : vector<32x144xbf16>, vector<144x128xbf16>, vector<32x128xf32> -> vector<32x128xf32>
    %c0_20 = arith.constant 0 : index
    %c16 = arith.constant 16 : index
    %46 = vector.load %arg5[%c0_20, %c16] : memref<48x162xbf16, #tpu.memory_space<vmem>>, vector<48x128xbf16>
    %cst_21 = arith.constant 0.000000e+00 : f32
    %47 = arith.truncf %cst_21 : f32 to bf16
    %48 = vector.shape_cast %25 : vector<1x128xi1> to vector<1x128xi1>
    %49 = vector.broadcast %48 : vector<1x128xi1> to vector<48x128xi1>
    %50 = vector.broadcast %47 : bf16 to vector<48x128xbf16>
    %51 = arith.select %49, %46, %50 : vector<48x128xi1>, vector<48x128xbf16>
    %c0_22 = arith.constant 0 : index
    %c17_23 = arith.constant 17 : index
    %52 = vector.load %arg5[%c0_22, %c17_23] : memref<48x162xbf16, #tpu.memory_space<vmem>>, vector<48x128xbf16>
    %c0_24 = arith.constant 0 : index
    %c18 = arith.constant 18 : index
    %53 = vector.load %arg5[%c0_24, %c18] : memref<48x162xbf16, #tpu.memory_space<vmem>>, vector<48x128xbf16>
    %cst_25 = arith.constant 0.000000e+00 : f32
    %54 = arith.truncf %cst_25 : f32 to bf16
    %55 = vector.shape_cast %27 : vector<1x128xi1> to vector<1x128xi1>
    %56 = vector.broadcast %55 : vector<1x128xi1> to vector<48x128xi1>
    %57 = vector.broadcast %54 : bf16 to vector<48x128xbf16>
    %58 = arith.select %56, %53, %57 : vector<48x128xi1>, vector<48x128xbf16>
    %59 = tpu.concatenate %51, %52, %58 in 0 : vector<48x128xbf16>, vector<48x128xbf16>, vector<48x128xbf16> -> vector<144x128xbf16>
    %c1_26 = arith.constant 1 : index
    %c0_27 = arith.constant 0 : index
    %c0_28 = arith.constant 0 : index
    %60 = vector.load %arg2[%c1_26, %c0_27, %c0_28] : memref<3x32x144xf32, #tpu.memory_space<vmem>>, vector<1x32x144xf32>
    %61 = vector.shape_cast %60 : vector<1x32x144xf32> to vector<32x144xf32>
    %62 = arith.truncf %61 : vector<32x144xf32> to vector<32x144xbf16>
    %cst_29 = arith.constant dense<0.000000e+00> : vector<32x128xf32>
    %63 = tpu.matmul %62, %59, %cst_29 {dimension_numbers = #tpu.dot_dimension_numbers<[1], [0], [0], [1], [0, 0, 1, 1], [], []>} : vector<32x144xbf16>, vector<144x128xbf16>, vector<32x128xf32> -> vector<32x128xf32>
    %64 = arith.addf %45, %63 : vector<32x128xf32>
    %c0_30 = arith.constant 0 : index
    %c32 = arith.constant 32 : index
    %65 = vector.load %arg5[%c0_30, %c32] : memref<48x162xbf16, #tpu.memory_space<vmem>>, vector<48x128xbf16>
    %cst_31 = arith.constant 0.000000e+00 : f32
    %66 = arith.truncf %cst_31 : f32 to bf16
    %67 = vector.shape_cast %25 : vector<1x128xi1> to vector<1x128xi1>
    %68 = vector.broadcast %67 : vector<1x128xi1> to vector<48x128xi1>
    %69 = vector.broadcast %66 : bf16 to vector<48x128xbf16>
    %70 = arith.select %68, %65, %69 : vector<48x128xi1>, vector<48x128xbf16>
    %c0_32 = arith.constant 0 : index
    %c33 = arith.constant 33 : index
    %71 = vector.load %arg5[%c0_32, %c33] : memref<48x162xbf16, #tpu.memory_space<vmem>>, vector<48x128xbf16>
    %c0_33 = arith.constant 0 : index
    %c34 = arith.constant 34 : index
    %72 = vector.load %arg5[%c0_33, %c34] : memref<48x162xbf16, #tpu.memory_space<vmem>>, vector<48x128xbf16>
    %cst_34 = arith.constant 0.000000e+00 : f32
    %73 = arith.truncf %cst_34 : f32 to bf16
    %74 = vector.shape_cast %27 : vector<1x128xi1> to vector<1x128xi1>
    %75 = vector.broadcast %74 : vector<1x128xi1> to vector<48x128xi1>
    %76 = vector.broadcast %73 : bf16 to vector<48x128xbf16>
    %77 = arith.select %75, %72, %76 : vector<48x128xi1>, vector<48x128xbf16>
    %78 = tpu.concatenate %70, %71, %77 in 0 : vector<48x128xbf16>, vector<48x128xbf16>, vector<48x128xbf16> -> vector<144x128xbf16>
    %c2_35 = arith.constant 2 : index
    %c0_36 = arith.constant 0 : index
    %c0_37 = arith.constant 0 : index
    %79 = vector.load %arg2[%c2_35, %c0_36, %c0_37] : memref<3x32x144xf32, #tpu.memory_space<vmem>>, vector<1x32x144xf32>
    %80 = vector.shape_cast %79 : vector<1x32x144xf32> to vector<32x144xf32>
    %81 = arith.truncf %80 : vector<32x144xf32> to vector<32x144xbf16>
    %cst_38 = arith.constant dense<0.000000e+00> : vector<32x128xf32>
    %82 = tpu.matmul %81, %78, %cst_38 {dimension_numbers = #tpu.dot_dimension_numbers<[1], [0], [0], [1], [0, 0, 1, 1], [], []>} : vector<32x144xbf16>, vector<144x128xbf16>, vector<32x128xf32> -> vector<32x128xf32>
    %83 = arith.addf %64, %82 : vector<32x128xf32>
    %c0_39 = arith.constant 0 : index
    %c0_40 = arith.constant 0 : index
    %84 = vector.load %arg3[%c0_39, %c0_40] : memref<32x1xf32, #tpu.memory_space<vmem>>, vector<32x1xf32>
    %85 = vector.broadcast %84 : vector<32x1xf32> to vector<32x128xf32>
    %86 = arith.addf %83, %85 : vector<32x128xf32>
    %c0_41 = arith.constant 0 : index
    %c0_42 = arith.constant 0 : index
    %c0_43 = arith.constant 0 : index
    %87 = vector.load %arg4[%c0_41, %c0_42, %c0_43] : memref<1x32x128xf32, #tpu.memory_space<vmem>>, vector<1x32x128xf32>
    %88 = vector.shape_cast %87 : vector<1x32x128xf32> to vector<32x128xf32>
    %89 = vector.shape_cast %86 : vector<32x128xf32> to vector<1x32x128xf32>
    tpu.vector_store %arg4[%c0_41, %c0_42, %c0_43], %89 {strides = array<i32>} : memref<1x32x128xf32, #tpu.memory_space<vmem>>, vector<1x32x128xf32>,
    return
  }
  func.func @transform_0(%arg0: i32) -> (i32, i32, i32) {
    %c0_i32 = arith.constant 0 : i32
    %c0_i32_0 = arith.constant 0 : i32
    %c0_i32_1 = arith.constant 0 : i32
    return %arg0, %c0_i32, %c0_i32_0 : i32, i32, i32
  }
  func.func @transform_1(%arg0: i32) -> (i32, i32, i32) {
    %c0_i32 = arith.constant 0 : i32
    %c0_i32_0 = arith.constant 0 : i32
    %c0_i32_1 = arith.constant 0 : i32
    %c0_i32_2 = arith.constant 0 : i32
    return %c0_i32, %c0_i32_0, %c0_i32_1 : i32, i32, i32
  }
  func.func @transform_2(%arg0: i32) -> (i32, i32) {
    %c0_i32 = arith.constant 0 : i32
    %c0_i32_0 = arith.constant 0 : i32
    %c0_i32_1 = arith.constant 0 : i32
    return %c0_i32, %c0_i32_0 : i32, i32
  }
  func.func @transform_3(%arg0: i32) -> (i32, i32, i32) {
    %c0_i32 = arith.constant 0 : i32
    %c0_i32_0 = arith.constant 0 : i32
    %c0_i32_1 = arith.constant 0 : i32
    return %arg0, %c0_i32, %c0_i32_0 : i32, i32, i32
  }
}

module attributes {stable_mosaic.version = 11 : i64} {
  func.func @_rcab_kernel(%arg0: i32, %arg1: memref<1x32x128xf32, #tpu.memory_space<vmem>>, %arg2: memref<3x32x96xf32, #tpu.memory_space<vmem>>, %arg3: memref<32x1xf32, #tpu.memory_space<vmem>>, %arg4: memref<3x32x96xf32, #tpu.memory_space<vmem>>, %arg5: memref<32x1xf32, #tpu.memory_space<vmem>>, %arg6: memref<32x8xf32, #tpu.memory_space<vmem>>, %arg7: memref<1x8xf32, #tpu.memory_space<vmem>>, %arg8: memref<32x8xf32, #tpu.memory_space<vmem>>, %arg9: memref<32x1xf32, #tpu.memory_space<vmem>>, %arg10: memref<1x32x128xf32, #tpu.memory_space<vmem>>, %arg11: memref<32x162xbf16, #tpu.memory_space<vmem>>) attributes {dimension_semantics = [#tpu.dimension_semantics<parallel>], iteration_bounds = array<i64: 2>, scalar_prefetch = 0 : i64, scratch_operands = 1 : i64, tpu.core_type = #tpu.core_type<tc>, window_params = [{transform_indices = @transform_0, window_bounds = array<i64: 1, 32, 128>}, {pipeline_mode = #tpu.pipeline_mode<synchronous>, transform_indices = @transform_1, window_bounds = array<i64: 3, 32, 96>}, {pipeline_mode = #tpu.pipeline_mode<synchronous>, transform_indices = @transform_2, window_bounds = array<i64: 32, 1>}, {pipeline_mode = #tpu.pipeline_mode<synchronous>, transform_indices = @transform_3, window_bounds = array<i64: 3, 32, 96>}, {pipeline_mode = #tpu.pipeline_mode<synchronous>, transform_indices = @transform_4, window_bounds = array<i64: 32, 1>}, {pipeline_mode = #tpu.pipeline_mode<synchronous>, transform_indices = @transform_5, window_bounds = array<i64: 32, 8>}, {pipeline_mode = #tpu.pipeline_mode<synchronous>, transform_indices = @transform_6, window_bounds = array<i64: 1, 8>}, {pipeline_mode = #tpu.pipeline_mode<synchronous>, transform_indices = @transform_7, window_bounds = array<i64: 32, 8>}, {pipeline_mode = #tpu.pipeline_mode<synchronous>, transform_indices = @transform_8, window_bounds = array<i64: 32, 1>}, {transform_indices = @transform_9, window_bounds = array<i64: 1, 32, 128>}]} {
    %cst = arith.constant 0.000000e+00 : bf16
    %0 = vector.broadcast %cst : bf16 to vector<32x17xbf16>
    %c0 = arith.constant 0 : index
    %c0_0 = arith.constant 0 : index
    %1 = vector.load %arg11[%c0, %c0_0] : memref<32x162xbf16, #tpu.memory_space<vmem>>, vector<32x17xbf16>
    tpu.vector_store %arg11[%c0, %c0_0], %0 {strides = array<i32>} : memref<32x162xbf16, #tpu.memory_space<vmem>>, vector<32x17xbf16>,
    %c0_1 = arith.constant 0 : index
    %c145 = arith.constant 145 : index
    %2 = vector.load %arg11[%c0_1, %c145] : memref<32x162xbf16, #tpu.memory_space<vmem>>, vector<32x17xbf16>
    tpu.vector_store %arg11[%c0_1, %c145], %0 {strides = array<i32>} : memref<32x162xbf16, #tpu.memory_space<vmem>>, vector<32x17xbf16>,
    %c0_2 = arith.constant 0 : index
    %c0_3 = arith.constant 0 : index
    %c0_4 = arith.constant 0 : index
    %3 = vector.load %arg1[%c0_2, %c0_3, %c0_4] : memref<1x32x128xf32, #tpu.memory_space<vmem>>, vector<1x32x128xf32>
    %4 = vector.shape_cast %3 : vector<1x32x128xf32> to vector<32x128xf32>
    %5 = arith.truncf %4 : vector<32x128xf32> to vector<32x128xbf16>
    %c0_5 = arith.constant 0 : index
    %c17 = arith.constant 17 : index
    %6 = vector.load %arg11[%c0_5, %c17] : memref<32x162xbf16, #tpu.memory_space<vmem>>, vector<32x128xbf16>
    tpu.vector_store %arg11[%c0_5, %c17], %5 {strides = array<i32>} : memref<32x162xbf16, #tpu.memory_space<vmem>>, vector<32x128xbf16>,
    %7 = tpu.iota {dimensions = array<i32: 1>} : vector<1x128xi32>
    %c16_i32 = arith.constant 16 : i32
    %c0_i32 = arith.constant 0 : i32
    %8 = arith.cmpi eq, %c16_i32, %c0_i32 : i32
    %c1_i32 = arith.constant 1 : i32
    %9 = arith.select %8, %c1_i32, %c16_i32 : i32
    %10 = vector.broadcast %9 : i32 to vector<1x128xi32>
    %11 = arith.remsi %7, %10 : vector<1x128xi32>
    %c0_i32_6 = arith.constant 0 : i32
    %12 = vector.broadcast %c0_i32_6 : i32 to vector<1x128xi32>
    %13 = arith.cmpi ne, %11, %12 : vector<1x128xi32>
    %c0_i32_7 = arith.constant 0 : i32
    %14 = vector.broadcast %c0_i32_7 : i32 to vector<1x128xi32>
    %15 = arith.cmpi slt, %11, %14 : vector<1x128xi32>
    %c0_i32_8 = arith.constant 0 : i32
    %16 = arith.cmpi slt, %9, %c0_i32_8 : i32
    %17 = vector.broadcast %16 : i1 to vector<1x128xi1>
    %18 = vector.broadcast %17 : vector<1x128xi1> to vector<1x128xi1>
    %19 = arith.xori %15, %18 : vector<1x128xi1>
    %20 = arith.andi %19, %13 : vector<1x128xi1>
    %21 = vector.broadcast %9 : i32 to vector<1x128xi32>
    %22 = arith.addi %11, %21 : vector<1x128xi32>
    %23 = arith.select %20, %22, %11 : vector<1x128xi1>, vector<1x128xi32>
    %c0_i32_9 = arith.constant 0 : i32
    %24 = vector.broadcast %c0_i32_9 : i32 to vector<1x128xi32>
    %25 = arith.cmpi ne, %23, %24 : vector<1x128xi32>
    %c15_i32 = arith.constant 15 : i32
    %26 = vector.broadcast %c15_i32 : i32 to vector<1x128xi32>
    %27 = arith.cmpi ne, %23, %26 : vector<1x128xi32>
    %c0_10 = arith.constant 0 : index
    %c0_11 = arith.constant 0 : index
    %28 = vector.load %arg11[%c0_10, %c0_11] : memref<32x162xbf16, #tpu.memory_space<vmem>>, vector<32x128xbf16>
    %cst_12 = arith.constant 0.000000e+00 : f32
    %29 = arith.truncf %cst_12 : f32 to bf16
    %30 = vector.shape_cast %25 : vector<1x128xi1> to vector<1x128xi1>
    %31 = vector.broadcast %30 : vector<1x128xi1> to vector<32x128xi1>
    %32 = vector.broadcast %29 : bf16 to vector<32x128xbf16>
    %33 = arith.select %31, %28, %32 : vector<32x128xi1>, vector<32x128xbf16>
    %c0_13 = arith.constant 0 : index
    %c1 = arith.constant 1 : index
    %34 = vector.load %arg11[%c0_13, %c1] : memref<32x162xbf16, #tpu.memory_space<vmem>>, vector<32x128xbf16>
    %c0_14 = arith.constant 0 : index
    %c2 = arith.constant 2 : index
    %35 = vector.load %arg11[%c0_14, %c2] : memref<32x162xbf16, #tpu.memory_space<vmem>>, vector<32x128xbf16>
    %cst_15 = arith.constant 0.000000e+00 : f32
    %36 = arith.truncf %cst_15 : f32 to bf16
    %37 = vector.shape_cast %27 : vector<1x128xi1> to vector<1x128xi1>
    %38 = vector.broadcast %37 : vector<1x128xi1> to vector<32x128xi1>
    %39 = vector.broadcast %36 : bf16 to vector<32x128xbf16>
    %40 = arith.select %38, %35, %39 : vector<32x128xi1>, vector<32x128xbf16>
    %41 = tpu.concatenate %33, %34, %40 in 0 : vector<32x128xbf16>, vector<32x128xbf16>, vector<32x128xbf16> -> vector<96x128xbf16>
    %c0_16 = arith.constant 0 : index
    %c0_17 = arith.constant 0 : index
    %c0_18 = arith.constant 0 : index
    %42 = vector.load %arg2[%c0_16, %c0_17, %c0_18] : memref<3x32x96xf32, #tpu.memory_space<vmem>>, vector<1x32x96xf32>
    %43 = vector.shape_cast %42 : vector<1x32x96xf32> to vector<32x96xf32>
    %44 = arith.truncf %43 : vector<32x96xf32> to vector<32x96xbf16>
    %cst_19 = arith.constant dense<0.000000e+00> : vector<32x128xf32>
    %45 = tpu.matmul %44, %41, %cst_19 {dimension_numbers = #tpu.dot_dimension_numbers<[1], [0], [0], [1], [0, 0, 1, 1], [], []>} : vector<32x96xbf16>, vector<96x128xbf16>, vector<32x128xf32> -> vector<32x128xf32>
    %c0_20 = arith.constant 0 : index
    %c16 = arith.constant 16 : index
    %46 = vector.load %arg11[%c0_20, %c16] : memref<32x162xbf16, #tpu.memory_space<vmem>>, vector<32x128xbf16>
    %cst_21 = arith.constant 0.000000e+00 : f32
    %47 = arith.truncf %cst_21 : f32 to bf16
    %48 = vector.shape_cast %25 : vector<1x128xi1> to vector<1x128xi1>
    %49 = vector.broadcast %48 : vector<1x128xi1> to vector<32x128xi1>
    %50 = vector.broadcast %47 : bf16 to vector<32x128xbf16>
    %51 = arith.select %49, %46, %50 : vector<32x128xi1>, vector<32x128xbf16>
    %c0_22 = arith.constant 0 : index
    %c17_23 = arith.constant 17 : index
    %52 = vector.load %arg11[%c0_22, %c17_23] : memref<32x162xbf16, #tpu.memory_space<vmem>>, vector<32x128xbf16>
    %c0_24 = arith.constant 0 : index
    %c18 = arith.constant 18 : index
    %53 = vector.load %arg11[%c0_24, %c18] : memref<32x162xbf16, #tpu.memory_space<vmem>>, vector<32x128xbf16>
    %cst_25 = arith.constant 0.000000e+00 : f32
    %54 = arith.truncf %cst_25 : f32 to bf16
    %55 = vector.shape_cast %27 : vector<1x128xi1> to vector<1x128xi1>
    %56 = vector.broadcast %55 : vector<1x128xi1> to vector<32x128xi1>
    %57 = vector.broadcast %54 : bf16 to vector<32x128xbf16>
    %58 = arith.select %56, %53, %57 : vector<32x128xi1>, vector<32x128xbf16>
    %59 = tpu.concatenate %51, %52, %58 in 0 : vector<32x128xbf16>, vector<32x128xbf16>, vector<32x128xbf16> -> vector<96x128xbf16>
    %c1_26 = arith.constant 1 : index
    %c0_27 = arith.constant 0 : index
    %c0_28 = arith.constant 0 : index
    %60 = vector.load %arg2[%c1_26, %c0_27, %c0_28] : memref<3x32x96xf32, #tpu.memory_space<vmem>>, vector<1x32x96xf32>
    %61 = vector.shape_cast %60 : vector<1x32x96xf32> to vector<32x96xf32>
    %62 = arith.truncf %61 : vector<32x96xf32> to vector<32x96xbf16>
    %cst_29 = arith.constant dense<0.000000e+00> : vector<32x128xf32>
    %63 = tpu.matmul %62, %59, %cst_29 {dimension_numbers = #tpu.dot_dimension_numbers<[1], [0], [0], [1], [0, 0, 1, 1], [], []>} : vector<32x96xbf16>, vector<96x128xbf16>, vector<32x128xf32> -> vector<32x128xf32>
    %64 = arith.addf %45, %63 : vector<32x128xf32>
    %c0_30 = arith.constant 0 : index
    %c32 = arith.constant 32 : index
    %65 = vector.load %arg11[%c0_30, %c32] : memref<32x162xbf16, #tpu.memory_space<vmem>>, vector<32x128xbf16>
    %cst_31 = arith.constant 0.000000e+00 : f32
    %66 = arith.truncf %cst_31 : f32 to bf16
    %67 = vector.shape_cast %25 : vector<1x128xi1> to vector<1x128xi1>
    %68 = vector.broadcast %67 : vector<1x128xi1> to vector<32x128xi1>
    %69 = vector.broadcast %66 : bf16 to vector<32x128xbf16>
    %70 = arith.select %68, %65, %69 : vector<32x128xi1>, vector<32x128xbf16>
    %c0_32 = arith.constant 0 : index
    %c33 = arith.constant 33 : index
    %71 = vector.load %arg11[%c0_32, %c33] : memref<32x162xbf16, #tpu.memory_space<vmem>>, vector<32x128xbf16>
    %c0_33 = arith.constant 0 : index
    %c34 = arith.constant 34 : index
    %72 = vector.load %arg11[%c0_33, %c34] : memref<32x162xbf16, #tpu.memory_space<vmem>>, vector<32x128xbf16>
    %cst_34 = arith.constant 0.000000e+00 : f32
    %73 = arith.truncf %cst_34 : f32 to bf16
    %74 = vector.shape_cast %27 : vector<1x128xi1> to vector<1x128xi1>
    %75 = vector.broadcast %74 : vector<1x128xi1> to vector<32x128xi1>
    %76 = vector.broadcast %73 : bf16 to vector<32x128xbf16>
    %77 = arith.select %75, %72, %76 : vector<32x128xi1>, vector<32x128xbf16>
    %78 = tpu.concatenate %70, %71, %77 in 0 : vector<32x128xbf16>, vector<32x128xbf16>, vector<32x128xbf16> -> vector<96x128xbf16>
    %c2_35 = arith.constant 2 : index
    %c0_36 = arith.constant 0 : index
    %c0_37 = arith.constant 0 : index
    %79 = vector.load %arg2[%c2_35, %c0_36, %c0_37] : memref<3x32x96xf32, #tpu.memory_space<vmem>>, vector<1x32x96xf32>
    %80 = vector.shape_cast %79 : vector<1x32x96xf32> to vector<32x96xf32>
    %81 = arith.truncf %80 : vector<32x96xf32> to vector<32x96xbf16>
    %cst_38 = arith.constant dense<0.000000e+00> : vector<32x128xf32>
    %82 = tpu.matmul %81, %78, %cst_38 {dimension_numbers = #tpu.dot_dimension_numbers<[1], [0], [0], [1], [0, 0, 1, 1], [], []>} : vector<32x96xbf16>, vector<96x128xbf16>, vector<32x128xf32> -> vector<32x128xf32>
    %83 = arith.addf %64, %82 : vector<32x128xf32>
    %c0_39 = arith.constant 0 : index
    %c0_40 = arith.constant 0 : index
    %84 = vector.load %arg3[%c0_39, %c0_40] : memref<32x1xf32, #tpu.memory_space<vmem>>, vector<32x1xf32>
    %85 = vector.broadcast %84 : vector<32x1xf32> to vector<32x128xf32>
    %86 = arith.addf %83, %85 : vector<32x128xf32>
    %cst_41 = arith.constant 0.000000e+00 : f32
    %87 = vector.broadcast %cst_41 : f32 to vector<32x128xf32>
    %88 = arith.maximumf %86, %87 : vector<32x128xf32>
    %89 = arith.truncf %88 : vector<32x128xf32> to vector<32x128xbf16>
    %c0_42 = arith.constant 0 : index
    %c17_43 = arith.constant 17 : index
    %90 = vector.load %arg11[%c0_42, %c17_43] : memref<32x162xbf16, #tpu.memory_space<vmem>>, vector<32x128xbf16>
    tpu.vector_store %arg11[%c0_42, %c17_43], %89 {strides = array<i32>} : memref<32x162xbf16, #tpu.memory_space<vmem>>, vector<32x128xbf16>,
    %91 = tpu.iota {dimensions = array<i32: 1>} : vector<1x128xi32>
    %c16_i32_44 = arith.constant 16 : i32
    %c0_i32_45 = arith.constant 0 : i32
    %92 = arith.cmpi eq, %c16_i32_44, %c0_i32_45 : i32
    %c1_i32_46 = arith.constant 1 : i32
    %93 = arith.select %92, %c1_i32_46, %c16_i32_44 : i32
    %94 = vector.broadcast %93 : i32 to vector<1x128xi32>
    %95 = arith.remsi %91, %94 : vector<1x128xi32>
    %c0_i32_47 = arith.constant 0 : i32
    %96 = vector.broadcast %c0_i32_47 : i32 to vector<1x128xi32>
    %97 = arith.cmpi ne, %95, %96 : vector<1x128xi32>
    %c0_i32_48 = arith.constant 0 : i32
    %98 = vector.broadcast %c0_i32_48 : i32 to vector<1x128xi32>
    %99 = arith.cmpi slt, %95, %98 : vector<1x128xi32>
    %c0_i32_49 = arith.constant 0 : i32
    %100 = arith.cmpi slt, %93, %c0_i32_49 : i32
    %101 = vector.broadcast %100 : i1 to vector<1x128xi1>
    %102 = vector.broadcast %101 : vector<1x128xi1> to vector<1x128xi1>
    %103 = arith.xori %99, %102 : vector<1x128xi1>
    %104 = arith.andi %103, %97 : vector<1x128xi1>
    %105 = vector.broadcast %93 : i32 to vector<1x128xi32>
    %106 = arith.addi %95, %105 : vector<1x128xi32>
    %107 = arith.select %104, %106, %95 : vector<1x128xi1>, vector<1x128xi32>
    %c0_i32_50 = arith.constant 0 : i32
    %108 = vector.broadcast %c0_i32_50 : i32 to vector<1x128xi32>
    %109 = arith.cmpi ne, %107, %108 : vector<1x128xi32>
    %c15_i32_51 = arith.constant 15 : i32
    %110 = vector.broadcast %c15_i32_51 : i32 to vector<1x128xi32>
    %111 = arith.cmpi ne, %107, %110 : vector<1x128xi32>
    %c0_52 = arith.constant 0 : index
    %c0_53 = arith.constant 0 : index
    %112 = vector.load %arg11[%c0_52, %c0_53] : memref<32x162xbf16, #tpu.memory_space<vmem>>, vector<32x128xbf16>
    %cst_54 = arith.constant 0.000000e+00 : f32
    %113 = arith.truncf %cst_54 : f32 to bf16
    %114 = vector.shape_cast %109 : vector<1x128xi1> to vector<1x128xi1>
    %115 = vector.broadcast %114 : vector<1x128xi1> to vector<32x128xi1>
    %116 = vector.broadcast %113 : bf16 to vector<32x128xbf16>
    %117 = arith.select %115, %112, %116 : vector<32x128xi1>, vector<32x128xbf16>
    %c0_55 = arith.constant 0 : index
    %c1_56 = arith.constant 1 : index
    %118 = vector.load %arg11[%c0_55, %c1_56] : memref<32x162xbf16, #tpu.memory_space<vmem>>, vector<32x128xbf16>
    %c0_57 = arith.constant 0 : index
    %c2_58 = arith.constant 2 : index
    %119 = vector.load %arg11[%c0_57, %c2_58] : memref<32x162xbf16, #tpu.memory_space<vmem>>, vector<32x128xbf16>
    %cst_59 = arith.constant 0.000000e+00 : f32
    %120 = arith.truncf %cst_59 : f32 to bf16
    %121 = vector.shape_cast %111 : vector<1x128xi1> to vector<1x128xi1>
    %122 = vector.broadcast %121 : vector<1x128xi1> to vector<32x128xi1>
    %123 = vector.broadcast %120 : bf16 to vector<32x128xbf16>
    %124 = arith.select %122, %119, %123 : vector<32x128xi1>, vector<32x128xbf16>
    %125 = tpu.concatenate %117, %118, %124 in 0 : vector<32x128xbf16>, vector<32x128xbf16>, vector<32x128xbf16> -> vector<96x128xbf16>
    %c0_60 = arith.constant 0 : index
    %c0_61 = arith.constant 0 : index
    %c0_62 = arith.constant 0 : index
    %126 = vector.load %arg4[%c0_60, %c0_61, %c0_62] : memref<3x32x96xf32, #tpu.memory_space<vmem>>, vector<1x32x96xf32>
    %127 = vector.shape_cast %126 : vector<1x32x96xf32> to vector<32x96xf32>
    %128 = arith.truncf %127 : vector<32x96xf32> to vector<32x96xbf16>
    %cst_63 = arith.constant dense<0.000000e+00> : vector<32x128xf32>
    %129 = tpu.matmul %128, %125, %cst_63 {dimension_numbers = #tpu.dot_dimension_numbers<[1], [0], [0], [1], [0, 0, 1, 1], [], []>} : vector<32x96xbf16>, vector<96x128xbf16>, vector<32x128xf32> -> vector<32x128xf32>
    %c0_64 = arith.constant 0 : index
    %c16_65 = arith.constant 16 : index
    %130 = vector.load %arg11[%c0_64, %c16_65] : memref<32x162xbf16, #tpu.memory_space<vmem>>, vector<32x128xbf16>
    %cst_66 = arith.constant 0.000000e+00 : f32
    %131 = arith.truncf %cst_66 : f32 to bf16
    %132 = vector.shape_cast %109 : vector<1x128xi1> to vector<1x128xi1>
    %133 = vector.broadcast %132 : vector<1x128xi1> to vector<32x128xi1>
    %134 = vector.broadcast %131 : bf16 to vector<32x128xbf16>
    %135 = arith.select %133, %130, %134 : vector<32x128xi1>, vector<32x128xbf16>
    %c0_67 = arith.constant 0 : index
    %c17_68 = arith.constant 17 : index
    %136 = vector.load %arg11[%c0_67, %c17_68] : memref<32x162xbf16, #tpu.memory_space<vmem>>, vector<32x128xbf16>
    %c0_69 = arith.constant 0 : index
    %c18_70 = arith.constant 18 : index
    %137 = vector.load %arg11[%c0_69, %c18_70] : memref<32x162xbf16, #tpu.memory_space<vmem>>, vector<32x128xbf16>
    %cst_71 = arith.constant 0.000000e+00 : f32
    %138 = arith.truncf %cst_71 : f32 to bf16
    %139 = vector.shape_cast %111 : vector<1x128xi1> to vector<1x128xi1>
    %140 = vector.broadcast %139 : vector<1x128xi1> to vector<32x128xi1>
    %141 = vector.broadcast %138 : bf16 to vector<32x128xbf16>
    %142 = arith.select %140, %137, %141 : vector<32x128xi1>, vector<32x128xbf16>
    %143 = tpu.concatenate %135, %136, %142 in 0 : vector<32x128xbf16>, vector<32x128xbf16>, vector<32x128xbf16> -> vector<96x128xbf16>
    %c1_72 = arith.constant 1 : index
    %c0_73 = arith.constant 0 : index
    %c0_74 = arith.constant 0 : index
    %144 = vector.load %arg4[%c1_72, %c0_73, %c0_74] : memref<3x32x96xf32, #tpu.memory_space<vmem>>, vector<1x32x96xf32>
    %145 = vector.shape_cast %144 : vector<1x32x96xf32> to vector<32x96xf32>
    %146 = arith.truncf %145 : vector<32x96xf32> to vector<32x96xbf16>
    %cst_75 = arith.constant dense<0.000000e+00> : vector<32x128xf32>
    %147 = tpu.matmul %146, %143, %cst_75 {dimension_numbers = #tpu.dot_dimension_numbers<[1], [0], [0], [1], [0, 0, 1, 1], [], []>} : vector<32x96xbf16>, vector<96x128xbf16>, vector<32x128xf32> -> vector<32x128xf32>
    %148 = arith.addf %129, %147 : vector<32x128xf32>
    %c0_76 = arith.constant 0 : index
    %c32_77 = arith.constant 32 : index
    %149 = vector.load %arg11[%c0_76, %c32_77] : memref<32x162xbf16, #tpu.memory_space<vmem>>, vector<32x128xbf16>
    %cst_78 = arith.constant 0.000000e+00 : f32
    %150 = arith.truncf %cst_78 : f32 to bf16
    %151 = vector.shape_cast %109 : vector<1x128xi1> to vector<1x128xi1>
    %152 = vector.broadcast %151 : vector<1x128xi1> to vector<32x128xi1>
    %153 = vector.broadcast %150 : bf16 to vector<32x128xbf16>
    %154 = arith.select %152, %149, %153 : vector<32x128xi1>, vector<32x128xbf16>
    %c0_79 = arith.constant 0 : index
    %c33_80 = arith.constant 33 : index
    %155 = vector.load %arg11[%c0_79, %c33_80] : memref<32x162xbf16, #tpu.memory_space<vmem>>, vector<32x128xbf16>
    %c0_81 = arith.constant 0 : index
    %c34_82 = arith.constant 34 : index
    %156 = vector.load %arg11[%c0_81, %c34_82] : memref<32x162xbf16, #tpu.memory_space<vmem>>, vector<32x128xbf16>
    %cst_83 = arith.constant 0.000000e+00 : f32
    %157 = arith.truncf %cst_83 : f32 to bf16
    %158 = vector.shape_cast %111 : vector<1x128xi1> to vector<1x128xi1>
    %159 = vector.broadcast %158 : vector<1x128xi1> to vector<32x128xi1>
    %160 = vector.broadcast %157 : bf16 to vector<32x128xbf16>
    %161 = arith.select %159, %156, %160 : vector<32x128xi1>, vector<32x128xbf16>
    %162 = tpu.concatenate %154, %155, %161 in 0 : vector<32x128xbf16>, vector<32x128xbf16>, vector<32x128xbf16> -> vector<96x128xbf16>
    %c2_84 = arith.constant 2 : index
    %c0_85 = arith.constant 0 : index
    %c0_86 = arith.constant 0 : index
    %163 = vector.load %arg4[%c2_84, %c0_85, %c0_86] : memref<3x32x96xf32, #tpu.memory_space<vmem>>, vector<1x32x96xf32>
    %164 = vector.shape_cast %163 : vector<1x32x96xf32> to vector<32x96xf32>
    %165 = arith.truncf %164 : vector<32x96xf32> to vector<32x96xbf16>
    %cst_87 = arith.constant dense<0.000000e+00> : vector<32x128xf32>
    %166 = tpu.matmul %165, %162, %cst_87 {dimension_numbers = #tpu.dot_dimension_numbers<[1], [0], [0], [1], [0, 0, 1, 1], [], []>} : vector<32x96xbf16>, vector<96x128xbf16>, vector<32x128xf32> -> vector<32x128xf32>
    %167 = arith.addf %148, %166 : vector<32x128xf32>
    %c0_88 = arith.constant 0 : index
    %c0_89 = arith.constant 0 : index
    %168 = vector.load %arg5[%c0_88, %c0_89] : memref<32x1xf32, #tpu.memory_space<vmem>>, vector<32x1xf32>
    %169 = vector.broadcast %168 : vector<32x1xf32> to vector<32x128xf32>
    %170 = arith.addf %167, %169 : vector<32x128xf32>
    %cst_90 = arith.constant dense<0.000000e+00> : vector<32xf32>
    %171 = vector.multi_reduction <add>, %170, %cst_90 [1] : vector<32x128xf32> to vector<32xf32>
    %172 = vector.shape_cast %171 : vector<32xf32> to vector<32x1xf32>
    %cst_91 = arith.constant 1.280000e+02 : f32
    %173 = vector.broadcast %cst_91 : f32 to vector<32x1xf32>
    %174 = arith.divf %172, %173 : vector<32x1xf32>
    %c0_92 = arith.constant 0 : index
    %c0_93 = arith.constant 0 : index
    %175 = vector.load %arg6[%c0_92, %c0_93] : memref<32x8xf32, #tpu.memory_space<vmem>>, vector<32x8xf32>
    %176 = vector.broadcast %174 : vector<32x1xf32> to vector<32x8xf32>
    %177 = arith.mulf %175, %176 : vector<32x8xf32>
    %cst_94 = arith.constant dense<0.000000e+00> : vector<8xf32>
    %178 = vector.multi_reduction <add>, %177, %cst_94 [0] : vector<32x8xf32> to vector<8xf32>
    %179 = vector.shape_cast %178 : vector<8xf32> to vector<1x8xf32>
    %c0_95 = arith.constant 0 : index
    %c0_96 = arith.constant 0 : index
    %180 = vector.load %arg7[%c0_95, %c0_96] : memref<1x8xf32, #tpu.memory_space<vmem>>, vector<1x8xf32>
    %181 = arith.addf %179, %180 : vector<1x8xf32>
    %cst_97 = arith.constant 0.000000e+00 : f32
    %182 = vector.broadcast %cst_97 : f32 to vector<1x8xf32>
    %183 = arith.maximumf %181, %182 : vector<1x8xf32>
    %c0_98 = arith.constant 0 : index
    %c0_99 = arith.constant 0 : index
    %184 = vector.load %arg8[%c0_98, %c0_99] : memref<32x8xf32, #tpu.memory_space<vmem>>, vector<32x8xf32>
    %185 = vector.broadcast %183 : vector<1x8xf32> to vector<32x8xf32>
    %186 = arith.mulf %184, %185 : vector<32x8xf32>
    %cst_100 = arith.constant dense<0.000000e+00> : vector<32xf32>
    %187 = vector.multi_reduction <add>, %186, %cst_100 [1] : vector<32x8xf32> to vector<32xf32>
    %188 = vector.shape_cast %187 : vector<32xf32> to vector<32x1xf32>
    %c0_101 = arith.constant 0 : index
    %c0_102 = arith.constant 0 : index
    %189 = vector.load %arg9[%c0_101, %c0_102] : memref<32x1xf32, #tpu.memory_space<vmem>>, vector<32x1xf32>
    %190 = arith.addf %188, %189 : vector<32x1xf32>
    %191 = arith.negf %190 : vector<32x1xf32>
    %192 = math.exp %191 : vector<32x1xf32>
    %cst_103 = arith.constant 1.000000e+00 : f32
    %193 = vector.broadcast %cst_103 : f32 to vector<32x1xf32>
    %194 = arith.addf %193, %192 : vector<32x1xf32>
    %195 = arith.divf %193, %194 : vector<32x1xf32>
    %196 = vector.broadcast %195 : vector<32x1xf32> to vector<32x128xf32>
    %197 = arith.mulf %170, %196 : vector<32x128xf32>
    %cst_104 = arith.constant 1.000000e+00 : f32
    %198 = vector.broadcast %cst_104 : f32 to vector<32x128xf32>
    %199 = arith.mulf %198, %197 : vector<32x128xf32>
    %200 = arith.addf %4, %199 : vector<32x128xf32>
    %c0_105 = arith.constant 0 : index
    %c0_106 = arith.constant 0 : index
    %c0_107 = arith.constant 0 : index
    %201 = vector.load %arg10[%c0_105, %c0_106, %c0_107] : memref<1x32x128xf32, #tpu.memory_space<vmem>>, vector<1x32x128xf32>
    %202 = vector.shape_cast %201 : vector<1x32x128xf32> to vector<32x128xf32>
    %203 = vector.shape_cast %200 : vector<32x128xf32> to vector<1x32x128xf32>
    tpu.vector_store %arg10[%c0_105, %c0_106, %c0_107], %203 {strides = array<i32>} : memref<1x32x128xf32, #tpu.memory_space<vmem>>, vector<1x32x128xf32>,
    return
  }
  func.func @transform_0(%arg0: i32) -> (i32, i32, i32) {
    %c0_i32 = arith.constant 0 : i32
    %c0_i32_0 = arith.constant 0 : i32
    %c0_i32_1 = arith.constant 0 : i32
    return %arg0, %c0_i32, %c0_i32_0 : i32, i32, i32
  }
  func.func @transform_1(%arg0: i32) -> (i32, i32, i32) {
    %c0_i32 = arith.constant 0 : i32
    %c0_i32_0 = arith.constant 0 : i32
    %c0_i32_1 = arith.constant 0 : i32
    %c0_i32_2 = arith.constant 0 : i32
    return %c0_i32, %c0_i32_0, %c0_i32_1 : i32, i32, i32
  }
  func.func @transform_2(%arg0: i32) -> (i32, i32) {
    %c0_i32 = arith.constant 0 : i32
    %c0_i32_0 = arith.constant 0 : i32
    %c0_i32_1 = arith.constant 0 : i32
    return %c0_i32, %c0_i32_0 : i32, i32
  }
  func.func @transform_3(%arg0: i32) -> (i32, i32, i32) {
    %c0_i32 = arith.constant 0 : i32
    %c0_i32_0 = arith.constant 0 : i32
    %c0_i32_1 = arith.constant 0 : i32
    %c0_i32_2 = arith.constant 0 : i32
    return %c0_i32, %c0_i32_0, %c0_i32_1 : i32, i32, i32
  }
  func.func @transform_4(%arg0: i32) -> (i32, i32) {
    %c0_i32 = arith.constant 0 : i32
    %c0_i32_0 = arith.constant 0 : i32
    %c0_i32_1 = arith.constant 0 : i32
    return %c0_i32, %c0_i32_0 : i32, i32
  }
  func.func @transform_5(%arg0: i32) -> (i32, i32) {
    %c0_i32 = arith.constant 0 : i32
    %c0_i32_0 = arith.constant 0 : i32
    %c0_i32_1 = arith.constant 0 : i32
    return %c0_i32, %c0_i32_0 : i32, i32
  }
  func.func @transform_6(%arg0: i32) -> (i32, i32) {
    %c0_i32 = arith.constant 0 : i32
    %c0_i32_0 = arith.constant 0 : i32
    %c0_i32_1 = arith.constant 0 : i32
    return %c0_i32, %c0_i32_0 : i32, i32
  }
  func.func @transform_7(%arg0: i32) -> (i32, i32) {
    %c0_i32 = arith.constant 0 : i32
    %c0_i32_0 = arith.constant 0 : i32
    %c0_i32_1 = arith.constant 0 : i32
    return %c0_i32, %c0_i32_0 : i32, i32
  }
  func.func @transform_8(%arg0: i32) -> (i32, i32) {
    %c0_i32 = arith.constant 0 : i32
    %c0_i32_0 = arith.constant 0 : i32
    %c0_i32_1 = arith.constant 0 : i32
    return %c0_i32, %c0_i32_0 : i32, i32
  }
  func.func @transform_9(%arg0: i32) -> (i32, i32, i32) {
    %c0_i32 = arith.constant 0 : i32
    %c0_i32_0 = arith.constant 0 : i32
    %c0_i32_1 = arith.constant 0 : i32
    return %arg0, %c0_i32, %c0_i32_0 : i32, i32, i32
  }
}

module attributes {stable_mosaic.version = 11 : i64} {
  func.func @_conv3x3_kernel(%arg0: i32, %arg1: memref<1x32x128xf32, #tpu.memory_space<vmem>>, %arg2: memref<1x32x128xf32, #tpu.memory_space<vmem>>, %arg3: memref<3x32x96xf32, #tpu.memory_space<vmem>>, %arg4: memref<32x1xf32, #tpu.memory_space<vmem>>, %arg5: memref<1x32x128xf32, #tpu.memory_space<vmem>>, %arg6: memref<32x162xbf16, #tpu.memory_space<vmem>>) attributes {dimension_semantics = [#tpu.dimension_semantics<parallel>], iteration_bounds = array<i64: 2>, scalar_prefetch = 0 : i64, scratch_operands = 1 : i64, tpu.core_type = #tpu.core_type<tc>, window_params = [{transform_indices = @transform_0, window_bounds = array<i64: 1, 32, 128>}, {transform_indices = @transform_1, window_bounds = array<i64: 1, 32, 128>}, {pipeline_mode = #tpu.pipeline_mode<synchronous>, transform_indices = @transform_2, window_bounds = array<i64: 3, 32, 96>}, {pipeline_mode = #tpu.pipeline_mode<synchronous>, transform_indices = @transform_3, window_bounds = array<i64: 32, 1>}, {transform_indices = @transform_4, window_bounds = array<i64: 1, 32, 128>}]} {
    %cst = arith.constant 0.000000e+00 : bf16
    %0 = vector.broadcast %cst : bf16 to vector<32x17xbf16>
    %c0 = arith.constant 0 : index
    %c0_0 = arith.constant 0 : index
    %1 = vector.load %arg6[%c0, %c0_0] : memref<32x162xbf16, #tpu.memory_space<vmem>>, vector<32x17xbf16>
    tpu.vector_store %arg6[%c0, %c0_0], %0 {strides = array<i32>} : memref<32x162xbf16, #tpu.memory_space<vmem>>, vector<32x17xbf16>,
    %c0_1 = arith.constant 0 : index
    %c145 = arith.constant 145 : index
    %2 = vector.load %arg6[%c0_1, %c145] : memref<32x162xbf16, #tpu.memory_space<vmem>>, vector<32x17xbf16>
    tpu.vector_store %arg6[%c0_1, %c145], %0 {strides = array<i32>} : memref<32x162xbf16, #tpu.memory_space<vmem>>, vector<32x17xbf16>,
    %c0_2 = arith.constant 0 : index
    %c0_3 = arith.constant 0 : index
    %c0_4 = arith.constant 0 : index
    %3 = vector.load %arg1[%c0_2, %c0_3, %c0_4] : memref<1x32x128xf32, #tpu.memory_space<vmem>>, vector<1x32x128xf32>
    %4 = vector.shape_cast %3 : vector<1x32x128xf32> to vector<32x128xf32>
    %5 = arith.truncf %4 : vector<32x128xf32> to vector<32x128xbf16>
    %c0_5 = arith.constant 0 : index
    %c17 = arith.constant 17 : index
    %6 = vector.load %arg6[%c0_5, %c17] : memref<32x162xbf16, #tpu.memory_space<vmem>>, vector<32x128xbf16>
    tpu.vector_store %arg6[%c0_5, %c17], %5 {strides = array<i32>} : memref<32x162xbf16, #tpu.memory_space<vmem>>, vector<32x128xbf16>,
    %7 = tpu.iota {dimensions = array<i32: 1>} : vector<1x128xi32>
    %c16_i32 = arith.constant 16 : i32
    %c0_i32 = arith.constant 0 : i32
    %8 = arith.cmpi eq, %c16_i32, %c0_i32 : i32
    %c1_i32 = arith.constant 1 : i32
    %9 = arith.select %8, %c1_i32, %c16_i32 : i32
    %10 = vector.broadcast %9 : i32 to vector<1x128xi32>
    %11 = arith.remsi %7, %10 : vector<1x128xi32>
    %c0_i32_6 = arith.constant 0 : i32
    %12 = vector.broadcast %c0_i32_6 : i32 to vector<1x128xi32>
    %13 = arith.cmpi ne, %11, %12 : vector<1x128xi32>
    %c0_i32_7 = arith.constant 0 : i32
    %14 = vector.broadcast %c0_i32_7 : i32 to vector<1x128xi32>
    %15 = arith.cmpi slt, %11, %14 : vector<1x128xi32>
    %c0_i32_8 = arith.constant 0 : i32
    %16 = arith.cmpi slt, %9, %c0_i32_8 : i32
    %17 = vector.broadcast %16 : i1 to vector<1x128xi1>
    %18 = vector.broadcast %17 : vector<1x128xi1> to vector<1x128xi1>
    %19 = arith.xori %15, %18 : vector<1x128xi1>
    %20 = arith.andi %19, %13 : vector<1x128xi1>
    %21 = vector.broadcast %9 : i32 to vector<1x128xi32>
    %22 = arith.addi %11, %21 : vector<1x128xi32>
    %23 = arith.select %20, %22, %11 : vector<1x128xi1>, vector<1x128xi32>
    %c0_i32_9 = arith.constant 0 : i32
    %24 = vector.broadcast %c0_i32_9 : i32 to vector<1x128xi32>
    %25 = arith.cmpi ne, %23, %24 : vector<1x128xi32>
    %c15_i32 = arith.constant 15 : i32
    %26 = vector.broadcast %c15_i32 : i32 to vector<1x128xi32>
    %27 = arith.cmpi ne, %23, %26 : vector<1x128xi32>
    %c0_10 = arith.constant 0 : index
    %c0_11 = arith.constant 0 : index
    %28 = vector.load %arg6[%c0_10, %c0_11] : memref<32x162xbf16, #tpu.memory_space<vmem>>, vector<32x128xbf16>
    %cst_12 = arith.constant 0.000000e+00 : f32
    %29 = arith.truncf %cst_12 : f32 to bf16
    %30 = vector.shape_cast %25 : vector<1x128xi1> to vector<1x128xi1>
    %31 = vector.broadcast %30 : vector<1x128xi1> to vector<32x128xi1>
    %32 = vector.broadcast %29 : bf16 to vector<32x128xbf16>
    %33 = arith.select %31, %28, %32 : vector<32x128xi1>, vector<32x128xbf16>
    %c0_13 = arith.constant 0 : index
    %c1 = arith.constant 1 : index
    %34 = vector.load %arg6[%c0_13, %c1] : memref<32x162xbf16, #tpu.memory_space<vmem>>, vector<32x128xbf16>
    %c0_14 = arith.constant 0 : index
    %c2 = arith.constant 2 : index
    %35 = vector.load %arg6[%c0_14, %c2] : memref<32x162xbf16, #tpu.memory_space<vmem>>, vector<32x128xbf16>
    %cst_15 = arith.constant 0.000000e+00 : f32
    %36 = arith.truncf %cst_15 : f32 to bf16
    %37 = vector.shape_cast %27 : vector<1x128xi1> to vector<1x128xi1>
    %38 = vector.broadcast %37 : vector<1x128xi1> to vector<32x128xi1>
    %39 = vector.broadcast %36 : bf16 to vector<32x128xbf16>
    %40 = arith.select %38, %35, %39 : vector<32x128xi1>, vector<32x128xbf16>
    %41 = tpu.concatenate %33, %34, %40 in 0 : vector<32x128xbf16>, vector<32x128xbf16>, vector<32x128xbf16> -> vector<96x128xbf16>
    %c0_16 = arith.constant 0 : index
    %c0_17 = arith.constant 0 : index
    %c0_18 = arith.constant 0 : index
    %42 = vector.load %arg3[%c0_16, %c0_17, %c0_18] : memref<3x32x96xf32, #tpu.memory_space<vmem>>, vector<1x32x96xf32>
    %43 = vector.shape_cast %42 : vector<1x32x96xf32> to vector<32x96xf32>
    %44 = arith.truncf %43 : vector<32x96xf32> to vector<32x96xbf16>
    %cst_19 = arith.constant dense<0.000000e+00> : vector<32x128xf32>
    %45 = tpu.matmul %44, %41, %cst_19 {dimension_numbers = #tpu.dot_dimension_numbers<[1], [0], [0], [1], [0, 0, 1, 1], [], []>} : vector<32x96xbf16>, vector<96x128xbf16>, vector<32x128xf32> -> vector<32x128xf32>
    %c0_20 = arith.constant 0 : index
    %c16 = arith.constant 16 : index
    %46 = vector.load %arg6[%c0_20, %c16] : memref<32x162xbf16, #tpu.memory_space<vmem>>, vector<32x128xbf16>
    %cst_21 = arith.constant 0.000000e+00 : f32
    %47 = arith.truncf %cst_21 : f32 to bf16
    %48 = vector.shape_cast %25 : vector<1x128xi1> to vector<1x128xi1>
    %49 = vector.broadcast %48 : vector<1x128xi1> to vector<32x128xi1>
    %50 = vector.broadcast %47 : bf16 to vector<32x128xbf16>
    %51 = arith.select %49, %46, %50 : vector<32x128xi1>, vector<32x128xbf16>
    %c0_22 = arith.constant 0 : index
    %c17_23 = arith.constant 17 : index
    %52 = vector.load %arg6[%c0_22, %c17_23] : memref<32x162xbf16, #tpu.memory_space<vmem>>, vector<32x128xbf16>
    %c0_24 = arith.constant 0 : index
    %c18 = arith.constant 18 : index
    %53 = vector.load %arg6[%c0_24, %c18] : memref<32x162xbf16, #tpu.memory_space<vmem>>, vector<32x128xbf16>
    %cst_25 = arith.constant 0.000000e+00 : f32
    %54 = arith.truncf %cst_25 : f32 to bf16
    %55 = vector.shape_cast %27 : vector<1x128xi1> to vector<1x128xi1>
    %56 = vector.broadcast %55 : vector<1x128xi1> to vector<32x128xi1>
    %57 = vector.broadcast %54 : bf16 to vector<32x128xbf16>
    %58 = arith.select %56, %53, %57 : vector<32x128xi1>, vector<32x128xbf16>
    %59 = tpu.concatenate %51, %52, %58 in 0 : vector<32x128xbf16>, vector<32x128xbf16>, vector<32x128xbf16> -> vector<96x128xbf16>
    %c1_26 = arith.constant 1 : index
    %c0_27 = arith.constant 0 : index
    %c0_28 = arith.constant 0 : index
    %60 = vector.load %arg3[%c1_26, %c0_27, %c0_28] : memref<3x32x96xf32, #tpu.memory_space<vmem>>, vector<1x32x96xf32>
    %61 = vector.shape_cast %60 : vector<1x32x96xf32> to vector<32x96xf32>
    %62 = arith.truncf %61 : vector<32x96xf32> to vector<32x96xbf16>
    %cst_29 = arith.constant dense<0.000000e+00> : vector<32x128xf32>
    %63 = tpu.matmul %62, %59, %cst_29 {dimension_numbers = #tpu.dot_dimension_numbers<[1], [0], [0], [1], [0, 0, 1, 1], [], []>} : vector<32x96xbf16>, vector<96x128xbf16>, vector<32x128xf32> -> vector<32x128xf32>
    %64 = arith.addf %45, %63 : vector<32x128xf32>
    %c0_30 = arith.constant 0 : index
    %c32 = arith.constant 32 : index
    %65 = vector.load %arg6[%c0_30, %c32] : memref<32x162xbf16, #tpu.memory_space<vmem>>, vector<32x128xbf16>
    %cst_31 = arith.constant 0.000000e+00 : f32
    %66 = arith.truncf %cst_31 : f32 to bf16
    %67 = vector.shape_cast %25 : vector<1x128xi1> to vector<1x128xi1>
    %68 = vector.broadcast %67 : vector<1x128xi1> to vector<32x128xi1>
    %69 = vector.broadcast %66 : bf16 to vector<32x128xbf16>
    %70 = arith.select %68, %65, %69 : vector<32x128xi1>, vector<32x128xbf16>
    %c0_32 = arith.constant 0 : index
    %c33 = arith.constant 33 : index
    %71 = vector.load %arg6[%c0_32, %c33] : memref<32x162xbf16, #tpu.memory_space<vmem>>, vector<32x128xbf16>
    %c0_33 = arith.constant 0 : index
    %c34 = arith.constant 34 : index
    %72 = vector.load %arg6[%c0_33, %c34] : memref<32x162xbf16, #tpu.memory_space<vmem>>, vector<32x128xbf16>
    %cst_34 = arith.constant 0.000000e+00 : f32
    %73 = arith.truncf %cst_34 : f32 to bf16
    %74 = vector.shape_cast %27 : vector<1x128xi1> to vector<1x128xi1>
    %75 = vector.broadcast %74 : vector<1x128xi1> to vector<32x128xi1>
    %76 = vector.broadcast %73 : bf16 to vector<32x128xbf16>
    %77 = arith.select %75, %72, %76 : vector<32x128xi1>, vector<32x128xbf16>
    %78 = tpu.concatenate %70, %71, %77 in 0 : vector<32x128xbf16>, vector<32x128xbf16>, vector<32x128xbf16> -> vector<96x128xbf16>
    %c2_35 = arith.constant 2 : index
    %c0_36 = arith.constant 0 : index
    %c0_37 = arith.constant 0 : index
    %79 = vector.load %arg3[%c2_35, %c0_36, %c0_37] : memref<3x32x96xf32, #tpu.memory_space<vmem>>, vector<1x32x96xf32>
    %80 = vector.shape_cast %79 : vector<1x32x96xf32> to vector<32x96xf32>
    %81 = arith.truncf %80 : vector<32x96xf32> to vector<32x96xbf16>
    %cst_38 = arith.constant dense<0.000000e+00> : vector<32x128xf32>
    %82 = tpu.matmul %81, %78, %cst_38 {dimension_numbers = #tpu.dot_dimension_numbers<[1], [0], [0], [1], [0, 0, 1, 1], [], []>} : vector<32x96xbf16>, vector<96x128xbf16>, vector<32x128xf32> -> vector<32x128xf32>
    %83 = arith.addf %64, %82 : vector<32x128xf32>
    %c0_39 = arith.constant 0 : index
    %c0_40 = arith.constant 0 : index
    %84 = vector.load %arg4[%c0_39, %c0_40] : memref<32x1xf32, #tpu.memory_space<vmem>>, vector<32x1xf32>
    %85 = vector.broadcast %84 : vector<32x1xf32> to vector<32x128xf32>
    %86 = arith.addf %83, %85 : vector<32x128xf32>
    %c0_41 = arith.constant 0 : index
    %c0_42 = arith.constant 0 : index
    %c0_43 = arith.constant 0 : index
    %87 = vector.load %arg2[%c0_41, %c0_42, %c0_43] : memref<1x32x128xf32, #tpu.memory_space<vmem>>, vector<1x32x128xf32>
    %88 = vector.shape_cast %87 : vector<1x32x128xf32> to vector<32x128xf32>
    %89 = arith.addf %86, %88 : vector<32x128xf32>
    %c0_44 = arith.constant 0 : index
    %c0_45 = arith.constant 0 : index
    %c0_46 = arith.constant 0 : index
    %90 = vector.load %arg5[%c0_44, %c0_45, %c0_46] : memref<1x32x128xf32, #tpu.memory_space<vmem>>, vector<1x32x128xf32>
    %91 = vector.shape_cast %90 : vector<1x32x128xf32> to vector<32x128xf32>
    %92 = vector.shape_cast %89 : vector<32x128xf32> to vector<1x32x128xf32>
    tpu.vector_store %arg5[%c0_44, %c0_45, %c0_46], %92 {strides = array<i32>} : memref<1x32x128xf32, #tpu.memory_space<vmem>>, vector<1x32x128xf32>,
    return
  }
  func.func @transform_0(%arg0: i32) -> (i32, i32, i32) {
    %c0_i32 = arith.constant 0 : i32
    %c0_i32_0 = arith.constant 0 : i32
    %c0_i32_1 = arith.constant 0 : i32
    return %arg0, %c0_i32, %c0_i32_0 : i32, i32, i32
  }
  func.func @transform_1(%arg0: i32) -> (i32, i32, i32) {
    %c0_i32 = arith.constant 0 : i32
    %c0_i32_0 = arith.constant 0 : i32
    %c0_i32_1 = arith.constant 0 : i32
    return %arg0, %c0_i32, %c0_i32_0 : i32, i32, i32
  }
  func.func @transform_2(%arg0: i32) -> (i32, i32, i32) {
    %c0_i32 = arith.constant 0 : i32
    %c0_i32_0 = arith.constant 0 : i32
    %c0_i32_1 = arith.constant 0 : i32
    %c0_i32_2 = arith.constant 0 : i32
    return %c0_i32, %c0_i32_0, %c0_i32_1 : i32, i32, i32
  }
  func.func @transform_3(%arg0: i32) -> (i32, i32) {
    %c0_i32 = arith.constant 0 : i32
    %c0_i32_0 = arith.constant 0 : i32
    %c0_i32_1 = arith.constant 0 : i32
    return %c0_i32, %c0_i32_0 : i32, i32
  }
  func.func @transform_4(%arg0: i32) -> (i32, i32, i32) {
    %c0_i32 = arith.constant 0 : i32
    %c0_i32_0 = arith.constant 0 : i32
    %c0_i32_1 = arith.constant 0 : i32
    return %arg0, %c0_i32, %c0_i32_0 : i32, i32, i32
  }
}

module attributes {stable_mosaic.version = 11 : i64} {
  func.func @_conv3x3_kernel(%arg0: i32, %arg1: memref<1x32x128xf32, #tpu.memory_space<vmem>>, %arg2: memref<3x128x96xf32, #tpu.memory_space<vmem>>, %arg3: memref<128x1xf32, #tpu.memory_space<vmem>>, %arg4: memref<1x128x128xf32, #tpu.memory_space<vmem>>, %arg5: memref<32x162xbf16, #tpu.memory_space<vmem>>) attributes {dimension_semantics = [#tpu.dimension_semantics<parallel>], iteration_bounds = array<i64: 2>, scalar_prefetch = 0 : i64, scratch_operands = 1 : i64, tpu.core_type = #tpu.core_type<tc>, window_params = [{transform_indices = @transform_0, window_bounds = array<i64: 1, 32, 128>}, {pipeline_mode = #tpu.pipeline_mode<synchronous>, transform_indices = @transform_1, window_bounds = array<i64: 3, 128, 96>}, {pipeline_mode = #tpu.pipeline_mode<synchronous>, transform_indices = @transform_2, window_bounds = array<i64: 128, 1>}, {transform_indices = @transform_3, window_bounds = array<i64: 1, 128, 128>}]} {
    %cst = arith.constant 0.000000e+00 : bf16
    %0 = vector.broadcast %cst : bf16 to vector<32x17xbf16>
    %c0 = arith.constant 0 : index
    %c0_0 = arith.constant 0 : index
    %1 = vector.load %arg5[%c0, %c0_0] : memref<32x162xbf16, #tpu.memory_space<vmem>>, vector<32x17xbf16>
    tpu.vector_store %arg5[%c0, %c0_0], %0 {strides = array<i32>} : memref<32x162xbf16, #tpu.memory_space<vmem>>, vector<32x17xbf16>,
    %c0_1 = arith.constant 0 : index
    %c145 = arith.constant 145 : index
    %2 = vector.load %arg5[%c0_1, %c145] : memref<32x162xbf16, #tpu.memory_space<vmem>>, vector<32x17xbf16>
    tpu.vector_store %arg5[%c0_1, %c145], %0 {strides = array<i32>} : memref<32x162xbf16, #tpu.memory_space<vmem>>, vector<32x17xbf16>,
    %c0_2 = arith.constant 0 : index
    %c0_3 = arith.constant 0 : index
    %c0_4 = arith.constant 0 : index
    %3 = vector.load %arg1[%c0_2, %c0_3, %c0_4] : memref<1x32x128xf32, #tpu.memory_space<vmem>>, vector<1x32x128xf32>
    %4 = vector.shape_cast %3 : vector<1x32x128xf32> to vector<32x128xf32>
    %5 = arith.truncf %4 : vector<32x128xf32> to vector<32x128xbf16>
    %c0_5 = arith.constant 0 : index
    %c17 = arith.constant 17 : index
    %6 = vector.load %arg5[%c0_5, %c17] : memref<32x162xbf16, #tpu.memory_space<vmem>>, vector<32x128xbf16>
    tpu.vector_store %arg5[%c0_5, %c17], %5 {strides = array<i32>} : memref<32x162xbf16, #tpu.memory_space<vmem>>, vector<32x128xbf16>,
    %7 = tpu.iota {dimensions = array<i32: 1>} : vector<1x128xi32>
    %c16_i32 = arith.constant 16 : i32
    %c0_i32 = arith.constant 0 : i32
    %8 = arith.cmpi eq, %c16_i32, %c0_i32 : i32
    %c1_i32 = arith.constant 1 : i32
    %9 = arith.select %8, %c1_i32, %c16_i32 : i32
    %10 = vector.broadcast %9 : i32 to vector<1x128xi32>
    %11 = arith.remsi %7, %10 : vector<1x128xi32>
    %c0_i32_6 = arith.constant 0 : i32
    %12 = vector.broadcast %c0_i32_6 : i32 to vector<1x128xi32>
    %13 = arith.cmpi ne, %11, %12 : vector<1x128xi32>
    %c0_i32_7 = arith.constant 0 : i32
    %14 = vector.broadcast %c0_i32_7 : i32 to vector<1x128xi32>
    %15 = arith.cmpi slt, %11, %14 : vector<1x128xi32>
    %c0_i32_8 = arith.constant 0 : i32
    %16 = arith.cmpi slt, %9, %c0_i32_8 : i32
    %17 = vector.broadcast %16 : i1 to vector<1x128xi1>
    %18 = vector.broadcast %17 : vector<1x128xi1> to vector<1x128xi1>
    %19 = arith.xori %15, %18 : vector<1x128xi1>
    %20 = arith.andi %19, %13 : vector<1x128xi1>
    %21 = vector.broadcast %9 : i32 to vector<1x128xi32>
    %22 = arith.addi %11, %21 : vector<1x128xi32>
    %23 = arith.select %20, %22, %11 : vector<1x128xi1>, vector<1x128xi32>
    %c0_i32_9 = arith.constant 0 : i32
    %24 = vector.broadcast %c0_i32_9 : i32 to vector<1x128xi32>
    %25 = arith.cmpi ne, %23, %24 : vector<1x128xi32>
    %c15_i32 = arith.constant 15 : i32
    %26 = vector.broadcast %c15_i32 : i32 to vector<1x128xi32>
    %27 = arith.cmpi ne, %23, %26 : vector<1x128xi32>
    %c0_10 = arith.constant 0 : index
    %c0_11 = arith.constant 0 : index
    %28 = vector.load %arg5[%c0_10, %c0_11] : memref<32x162xbf16, #tpu.memory_space<vmem>>, vector<32x128xbf16>
    %cst_12 = arith.constant 0.000000e+00 : f32
    %29 = arith.truncf %cst_12 : f32 to bf16
    %30 = vector.shape_cast %25 : vector<1x128xi1> to vector<1x128xi1>
    %31 = vector.broadcast %30 : vector<1x128xi1> to vector<32x128xi1>
    %32 = vector.broadcast %29 : bf16 to vector<32x128xbf16>
    %33 = arith.select %31, %28, %32 : vector<32x128xi1>, vector<32x128xbf16>
    %c0_13 = arith.constant 0 : index
    %c1 = arith.constant 1 : index
    %34 = vector.load %arg5[%c0_13, %c1] : memref<32x162xbf16, #tpu.memory_space<vmem>>, vector<32x128xbf16>
    %c0_14 = arith.constant 0 : index
    %c2 = arith.constant 2 : index
    %35 = vector.load %arg5[%c0_14, %c2] : memref<32x162xbf16, #tpu.memory_space<vmem>>, vector<32x128xbf16>
    %cst_15 = arith.constant 0.000000e+00 : f32
    %36 = arith.truncf %cst_15 : f32 to bf16
    %37 = vector.shape_cast %27 : vector<1x128xi1> to vector<1x128xi1>
    %38 = vector.broadcast %37 : vector<1x128xi1> to vector<32x128xi1>
    %39 = vector.broadcast %36 : bf16 to vector<32x128xbf16>
    %40 = arith.select %38, %35, %39 : vector<32x128xi1>, vector<32x128xbf16>
    %41 = tpu.concatenate %33, %34, %40 in 0 : vector<32x128xbf16>, vector<32x128xbf16>, vector<32x128xbf16> -> vector<96x128xbf16>
    %c0_16 = arith.constant 0 : index
    %c0_17 = arith.constant 0 : index
    %c0_18 = arith.constant 0 : index
    %42 = vector.load %arg2[%c0_16, %c0_17, %c0_18] : memref<3x128x96xf32, #tpu.memory_space<vmem>>, vector<1x128x96xf32>
    %43 = vector.shape_cast %42 : vector<1x128x96xf32> to vector<128x96xf32>
    %44 = arith.truncf %43 : vector<128x96xf32> to vector<128x96xbf16>
    %cst_19 = arith.constant dense<0.000000e+00> : vector<128x128xf32>
    %45 = tpu.matmul %44, %41, %cst_19 {dimension_numbers = #tpu.dot_dimension_numbers<[1], [0], [0], [1], [0, 0, 1, 1], [], []>} : vector<128x96xbf16>, vector<96x128xbf16>, vector<128x128xf32> -> vector<128x128xf32>
    %c0_20 = arith.constant 0 : index
    %c16 = arith.constant 16 : index
    %46 = vector.load %arg5[%c0_20, %c16] : memref<32x162xbf16, #tpu.memory_space<vmem>>, vector<32x128xbf16>
    %cst_21 = arith.constant 0.000000e+00 : f32
    %47 = arith.truncf %cst_21 : f32 to bf16
    %48 = vector.shape_cast %25 : vector<1x128xi1> to vector<1x128xi1>
    %49 = vector.broadcast %48 : vector<1x128xi1> to vector<32x128xi1>
    %50 = vector.broadcast %47 : bf16 to vector<32x128xbf16>
    %51 = arith.select %49, %46, %50 : vector<32x128xi1>, vector<32x128xbf16>
    %c0_22 = arith.constant 0 : index
    %c17_23 = arith.constant 17 : index
    %52 = vector.load %arg5[%c0_22, %c17_23] : memref<32x162xbf16, #tpu.memory_space<vmem>>, vector<32x128xbf16>
    %c0_24 = arith.constant 0 : index
    %c18 = arith.constant 18 : index
    %53 = vector.load %arg5[%c0_24, %c18] : memref<32x162xbf16, #tpu.memory_space<vmem>>, vector<32x128xbf16>
    %cst_25 = arith.constant 0.000000e+00 : f32
    %54 = arith.truncf %cst_25 : f32 to bf16
    %55 = vector.shape_cast %27 : vector<1x128xi1> to vector<1x128xi1>
    %56 = vector.broadcast %55 : vector<1x128xi1> to vector<32x128xi1>
    %57 = vector.broadcast %54 : bf16 to vector<32x128xbf16>
    %58 = arith.select %56, %53, %57 : vector<32x128xi1>, vector<32x128xbf16>
    %59 = tpu.concatenate %51, %52, %58 in 0 : vector<32x128xbf16>, vector<32x128xbf16>, vector<32x128xbf16> -> vector<96x128xbf16>
    %c1_26 = arith.constant 1 : index
    %c0_27 = arith.constant 0 : index
    %c0_28 = arith.constant 0 : index
    %60 = vector.load %arg2[%c1_26, %c0_27, %c0_28] : memref<3x128x96xf32, #tpu.memory_space<vmem>>, vector<1x128x96xf32>
    %61 = vector.shape_cast %60 : vector<1x128x96xf32> to vector<128x96xf32>
    %62 = arith.truncf %61 : vector<128x96xf32> to vector<128x96xbf16>
    %cst_29 = arith.constant dense<0.000000e+00> : vector<128x128xf32>
    %63 = tpu.matmul %62, %59, %cst_29 {dimension_numbers = #tpu.dot_dimension_numbers<[1], [0], [0], [1], [0, 0, 1, 1], [], []>} : vector<128x96xbf16>, vector<96x128xbf16>, vector<128x128xf32> -> vector<128x128xf32>
    %64 = arith.addf %45, %63 : vector<128x128xf32>
    %c0_30 = arith.constant 0 : index
    %c32 = arith.constant 32 : index
    %65 = vector.load %arg5[%c0_30, %c32] : memref<32x162xbf16, #tpu.memory_space<vmem>>, vector<32x128xbf16>
    %cst_31 = arith.constant 0.000000e+00 : f32
    %66 = arith.truncf %cst_31 : f32 to bf16
    %67 = vector.shape_cast %25 : vector<1x128xi1> to vector<1x128xi1>
    %68 = vector.broadcast %67 : vector<1x128xi1> to vector<32x128xi1>
    %69 = vector.broadcast %66 : bf16 to vector<32x128xbf16>
    %70 = arith.select %68, %65, %69 : vector<32x128xi1>, vector<32x128xbf16>
    %c0_32 = arith.constant 0 : index
    %c33 = arith.constant 33 : index
    %71 = vector.load %arg5[%c0_32, %c33] : memref<32x162xbf16, #tpu.memory_space<vmem>>, vector<32x128xbf16>
    %c0_33 = arith.constant 0 : index
    %c34 = arith.constant 34 : index
    %72 = vector.load %arg5[%c0_33, %c34] : memref<32x162xbf16, #tpu.memory_space<vmem>>, vector<32x128xbf16>
    %cst_34 = arith.constant 0.000000e+00 : f32
    %73 = arith.truncf %cst_34 : f32 to bf16
    %74 = vector.shape_cast %27 : vector<1x128xi1> to vector<1x128xi1>
    %75 = vector.broadcast %74 : vector<1x128xi1> to vector<32x128xi1>
    %76 = vector.broadcast %73 : bf16 to vector<32x128xbf16>
    %77 = arith.select %75, %72, %76 : vector<32x128xi1>, vector<32x128xbf16>
    %78 = tpu.concatenate %70, %71, %77 in 0 : vector<32x128xbf16>, vector<32x128xbf16>, vector<32x128xbf16> -> vector<96x128xbf16>
    %c2_35 = arith.constant 2 : index
    %c0_36 = arith.constant 0 : index
    %c0_37 = arith.constant 0 : index
    %79 = vector.load %arg2[%c2_35, %c0_36, %c0_37] : memref<3x128x96xf32, #tpu.memory_space<vmem>>, vector<1x128x96xf32>
    %80 = vector.shape_cast %79 : vector<1x128x96xf32> to vector<128x96xf32>
    %81 = arith.truncf %80 : vector<128x96xf32> to vector<128x96xbf16>
    %cst_38 = arith.constant dense<0.000000e+00> : vector<128x128xf32>
    %82 = tpu.matmul %81, %78, %cst_38 {dimension_numbers = #tpu.dot_dimension_numbers<[1], [0], [0], [1], [0, 0, 1, 1], [], []>} : vector<128x96xbf16>, vector<96x128xbf16>, vector<128x128xf32> -> vector<128x128xf32>
    %83 = arith.addf %64, %82 : vector<128x128xf32>
    %c0_39 = arith.constant 0 : index
    %c0_40 = arith.constant 0 : index
    %84 = vector.load %arg3[%c0_39, %c0_40] : memref<128x1xf32, #tpu.memory_space<vmem>>, vector<128x1xf32>
    %85 = vector.broadcast %84 : vector<128x1xf32> to vector<128x128xf32>
    %86 = arith.addf %83, %85 : vector<128x128xf32>
    %c0_41 = arith.constant 0 : index
    %c0_42 = arith.constant 0 : index
    %c0_43 = arith.constant 0 : index
    %87 = vector.load %arg4[%c0_41, %c0_42, %c0_43] : memref<1x128x128xf32, #tpu.memory_space<vmem>>, vector<1x128x128xf32>
    %88 = vector.shape_cast %87 : vector<1x128x128xf32> to vector<128x128xf32>
    %89 = vector.shape_cast %86 : vector<128x128xf32> to vector<1x128x128xf32>
    tpu.vector_store %arg4[%c0_41, %c0_42, %c0_43], %89 {strides = array<i32>} : memref<1x128x128xf32, #tpu.memory_space<vmem>>, vector<1x128x128xf32>,
    return
  }
  func.func @transform_0(%arg0: i32) -> (i32, i32, i32) {
    %c0_i32 = arith.constant 0 : i32
    %c0_i32_0 = arith.constant 0 : i32
    %c0_i32_1 = arith.constant 0 : i32
    return %arg0, %c0_i32, %c0_i32_0 : i32, i32, i32
  }
  func.func @transform_1(%arg0: i32) -> (i32, i32, i32) {
    %c0_i32 = arith.constant 0 : i32
    %c0_i32_0 = arith.constant 0 : i32
    %c0_i32_1 = arith.constant 0 : i32
    %c0_i32_2 = arith.constant 0 : i32
    return %c0_i32, %c0_i32_0, %c0_i32_1 : i32, i32, i32
  }
  func.func @transform_2(%arg0: i32) -> (i32, i32) {
    %c0_i32 = arith.constant 0 : i32
    %c0_i32_0 = arith.constant 0 : i32
    %c0_i32_1 = arith.constant 0 : i32
    return %c0_i32, %c0_i32_0 : i32, i32
  }
  func.func @transform_3(%arg0: i32) -> (i32, i32, i32) {
    %c0_i32 = arith.constant 0 : i32
    %c0_i32_0 = arith.constant 0 : i32
    %c0_i32_1 = arith.constant 0 : i32
    return %arg0, %c0_i32, %c0_i32_0 : i32, i32, i32
  }
}

module attributes {stable_mosaic.version = 11 : i64} {
  func.func @_conv3x3_kernel(%arg0: i32, %arg1: memref<1x32x512xf32, #tpu.memory_space<vmem>>, %arg2: memref<3x3x96xf32, #tpu.memory_space<vmem>>, %arg3: memref<3x1xf32, #tpu.memory_space<vmem>>, %arg4: memref<1x3x512xf32, #tpu.memory_space<vmem>>, %arg5: memref<32x578xbf16, #tpu.memory_space<vmem>>) attributes {dimension_semantics = [#tpu.dimension_semantics<parallel>], iteration_bounds = array<i64: 2>, scalar_prefetch = 0 : i64, scratch_operands = 1 : i64, tpu.core_type = #tpu.core_type<tc>, window_params = [{transform_indices = @transform_0, window_bounds = array<i64: 1, 32, 512>}, {pipeline_mode = #tpu.pipeline_mode<synchronous>, transform_indices = @transform_1, window_bounds = array<i64: 3, 3, 96>}, {pipeline_mode = #tpu.pipeline_mode<synchronous>, transform_indices = @transform_2, window_bounds = array<i64: 3, 1>}, {transform_indices = @transform_3, window_bounds = array<i64: 1, 3, 512>}]} {
    %cst = arith.constant 0.000000e+00 : bf16
    %0 = vector.broadcast %cst : bf16 to vector<32x33xbf16>
    %c0 = arith.constant 0 : index
    %c0_0 = arith.constant 0 : index
    %1 = vector.load %arg5[%c0, %c0_0] : memref<32x578xbf16, #tpu.memory_space<vmem>>, vector<32x33xbf16>
    tpu.vector_store %arg5[%c0, %c0_0], %0 {strides = array<i32>} : memref<32x578xbf16, #tpu.memory_space<vmem>>, vector<32x33xbf16>,
    %c0_1 = arith.constant 0 : index
    %c545 = arith.constant 545 : index
    %2 = vector.load %arg5[%c0_1, %c545] : memref<32x578xbf16, #tpu.memory_space<vmem>>, vector<32x33xbf16>
    tpu.vector_store %arg5[%c0_1, %c545], %0 {strides = array<i32>} : memref<32x578xbf16, #tpu.memory_space<vmem>>, vector<32x33xbf16>,
    %c0_2 = arith.constant 0 : index
    %c0_3 = arith.constant 0 : index
    %c0_4 = arith.constant 0 : index
    %3 = vector.load %arg1[%c0_2, %c0_3, %c0_4] : memref<1x32x512xf32, #tpu.memory_space<vmem>>, vector<1x32x512xf32>
    %4 = vector.shape_cast %3 : vector<1x32x512xf32> to vector<32x512xf32>
    %5 = arith.truncf %4 : vector<32x512xf32> to vector<32x512xbf16>
    %c0_5 = arith.constant 0 : index
    %c33 = arith.constant 33 : index
    %6 = vector.load %arg5[%c0_5, %c33] : memref<32x578xbf16, #tpu.memory_space<vmem>>, vector<32x512xbf16>
    tpu.vector_store %arg5[%c0_5, %c33], %5 {strides = array<i32>} : memref<32x578xbf16, #tpu.memory_space<vmem>>, vector<32x512xbf16>,
    %7 = tpu.iota {dimensions = array<i32: 1>} : vector<1x512xi32>
    %c32_i32 = arith.constant 32 : i32
    %c0_i32 = arith.constant 0 : i32
    %8 = arith.cmpi eq, %c32_i32, %c0_i32 : i32
    %c1_i32 = arith.constant 1 : i32
    %9 = arith.select %8, %c1_i32, %c32_i32 : i32
    %10 = vector.broadcast %9 : i32 to vector<1x512xi32>
    %11 = arith.remsi %7, %10 : vector<1x512xi32>
    %c0_i32_6 = arith.constant 0 : i32
    %12 = vector.broadcast %c0_i32_6 : i32 to vector<1x512xi32>
    %13 = arith.cmpi ne, %11, %12 : vector<1x512xi32>
    %c0_i32_7 = arith.constant 0 : i32
    %14 = vector.broadcast %c0_i32_7 : i32 to vector<1x512xi32>
    %15 = arith.cmpi slt, %11, %14 : vector<1x512xi32>
    %c0_i32_8 = arith.constant 0 : i32
    %16 = arith.cmpi slt, %9, %c0_i32_8 : i32
    %17 = vector.broadcast %16 : i1 to vector<1x512xi1>
    %18 = vector.broadcast %17 : vector<1x512xi1> to vector<1x512xi1>
    %19 = arith.xori %15, %18 : vector<1x512xi1>
    %20 = arith.andi %19, %13 : vector<1x512xi1>
    %21 = vector.broadcast %9 : i32 to vector<1x512xi32>
    %22 = arith.addi %11, %21 : vector<1x512xi32>
    %23 = arith.select %20, %22, %11 : vector<1x512xi1>, vector<1x512xi32>
    %c0_i32_9 = arith.constant 0 : i32
    %24 = vector.broadcast %c0_i32_9 : i32 to vector<1x512xi32>
    %25 = arith.cmpi ne, %23, %24 : vector<1x512xi32>
    %c31_i32 = arith.constant 31 : i32
    %26 = vector.broadcast %c31_i32 : i32 to vector<1x512xi32>
    %27 = arith.cmpi ne, %23, %26 : vector<1x512xi32>
    %c0_10 = arith.constant 0 : index
    %c0_11 = arith.constant 0 : index
    %28 = vector.load %arg5[%c0_10, %c0_11] : memref<32x578xbf16, #tpu.memory_space<vmem>>, vector<32x512xbf16>
    %cst_12 = arith.constant 0.000000e+00 : f32
    %29 = arith.truncf %cst_12 : f32 to bf16
    %30 = vector.shape_cast %25 : vector<1x512xi1> to vector<1x512xi1>
    %31 = vector.broadcast %30 : vector<1x512xi1> to vector<32x512xi1>
    %32 = vector.broadcast %29 : bf16 to vector<32x512xbf16>
    %33 = arith.select %31, %28, %32 : vector<32x512xi1>, vector<32x512xbf16>
    %c0_13 = arith.constant 0 : index
    %c1 = arith.constant 1 : index
    %34 = vector.load %arg5[%c0_13, %c1] : memref<32x578xbf16, #tpu.memory_space<vmem>>, vector<32x512xbf16>
    %c0_14 = arith.constant 0 : index
    %c2 = arith.constant 2 : index
    %35 = vector.load %arg5[%c0_14, %c2] : memref<32x578xbf16, #tpu.memory_space<vmem>>, vector<32x512xbf16>
    %cst_15 = arith.constant 0.000000e+00 : f32
    %36 = arith.truncf %cst_15 : f32 to bf16
    %37 = vector.shape_cast %27 : vector<1x512xi1> to vector<1x512xi1>
    %38 = vector.broadcast %37 : vector<1x512xi1> to vector<32x512xi1>
    %39 = vector.broadcast %36 : bf16 to vector<32x512xbf16>
    %40 = arith.select %38, %35, %39 : vector<32x512xi1>, vector<32x512xbf16>
    %41 = tpu.concatenate %33, %34, %40 in 0 : vector<32x512xbf16>, vector<32x512xbf16>, vector<32x512xbf16> -> vector<96x512xbf16>
    %c0_16 = arith.constant 0 : index
    %c0_17 = arith.constant 0 : index
    %c0_18 = arith.constant 0 : index
    %42 = vector.load %arg2[%c0_16, %c0_17, %c0_18] : memref<3x3x96xf32, #tpu.memory_space<vmem>>, vector<1x3x96xf32>
    %43 = vector.shape_cast %42 : vector<1x3x96xf32> to vector<3x96xf32>
    %44 = arith.truncf %43 : vector<3x96xf32> to vector<3x96xbf16>
    %cst_19 = arith.constant dense<0.000000e+00> : vector<3x512xf32>
    %45 = tpu.matmul %44, %41, %cst_19 {dimension_numbers = #tpu.dot_dimension_numbers<[1], [0], [0], [1], [0, 0, 1, 1], [], []>} : vector<3x96xbf16>, vector<96x512xbf16>, vector<3x512xf32> -> vector<3x512xf32>
    %c0_20 = arith.constant 0 : index
    %c32 = arith.constant 32 : index
    %46 = vector.load %arg5[%c0_20, %c32] : memref<32x578xbf16, #tpu.memory_space<vmem>>, vector<32x512xbf16>
    %cst_21 = arith.constant 0.000000e+00 : f32
    %47 = arith.truncf %cst_21 : f32 to bf16
    %48 = vector.shape_cast %25 : vector<1x512xi1> to vector<1x512xi1>
    %49 = vector.broadcast %48 : vector<1x512xi1> to vector<32x512xi1>
    %50 = vector.broadcast %47 : bf16 to vector<32x512xbf16>
    %51 = arith.select %49, %46, %50 : vector<32x512xi1>, vector<32x512xbf16>
    %c0_22 = arith.constant 0 : index
    %c33_23 = arith.constant 33 : index
    %52 = vector.load %arg5[%c0_22, %c33_23] : memref<32x578xbf16, #tpu.memory_space<vmem>>, vector<32x512xbf16>
    %c0_24 = arith.constant 0 : index
    %c34 = arith.constant 34 : index
    %53 = vector.load %arg5[%c0_24, %c34] : memref<32x578xbf16, #tpu.memory_space<vmem>>, vector<32x512xbf16>
    %cst_25 = arith.constant 0.000000e+00 : f32
    %54 = arith.truncf %cst_25 : f32 to bf16
    %55 = vector.shape_cast %27 : vector<1x512xi1> to vector<1x512xi1>
    %56 = vector.broadcast %55 : vector<1x512xi1> to vector<32x512xi1>
    %57 = vector.broadcast %54 : bf16 to vector<32x512xbf16>
    %58 = arith.select %56, %53, %57 : vector<32x512xi1>, vector<32x512xbf16>
    %59 = tpu.concatenate %51, %52, %58 in 0 : vector<32x512xbf16>, vector<32x512xbf16>, vector<32x512xbf16> -> vector<96x512xbf16>
    %c1_26 = arith.constant 1 : index
    %c0_27 = arith.constant 0 : index
    %c0_28 = arith.constant 0 : index
    %60 = vector.load %arg2[%c1_26, %c0_27, %c0_28] : memref<3x3x96xf32, #tpu.memory_space<vmem>>, vector<1x3x96xf32>
    %61 = vector.shape_cast %60 : vector<1x3x96xf32> to vector<3x96xf32>
    %62 = arith.truncf %61 : vector<3x96xf32> to vector<3x96xbf16>
    %cst_29 = arith.constant dense<0.000000e+00> : vector<3x512xf32>
    %63 = tpu.matmul %62, %59, %cst_29 {dimension_numbers = #tpu.dot_dimension_numbers<[1], [0], [0], [1], [0, 0, 1, 1], [], []>} : vector<3x96xbf16>, vector<96x512xbf16>, vector<3x512xf32> -> vector<3x512xf32>
    %64 = arith.addf %45, %63 : vector<3x512xf32>
    %c0_30 = arith.constant 0 : index
    %c64 = arith.constant 64 : index
    %65 = vector.load %arg5[%c0_30, %c64] : memref<32x578xbf16, #tpu.memory_space<vmem>>, vector<32x512xbf16>
    %cst_31 = arith.constant 0.000000e+00 : f32
    %66 = arith.truncf %cst_31 : f32 to bf16
    %67 = vector.shape_cast %25 : vector<1x512xi1> to vector<1x512xi1>
    %68 = vector.broadcast %67 : vector<1x512xi1> to vector<32x512xi1>
    %69 = vector.broadcast %66 : bf16 to vector<32x512xbf16>
    %70 = arith.select %68, %65, %69 : vector<32x512xi1>, vector<32x512xbf16>
    %c0_32 = arith.constant 0 : index
    %c65 = arith.constant 65 : index
    %71 = vector.load %arg5[%c0_32, %c65] : memref<32x578xbf16, #tpu.memory_space<vmem>>, vector<32x512xbf16>
    %c0_33 = arith.constant 0 : index
    %c66 = arith.constant 66 : index
    %72 = vector.load %arg5[%c0_33, %c66] : memref<32x578xbf16, #tpu.memory_space<vmem>>, vector<32x512xbf16>
    %cst_34 = arith.constant 0.000000e+00 : f32
    %73 = arith.truncf %cst_34 : f32 to bf16
    %74 = vector.shape_cast %27 : vector<1x512xi1> to vector<1x512xi1>
    %75 = vector.broadcast %74 : vector<1x512xi1> to vector<32x512xi1>
    %76 = vector.broadcast %73 : bf16 to vector<32x512xbf16>
    %77 = arith.select %75, %72, %76 : vector<32x512xi1>, vector<32x512xbf16>
    %78 = tpu.concatenate %70, %71, %77 in 0 : vector<32x512xbf16>, vector<32x512xbf16>, vector<32x512xbf16> -> vector<96x512xbf16>
    %c2_35 = arith.constant 2 : index
    %c0_36 = arith.constant 0 : index
    %c0_37 = arith.constant 0 : index
    %79 = vector.load %arg2[%c2_35, %c0_36, %c0_37] : memref<3x3x96xf32, #tpu.memory_space<vmem>>, vector<1x3x96xf32>
    %80 = vector.shape_cast %79 : vector<1x3x96xf32> to vector<3x96xf32>
    %81 = arith.truncf %80 : vector<3x96xf32> to vector<3x96xbf16>
    %cst_38 = arith.constant dense<0.000000e+00> : vector<3x512xf32>
    %82 = tpu.matmul %81, %78, %cst_38 {dimension_numbers = #tpu.dot_dimension_numbers<[1], [0], [0], [1], [0, 0, 1, 1], [], []>} : vector<3x96xbf16>, vector<96x512xbf16>, vector<3x512xf32> -> vector<3x512xf32>
    %83 = arith.addf %64, %82 : vector<3x512xf32>
    %c0_39 = arith.constant 0 : index
    %c0_40 = arith.constant 0 : index
    %84 = vector.load %arg3[%c0_39, %c0_40] : memref<3x1xf32, #tpu.memory_space<vmem>>, vector<3x1xf32>
    %85 = vector.broadcast %84 : vector<3x1xf32> to vector<3x512xf32>
    %86 = arith.addf %83, %85 : vector<3x512xf32>
    %c0_41 = arith.constant 0 : index
    %c0_42 = arith.constant 0 : index
    %c0_43 = arith.constant 0 : index
    %87 = vector.load %arg4[%c0_41, %c0_42, %c0_43] : memref<1x3x512xf32, #tpu.memory_space<vmem>>, vector<1x3x512xf32>
    %88 = vector.shape_cast %87 : vector<1x3x512xf32> to vector<3x512xf32>
    %89 = vector.shape_cast %86 : vector<3x512xf32> to vector<1x3x512xf32>
    tpu.vector_store %arg4[%c0_41, %c0_42, %c0_43], %89 {strides = array<i32>} : memref<1x3x512xf32, #tpu.memory_space<vmem>>, vector<1x3x512xf32>,
    return
  }
  func.func @transform_0(%arg0: i32) -> (i32, i32, i32) {
    %c0_i32 = arith.constant 0 : i32
    %c0_i32_0 = arith.constant 0 : i32
    %c0_i32_1 = arith.constant 0 : i32
    return %arg0, %c0_i32, %c0_i32_0 : i32, i32, i32
  }
  func.func @transform_1(%arg0: i32) -> (i32, i32, i32) {
    %c0_i32 = arith.constant 0 : i32
    %c0_i32_0 = arith.constant 0 : i32
    %c0_i32_1 = arith.constant 0 : i32
    %c0_i32_2 = arith.constant 0 : i32
    return %c0_i32, %c0_i32_0, %c0_i32_1 : i32, i32, i32
  }
  func.func @transform_2(%arg0: i32) -> (i32, i32) {
    %c0_i32 = arith.constant 0 : i32
    %c0_i32_0 = arith.constant 0 : i32
    %c0_i32_1 = arith.constant 0 : i32
    return %c0_i32, %c0_i32_0 : i32, i32
  }
  func.func @transform_3(%arg0: i32) -> (i32, i32, i32) {
    %c0_i32 = arith.constant 0 : i32
    %c0_i32_0 = arith.constant 0 : i32
    %c0_i32_1 = arith.constant 0 : i32
    return %arg0, %c0_i32, %c0_i32_0 : i32, i32, i32
  }
}

</mosaic_0001>

<bundles_post_ra>
// kernel: baseline_hr_forward.10
= control target key start
LH: loop header
LB: loop body
LE: loop exit
PB: predicated region body
PF: predicated region fallthrough
CT: control target
= control target key end

     0   :  { %s1105_s12 = smov 0   ;;  %s1609_s0 = inlined_call_operand.vmem [shape: f32[2,48,128], index: 0, kind: input, shape index: {}]   ;;  %s1610_s1 = inlined_call_operand.vmem [shape: f32[3,32,144], index: 1, kind: input, shape index: {}]   ;;  %s1611_s2 = inlined_call_operand.vmem [shape: f32[32,1], index: 2, kind: input, shape index: {}]   ;;  %s1612_s3 = inlined_call_operand.vmem [shape: f32[2,32,128], index: 3, kind: output, shape index: {}]  }
   0x1 LB: > { %s980_s13 = sadd.s32 4294967295, %s1072_s12   ;;  %p984_p0 = scmp.ge.s32.totalorder %s1072_s12, 1  ;;  %s1072_s12 = sphi %s1105_s12, %s13_s12  }
   0x2   : > { %p137_p1 = scmp.lt.s32.totalorder %s1072_s12, 3 }
   0x4   : > { %p138_p2 = pnand %p984_p0, %p137_p1 }
   0x5   : > { %p161_p3 = scmp.lt.s32.totalorder (!%p138_p2), %s980_s13, 1  ;;  %s1075_s18 = smov (!%p138_p2), 17  }
   0x6   : > { %141 = sbr.rel (%p138_p2) target bundleno = 619 (0x26b), region = 32  ;;  %s1076_s19 = smov (!%p138_p2), 34  }
   0x7   : > { %s1077_s20 = smov (!%p138_p2), 18   ;;  %s1078_s21 = smov (!%p138_p2), 2  }
   0x8   : > { %s1079_s22 = smov (!%p138_p2), 16   ;;  %s1080_s23 = smov (!%p138_p2), 32  }
   0x9   : > { %s1081_s24 = smov (!%p138_p2), 127   ;;  %s1082_s25 = smov (!%p138_p2), 126  }
   0xa   : > { %s1083_s26 = smov (!%p138_p2), 112   ;;  %s1084_s27 = smov (!%p138_p2), 96  }
   0xb   : > { %v1074_v0 = vmov 0   ;;  %s1638_s13 = smov (!%p161_p3, %s980_s13), 1  ;;  %v246_v1 = vlaneseq  ;;  %vm174_vm0 = vcmask 134144   ;;  %vm181_vm1 = vcmask 273544  }
   0xc   : > { %1064 = vset.pattern.permute.xlu0 %v1074_v0  ;;  %1065 = vset.pattern.permute.xlu1 %v1074_v0  ;;  %s1043_s14 = smul.u32 48, %s1638_s13  ;;  %175 = vst.msk [vmem:[#allocation2] sm:$0xf] %vm174_vm0, %v1074_v0  ;;  %vm237_vm6 = vcmask 1043592   ;;  %vm238_vm7 = vcmask 138244   ;;  %vm224_vm8 = vcmask 138240   ;;  %v1177_v47 = vunpack.c.l.b16 %v1074_v0 }
   0xd   : > { %1063 = vset.pattern.permute.xlu2 %v1074_v0  ;;  %v247_v8 = vand.u32 127, %v246_v1  ;;  %182 = vst.msk [vmem:[#allocation2 + $0x4] sm:$0xf] %vm181_vm1, %v1074_v0  ;;  %vm1154_vm9 = vmor %vm238_vm7, %vm237_vm6  ;;  %vm699_vm10 = vcmask 277504   ;;  %vm443_vm11 = vcmask 146432   ;;  %v1180_v48 = vunpack.c.h.b16 %v1074_v0  ;;  %s1036_s7 = sshll.u32 %s1638_s13, 5 }
   0xe   : > { %s165_s17 = scalar_lea.vmem %s1609_s0, %s1043_s14  ;;  %176 = vst.msk [vmem:[#allocation2 + $0x8] sm:$0xf] %vm174_vm0, %v1074_v0  ;;  %s1600_s10 = scalar_lea.vmem %s1612_s3, %s1036_s7 }
   0xf   : > { %v192_v2 = vld [vmem:[%s165_s17 + $0x20] sm:$0xff]  ;;  %v190_v3 = vld [vmem:[%s165_s17 + $0x10] sm:$0xff]  ;;  %v193_v9 = vld [vmem:[%s165_s17 + $0x28] sm:$0xff]  ;;  %v252_v12 = vand.u32 15, %v247_v8  ;;  %177 = vst.msk [vmem:[#allocation2 + $0x10] sm:$0xf] %vm174_vm0, %v1074_v0 }
  0x10   : > { %v198_v4 = vpack.c.bf16 %v192_v2, %v192_v2  ;;  %v196_v5 = vpack.c.bf16 %v190_v3, %v190_v3  ;;  %v188_v6 = vld [vmem:[%s165_s17] sm:$0xff]  ;;  %v191_v10 = vld [vmem:[%s165_s17 + $0x18] sm:$0xff]  ;;  %v189_v11 = vld [vmem:[%s165_s17 + $0x8] sm:$0xff]  ;;  %v199_v13 = vpack.c.bf16 %v193_v9, %v193_v9  ;;  %178 = vst.msk [vmem:[#allocation2 + $0x18] sm:$0xf] %vm174_vm0, %v1074_v0 }
  0x11   : > { %v194_v7 = vpack.c.bf16 %v188_v6, %v188_v6  ;;  %v197_v14 = vpack.c.bf16 %v191_v10, %v191_v10  ;;  %v195_v15 = vpack.c.bf16 %v189_v11, %v189_v11  ;;  %179 = vst.msk [vmem:[#allocation2 + $0x20] sm:$0xf] %vm174_vm0, %v1074_v0  ;;  %vm261_vm2 = vcmp.ne.s32.totalorder %v252_v12, 15 }
  0x12   : > { %214 = vrot.lane.b32.xlu1 %v198_v4, %s1075_s18  ;;  %210 = vrot.lane.b32.xlu0 %v196_v5, %s1075_s18  ;;  %180 = vst.msk [vmem:[#allocation2 + $0x28] sm:$0xf] %vm174_vm0, %v1074_v0  ;;  %vm285_vm3 = vmpackc.low %vm261_vm2, %vm261_vm2  ;;  %vm260_vm4 = vcmp.ne.s32.totalorder %v252_v12, 0  ;;  %vm290_vm2 = vcmask 15360  }
  0x13   : > { %206 = vrot.lane.b32.xlu2 %v194_v7, %s1075_s18  ;;  %183 = vst.msk [vmem:[#allocation2 + $0xc] sm:$0xf] %vm181_vm1, %v1074_v0  ;;  %v286_v16 = vsel %vm285_vm3, 65537, %v1074_v0  ;;  %vm1147_vm5 = vmpackc.low %vm260_vm4, %vm260_vm4  ;;  %vm681_vm4 = vcmask 261120  }
  0x14   : > { %184 = vst.msk [vmem:[#allocation2 + $0x14] sm:$0xf] %vm181_vm1, %v1074_v0  ;;  %v421_v18 = vsel %vm1147_vm5, 65537, %v1074_v0 }
  0x15   : > { %185 = vst.msk [vmem:[#allocation2 + $0x1c] sm:$0xf] %vm181_vm1, %v1074_v0 }
  0x16   : > { %186 = vst.msk [vmem:[#allocation2 + $0x24] sm:$0xf] %vm181_vm1, %v1074_v0 }
  0x17   : > { %187 = vst.msk [vmem:[#allocation2 + $0x2c] sm:$0xf] %vm181_vm1, %v1074_v0  ;;  %vm425_vm1 = vcmask 130048  }
  0x1a   : > { %216 = vrot.lane.b32.xlu1 %v199_v13, %s1075_s18  ;;  %212 = vrot.lane.b32.xlu0 %v197_v14, %s1075_s18 }
  0x1b   : > { %208 = vrot.lane.b32.xlu2 %v195_v15, %s1075_s18 }
  0x22   : > { %696 = vrot.lane.b32.xlu1 %v286_v16, %s1076_s19  ;;  %440 = vrot.lane.b32.xlu0 %v286_v16, %s1077_s20 }
  0x23   : > { %287 = vrot.lane.b32.xlu2 %v286_v16, %s1078_s21 }
  0x2a   : > { %422 = vrot.lane.b32.xlu0 %v421_v18, %s1079_s22 }
  0x32   : > { %678 = vrot.lane.b32.xlu0 %v421_v18, %s1080_s23 }
  0x6d   : > { %v207_v19 = vpop.permute.xlu2 %206 }
  0x6e   : > { %v218_v20 = vrot.slane %v207_v19, 4 }
  0x70   : > { %v225_v22 = vsel %vm224_vm8, %v218_v20, %v207_v19 }
  0x71   : > { %240 = vst.msk [vmem:[#allocation2] sm:$0xff] %vm1154_vm9, %v225_v22 }
  0x75   : > { %v209_v23 = vpop.permute.xlu2 %208 }
  0x76   : > { %v219_v24 = vrot.slane %v209_v23, 4 }
  0x78   : > { %v226_v25 = vsel %vm224_vm8, %v219_v24, %v209_v23  ;;  %v990_v6 = vld [vmem:[#allocation2] sm:$0xf] }
  0x79   : > { %241 = vst.msk [vmem:[#allocation2 + $0x8] sm:$0xff] %vm1154_vm9, %v226_v25 }
  0x7d   : > { %v288_v59 = vpop.permute.xlu2 %287 }
  0x7e   : > { %v289_v8 = vrot.slane %v288_v59, 4 }
  0x80   : > { %v1038_v7 = vld [vmem:[#allocation2 + $0x4] sm:$0xf0]  ;;  %v291_v21 = vsel %vm290_vm2, %v289_v8, %v288_v59  ;;  %vm570_vm2 = vcmask 916480  }
  0x81   : > { %v991_v15 = vor.u32 %v1038_v7, %v990_v6 }
  0x84   : > { %v215_v26 = vpop.permute.xlu1 %214  ;;  %v211_v27 = vpop.permute.xlu0 %210 }
  0x85   : > { %v222_v28 = vrot.slane %v215_v26, 4  ;;  %v220_v29 = vrot.slane %v211_v27, 4 }
  0x87   : > { %v229_v30 = vsel %vm224_vm8, %v222_v28, %v215_v26  ;;  %v227_v31 = vsel %vm224_vm8, %v220_v29, %v211_v27  ;;  %v1037_v26 = vld [vmem:[#allocation2 + $0x4] sm:$0xf]  ;;  %v992_v27 = vld [vmem:[#allocation2 + $0x8] sm:$0xf0] }
  0x88   : > { %244 = vst.msk [vmem:[#allocation2 + $0x20] sm:$0xff] %vm1154_vm9, %v229_v30 }
  0x89   : > { %242 = vst.msk [vmem:[#allocation2 + $0x10] sm:$0xff] %vm1154_vm9, %v227_v31 }
  0x8c   : > { %v217_v32 = vpop.permute.xlu1 %216  ;;  %v213_v33 = vpop.permute.xlu0 %212 }
  0x8d   : > { %v223_v34 = vrot.slane %v217_v32, 4  ;;  %v221_v35 = vrot.slane %v213_v33, 4 }
  0x8f   : > { %v230_v36 = vsel %vm224_vm8, %v223_v34, %v217_v32  ;;  %v228_v37 = vsel %vm224_vm8, %v221_v35, %v213_v33  ;;  %v1041_v44 = vld [vmem:[#allocation2 + $0x24] sm:$0xf]  ;;  %v1006_v53 = vld [vmem:[#allocation2 + $0x20] sm:$0xf]  ;;  %v292_v34 = vunpack.c.l.b16 %v291_v21  ;;  %v293_v35 = vunpack.c.h.b16 %v291_v21 }
  0x90   : > { %245 = vst.msk [vmem:[#allocation2 + $0x28] sm:$0xff] %vm1154_vm9, %v230_v36  ;;  %v998_v51 = vld [vmem:[#allocation2 + $0x10] sm:$0xf]  ;;  %v1207_v11 = vld [vmem:[#allocation2 + $0x20] sm:$0xff]  ;;  %v1039_v14 = vld [vmem:[#allocation2 + $0x14] sm:$0xf] }
  0x91   : > { %243 = vst.msk [vmem:[#allocation2 + $0x18] sm:$0xff] %vm1154_vm9, %v228_v37  ;;  %v1191_v62 = vld [vmem:[#allocation2 + $0x10] sm:$0xff]  ;;  %v995_v37 = vor.u32 %v1037_v26, %v992_v27 }
  0x94   : > { %v697_v38 = vpop.permute.xlu1 %696  ;;  %v441_v39 = vpop.permute.xlu0 %440 }
  0x95   : > { %v698_v40 = vrot.slane %v697_v38, 4  ;;  %v442_v41 = vrot.slane %v441_v39, 4 }
  0x97   : > { %v700_v42 = vsel %vm699_vm10, %v698_v40, %v697_v38  ;;  %v444_v43 = vsel %vm443_vm11, %v442_v41, %v441_v39  ;;  %v1008_v45 = vld [vmem:[#allocation2 + $0x28] sm:$0xf0]  ;;  %v1042_v46 = vld [vmem:[#allocation2 + $0x24] sm:$0xf0] }
  0x98   : > { %v445_v49 = vunpack.c.l.b16 %v444_v43  ;;  %v446_v50 = vunpack.c.h.b16 %v444_v43  ;;  %v1040_v52 = vld [vmem:[#allocation2 + $0x14] sm:$0xf0]  ;;  %v701_v54 = vunpack.c.l.b16 %v700_v42  ;;  %v1011_v55 = vor.u32 %v1041_v44, %v1008_v45  ;;  %v1000_v9 = vld [vmem:[#allocation2 + $0x18] sm:$0xf0]  ;;  %v1209_v12 = vld [vmem:[#allocation2 + $0x28] sm:$0xff] }
  0x99   : > { %v999_v56 = vor.u32 %v1040_v52, %v998_v51  ;;  %v1007_v57 = vor.u32 %v1042_v46, %v1006_v53  ;;  %v702_v58 = vunpack.c.h.b16 %v700_v42  ;;  %v1193_v63 = vld [vmem:[#allocation2 + $0x18] sm:$0xff]  ;;  %v1003_v20 = vor.u32 %v1039_v14, %v1000_v9  ;;  %v1250_v46 = vld [vmem:[#allocation2] sm:$0xff] }
  0x9a   : > { %vm449_vm12 = vcmp.ne.s32.totalorder %v445_v49, %v1177_v47  ;;  %vm450_vm13 = vcmp.ne.s32.totalorder %v446_v50, %v1180_v48  ;;  %357 = vrot.lane.b32.xlu0 %v1011_v55, %s1081_s24  ;;  %vm1196_vm15 = vcmp.ne.s32.totalorder %v701_v54, %v1177_v47  ;;  %v1252_v49 = vld [vmem:[#allocation2 + $0x8] sm:$0xff] }
  0x9b   : > { %351 = vrot.lane.b32.xlu1 %v999_v56, %s1081_s24  ;;  %vm1186_vm14 = vmpackc.low %vm450_vm13, %vm449_vm12  ;;  %355 = vrot.lane.b32.xlu2 %v1007_v57, %s1081_s24  ;;  %vm706_vm0 = vcmp.ne.s32.totalorder %v702_v58, %v1180_v48  ;;  %vm1291_vm12 = vcmp.ne.s32.totalorder %v292_v34, %v1177_v47  ;;  %vm1296_vm13 = vcmp.ne.s32.totalorder %v293_v35, %v1180_v48 }
  0x9c   : > { %v423_v61 = vpop.permute.xlu0 %422  ;;  %v454_v1 = vsel %vm1186_vm14, %v1191_v62, 0  ;;  %v455_v2 = vsel %vm1186_vm14, %v1193_v63, 0  ;;  %vm1213_vm3 = vmpackc.low %vm706_vm0, %vm1196_vm15  ;;  %v456_v16 = vsel %vm1186_vm14, %v1207_v11, 0  ;;  %v457_v18 = vsel %vm1186_vm14, %v1209_v12, 0 }
  0x9d   : > { %v424_v3 = vrot.slane %v423_v61, 4  ;;  %v492_v4 = vunpack.c.l.b16 %v454_v1  ;;  %v494_v5 = vunpack.c.l.b16 %v455_v2  ;;  %v497_v23 = vunpack.c.h.b16 %v456_v16 }
  0x9e   : > { %v499_v24 = vunpack.c.h.b16 %v457_v18  ;;  %v493_v25 = vunpack.c.h.b16 %v454_v1  ;;  %v1230_v28 = vsel %vm1213_vm3, %v1191_v62, 0  ;;  %v495_v32 = vunpack.c.h.b16 %v455_v2 }
  0x9f   : > { %v502_v10 = vpack.c.b16 %v494_v5, %v492_v4  ;;  %v426_v19 = vsel %vm425_vm1, %v424_v3, %v423_v61  ;;  %v1235_v33 = vsel %vm1213_vm3, %v1193_v63, 0  ;;  %v748_v41 = vunpack.c.l.b16 %v1230_v28 }
  0xa0   : > { %v427_v29 = vunpack.c.l.b16 %v426_v19  ;;  %v428_v30 = vunpack.c.h.b16 %v426_v19  ;;  %v505_v40 = vpack.c.b16 %v499_v24, %v497_v23  ;;  %v503_v44 = vpack.c.b16 %v495_v32, %v493_v25 }
  0xa1   : > { %v750_v45 = vunpack.c.l.b16 %v1235_v33  ;;  %v1259_v50 = vsel %vm1186_vm14, %v1250_v46, 0  ;;  %v453_v51 = vsel %vm1186_vm14, %v1252_v49, 0  ;;  %v496_v53 = vunpack.c.l.b16 %v456_v16  ;;  %vm1346_vm14 = vmpackc.low %vm1296_vm13, %vm1291_vm12 }
  0xa2   : > { %510 = vrot.lane.b32.xlu0 %v502_v10, %s1082_s25  ;;  %vm1240_vm6 = vcmp.ne.s32.totalorder %v427_v29, %v1177_v47  ;;  %vm1245_vm7 = vcmp.ne.s32.totalorder %v428_v30, %v1180_v48  ;;  %v498_v54 = vunpack.c.l.b16 %v457_v18  ;;  %v1274_v55 = vsel %vm1213_vm3, %v1207_v11, 0 }
  0xa3   : > { %347 = vrot.lane.b32.xlu1 %v991_v15, %s1081_s24  ;;  %353 = vrot.lane.b32.xlu2 %v1003_v20, %s1081_s24  ;;  %v1279_v56 = vsel %vm1213_vm3, %v1209_v12, 0  ;;  %vm1285_vm11 = vmpackc.low %vm1245_vm7, %vm1240_vm6  ;;  %v488_v58 = vunpack.c.l.b16 %v1259_v50  ;;  %v490_v59 = vunpack.c.l.b16 %v453_v51  ;;  %v758_v0 = vpack.c.b16 %v750_v45, %v748_v41 }
  0xa4   : > { %v679_v22 = vpop.permute.xlu0 %678  ;;  %v504_v1 = vpack.c.b16 %v498_v54, %v496_v53  ;;  %v752_v2 = vunpack.c.l.b16 %v1274_v55  ;;  %v754_v3 = vunpack.c.l.b16 %v1279_v56  ;;  %v489_v4 = vunpack.c.h.b16 %v1259_v50 }
  0xa5   : > { %v680_v31 = vrot.slane %v679_v22, 4  ;;  %v491_v5 = vunpack.c.h.b16 %v453_v51  ;;  %v434_v6 = vsel %vm1285_vm11, %v1250_v46, 0  ;;  %v500_v7 = vpack.c.b16 %v490_v59, %v488_v58 }
  0xa6   : > { %v749_v8 = vunpack.c.h.b16 %v1230_v28  ;;  %v751_v14 = vunpack.c.h.b16 %v1235_v33  ;;  %v435_v18 = vsel %vm1285_vm11, %v1252_v49, 0  ;;  %v465_v20 = vunpack.c.h.b16 %v434_v6 }
  0xa7   : > { %v682_v36 = vsel %vm681_vm4, %v680_v31, %v679_v22  ;;  %v467_v21 = vunpack.c.h.b16 %v435_v18  ;;  %v464_v22 = vunpack.c.l.b16 %v434_v6  ;;  %v466_v24 = vunpack.c.l.b16 %v435_v18 }
  0xa8   : > { %v683_v38 = vunpack.c.l.b16 %v682_v36  ;;  %v684_v39 = vunpack.c.h.b16 %v682_v36  ;;  %v760_v42 = vpack.c.b16 %v754_v3, %v752_v2  ;;  %v759_v43 = vpack.c.b16 %v751_v14, %v749_v8 }
  0xa9   : > { %v1330_v27 = vpack.c.b16 %v467_v21, %v465_v20  ;;  %v1332_v31 = vpack.c.b16 %v466_v24, %v464_v22  ;;  %v501_v50 = vpack.c.b16 %v491_v5, %v489_v4  ;;  %v708_v51 = vsel %vm1213_vm3, %v1250_v46, 0 }
  0xaa   : > { %vm687_vm8 = vcmp.ne.s32.totalorder %v683_v38, %v1177_v47  ;;  %vm688_vm9 = vcmp.ne.s32.totalorder %v684_v39, %v1180_v48  ;;  %516 = vrot.lane.b32.xlu0 %v505_v40, %s1082_s25  ;;  %v709_v52 = vsel %vm1213_vm3, %v1252_v49, 0  ;;  %v303_v54 = vsel %vm1346_vm14, %v1207_v11, 0 }
  0xab   : > { %vm1264_vm10 = vmpackc.low %vm688_vm9, %vm687_vm8  ;;  %512 = vrot.lane.b32.xlu1 %v503_v44, %s1082_s25  ;;  %349 = vrot.lane.b32.xlu2 %v995_v37, %s1081_s24  ;;  %v304_v44 = vsel %vm1346_vm14, %v1209_v12, 0  ;;  %v744_v58 = vunpack.c.l.b16 %v708_v51  ;;  %v746_v59 = vunpack.c.l.b16 %v709_v52  ;;  %v745_v61 = vunpack.c.h.b16 %v708_v51 }
  0xac   : > { %v694_v47 = vsel %vm1264_vm10, %v1207_v11, 0  ;;  %v695_v48 = vsel %vm1264_vm10, %v1209_v12, 0  ;;  %v692_v25 = vsel %vm1264_vm10, %v1191_v62, 0  ;;  %v693_v26 = vsel %vm1264_vm10, %v1193_v63, 0 }
  0xad   : > { %v728_v9 = vunpack.c.l.b16 %v694_v47  ;;  %v730_v10 = vunpack.c.l.b16 %v695_v48  ;;  %v729_v15 = vunpack.c.h.b16 %v694_v47  ;;  %v731_v16 = vunpack.c.h.b16 %v695_v48 }
  0xae   : > { %v724_v28 = vunpack.c.l.b16 %v692_v25  ;;  %v726_v29 = vunpack.c.l.b16 %v693_v26  ;;  %v725_v30 = vunpack.c.h.b16 %v692_v25  ;;  %v727_v32 = vunpack.c.h.b16 %v693_v26 }
  0xaf   : > { %v1319_v19 = vpack.c.b16 %v730_v10, %v728_v9  ;;  %v1322_v23 = vpack.c.b16 %v731_v16, %v729_v15  ;;  %v690_v33 = vsel %vm1264_vm10, %v1250_v46, 0  ;;  %v691_v34 = vsel %vm1264_vm10, %v1252_v49, 0 }
  0xb0   : > { %v1340_v35 = vpack.c.b16 %v726_v29, %v724_v28  ;;  %v721_v36 = vunpack.c.h.b16 %v690_v33  ;;  %v723_v37 = vunpack.c.h.b16 %v691_v34  ;;  %v720_v38 = vunpack.c.l.b16 %v690_v33 }
  0xb1   : > { %v1350_v40 = vpack.c.b16 %v727_v32, %v725_v30  ;;  %v722_v41 = vunpack.c.l.b16 %v691_v34  ;;  %v383_v60 = vunpack.c.h.b16 %v304_v44  ;;  %v756_v13 = vpack.c.b16 %v746_v59, %v744_v58 }
  0xb2   : > { %766 = vrot.lane.b32.xlu0 %v758_v0, %s1082_s25  ;;  %v1355_v45 = vpack.c.b16 %v723_v37, %v721_v36  ;;  %v747_v0 = vunpack.c.h.b16 %v709_v52  ;;  %v299_v4 = vsel %vm1346_vm14, %v1250_v46, 0  ;;  %v300_v5 = vsel %vm1346_vm14, %v1252_v49, 0 }
  0xb3   : > { %506 = vrot.lane.b32.xlu1 %v500_v7, %s1082_s25  ;;  %514 = vrot.lane.b32.xlu2 %v504_v1, %s1082_s25  ;;  %v1363_v53 = vpack.c.b16 %v722_v41, %v720_v38  ;;  %v381_v1 = vunpack.c.h.b16 %v303_v54  ;;  %v753_v47 = vunpack.c.h.b16 %v1274_v55  ;;  %v755_v48 = vunpack.c.h.b16 %v1279_v56 }
  0xb4   : > { %v757_v3 = vpack.c.b16 %v747_v0, %v745_v61  ;;  %v372_v6 = vunpack.c.l.b16 %v299_v4  ;;  %v374_v7 = vunpack.c.l.b16 %v300_v5  ;;  %v382_v8 = vunpack.c.l.b16 %v304_v44 }
  0xb5   : > { %v389_v2 = vpack.c.b16 %v383_v60, %v381_v1  ;;  %v380_v9 = vunpack.c.l.b16 %v303_v54  ;;  %v761_v10 = vpack.c.b16 %v755_v48, %v753_v47  ;;  %v302_v49 = vsel %vm1346_vm14, %v1193_v63, 0 }
  0xb6   : > { %v384_v46 = vpack.c.b16 %v374_v7, %v372_v6  ;;  %v436_v15 = vsel %vm1285_vm11, %v1191_v62, 0  ;;  %v437_v55 = vsel %vm1285_vm11, %v1193_v63, 0  ;;  %v301_v56 = vsel %vm1346_vm14, %v1191_v62, 0 }
  0xb7   : > { %v388_v14 = vpack.c.b16 %v382_v8, %v380_v9  ;;  %v378_v16 = vunpack.c.l.b16 %v302_v49  ;;  %v469_v18 = vunpack.c.h.b16 %v436_v15  ;;  %v471_v20 = vunpack.c.h.b16 %v437_v55 }
  0xb8   : > { %v379_v21 = vunpack.c.h.b16 %v302_v49  ;;  %v376_v22 = vunpack.c.l.b16 %v301_v56  ;;  %v377_v24 = vunpack.c.h.b16 %v301_v56  ;;  %v438_v63 = vsel %vm1285_vm11, %v1207_v11, 0 }
  0xb9   : > { %v479_v26 = vpack.c.b16 %v471_v20, %v469_v18  ;;  %v439_v62 = vsel %vm1285_vm11, %v1209_v12, 0  ;;  %v373_v29 = vunpack.c.h.b16 %v299_v4  ;;  %v375_v30 = vunpack.c.h.b16 %v300_v5 }
  0xba   : > { %770 = vrot.lane.b32.xlu0 %v760_v42, %s1082_s25  ;;  %v386_v25 = vpack.c.b16 %v378_v16, %v376_v22  ;;  %v387_v28 = vpack.c.b16 %v379_v21, %v377_v24  ;;  %v473_v32 = vunpack.c.h.b16 %v438_v63  ;;  %v475_v33 = vunpack.c.h.b16 %v439_v62 }
  0xbb   : > { %768 = vrot.lane.b32.xlu1 %v759_v43, %s1082_s25  ;;  %508 = vrot.lane.b32.xlu2 %v501_v50, %s1082_s25  ;;  %v385_v34 = vpack.c.b16 %v375_v30, %v373_v29  ;;  %v472_v37 = vunpack.c.l.b16 %v438_v63  ;;  %v474_v38 = vunpack.c.l.b16 %v439_v62  ;;  %v468_v39 = vunpack.c.l.b16 %v436_v15 }
  0xbc   : > { %v481_v36 = vpack.c.b16 %v475_v33, %v473_v32  ;;  %v470_v11 = vunpack.c.l.b16 %v437_v55  ;;  %vm359_vm15 = vcmask 1039360   ;;  %vm402_vm0 = vcmask 1031168   ;;  %v263_v32 = vld [vmem:[#allocation2 + $0x8] sm:$0xf] }
  0xbd   : > { %v480_v41 = vpack.c.b16 %v474_v38, %v472_v37  ;;  %v272_v37 = vsel %vm1147_vm5, %v263_v32, 0 }
  0xbe   : > { %v478_v42 = vpack.c.b16 %v470_v11, %v468_v39 }
  0xc2   : > { %400 = vrot.lane.b32.xlu0 %v389_v2, %s1082_s25 }
  0xc3   : > { %762 = vrot.lane.b32.xlu1 %v756_v13, %s1082_s25  ;;  %764 = vrot.lane.b32.xlu2 %v757_v3, %s1082_s25 }
  0xca   : > { %390 = vrot.lane.b32.xlu0 %v384_v46, %s1082_s25 }
  0xcb   : > { %772 = vrot.lane.b32.xlu1 %v761_v10, %s1082_s25  ;;  %398 = vrot.lane.b32.xlu2 %v388_v14, %s1082_s25 }
  0xd2   : > { %540 = vrot.lane.b32.xlu0 %v479_v26, %s1083_s26 }
  0xd3   : > { %394 = vrot.lane.b32.xlu1 %v386_v25, %s1082_s25  ;;  %396 = vrot.lane.b32.xlu2 %v387_v28, %s1082_s25 }
  0xdb   : > { %392 = vrot.lane.b32.xlu1 %v385_v34, %s1082_s25  ;;  %544 = vrot.lane.b32.xlu2 %v481_v36, %s1083_s26 }
  0xe3   : > { %542 = vrot.lane.b32.xlu1 %v480_v41, %s1083_s26  ;;  %538 = vrot.lane.b32.xlu2 %v478_v42, %s1083_s26  ;;  %v312_v41 = vunpack.c.l.b16 %v272_v37  ;;  %v894_v37 = vld [vmem:[%s1611_s2 + $0x8] sm:$0xff] }
  0xf5   : > { %v356_v12 = vpop.permute.xlu2 %355 }
  0xfd   : > { %v354_v57 = vpop.permute.xlu2 %353 }
  0xfe   : > { %552 = vrot.lane.b32.xlu0 %v354_v57, %s1083_s26 }
 0x105   : > { %v350_v43 = vpop.permute.xlu2 %349 }
 0x106   : > { %808 = vrot.lane.b32.xlu0 %v354_v57, %s1084_s27  ;;  %548 = vrot.lane.b32.xlu1 %v350_v43, %s1083_s26 }
 0x10c   : > { %v358_v50 = vpop.permute.xlu0 %357 }
 0x10d   : > { %v352_v44 = vpop.permute.xlu1 %351  ;;  %v515_v51 = vpop.permute.xlu2 %514  ;;  %556 = vrot.lane.b32.xlu2 %v358_v50, %s1083_s26  ;;  %v362_v59 = vsel %vm359_vm15, %v356_v12, %v358_v50 }
 0x10e   : > { %804 = vrot.lane.b32.xlu1 %v350_v43, %s1084_s27  ;;  %v361_v1 = vsel %vm359_vm15, %v352_v44, %v354_v57 }
 0x114   : > { %v511_v52 = vpop.permute.xlu0 %510 }
 0x115   : > { %v348_v54 = vpop.permute.xlu1 %347  ;;  %v509_v58 = vpop.permute.xlu2 %508  ;;  %812 = vrot.lane.b32.xlu2 %v358_v50, %s1084_s27 }
 0x116   : > { %v1416_v60 = vsel %vm359_vm15, %v348_v54, %v350_v43  ;;  %554 = vrot.lane.b32.xlu1 %v362_v59, %s1083_s26 }
 0x117   : > { %546 = vrot.lane.b32.xlu0 %v1416_v60, %s1083_s26 }
 0x11c   : > { %v517_v61 = vpop.permute.xlu0 %516 }
 0x11d   : > { %v513_v0 = vpop.permute.xlu1 %512  ;;  %v765_v13 = vpop.permute.xlu2 %764  ;;  %550 = vrot.lane.b32.xlu2 %v361_v1, %s1083_s26  ;;  %v520_v9 = vsel %vm402_vm0, %v515_v51, %v517_v61 }
 0x11e   : > { %810 = vrot.lane.b32.xlu1 %v362_v59, %s1084_s27  ;;  %v519_v8 = vsel %vm402_vm0, %v511_v52, %v513_v0 }
 0x11f   : > { %802 = vrot.lane.b32.xlu0 %v1416_v60, %s1084_s27 }
 0x124   : > { %v767_v2 = vpop.permute.xlu0 %766 }
 0x125   : > { %v507_v3 = vpop.permute.xlu1 %506  ;;  %v399_v4 = vpop.permute.xlu2 %398  ;;  %806 = vrot.lane.b32.xlu2 %v361_v1, %s1084_s27 }
 0x126   : > { %560 = vrot.lane.b32.xlu1 %v509_v58, %s1083_s26  ;;  %v518_v10 = vsel %vm402_vm0, %v507_v3, %v509_v58 }
 0x127   : > { %564 = vrot.lane.b32.xlu0 %v513_v0, %s1083_s26 }
 0x12c   : > { %v771_v5 = vpop.permute.xlu0 %770 }
 0x12d   : > { %v769_v47 = vpop.permute.xlu1 %768  ;;  %568 = vrot.lane.b32.xlu2 %v517_v61, %s1083_s26  ;;  %v397_v48 = vpop.permute.xlu2 %396 }
 0x12e   : > { %816 = vrot.lane.b32.xlu1 %v765_v13, %s1084_s27  ;;  %v775_v55 = vsel %vm402_vm0, %v767_v2, %v769_v47 }
 0x12f   : > { %820 = vrot.lane.b32.xlu0 %v769_v47, %s1084_s27  ;;  %v416_v47 = vld [vmem:[%s1610_s1 + $0x38] sm:$0xff] }
 0x134   : > { %v401_v7 = vpop.permute.xlu0 %400 }
 0x135   : > { %v763_v6 = vpop.permute.xlu1 %762  ;;  %562 = vrot.lane.b32.xlu2 %v519_v8, %s1083_s26  ;;  %v405_v46 = vsel %vm402_vm0, %v399_v4, %v401_v7  ;;  %v545_v14 = vpop.permute.xlu2 %544 }
 0x136   : > { %566 = vrot.lane.b32.xlu1 %v520_v9, %s1083_s26  ;;  %666 = vmatpush.bf16.msra.mxu3 %v405_v46  ;;  %v774_v56 = vsel %vm402_vm0, %v763_v6, %v765_v13  ;;  %v409_v9 = vld [vmem:[%s1610_s1] sm:$0xff] }
 0x137   : > { %558 = vrot.lane.b32.xlu0 %v518_v10, %s1083_s26  ;;  %v411_v10 = vld [vmem:[%s1610_s1 + $0x10] sm:$0xff] }
 0x138   : > { %v417_v46 = vpack.c.bf16 %v411_v10, %v409_v9 }
 0x13c   : > { %v391_v15 = vpop.permute.xlu0 %390 }
 0x13d   : > { %v773_v49 = vpop.permute.xlu1 %772  ;;  %818 = vrot.lane.b32.xlu2 %v775_v55, %s1084_s27  ;;  %v539_v16 = vpop.permute.xlu2 %538 }
 0x13e   : > { %798 = vrot.lane.b32.xlu1 %v1319_v19, %s1084_s27  ;;  %v776_v24 = vsel %vm402_vm0, %v771_v5, %v773_v49  ;;  %v414_v5 = vld [vmem:[%s1610_s1 + $0x28] sm:$0xff] }
 0x13f   : > { %814 = vrot.lane.b32.xlu0 %v774_v56, %s1084_s27  ;;  %v420_v6 = vpack.c.bf16 %v416_v47, %v414_v5 }
 0x144   : > { %v541_v20 = vpop.permute.xlu0 %540 }
 0x145   : > { %v395_v18 = vpop.permute.xlu1 %394  ;;  %800 = vrot.lane.b32.xlu2 %v1322_v23, %s1084_s27  ;;  %v1448_v22 = vsel %vm570_vm2, %v539_v16, %v541_v20  ;;  %v267_v23 = vld [vmem:[#allocation2 + $0x28] sm:$0xf] }
 0x146   : > { %v404_v21 = vsel %vm402_vm0, %v395_v18, %v397_v48  ;;  %824 = vrot.lane.b32.xlu1 %v773_v49, %s1084_s27  ;;  %v1013_v49 = vld [vmem:[%s1610_s1 + $0x48] sm:$0xff] }
 0x147   : > { %536 = vrot.lane.b32.xlu0 %v1330_v27, %s1083_s26  ;;  %640 = vmatpush.bf16.msra.mxu2 %v404_v21  ;;  %v266_v27 = vld [vmem:[#allocation2 + $0x20] sm:$0xf] }
 0x148   : > { %v275_v63 = vsel %vm1147_vm5, %v266_v27, 0 }
 0x149   : > { %v315_v30 = vunpack.c.l.b16 %v275_v63 }
 0x14d   : > { %v393_v19 = vpop.permute.xlu1 %392  ;;  %534 = vrot.lane.b32.xlu2 %v1332_v31, %s1083_s26  ;;  %v276_v31 = vsel %vm1147_vm5, %v267_v23, 0 }
 0x14e   : > { %v403_v25 = vsel %vm402_vm0, %v391_v15, %v393_v19  ;;  %794 = vrot.lane.b32.xlu1 %v1340_v35, %s1084_s27  ;;  %v265_v35 = vld [vmem:[#allocation2 + $0x18] sm:$0xf]  ;;  %v316_v62 = vunpack.c.l.b16 %v276_v31 }
 0x14f   : > { %822 = vrot.lane.b32.xlu0 %v776_v24, %s1084_s27  ;;  %641 = vmatpush.bf16.msra.mxu2 %v403_v25  ;;  %v274_v29 = vsel %vm1147_vm5, %v265_v35, 0  ;;  %v1015_v15 = vld [vmem:[%s1610_s1 + $0x58] sm:$0xff]  ;;  %v413_v24 = vld [vmem:[%s1610_s1 + $0x20] sm:$0xff]  ;;  %v415_v25 = vld [vmem:[%s1610_s1 + $0x30] sm:$0xff] }
 0x150   : > { %v319_v33 = vpack.c.b16 %v316_v62, %v315_v30  ;;  %v314_v34 = vunpack.c.l.b16 %v274_v29  ;;  %v531_v20 = vpack.c.bf16 %v1015_v15, %v1013_v49  ;;  %v1017_v29 = vld [vmem:[%s1610_s1 + $0x68] sm:$0xff]  ;;  %v1019_v30 = vld [vmem:[%s1610_s1 + $0x78] sm:$0xff] }
 0x153   : > { %642 = vmatpush.bf16.msra.mxu2 %v362_v59  ;;  %v410_v59 = vld [vmem:[%s1610_s1 + $0x8] sm:$0xff] }
 0x155   : > { %v543_v26 = vpop.permute.xlu1 %542  ;;  %796 = vrot.lane.b32.xlu2 %v1350_v40, %s1084_s27  ;;  %v264_v40 = vld [vmem:[#allocation2 + $0x10] sm:$0xf] }
 0x156   : > { %v1463_v28 = vsel %vm570_vm2, %v543_v26, %v545_v14  ;;  %792 = vrot.lane.b32.xlu1 %v1355_v45, %s1084_s27  ;;  %v262_v45 = vld [vmem:[#allocation2] sm:$0xf]  ;;  %v419_v26 = vpack.c.bf16 %v415_v25, %v413_v24 }
 0x157   : > { %790 = vrot.lane.b32.xlu0 %v1363_v53, %s1084_s27  ;;  %643 = vmatpush.bf16.msra.mxu2 %v361_v1  ;;  %v273_v53 = vsel %vm1147_vm5, %v264_v40, 0  ;;  %v271_v36 = vsel %vm1147_vm5, %v262_v45, 0  ;;  %vm826_vm5 = vcmask 785408  }
 0x158   : > { %v313_v38 = vunpack.c.l.b16 %v273_v53  ;;  %v311_v11 = vunpack.c.l.b16 %v271_v36 }
 0x15a   : > { %v318_v39 = vpack.c.b16 %v314_v34, %v313_v38  ;;  %v317_v42 = vpack.c.b16 %v312_v41, %v311_v11  ;;  %v895_v38 = vld [vmem:[%s1611_s2 + $0x10] sm:$0xff]  ;;  %v1025_v41 = vld [vmem:[%s1610_s1 + $0x88] sm:$0xff] }
 0x15b   : > { %644 = vmatpush.bf16.msra.mxu2 %v1416_v60  ;;  %v412_v60 = vld [vmem:[%s1610_s1 + $0x18] sm:$0xff]  ;;  %v1014_v11 = vld [vmem:[%s1610_s1 + $0x50] sm:$0xff] }
 0x15c   : > { %v418_v61 = vpack.c.bf16 %v412_v60, %v410_v59  ;;  %v1026_v59 = vld [vmem:[%s1610_s1 + $0x90] sm:$0xff] }
 0x15e   : > { %1022 = vmatmul.msk.bf16.vlgmr.msra.gmra.mxu3 %vm425_vm1, %v418_v61  ;;  %909 = vperm.xlu1 %1065, %v895_v38  }
 0x15f   : > { %645 = vmatpush.bf16.msra.mxu2 %v319_v33  ;;  %v533_v33 = vpack.c.bf16 %v1019_v30, %v1017_v29  ;;  %904 = vperm.xlu0 %1064, %v894_v37  }
 0x163   : > { %646 = vmatpush.bf16.msra.mxu2 %v318_v39  ;;  %v893_v39 = vld [vmem:[%s1611_s2] sm:$0xff] }
 0x164   : > { %899 = vperm.xlu2 %1063, %v893_v39  }
 0x167   : > { %647 = vmatpush.bf16.msra.mxu2 %v317_v42  ;;  %v557_v12 = vpop.permute.xlu2 %556  ;;  %v1027_v42 = vld [vmem:[%s1610_s1 + $0x98] sm:$0xff] }
 0x16a   : > { %648 = vmatmul.bf16.vlgmr.msra.gmra.mxu2 %v417_v46 }
 0x16e   : > { %1023 = vmatmul.msk.bf16.gmra.mxu3 %vm425_vm1, %v420_v6  ;;  %v1030_v6 = vld [vmem:[%s1610_s1 + $0xb0] sm:$0xff] }
 0x16f   : > { %v813_v57 = vpop.permute.xlu2 %812 }
 0x170   : > { %v553_v43 = vpop.permute.xlu0 %552 }
 0x177   : > { %v551_v50 = vpop.permute.xlu2 %550 }
 0x178   : > { %v549_v44 = vpop.permute.xlu1 %548  ;;  %v1482_v51 = vpop.permute.xlu0 %808  ;;  %v575_v35 = vsel %vm570_vm2, %v551_v50, %v553_v43 }
 0x17a   : > { %653 = vmatmul.bf16.gmra.mxu2 %v419_v26 }
 0x17f   : > { %v807_v54 = vpop.permute.xlu2 %806 }
 0x180   : > { %v1484_v52 = vpop.permute.xlu1 %804  ;;  %v831_v53 = vsel %vm826_vm5, %v807_v54, %v1482_v51  ;;  %v787_v51 = vpack.c.bf16 %v1027_v42, %v1025_v41 }
 0x187   : > { %v569_v0 = vpop.permute.xlu2 %568 }
 0x188   : > { %v555_v17 = vpop.permute.xlu1 %554 }
 0x189   : > { %v547_v58 = vpop.permute.xlu0 %546  ;;  %v576_v19 = vsel %vm570_vm2, %v555_v17, %v557_v12  ;;  %v896_v17 = vld [vmem:[%s1611_s2 + $0x18] sm:$0xff] }
 0x18a   : > { %v574_v62 = vsel %vm570_vm2, %v547_v58, %v549_v44  ;;  %v1024_v58 = vld [vmem:[%s1610_s1 + $0x80] sm:$0xff]  ;;  %914 = vperm.xlu2 %1063, %v896_v17  }
 0x18f   : > { %v563_v2 = vpop.permute.xlu2 %562 }
 0x190   : > { %v811_v1 = vpop.permute.xlu1 %810 }
 0x191   : > { %v803_v13 = vpop.permute.xlu0 %802  ;;  %v832_v40 = vsel %vm826_vm5, %v811_v1, %v813_v57  ;;  %v786_v1 = vpack.c.bf16 %v1026_v59, %v1024_v58 }
 0x192   : > { %v830_v36 = vsel %vm826_vm5, %v803_v13, %v1484_v52  ;;  %v1016_v13 = vld [vmem:[%s1610_s1 + $0x60] sm:$0xff] }
 0x197   : > { %v819_v14 = vpop.permute.xlu2 %818 }
 0x198   : > { %v561_v3 = vpop.permute.xlu1 %560 }
 0x199   : > { %v565_v4 = vpop.permute.xlu0 %564 }
 0x19a   : > { %v578_v48 = vsel %vm570_vm2, %v563_v2, %v565_v4  ;;  %v1018_v2 = vld [vmem:[%s1610_s1 + $0x70] sm:$0xff]  ;;  %v1031_v4 = vld [vmem:[%s1610_s1 + $0xb8] sm:$0xff] }
 0x19b   : > { %596 = vmatpush.bf16.msra.mxu0 %v578_v48  ;;  %v532_v5 = vpack.c.bf16 %v1018_v2, %v1016_v13  ;;  %v1028_v48 = vld [vmem:[%s1610_s1 + $0xa0] sm:$0xff] }
 0x19f   : > { %v801_v23 = vpop.permute.xlu2 %800 }
 0x1a0   : > { %v817_v7 = vpop.permute.xlu1 %816 }
 0x1a1   : > { %v821_v8 = vpop.permute.xlu0 %820 }
 0x1a2   : > { %v834_v21 = vsel %vm826_vm5, %v819_v14, %v821_v8 }
 0x1a7   : > { %v535_v34 = vpop.permute.xlu2 %534 }
 0x1a8   : > { %v567_v55 = vpop.permute.xlu1 %566 }
 0x1a9   : > { %v559_v56 = vpop.permute.xlu0 %558  ;;  %v579_v16 = vsel %vm570_vm2, %v567_v55, %v569_v0 }
 0x1aa   : > { %v577_v18 = vsel %vm570_vm2, %v559_v56, %v561_v3  ;;  %622 = vmatpush.bf16.msra.mxu1 %v579_v16  ;;  %v1029_v3 = vld [vmem:[%s1610_s1 + $0xa8] sm:$0xff] }
 0x1ab   : > { %597 = vmatpush.bf16.msra.mxu0 %v577_v18  ;;  %v789_v47 = vpack.c.bf16 %v1031_v4, %v1029_v3 }
 0x1ad   : > { %1020 = vmatmul.msk.bf16.vlgmr.msra.gmra.mxu1 %vm425_vm1, %v531_v20 }
 0x1ae   : > { %851 = vmatpush.bf16.msrb.mxu1 %v834_v21 }
 0x1af   : > { %598 = vmatpush.bf16.msra.mxu0 %v576_v19  ;;  %v797_v52 = vpop.permute.xlu2 %796 }
 0x1b0   : > { %v799_v27 = vpop.permute.xlu1 %798 }
 0x1b1   : > { %v815_v31 = vpop.permute.xlu0 %814  ;;  %v829_v43 = vsel %vm826_vm5, %v799_v27, %v801_v23 }
 0x1b2   : > { %v833_v63 = vsel %vm826_vm5, %v815_v31, %v817_v7  ;;  %v788_v7 = vpack.c.bf16 %v1030_v6, %v1028_v48 }
 0x1b3   : > { %599 = vmatpush.bf16.msra.mxu0 %v575_v35  ;;  %852 = vmatpush.bf16.msrb.mxu1 %v833_v63 }
 0x1b7   : > { %600 = vmatpush.bf16.msra.mxu0 %v574_v62  ;;  %853 = vmatpush.bf16.msrb.mxu1 %v832_v40 }
 0x1b8   : > { %v825_v45 = vpop.permute.xlu1 %824 }
 0x1b9   : > { %v537_v32 = vpop.permute.xlu0 %536 }
 0x1ba   : > { %v571_v57 = vsel %vm570_vm2, %v535_v34, %v537_v32 }
 0x1bb   : > { %601 = vmatpush.bf16.msra.mxu0 %v1463_v28  ;;  %854 = vmatpush.bf16.msrb.mxu1 %v831_v53  ;;  %v1012_v28 = vld [vmem:[%s1610_s1 + $0x40] sm:$0xff] }
 0x1bc   : > { %v530_v50 = vpack.c.bf16 %v1014_v11, %v1012_v28 }
 0x1bd   : > { %1021 = vmatmul.msk.bf16.gmra.mxu1 %vm425_vm1, %v533_v33 }
 0x1be   : > { %v900_v31 = vpop.permute.xlu2 %899 }
 0x1bf   : > { %602 = vmatpush.bf16.msra.mxu0 %v1448_v22  ;;  %855 = vmatpush.bf16.msrb.mxu1 %v830_v36 }
 0x1c0   : > { %v795_v22 = vpop.permute.xlu1 %794 }
 0x1c1   : > { %v823_v12 = vpop.permute.xlu0 %822  ;;  %v828_v54 = vsel %vm826_vm5, %v795_v22, %v797_v52 }
 0x1c2   : > { %v835_v44 = vsel %vm826_vm5, %v823_v12, %v825_v45 }
 0x1c3   : > { %603 = vmatpush.bf16.msra.mxu0 %v571_v57  ;;  %856 = vmatpush.bf16.msrb.mxu1 %v829_v43 }
 0x1c4   : > { %877 = vmatpush.bf16.msrb.mxu3 %v835_v44 }
 0x1c6   : > { %604 = vmatmul.bf16.vlgmr.msra.gmra.mxu0 %v530_v50 }
 0x1c7   : > { %857 = vmatpush.bf16.msrb.mxu1 %v828_v54  ;;  %1032 = vmatmul.msk.bf16.vlgmr.msrb.gmra.mxu3 %vm425_vm1, %v787_v51 }
 0x1c8   : > { %v793_v60 = vpop.permute.xlu1 %792 }
 0x1c9   : > { %v791_v61 = vpop.permute.xlu0 %790 }
 0x1ca   : > { %v827_v0 = vsel %vm826_vm5, %v791_v61, %v793_v60 }
 0x1cb   : > { %858 = vmatpush.bf16.msrb.mxu1 %v827_v0 }
 0x1ce   : > { %859 = vmatmul.bf16.vlgmr.msrb.gmra.mxu1 %v786_v1 }
 0x1d0   : > { %v910_v12 = vpop.permute.xlu1 %909 }
 0x1d1   : > { %v905_v34 = vpop.permute.xlu0 %904 }
 0x1d6   : > { %609 = vmatmul.bf16.gmra.mxu0 %v532_v5 }
 0x1d7   : > { %1033 = vmatmul.msk.bf16.gmra.mxu3 %vm425_vm1, %v789_v47 }
 0x1de   : > { %864 = vmatmul.bf16.gmra.mxu1 %v788_v7 }
 0x1e1   : > { %v668_v8 = vpop.f32.mrf.mxu3 }
 0x1e4   : > { %v915_v59 = vpop.permute.xlu2 %914 }
 0x1e9   : > { %v670_v10 = vpop.f32.mrf.mxu3 }
 0x1ed   : > { %v649_v15 = vpop.f32.mrf.mxu2 }
 0x1f1   : > { %v673_v14 = vpop.f32.mrf.mxu3 }
 0x1f5   : > { %v651_v19 = vpop.f32.mrf.mxu2 }
 0x1f9   : > { %v675_v55 = vpop.f32.mrf.mxu3 }
 0x1fd   : > { %v654_v33 = vpop.f32.mrf.mxu2 }
 0x205   : > { %v656_v43 = vpop.f32.mrf.mxu2 }
 0x22a   : > { %v624_v9 = vpop.f32.mrf.mxu1 }
 0x232   : > { %v626_v46 = vpop.f32.mrf.mxu1 }
 0x23a   : > { %v629_v49 = vpop.f32.mrf.mxu1 }
 0x242   : > { %v631_v16 = vpop.f32.mrf.mxu1 }
 0x243   : > { %v605_v56 = vpop.f32.mrf.mxu0 }
 0x244   : > { %v625_v18 = vadd.f32 %v624_v9, %v605_v56 }
 0x246   : > { %v650_v20 = vadd.f32 %v649_v15, %v625_v18 }
 0x248   : > { %v669_v23 = vadd.f32 %v668_v8, %v650_v20 }
 0x24a   : > { %v879_v21 = vpop.f32.mrf.mxu3 }
 0x24b   : > { %v607_v24 = vpop.f32.mrf.mxu0  ;;  %v860_v25 = vpop.f32.mrf.mxu1 }
 0x24c   : > { %v627_v26 = vadd.f32 %v626_v46, %v607_v24  ;;  %v880_v27 = vadd.f32 %v879_v21, %v860_v25 }
 0x24e   : > { %v889_v35 = vadd.f32 %v880_v27, %v669_v23  ;;  %v652_v63 = vadd.f32 %v651_v19, %v627_v26 }
 0x250   : > { %v917_v62 = vadd.f32 %v900_v31, %v889_v35  ;;  %v671_v45 = vadd.f32 %v670_v10, %v652_v63 }
 0x252   : > { %921 = vst [vmem:[%s1600_s10] sm:$0xff] %v917_v62  ;;  %v881_v40 = vpop.f32.mrf.mxu3 }
 0x253   : > { %v610_v29 = vpop.f32.mrf.mxu0  ;;  %v862_v30 = vpop.f32.mrf.mxu1 }
 0x254   : > { %v630_v32 = vadd.f32 %v629_v49, %v610_v29  ;;  %v882_v53 = vadd.f32 %v881_v40, %v862_v30 }
 0x256   : > { %v890_v36 = vadd.f32 %v882_v53, %v671_v45  ;;  %v655_v37 = vadd.f32 %v654_v33, %v630_v32 }
 0x258   : > { %v918_v38 = vadd.f32 %v905_v34, %v890_v36  ;;  %v674_v41 = vadd.f32 %v673_v14, %v655_v37 }
 0x25a   : > { %922 = vst [vmem:[%s1600_s10 + $0x8] sm:$0xff] %v918_v38  ;;  %v884_v39 = vpop.f32.mrf.mxu3 }
 0x25b   : > { %v612_v28 = vpop.f32.mrf.mxu0  ;;  %v865_v11 = vpop.f32.mrf.mxu1 }
 0x25c   : > { %v632_v42 = vadd.f32 %v631_v16, %v612_v28  ;;  %v885_v22 = vadd.f32 %v884_v39, %v865_v11 }
 0x25e   : > { %v891_v57 = vadd.f32 %v885_v22, %v674_v41  ;;  %v657_v44 = vadd.f32 %v656_v43, %v632_v42 }
 0x260   : > { %v919_v50 = vadd.f32 %v910_v12, %v891_v57  ;;  %v676_v54 = vadd.f32 %v675_v55, %v657_v44 }
 0x262   : > { %923 = vst [vmem:[%s1600_s10 + $0x10] sm:$0xff] %v919_v50  ;;  %v886_v52 = vpop.f32.mrf.mxu3 }
 0x263   : > { %v867_v51 = vpop.f32.mrf.mxu1 }
 0x264   : > { %v887_v17 = vadd.f32 %v886_v52, %v867_v51 }
 0x266   : > { %v892_v58 = vadd.f32 %v887_v17, %v676_v54 }
 0x268   : > { %v920_v60 = vadd.f32 %v915_v59, %v892_v58 }
 0x26a   : > { %924 = vst [vmem:[%s1600_s10 + $0x18] sm:$0xff] %v920_v60 }
 0x26b PF: > { %s13_s12 = sadd.s32 1, %s1072_s12  }
 0x26c   : > { %p10_p4 = scmp.ge.s32.totalorder %s13_s12, 4  }
 0x26e   :  { %12 = sbr.rel (!%p10_p4) target bundleno = 1 (0x1), region = 64 }

// kernel: baseline_hr_forward.13
= control target key start
LH: loop header
LB: loop body
LE: loop exit
PB: predicated region body
PF: predicated region fallthrough
CT: control target
= control target key end

     0   :  { %s944_s15 = smov 0   ;;  %s1272_s0 = inlined_call_operand.vmem [shape: f32[2,32,128], index: 0, kind: input, shape index: {}]   ;;  %s1273_s1 = inlined_call_operand.vmem [shape: f32[2,32,128], index: 1, kind: input, shape index: {}]   ;;  %s1274_s2 = inlined_call_operand.vmem [shape: f32[3,32,96], index: 2, kind: input, shape index: {}]   ;;  %s1275_s3 = inlined_call_operand.vmem [shape: f32[32,1], index: 3, kind: input, shape index: {}]   ;;  %s1276_s4 = inlined_call_operand.vmem [shape: f32[2,32,128], index: 4, kind: output, shape index: {}]  }
   0x1 LB: > { %s822_s16 = sadd.s32 4294967295, %s906_s15   ;;  %p826_p0 = scmp.ge.s32.totalorder %s906_s15, 1  ;;  %s906_s15 = sphi %s944_s15, %s14_s15  }
   0x2   : > { %p172_p1 = scmp.lt.s32.totalorder %s906_s15, 3 }
   0x4   : > { %p173_p2 = pnand %p826_p0, %p172_p1 }
   0x5   : > { %p203_p3 = scmp.lt.s32.totalorder (!%p173_p2), %s822_s16, 1  ;;  %s909_s21 = smov (!%p173_p2), 17  }
   0x6   : > { %176 = sbr.rel (%p173_p2) target bundleno = 606 (0x25e), region = 36  ;;  %s910_s22 = smov (!%p173_p2), 34  }
   0x7   : > { %s911_s23 = smov (!%p173_p2), 18   ;;  %s912_s24 = smov (!%p173_p2), 2  }
   0x8   : > { %s913_s25 = smov (!%p173_p2), 32   ;;  %s914_s26 = smov (!%p173_p2), 16  }
   0x9   : > { %s915_s27 = smov (!%p173_p2), 127   ;;  %s916_s28 = smov (!%p173_p2), 126  }
   0xa   : > { %s917_s29 = smov (!%p173_p2), 96   ;;  %s918_s30 = smov (!%p173_p2), 112  }
   0xb   : > { %v271_v0 = vlaneseq  ;;  %v908_v1 = vmov 0   ;;  %s1296_s16 = smov (!%p203_p3, %s822_s16), 1  ;;  %vm221_vm4 = vcmask 134144   ;;  %vm226_vm5 = vcmask 273544  }
   0xc   : > { %897 = vset.pattern.permute.xlu1 %v908_v1  ;;  %899 = vset.pattern.permute.xlu0 %v908_v1  ;;  %s955_s17 = sshll.u32 %s1296_s16, 5  ;;  %224 = vst.msk [vmem:[#allocation2 + $0x10] sm:$0xf] %vm221_vm4, %v908_v1  ;;  %vm264_vm6 = vcmask 1043592   ;;  %vm265_vm7 = vcmask 138244   ;;  %vm255_vm8 = vcmask 138240   ;;  %v982_v26 = vunpack.c.l.b16 %v908_v1 }
   0xd   : > { %v272_v2 = vand.u32 127, %v271_v0  ;;  %898 = vset.pattern.permute.xlu2 %v908_v1  ;;  %s207_s20 = scalar_lea.vmem %s1272_s0, %s955_s17  ;;  %229 = vst.msk [vmem:[#allocation2 + $0x14] sm:$0xf] %vm226_vm5, %v908_v1  ;;  %vm977_vm9 = vmor %vm265_vm7, %vm264_vm6  ;;  %vm402_vm10 = vcmask 130048   ;;  %vm571_vm11 = vcmask 261120   ;;  %v985_v27 = vunpack.c.h.b16 %v908_v1  ;;  %s1259_s16 = scalar_lea.vmem %s1273_s1, %s955_s17 }
   0xe   : > { %v233_v4 = vld [vmem:[%s207_s20 + $0x10] sm:$0xff]  ;;  %v231_v5 = vld [vmem:[%s207_s20] sm:$0xff]  ;;  %v234_v9 = vld [vmem:[%s207_s20 + $0x18] sm:$0xff]  ;;  %222 = vst.msk [vmem:[#allocation2] sm:$0xf] %vm221_vm4, %v908_v1  ;;  %vm587_vm12 = vcmask 277504  }
   0xf   : > { %v277_v3 = vand.u32 15, %v272_v2  ;;  %v237_v6 = vpack.c.bf16 %v233_v4, %v233_v4  ;;  %v235_v7 = vpack.c.bf16 %v231_v5, %v231_v5  ;;  %v232_v10 = vld [vmem:[%s207_s20 + $0x8] sm:$0xff]  ;;  %v238_v11 = vpack.c.bf16 %v234_v9, %v234_v9  ;;  %223 = vst.msk [vmem:[#allocation2 + $0x8] sm:$0xf] %vm221_vm4, %v908_v1  ;;  %s217_s20 = scalar_lea.vmem %s1276_s4, %s955_s17 }
  0x10   : > { %v236_v12 = vpack.c.bf16 %v232_v10, %v232_v10  ;;  %225 = vst.msk [vmem:[#allocation2 + $0x18] sm:$0xf] %vm221_vm4, %v908_v1 }
  0x11   : > { %vm286_vm0 = vcmp.ne.s32.totalorder %v277_v3, 15  ;;  %247 = vrot.lane.b32.xlu0 %v237_v6, %s909_s21  ;;  %243 = vrot.lane.b32.xlu1 %v235_v7, %s909_s21  ;;  %vm285_vm2 = vcmp.ne.s32.totalorder %v277_v3, 0  ;;  %227 = vst.msk [vmem:[#allocation2 + $0x4] sm:$0xf] %vm226_vm5, %v908_v1 }
  0x12   : > { %vm304_vm1 = vmpackc.low %vm286_vm0, %vm286_vm0  ;;  %228 = vst.msk [vmem:[#allocation2 + $0xc] sm:$0xf] %vm226_vm5, %v908_v1 }
  0x13   : > { %v305_v8 = vsel %vm304_vm1, 65537, %v908_v1  ;;  %vm962_vm3 = vmpackc.low %vm285_vm2, %vm285_vm2  ;;  %230 = vst.msk [vmem:[#allocation2 + $0x1c] sm:$0xf] %vm226_vm5, %v908_v1  ;;  %vm418_vm2 = vcmask 146432  }
  0x14   : > { %584 = vrot.lane.b32.xlu2 %v305_v8, %s910_s22  ;;  %v398_v14 = vsel %vm962_vm3, 65537, %v908_v1 }
  0x19   : > { %249 = vrot.lane.b32.xlu0 %v238_v11, %s909_s21  ;;  %245 = vrot.lane.b32.xlu1 %v236_v12, %s909_s21 }
  0x1c   : > { %415 = vrot.lane.b32.xlu2 %v305_v8, %s911_s23 }
  0x21   : > { %306 = vrot.lane.b32.xlu0 %v305_v8, %s912_s24 }
  0x24   : > { %568 = vrot.lane.b32.xlu2 %v398_v14, %s913_s25 }
  0x2c   : > { %399 = vrot.lane.b32.xlu2 %v398_v14, %s914_s26 }
  0x6e   : > { %v585_v15 = vpop.permute.xlu2 %584 }
  0x6f   : > { %v586_v34 = vrot.slane %v585_v15, 4 }
  0x71   : > { %v588_v42 = vsel %vm587_vm12, %v586_v34, %v585_v15 }
  0x72   : > { %v589_v46 = vunpack.c.l.b16 %v588_v42  ;;  %v590_v47 = vunpack.c.h.b16 %v588_v42 }
  0x74   : > { %vm593_vm5 = vcmp.ne.s32.totalorder %v589_v46, %v982_v26  ;;  %vm594_vm6 = vcmp.ne.s32.totalorder %v590_v47, %v985_v27 }
  0x75   : > { %vm1034_vm7 = vmpackc.low %vm594_vm6, %vm593_vm5 }
  0x76   : > { %v416_v16 = vpop.permute.xlu2 %415 }
  0x77   : > { %v417_v45 = vrot.slane %v416_v16, 4 }
  0x79   : > { %v419_v51 = vsel %vm418_vm2, %v417_v45, %v416_v16 }
  0x7a   : > { %v420_v58 = vunpack.c.l.b16 %v419_v51  ;;  %v421_v59 = vunpack.c.h.b16 %v419_v51 }
  0x7e   : > { %v569_v17 = vpop.permute.xlu2 %568 }
  0x7f   : > { %v570_v20 = vrot.slane %v569_v17, 4 }
  0x81   : > { %v572_v31 = vsel %vm571_vm11, %v570_v20, %v569_v17 }
  0x82   : > { %v573_v35 = vunpack.c.l.b16 %v572_v31  ;;  %v574_v36 = vunpack.c.h.b16 %v572_v31 }
  0x83   : > { %v248_v18 = vpop.permute.xlu0 %247  ;;  %v244_v19 = vpop.permute.xlu1 %243 }
  0x84   : > { %v253_v22 = vrot.slane %v248_v18, 4  ;;  %v251_v23 = vrot.slane %v244_v19, 4  ;;  %vm577_vm0 = vcmp.ne.s32.totalorder %v573_v35, %v982_v26  ;;  %vm578_vm1 = vcmp.ne.s32.totalorder %v574_v36, %v985_v27 }
  0x85   : > { %vm1011_vm4 = vmpackc.low %vm578_vm1, %vm577_vm0  ;;  %vm358_vm0 = vcmask 1039360   ;;  %vm504_vm1 = vcmask 916480  }
  0x86   : > { %v400_v24 = vpop.permute.xlu2 %399  ;;  %v258_v28 = vsel %vm255_vm8, %v253_v22, %v248_v18  ;;  %v256_v29 = vsel %vm255_vm8, %v251_v23, %v244_v19 }
  0x87   : > { %v401_v25 = vrot.slane %v400_v24, 4  ;;  %269 = vst.msk [vmem:[#allocation2 + $0x10] sm:$0xff] %vm977_vm9, %v258_v28 }
  0x88   : > { %267 = vst.msk [vmem:[#allocation2] sm:$0xff] %vm977_vm9, %v256_v29 }
  0x89   : > { %v403_v30 = vsel %vm402_vm10, %v401_v25, %v400_v24  ;;  %vm425_vm10 = vcmp.ne.s32.totalorder %v421_v59, %v985_v27 }
  0x8a   : > { %v404_v32 = vunpack.c.l.b16 %v403_v30  ;;  %v405_v33 = vunpack.c.h.b16 %v403_v30 }
  0x8b   : > { %v250_v38 = vpop.permute.xlu0 %249  ;;  %v246_v39 = vpop.permute.xlu1 %245 }
  0x8c   : > { %vm408_vm13 = vcmp.ne.s32.totalorder %v404_v32, %v982_v26  ;;  %vm409_vm14 = vcmp.ne.s32.totalorder %v405_v33, %v985_v27  ;;  %v254_v40 = vrot.slane %v250_v38, 4  ;;  %v252_v41 = vrot.slane %v246_v39, 4 }
  0x8d   : > { %vm995_vm15 = vmpackc.low %vm409_vm14, %vm408_vm13 }
  0x8e   : > { %v259_v43 = vsel %vm255_vm8, %v254_v40, %v250_v38  ;;  %v257_v44 = vsel %vm255_vm8, %v252_v41, %v246_v39  ;;  %v1007_v48 = vld [vmem:[#allocation2 + $0x10] sm:$0xff]  ;;  %vm309_vm8 = vcmask 15360  }
  0x8f   : > { %270 = vst.msk [vmem:[#allocation2 + $0x18] sm:$0xff] %vm977_vm9, %v259_v43  ;;  %v1009_v49 = vld [vmem:[#allocation2] sm:$0xff]  ;;  %v1023_v54 = vsel %vm995_vm15, %v1007_v48, 0  ;;  %v843_v55 = vld [vmem:[#allocation2 + $0x10] sm:$0xf]  ;;  %v598_v8 = vsel %vm1034_vm7, %v1007_v48, 0 }
  0x90   : > { %268 = vst.msk [vmem:[#allocation2 + $0x8] sm:$0xff] %vm977_vm9, %v257_v44  ;;  %v1018_v53 = vsel %vm1011_vm4, %v1009_v49, 0  ;;  %v870_v56 = vld [vmem:[#allocation2 + $0x14] sm:$0xf]  ;;  %v1030_v57 = vsel %vm995_vm15, %v1009_v49, 0  ;;  %vm424_vm9 = vcmp.ne.s32.totalorder %v420_v58, %v982_v26  ;;  %v624_v16 = vunpack.c.l.b16 %v598_v8 }
  0x91   : > { %v835_v3 = vld [vmem:[#allocation2] sm:$0xf]  ;;  %vm1048_vm11 = vmpackc.low %vm425_vm10, %vm424_vm9  ;;  %v596_v17 = vsel %vm1034_vm7, %v1009_v49, 0  ;;  %v625_v19 = vunpack.c.h.b16 %v598_v8  ;;  %v868_v20 = vld [vmem:[#allocation2 + $0x4] sm:$0xf]  ;;  %v604_v29 = vunpack.c.l.b16 %v1018_v53  ;;  %v605_v32 = vunpack.c.h.b16 %v1018_v53 }
  0x92   : > { %v429_v25 = vsel %vm1048_vm11, %v1007_v48, 0  ;;  %v621_v28 = vunpack.c.h.b16 %v596_v17  ;;  %v439_v33 = vunpack.c.l.b16 %v1023_v54  ;;  %v436_v44 = vunpack.c.h.b16 %v1030_v57 }
  0x93   : > { %v307_v52 = vpop.permute.xlu0 %306  ;;  %v456_v53 = vunpack.c.h.b16 %v429_v25  ;;  %v435_v37 = vunpack.c.l.b16 %v1030_v57  ;;  %v455_v8 = vunpack.c.l.b16 %v429_v25  ;;  %v582_v14 = vsel %vm1011_vm4, %v1007_v48, 0 }
  0x94   : > { %v308_v60 = vrot.slane %v307_v52, 4 }
  0x96   : > { %v871_v61 = vld [vmem:[#allocation2 + $0x14] sm:$0xf0]  ;;  %v845_v62 = vld [vmem:[#allocation2 + $0x18] sm:$0xf0]  ;;  %v310_v7 = vsel %vm309_vm8, %v308_v60, %v307_v52 }
  0x97   : > { %v1032_v63 = vld [vmem:[#allocation2 + $0x18] sm:$0xff]  ;;  %v844_v1 = vor.u32 %v871_v61, %v843_v55  ;;  %v848_v2 = vor.u32 %v870_v56, %v845_v62  ;;  %v869_v4 = vld [vmem:[#allocation2 + $0x4] sm:$0xf0]  ;;  %v837_v11 = vld [vmem:[#allocation2 + $0x8] sm:$0xf0]  ;;  %v311_v15 = vunpack.c.l.b16 %v310_v7  ;;  %v312_v18 = vunpack.c.h.b16 %v310_v7 }
  0x98   : > { %v836_v5 = vor.u32 %v869_v4, %v835_v3  ;;  %v599_v6 = vsel %vm1034_vm7, %v1032_v63, 0  ;;  %v1046_v12 = vld [vmem:[#allocation2 + $0x8] sm:$0xff]  ;;  %v840_v22 = vor.u32 %v868_v20, %v837_v11  ;;  %v430_v31 = vsel %vm1048_vm11, %v1032_v63, 0 }
  0x99   : > { %354 = vrot.lane.b32.xlu0 %v844_v1, %s915_s27  ;;  %356 = vrot.lane.b32.xlu1 %v848_v2, %s915_s27  ;;  %v626_v9 = vunpack.c.l.b16 %v599_v6  ;;  %v627_v10 = vunpack.c.h.b16 %v599_v6  ;;  %v597_v23 = vsel %vm1034_vm7, %v1046_v12, 0  ;;  %vm1063_vm12 = vcmp.ne.s32.totalorder %v311_v15, %v982_v26 }
  0x9a   : > { %350 = vrot.lane.b32.xlu2 %v836_v5, %s915_s27  ;;  %vm1074_vm13 = vcmp.ne.s32.totalorder %v312_v18, %v985_v27  ;;  %v623_v26 = vunpack.c.h.b16 %v597_v23  ;;  %v581_v35 = vsel %vm1011_vm4, %v1046_v12, 0  ;;  %v414_v36 = vsel %vm995_vm15, %v1032_v63, 0 }
  0x9b   : > { %v630_v21 = vpack.c.b16 %v626_v9, %v624_v16  ;;  %v631_v24 = vpack.c.b16 %v627_v10, %v625_v19  ;;  %v622_v38 = vunpack.c.l.b16 %v597_v23  ;;  %v606_v39 = vunpack.c.l.b16 %v581_v35  ;;  %vm1099_vm14 = vmpackc.low %vm1074_vm13, %vm1063_vm12 }
  0x9c   : > { %v607_v40 = vunpack.c.h.b16 %v581_v35  ;;  %v441_v41 = vunpack.c.l.b16 %v414_v36  ;;  %v458_v42 = vunpack.c.h.b16 %v430_v31  ;;  %v620_v27 = vunpack.c.l.b16 %v596_v17 }
  0x9d   : > { %v412_v43 = vsel %vm995_vm15, %v1046_v12, 0  ;;  %v1089_v45 = vpack.c.b16 %v606_v39, %v604_v29  ;;  %v440_v56 = vunpack.c.h.b16 %v1023_v54  ;;  %v629_v58 = vpack.c.b16 %v623_v26, %v621_v28 }
  0x9e   : > { %v1091_v46 = vpack.c.b16 %v607_v40, %v605_v32  ;;  %v1093_v47 = vpack.c.b16 %v441_v41, %v439_v33  ;;  %v438_v51 = vunpack.c.h.b16 %v412_v43  ;;  %v437_v55 = vunpack.c.l.b16 %v412_v43 }
  0x9f   : > { %v628_v59 = vpack.c.b16 %v622_v38, %v620_v27  ;;  %v442_v61 = vunpack.c.h.b16 %v414_v36  ;;  %v462_v62 = vpack.c.b16 %v458_v42, %v456_v53  ;;  %v428_v0 = vsel %vm1048_vm11, %v1046_v12, 0 }
  0xa0   : > { %v1105_v60 = vpack.c.b16 %v438_v51, %v436_v44  ;;  %v1110_v1 = vpack.c.b16 %v437_v55, %v435_v37  ;;  %v320_v54 = vsel %vm1099_vm14, %v1007_v48, 0  ;;  %v321_v57 = vsel %vm1099_vm14, %v1032_v63, 0 }
  0xa1   : > { %636 = vrot.lane.b32.xlu1 %v630_v21, %s916_s28  ;;  %352 = vrot.lane.b32.xlu0 %v840_v22, %s915_s27  ;;  %v1120_v2 = vpack.c.b16 %v442_v61, %v440_v56  ;;  %v427_v3 = vsel %vm1048_vm11, %v1009_v49, 0  ;;  %v457_v4 = vunpack.c.l.b16 %v430_v31  ;;  %v453_v5 = vunpack.c.l.b16 %v428_v0 }
  0xa2   : > { %638 = vrot.lane.b32.xlu2 %v631_v24, %s916_s28  ;;  %v371_v6 = vunpack.c.l.b16 %v320_v54  ;;  %v373_v7 = vunpack.c.l.b16 %v321_v57  ;;  %v451_v9 = vunpack.c.l.b16 %v427_v3  ;;  %v583_v16 = vsel %vm1011_vm4, %v1032_v63, 0 }
  0xa3   : > { %v461_v10 = vpack.c.b16 %v457_v4, %v455_v8  ;;  %v454_v17 = vunpack.c.h.b16 %v428_v0  ;;  %v372_v18 = vunpack.c.h.b16 %v320_v54  ;;  %v374_v19 = vunpack.c.h.b16 %v321_v57  ;;  %v290_v0 = vld [vmem:[#allocation2 + $0x18] sm:$0xf]  ;;  %v289_v54 = vld [vmem:[#allocation2 + $0x10] sm:$0xf] }
  0xa4   : > { %v459_v11 = vpack.c.b16 %v453_v5, %v451_v9  ;;  %v377_v15 = vpack.c.b16 %v373_v7, %v371_v6  ;;  %v610_v20 = vunpack.c.l.b16 %v583_v16  ;;  %v452_v21 = vunpack.c.h.b16 %v427_v3  ;;  %v288_v3 = vld [vmem:[#allocation2 + $0x8] sm:$0xf]  ;;  %v287_v6 = vld [vmem:[#allocation2] sm:$0xf] }
  0xa5   : > { %v608_v22 = vunpack.c.l.b16 %v582_v14  ;;  %v378_v24 = vpack.c.b16 %v374_v19, %v372_v18  ;;  %v318_v28 = vsel %vm1099_vm14, %v1009_v49, 0  ;;  %v319_v63 = vsel %vm1099_vm14, %v1046_v12, 0 }
  0xa6   : > { %v460_v23 = vpack.c.b16 %v454_v17, %v452_v21  ;;  %v368_v48 = vunpack.c.h.b16 %v318_v28  ;;  %v370_v50 = vunpack.c.h.b16 %v319_v63  ;;  %v367_v29 = vunpack.c.l.b16 %v318_v28 }
  0xa7   : > { %v614_v25 = vpack.c.b16 %v610_v20, %v608_v22  ;;  %v369_v30 = vunpack.c.l.b16 %v319_v63  ;;  %v611_v49 = vunpack.c.h.b16 %v583_v16  ;;  %v609_v33 = vunpack.c.h.b16 %v582_v14 }
  0xa8   : > { %v376_v31 = vpack.c.b16 %v370_v50, %v368_v48  ;;  %vm387_vm15 = vcmask 1031168   ;;  %v297_v57 = vsel %vm962_vm3, %v290_v0, 0  ;;  %v296_v4 = vsel %vm962_vm3, %v289_v54, 0  ;;  %v849_v54 = vld [vmem:[%s1274_s2 + $0x20] sm:$0xff] }
  0xa9   : > { %634 = vrot.lane.b32.xlu1 %v629_v58, %s916_s28  ;;  %632 = vrot.lane.b32.xlu0 %v628_v59, %s916_s28  ;;  %v375_v32 = vpack.c.b16 %v369_v30, %v367_v29  ;;  %v615_v12 = vpack.c.b16 %v611_v49, %v609_v33  ;;  %v329_v5 = vunpack.c.l.b16 %v297_v57  ;;  %v295_v7 = vsel %vm962_vm3, %v288_v3, 0  ;;  %v850_v57 = vld [vmem:[%s1274_s2 + $0x28] sm:$0xff]  ;;  %v851_v3 = vld [vmem:[%s1274_s2 + $0x30] sm:$0xff] }
  0xaa   : > { %469 = vrot.lane.b32.xlu2 %v462_v62, %s916_s28  ;;  %v294_v8 = vsel %vm962_vm3, %v287_v6, 0  ;;  %vm517_vm3 = vcmask 785408  }
  0xb1   : > { %467 = vrot.lane.b32.xlu1 %v461_v10, %s916_s28  ;;  %463 = vrot.lane.b32.xlu0 %v459_v11, %s916_s28  ;;  %v327_v10 = vunpack.c.l.b16 %v295_v7  ;;  %v326_v11 = vunpack.c.l.b16 %v294_v8 }
  0xb2   : > { %383 = vrot.lane.b32.xlu2 %v377_v15, %s916_s28 }
  0xb3   : > { %v330_v15 = vpack.c.b16 %v327_v10, %v326_v11 }
  0xb9   : > { %465 = vrot.lane.b32.xlu1 %v460_v23, %s916_s28  ;;  %385 = vrot.lane.b32.xlu0 %v378_v24, %s916_s28 }
  0xba   : > { %653 = vrot.lane.b32.xlu2 %v614_v25, %s917_s29 }
  0xc1   : > { %381 = vrot.lane.b32.xlu1 %v376_v31, %s916_s28  ;;  %379 = vrot.lane.b32.xlu0 %v375_v32, %s916_s28  ;;  %v394_v31 = vld [vmem:[%s1274_s2 + $0x10] sm:$0xff]  ;;  %v395_v32 = vld [vmem:[%s1274_s2 + $0x18] sm:$0xff] }
  0xc2   : > { %v397_v33 = vpack.c.bf16 %v395_v32, %v394_v31 }
  0xc9   : > { %655 = vrot.lane.b32.xlu0 %v615_v12, %s917_s29 }
  0xf4   : > { %v351_v34 = vpop.permute.xlu2 %350 }
  0xfc   : > { %v639_v36 = vpop.permute.xlu2 %638 }
 0x104   : > { %v470_v44 = vpop.permute.xlu2 %469 }
 0x10b   : > { %v355_v26 = vpop.permute.xlu0 %354  ;;  %v357_v35 = vpop.permute.xlu1 %356 }
 0x10c   : > { %663 = vrot.lane.b32.xlu0 %v357_v35, %s917_s29  ;;  %v360_v43 = vsel %vm358_vm0, %v355_v26, %v357_v35  ;;  %v384_v37 = vpop.permute.xlu2 %383  ;;  %v717_v26 = vld [vmem:[%s1275_s3 + $0x10] sm:$0xff] }
 0x113   : > { %v353_v38 = vpop.permute.xlu0 %352  ;;  %v637_v39 = vpop.permute.xlu1 %636 }
 0x114   : > { %659 = vrot.lane.b32.xlu2 %v353_v38, %s917_s29  ;;  %v359_v40 = vsel %vm358_vm0, %v351_v34, %v353_v38  ;;  %v641_v41 = vsel %vm387_vm15, %v637_v39, %v639_v36  ;;  %v654_v14 = vpop.permute.xlu2 %653  ;;  %v715_v34 = vld [vmem:[%s1275_s3] sm:$0xff] }
 0x115   : > { %657 = vrot.lane.b32.xlu1 %v359_v40, %s917_s29  ;;  %669 = vrot.lane.b32.xlu0 %v641_v41, %s917_s29  ;;  %v858_v41 = vld [vmem:[%s1274_s2 + $0x48] sm:$0xff] }
 0x11b   : > { %v633_v42 = vpop.permute.xlu0 %632  ;;  %v635_v27 = vpop.permute.xlu1 %634 }
 0x11c   : > { %661 = vrot.lane.b32.xlu2 %v360_v43, %s917_s29 }
 0x11d   : > { %671 = vrot.lane.b32.xlu1 %v639_v36, %s917_s29  ;;  %649 = vrot.lane.b32.xlu0 %v1089_v45, %s917_s29  ;;  %v640_v45 = vsel %vm387_vm15, %v633_v42, %v635_v27 }
 0x123   : > { %v464_v51 = vpop.permute.xlu0 %463  ;;  %v468_v52 = vpop.permute.xlu1 %467 }
 0x124   : > { %667 = vrot.lane.b32.xlu2 %v635_v27, %s917_s29  ;;  %v472_v53 = vsel %vm387_vm15, %v468_v52, %v470_v44  ;;  %v718_v27 = vld [vmem:[%s1275_s3 + $0x18] sm:$0xff] }
 0x125   : > { %502 = vrot.lane.b32.xlu1 %v470_v44, %s918_s30  ;;  %500 = vrot.lane.b32.xlu0 %v472_v53, %s918_s30 }
 0x12b   : > { %v386_v55 = vpop.permute.xlu0 %385  ;;  %v466_v56 = vpop.permute.xlu1 %465 }
 0x12c   : > { %498 = vrot.lane.b32.xlu2 %v466_v56, %s918_s30  ;;  %v389_v58 = vsel %vm387_vm15, %v384_v37, %v386_v55 }
 0x12d   : > { %551 = vmatpush.bf16.msra.mxu1 %v389_v58  ;;  %665 = vrot.lane.b32.xlu1 %v640_v45, %s917_s29  ;;  %v859_v58 = vld [vmem:[%s1274_s2 + $0x50] sm:$0xff]  ;;  %v860_v45 = vld [vmem:[%s1274_s2 + $0x58] sm:$0xff] }
 0x12e   : > { %494 = vrot.lane.b32.xlu0 %v357_v35, %s918_s30  ;;  %v716_v35 = vld [vmem:[%s1275_s3 + $0x8] sm:$0xff]  ;;  %v648_v0 = vpack.c.bf16 %v860_v45, %v859_v58 }
 0x133   : > { %v380_v59 = vpop.permute.xlu0 %379  ;;  %v382_v61 = vpop.permute.xlu1 %381 }
 0x134   : > { %492 = vrot.lane.b32.xlu2 %v360_v43, %s918_s30  ;;  %v388_v62 = vsel %vm387_vm15, %v380_v59, %v382_v61 }
 0x135   : > { %651 = vrot.lane.b32.xlu1 %v1091_v46, %s917_s29  ;;  %552 = vmatpush.bf16.msra.mxu1 %v388_v62  ;;  %v471_v46 = vsel %vm387_vm15, %v464_v51, %v466_v56 }
 0x136   : > { %484 = vrot.lane.b32.xlu0 %v1093_v47, %s918_s30  ;;  %v328_v47 = vunpack.c.l.b16 %v296_v4  ;;  %v852_v4 = vld [vmem:[%s1274_s2 + $0x38] sm:$0xff] }
 0x137   : > { %v479_v7 = vpack.c.bf16 %v852_v4, %v851_v3 }
 0x138   : > { %v331_v9 = vpack.c.b16 %v329_v5, %v328_v47 }
 0x139   : > { %553 = vmatpush.bf16.msra.mxu1 %v360_v43 }
 0x13b   : > { %v656_v16 = vpop.permute.xlu0 %655 }
 0x13c   : > { %490 = vrot.lane.b32.xlu2 %v353_v38, %s918_s30  ;;  %v675_v38 = vsel %vm517_vm3, %v654_v14, %v656_v16  ;;  %v743_v14 = vld [vmem:[%s1259_s16] sm:$0xff] }
 0x13d   : > { %496 = vrot.lane.b32.xlu1 %v471_v46, %s918_s30  ;;  %554 = vmatpush.bf16.msra.mxu1 %v359_v40  ;;  %v478_v46 = vpack.c.bf16 %v850_v57, %v849_v54 }
 0x13e   : > { %482 = vrot.lane.b32.xlu0 %v1105_v60, %s918_s30 }
 0x141   : > { %555 = vmatpush.bf16.msra.mxu1 %v331_v9 }
 0x144   : > { %480 = vrot.lane.b32.xlu2 %v1110_v1, %s918_s30  ;;  %v392_v1 = vld [vmem:[%s1274_s2] sm:$0xff] }
 0x145   : > { %488 = vrot.lane.b32.xlu1 %v359_v40, %s918_s30  ;;  %556 = vmatpush.bf16.msra.mxu1 %v330_v15  ;;  %v857_v40 = vld [vmem:[%s1274_s2 + $0x40] sm:$0xff] }
 0x146   : > { %731 = vperm.xlu0 %899, %v717_v26   ;;  %v647_v51 = vpack.c.bf16 %v858_v41, %v857_v40  ;;  %v746_v26 = vld [vmem:[%s1259_s16 + $0x18] sm:$0xff] }
 0x14c   : > { %726 = vperm.xlu2 %898, %v716_v35  }
 0x14d   : > { %486 = vrot.lane.b32.xlu1 %v1120_v2, %s918_s30  ;;  %v393_v2 = vld [vmem:[%s1274_s2 + $0x8] sm:$0xff] }
 0x14e   : > { %v396_v25 = vpack.c.bf16 %v393_v2, %v392_v1 }
 0x150   : > { %855 = vmatmul.msk.bf16.vlgmr.msra.gmra.mxu1 %vm517_vm3, %v396_v25  ;;  %v745_v25 = vld [vmem:[%s1259_s16 + $0x10] sm:$0xff] }
 0x155   : > { %721 = vperm.xlu1 %897, %v715_v34  }
 0x15d   : > { %736 = vperm.xlu1 %897, %v718_v27  }
 0x160   : > { %856 = vmatmul.msk.bf16.gmra.mxu1 %vm517_vm3, %v397_v33 }
 0x16e   : > { %v660_v17 = vpop.permute.xlu2 %659 }
 0x176   : > { %v662_v19 = vpop.permute.xlu2 %661 }
 0x17e   : > { %v664_v60 = vpop.permute.xlu0 %663  ;;  %v668_v28 = vpop.permute.xlu2 %667 }
 0x17f   : > { %v677_v30 = vsel %vm517_vm3, %v662_v19, %v664_v60 }
 0x186   : > { %v499_v29 = vpop.permute.xlu2 %498 }
 0x187   : > { %v670_v13 = vpop.permute.xlu0 %669  ;;  %v658_v18 = vpop.permute.xlu1 %657 }
 0x188   : > { %v676_v12 = vsel %vm517_vm3, %v658_v18, %v660_v17 }
 0x18e   : > { %v493_v36 = vpop.permute.xlu2 %492 }
 0x18f   : > { %v650_v20 = vpop.permute.xlu0 %649  ;;  %v672_v21 = vpop.permute.xlu1 %671 }
 0x190   : > { %v679_v22 = vsel %vm517_vm3, %v670_v13, %v672_v21 }
 0x191   : > { %694 = vmatpush.bf16.msra.mxu2 %v679_v22 }
 0x196   : > { %v491_v53 = vpop.permute.xlu2 %490 }
 0x197   : > { %v501_v23 = vpop.permute.xlu0 %500  ;;  %v503_v24 = vpop.permute.xlu1 %502 }
 0x198   : > { %v510_v63 = vsel %vm504_vm1, %v501_v23, %v503_v24 }
 0x199   : > { %526 = vmatpush.bf16.msra.mxu0 %v510_v63  ;;  %872 = vmatpush.bf16.msra.mxu3 %v510_v63 }
 0x19e   : > { %v481_v5 = vpop.permute.xlu2 %480 }
 0x19f   : > { %v666_v48 = vpop.permute.xlu1 %665 }
 0x1a0   : > { %v678_v50 = vsel %vm517_vm3, %v666_v48, %v668_v28  ;;  %v495_v39 = vpop.permute.xlu0 %494  ;;  %v744_v48 = vld [vmem:[%s1259_s16 + $0x8] sm:$0xff] }
 0x1a1   : > { %695 = vmatpush.bf16.msra.mxu2 %v678_v50  ;;  %v508_v52 = vsel %vm504_vm1, %v493_v36, %v495_v39 }
 0x1a5   : > { %696 = vmatpush.bf16.msra.mxu2 %v677_v30 }
 0x1a6   : > { %v727_v24 = vpop.permute.xlu2 %726 }
 0x1a7   : > { %v652_v49 = vpop.permute.xlu1 %651 }
 0x1a8   : > { %v674_v44 = vsel %vm517_vm3, %v650_v20, %v652_v49  ;;  %v485_v37 = vpop.permute.xlu0 %484 }
 0x1a9   : > { %697 = vmatpush.bf16.msra.mxu2 %v676_v12 }
 0x1ad   : > { %698 = vmatpush.bf16.msra.mxu2 %v675_v38 }
 0x1af   : > { %v497_v42 = vpop.permute.xlu1 %496 }
 0x1b0   : > { %v509_v43 = vsel %vm504_vm1, %v497_v42, %v499_v29  ;;  %v483_v62 = vpop.permute.xlu0 %482 }
 0x1b1   : > { %527 = vmatpush.bf16.msra.mxu0 %v509_v43  ;;  %873 = vmatpush.bf16.msra.mxu3 %v509_v43  ;;  %v505_v6 = vsel %vm504_vm1, %v481_v5, %v483_v62 }
 0x1b2   : > { %699 = vmatpush.bf16.msra.mxu2 %v674_v44 }
 0x1b5   : > { %861 = vmatmul.msk.bf16.vlgmr.msra.gmra.mxu2 %vm517_vm3, %v647_v51  ;;  %528 = vmatpush.bf16.msra.mxu0 %v508_v52 }
 0x1b6   : > { %874 = vmatpush.bf16.msra.mxu3 %v508_v52 }
 0x1b7   : > { %v489_v55 = vpop.permute.xlu1 %488 }
 0x1b8   : > { %v507_v56 = vsel %vm504_vm1, %v489_v55, %v491_v53  ;;  %v732_v2 = vpop.permute.xlu0 %731 }
 0x1b9   : > { %529 = vmatpush.bf16.msra.mxu0 %v507_v56 }
 0x1ba   : > { %875 = vmatpush.bf16.msra.mxu3 %v507_v56 }
 0x1bf   : > { %v487_v59 = vpop.permute.xlu1 %486 }
 0x1c0   : > { %v506_v61 = vsel %vm504_vm1, %v485_v37, %v487_v59 }
 0x1c1   : > { %530 = vmatpush.bf16.msra.mxu0 %v506_v61  ;;  %876 = vmatpush.bf16.msra.mxu3 %v506_v61 }
 0x1c5   : > { %862 = vmatmul.msk.bf16.gmra.mxu2 %vm517_vm3, %v648_v0  ;;  %531 = vmatpush.bf16.msra.mxu0 %v505_v6 }
 0x1c6   : > { %877 = vmatpush.bf16.msra.mxu3 %v505_v6 }
 0x1c7   : > { %v722_v60 = vpop.permute.xlu1 %721 }
 0x1c8   : > { %853 = vmatmul.msk.bf16.vlgmr.msra.gmra.mxu0 %vm517_vm3, %v478_v46 }
 0x1c9   : > { %854 = vmatmul.msk.bf16.vlgmr.msra.gmra.mxu3 %vm517_vm3, %v479_v7 }
 0x1cd   : > { %v558_v47 = vpop.f32.mrf.mxu1 }
 0x1cf   : > { %v737_v34 = vpop.permute.xlu1 %736 }
 0x1d5   : > { %v560_v9 = vpop.f32.mrf.mxu1 }
 0x1dd   : > { %v563_v17 = vpop.f32.mrf.mxu1 }
 0x1e5   : > { %v565_v30 = vpop.f32.mrf.mxu1 }
 0x238   : > { %v701_v8 = vpop.f32.mrf.mxu2 }
 0x240   : > { %v703_v10 = vpop.f32.mrf.mxu2 }
 0x245   : > { %v533_v11 = vpop.f32.mrf.mxu0 }
 0x246   : > { %v559_v15 = vadd.f32 %v558_v47, %v533_v11 }
 0x248   : > { %v711_v16 = vadd.f32 %v701_v8, %v559_v15  ;;  %v706_v18 = vpop.f32.mrf.mxu2 }
 0x24a   : > { %v739_v13 = vadd.f32 %v722_v60, %v711_v16 }
 0x24c   : > { %v747_v19 = vadd.f32 %v743_v14, %v739_v13  ;;  %v538_v20 = vpop.f32.mrf.mxu3 }
 0x24d   : > { %v564_v21 = vadd.f32 %v563_v17, %v538_v20  ;;  %v535_v22 = vpop.f32.mrf.mxu0 }
 0x24e   : > { %751 = vst [vmem:[%s217_s20] sm:$0xff] %v747_v19  ;;  %v561_v1 = vadd.f32 %v560_v9, %v535_v22 }
 0x24f   : > { %v713_v23 = vadd.f32 %v706_v18, %v564_v21 }
 0x250   : > { %v712_v28 = vadd.f32 %v703_v10, %v561_v1  ;;  %v708_v33 = vpop.f32.mrf.mxu2 }
 0x251   : > { %v741_v63 = vadd.f32 %v732_v2, %v713_v23 }
 0x252   : > { %v740_v50 = vadd.f32 %v727_v24, %v712_v28 }
 0x253   : > { %v749_v29 = vadd.f32 %v745_v25, %v741_v63 }
 0x254   : > { %v748_v31 = vadd.f32 %v744_v48, %v740_v50  ;;  %v540_v32 = vpop.f32.mrf.mxu3 }
 0x255   : > { %753 = vst [vmem:[%s217_s20 + $0x10] sm:$0xff] %v749_v29  ;;  %v566_v49 = vadd.f32 %v565_v30, %v540_v32 }
 0x256   : > { %752 = vst [vmem:[%s217_s20 + $0x8] sm:$0xff] %v748_v31 }
 0x257   : > { %v714_v12 = vadd.f32 %v708_v33, %v566_v49 }
 0x259   : > { %v742_v35 = vadd.f32 %v737_v34, %v714_v12 }
 0x25b   : > { %v750_v36 = vadd.f32 %v746_v26, %v742_v35 }
 0x25d   : > { %754 = vst [vmem:[%s217_s20 + $0x18] sm:$0xff] %v750_v36 }
 0x25e PF: > { %s14_s15 = sadd.s32 1, %s906_s15  }
 0x25f   : > { %p11_p4 = scmp.ge.s32.totalorder %s14_s15, 4  }
 0x261   :  { %13 = sbr.rel (!%p11_p4) target bundleno = 1 (0x1), region = 71 }

// kernel: baseline_hr_forward.11
= control target key start
LH: loop header
LB: loop body
LE: loop exit
PB: predicated region body
PF: predicated region fallthrough
CT: control target
= control target key end

     0   :  { %s1725_s30 = smov 0   ;;  %s2323_s0 = inlined_call_operand.vmem [shape: f32[2,32,128], index: 0, kind: input, shape index: {}]   ;;  %s2324_s1 = inlined_call_operand.vmem [shape: f32[3,32,96], index: 1, kind: input, shape index: {}]   ;;  %s2325_s2 = inlined_call_operand.vmem [shape: f32[32,1], index: 2, kind: input, shape index: {}]   ;;  %s2326_s3 = inlined_call_operand.vmem [shape: f32[3,32,96], index: 3, kind: input, shape index: {}]   ;;  %s2327_s4 = inlined_call_operand.vmem [shape: f32[32,1], index: 4, kind: input, shape index: {}]   ;;  %s2328_s5 = inlined_call_operand.vmem [shape: f32[32,8], index: 5, kind: input, shape index: {}]   ;;  %s2329_s6 = inlined_call_operand.vmem [shape: f32[1,8], index: 6, kind: input, shape index: {}]   ;;  %s2330_s7 = inlined_call_operand.vmem [shape: f32[32,8], index: 7, kind: input, shape index: {}]   ;;  %s2331_s8 = inlined_call_operand.vmem [shape: f32[32,1], index: 8, kind: input, shape index: {}]   ;;  %s2332_s9 = inlined_call_operand.vmem [shape: f32[2,32,128], index: 9, kind: output, shape index: {}]  }
   0x1 LB: > { %s1513_s10 = sadd.s32 4294967295, %s1661_s30   ;;  %p1517_p0 = scmp.ge.s32.totalorder %s1661_s30, 1  ;;  %s1661_s30 = sphi %s1725_s30, %s19_s30  }
   0x2   : > { %p287_p1 = scmp.lt.s32.totalorder %s1661_s30, 3 }
   0x4   : > { %p288_p2 = pnand %p1517_p0, %p287_p1 }
   0x5   : > { %p323_p3 = scmp.lt.s32.totalorder (!%p288_p2), %s1513_s10, 1  ;;  %s1664_s15 = smov (!%p288_p2), 17  }
   0x6   : > { %291 = sbr.rel (%p288_p2) target bundleno = 1628 (0x65c), region = 56  ;;  %s1665_s16 = smov (!%p288_p2), 34  }
   0x7   : > { %s1666_s17 = smov (!%p288_p2), 18   ;;  %s1667_s18 = smov (!%p288_p2), 2  }
   0x8   : > { %s1668_s19 = smov (!%p288_p2), 32   ;;  %s1669_s20 = smov (!%p288_p2), 16  }
   0x9   : > { %s1670_s21 = smov (!%p288_p2), 127   ;;  %s1671_s22 = smov (!%p288_p2), 126  }
   0xa   : > { %s1672_s23 = smov (!%p288_p2), 96   ;;  %s1673_s24 = smov (!%p288_p2), 112  }
   0xb   : > { %v386_v0 = vlaneseq  ;;  %v1663_v1 = vmov 0   ;;  %s2348_s10 = smov (!%p323_p3, %s1513_s10), 1  ;;  %vm336_vm4 = vcmask 134144   ;;  %vm341_vm5 = vcmask 273544   ;;  %v978_v13 = vld [vmem:[%s2326_s3] sm:$0xff] }
   0xc   : > { %1632 = vset.pattern.permute.xlu0 %v1663_v1  ;;  %1630 = vset.pattern.permute.xlu1 %v1663_v1  ;;  %s1588_s11 = sshll.u32 %s2348_s10, 5  ;;  %339 = vst.msk [vmem:[#allocation2 + $0x10] sm:$0xf] %vm336_vm4, %v1663_v1  ;;  %vm379_vm6 = vcmask 1043592   ;;  %vm380_vm7 = vcmask 138244   ;;  %vm370_vm8 = vcmask 138240   ;;  %v1781_v31 = vunpack.c.l.b16 %v1663_v1 }
   0xd   : > { %v387_v2 = vand.u32 127, %v386_v0  ;;  %1631 = vset.pattern.permute.xlu2 %v1663_v1  ;;  %s1744_s14 = scalar_lea.vmem %s2323_s0, %s1588_s11  ;;  %344 = vst.msk [vmem:[#allocation2 + $0x14] sm:$0xf] %vm341_vm5, %v1663_v1  ;;  %vm1770_vm9 = vmor %vm380_vm7, %vm379_vm6  ;;  %vm702_vm10 = vcmask 277504   ;;  %vm533_vm11 = vcmask 146432   ;;  %v1784_v32 = vunpack.c.h.b16 %v1663_v1  ;;  %s332_s25 = scalar_lea.vmem %s2332_s9, %s1588_s11 }
   0xe   : > { %v348_v4 = vld [vmem:[%s1744_s14 + $0x10] sm:$0xff]  ;;  %v346_v5 = vld [vmem:[%s1744_s14] sm:$0xff]  ;;  %v349_v9 = vld [vmem:[%s1744_s14 + $0x18] sm:$0xff]  ;;  %337 = vst.msk [vmem:[#allocation2] sm:$0xf] %vm336_vm4, %v1663_v1  ;;  %vm686_vm14 = vcmask 261120  }
   0xf   : > { %v392_v3 = vand.u32 15, %v387_v2  ;;  %v352_v6 = vpack.c.bf16 %v348_v4, %v348_v4  ;;  %v350_v7 = vpack.c.bf16 %v346_v5, %v346_v5  ;;  %v347_v10 = vld [vmem:[%s1744_s14 + $0x8] sm:$0xff]  ;;  %v353_v11 = vpack.c.bf16 %v349_v9, %v349_v9  ;;  %338 = vst.msk [vmem:[#allocation2 + $0x8] sm:$0xf] %vm336_vm4, %v1663_v1 }
  0x10   : > { %v351_v12 = vpack.c.bf16 %v347_v10, %v347_v10  ;;  %340 = vst.msk [vmem:[#allocation2 + $0x18] sm:$0xf] %vm336_vm4, %v1663_v1  ;;  %vm424_vm4 = vcmask 15360  }
  0x11   : > { %vm401_vm0 = vcmp.ne.s32.totalorder %v392_v3, 15  ;;  %362 = vrot.lane.b32.xlu0 %v352_v6, %s1664_s15  ;;  %358 = vrot.lane.b32.xlu1 %v350_v7, %s1664_s15  ;;  %vm400_vm2 = vcmp.ne.s32.totalorder %v392_v3, 0  ;;  %342 = vst.msk [vmem:[#allocation2 + $0x4] sm:$0xf] %vm341_vm5, %v1663_v1 }
  0x12   : > { %vm419_vm1 = vmpackc.low %vm401_vm0, %vm401_vm0  ;;  %343 = vst.msk [vmem:[#allocation2 + $0xc] sm:$0xf] %vm341_vm5, %v1663_v1 }
  0x13   : > { %v420_v8 = vsel %vm419_vm1, 65537, %v1663_v1  ;;  %vm1755_vm3 = vmpackc.low %vm400_vm2, %vm400_vm2  ;;  %345 = vst.msk [vmem:[#allocation2 + $0x1c] sm:$0xf] %vm341_vm5, %v1663_v1  ;;  %vm517_vm5 = vcmask 130048  }
  0x14   : > { %699 = vrot.lane.b32.xlu2 %v420_v8, %s1665_s16  ;;  %v513_v14 = vsel %vm1755_vm3, 65537, %v1663_v1 }
  0x19   : > { %364 = vrot.lane.b32.xlu0 %v353_v11, %s1664_s15  ;;  %360 = vrot.lane.b32.xlu1 %v351_v12, %s1664_s15 }
  0x1c   : > { %530 = vrot.lane.b32.xlu2 %v420_v8, %s1666_s17 }
  0x21   : > { %421 = vrot.lane.b32.xlu0 %v420_v8, %s1667_s18  ;;  %683 = vrot.lane.b32.xlu1 %v513_v14, %s1668_s19 }
  0x29   : > { %514 = vrot.lane.b32.xlu0 %v513_v14, %s1669_s20 }
  0x6e   : > { %v700_v15 = vpop.permute.xlu2 %699 }
  0x6f   : > { %v701_v21 = vrot.slane %v700_v15, 4 }
  0x71   : > { %v703_v25 = vsel %vm702_vm10, %v701_v21, %v700_v15 }
  0x72   : > { %v704_v33 = vunpack.c.l.b16 %v703_v25  ;;  %v705_v34 = vunpack.c.h.b16 %v703_v25 }
  0x74   : > { %vm708_vm12 = vcmp.ne.s32.totalorder %v704_v33, %v1781_v31  ;;  %vm709_vm13 = vcmp.ne.s32.totalorder %v705_v34, %v1784_v32 }
  0x75   : > { %vm1794_vm15 = vmpackc.low %vm709_vm13, %vm708_vm12 }
  0x76   : > { %v531_v24 = vpop.permute.xlu2 %530 }
  0x77   : > { %v532_v26 = vrot.slane %v531_v24, 4 }
  0x79   : > { %v534_v35 = vsel %vm533_vm11, %v532_v26, %v531_v24 }
  0x7a   : > { %v535_v38 = vunpack.c.l.b16 %v534_v35  ;;  %v536_v39 = vunpack.c.h.b16 %v534_v35 }
  0x7c   : > { %vm539_vm0 = vcmp.ne.s32.totalorder %v535_v38, %v1781_v31  ;;  %vm540_vm1 = vcmp.ne.s32.totalorder %v536_v39, %v1784_v32 }
  0x7d   : > { %vm1802_vm2 = vmpackc.low %vm540_vm1, %vm539_vm0 }
  0x83   : > { %v363_v16 = vpop.permute.xlu0 %362  ;;  %v359_v17 = vpop.permute.xlu1 %358 }
  0x84   : > { %v368_v19 = vrot.slane %v363_v16, 4  ;;  %v366_v20 = vrot.slane %v359_v17, 4 }
  0x86   : > { %v373_v22 = vsel %vm370_vm8, %v368_v19, %v363_v16  ;;  %v371_v23 = vsel %vm370_vm8, %v366_v20, %v359_v17 }
  0x87   : > { %384 = vst.msk [vmem:[#allocation2 + $0x10] sm:$0xff] %vm1770_vm9, %v373_v22 }
  0x88   : > { %382 = vst.msk [vmem:[#allocation2] sm:$0xff] %vm1770_vm9, %v371_v23 }
  0x8b   : > { %v365_v27 = vpop.permute.xlu0 %364  ;;  %v361_v28 = vpop.permute.xlu1 %360 }
  0x8c   : > { %v369_v29 = vrot.slane %v365_v27, 4  ;;  %v367_v30 = vrot.slane %v361_v28, 4 }
  0x8e   : > { %v374_v36 = vsel %vm370_vm8, %v369_v29, %v365_v27  ;;  %v372_v37 = vsel %vm370_vm8, %v367_v30, %v361_v28  ;;  %v1532_v49 = vld [vmem:[#allocation2 + $0x10] sm:$0xf]  ;;  %v1592_v50 = vld [vmem:[#allocation2 + $0x14] sm:$0xf] }
  0x8f   : > { %385 = vst.msk [vmem:[#allocation2 + $0x18] sm:$0xff] %vm1770_vm9, %v374_v36  ;;  %v1524_v44 = vld [vmem:[#allocation2] sm:$0xf]  ;;  %v1806_v57 = vld [vmem:[#allocation2 + $0x10] sm:$0xff]  ;;  %v1590_v5 = vld [vmem:[#allocation2 + $0x4] sm:$0xf] }
  0x90   : > { %383 = vst.msk [vmem:[#allocation2 + $0x8] sm:$0xff] %vm1770_vm9, %v372_v37  ;;  %v544_v63 = vsel %vm1802_vm2, %v1806_v57, 0  ;;  %v713_v0 = vsel %vm1794_vm15, %v1806_v57, 0  ;;  %v1825_v7 = vld [vmem:[#allocation2] sm:$0xff] }
  0x91   : > { %v570_v9 = vunpack.c.l.b16 %v544_v63  ;;  %v739_v10 = vunpack.c.l.b16 %v713_v0  ;;  %v711_v21 = vsel %vm1794_vm15, %v1825_v7, 0  ;;  %v571_v35 = vunpack.c.h.b16 %v544_v63 }
  0x92   : > { %v736_v27 = vunpack.c.h.b16 %v711_v21 }
  0x93   : > { %v422_v40 = vpop.permute.xlu0 %421  ;;  %v684_v41 = vpop.permute.xlu1 %683 }
  0x94   : > { %v685_v42 = vrot.slane %v684_v41, 4  ;;  %v423_v53 = vrot.slane %v422_v40, 4 }
  0x96   : > { %v687_v45 = vsel %vm686_vm14, %v685_v42, %v684_v41  ;;  %v1593_v46 = vld [vmem:[#allocation2 + $0x14] sm:$0xf0]  ;;  %v1534_v47 = vld [vmem:[#allocation2 + $0x18] sm:$0xf0]  ;;  %v425_v1 = vsel %vm424_vm4, %v423_v53, %v422_v40  ;;  %v542_v42 = vsel %vm1802_vm2, %v1825_v7, 0  ;;  %vm473_vm4 = vcmask 1039360  }
  0x97   : > { %v1800_v48 = vld [vmem:[#allocation2 + $0x18] sm:$0xff]  ;;  %v1591_v51 = vld [vmem:[#allocation2 + $0x4] sm:$0xf0]  ;;  %v1533_v54 = vor.u32 %v1593_v46, %v1532_v49  ;;  %v1537_v55 = vor.u32 %v1592_v50, %v1534_v47  ;;  %v688_v58 = vunpack.c.l.b16 %v687_v45  ;;  %v689_v59 = vunpack.c.h.b16 %v687_v45  ;;  %v1526_v6 = vld [vmem:[#allocation2 + $0x8] sm:$0xf0] }
  0x98   : > { %v1525_v56 = vor.u32 %v1591_v51, %v1524_v44  ;;  %v545_v60 = vsel %vm1802_vm2, %v1800_v48, 0  ;;  %v714_v61 = vsel %vm1794_vm15, %v1800_v48, 0  ;;  %v1827_v11 = vld [vmem:[#allocation2 + $0x8] sm:$0xff]  ;;  %v426_v12 = vunpack.c.l.b16 %v425_v1 }
  0x99   : > { %469 = vrot.lane.b32.xlu2 %v1533_v54, %s1670_s21  ;;  %471 = vrot.lane.b32.xlu0 %v1537_v55, %s1670_s21  ;;  %v572_v3 = vunpack.c.l.b16 %v545_v60  ;;  %vm692_vm6 = vcmp.ne.s32.totalorder %v688_v58, %v1781_v31  ;;  %vm693_vm7 = vcmp.ne.s32.totalorder %v689_v59, %v1784_v32  ;;  %v741_v4 = vunpack.c.l.b16 %v714_v61 }
  0x9a   : > { %465 = vrot.lane.b32.xlu1 %v1525_v56, %s1670_s21  ;;  %v427_v14 = vunpack.c.h.b16 %v425_v1  ;;  %vm1829_vm10 = vmpackc.low %vm693_vm7, %vm692_vm6  ;;  %v1529_v20 = vor.u32 %v1590_v5, %v1526_v6  ;;  %v712_v23 = vsel %vm1794_vm15, %v1827_v11, 0  ;;  %vm430_vm14 = vcmp.ne.s32.totalorder %v426_v12, %v1781_v31 }
  0x9b   : > { %v515_v62 = vpop.permute.xlu0 %514  ;;  %v576_v19 = vpack.c.b16 %v572_v3, %v570_v9  ;;  %v745_v22 = vpack.c.b16 %v741_v4, %v739_v10  ;;  %v697_v25 = vsel %vm1829_vm10, %v1806_v57, 0  ;;  %v742_v26 = vunpack.c.h.b16 %v714_v61 }
  0x9c   : > { %v516_v2 = vrot.slane %v515_v62, 4  ;;  %vm431_vm0 = vcmp.ne.s32.totalorder %v427_v14, %v1784_v32  ;;  %v738_v28 = vunpack.c.h.b16 %v712_v23  ;;  %v698_v29 = vsel %vm1829_vm10, %v1800_v48, 0 }
  0x9d   : > { %v573_v30 = vunpack.c.h.b16 %v545_v60  ;;  %vm1856_vm1 = vmpackc.low %vm431_vm0, %vm430_vm14  ;;  %v726_v34 = vunpack.c.h.b16 %v698_v29  ;;  %v543_v44 = vsel %vm1802_vm2, %v1827_v11, 0  ;;  %v735_v47 = vunpack.c.l.b16 %v711_v21 }
  0x9e   : > { %v518_v8 = vsel %vm517_vm5, %v516_v2, %v515_v62  ;;  %v744_v37 = vpack.c.b16 %v738_v28, %v736_v27  ;;  %v435_v40 = vsel %vm1856_vm1, %v1806_v57, 0  ;;  %v436_v41 = vsel %vm1856_vm1, %v1800_v48, 0 }
  0x9f   : > { %v519_v15 = vunpack.c.l.b16 %v518_v8  ;;  %v520_v16 = vunpack.c.h.b16 %v518_v8  ;;  %v577_v39 = vpack.c.b16 %v573_v30, %v571_v35  ;;  %v487_v45 = vunpack.c.h.b16 %v435_v40 }
  0xa0   : > { %v489_v46 = vunpack.c.h.b16 %v436_v41  ;;  %v737_v49 = vunpack.c.l.b16 %v712_v23  ;;  %v566_v50 = vunpack.c.l.b16 %v542_v42  ;;  %v568_v51 = vunpack.c.l.b16 %v543_v44 }
  0xa1   : > { %vm523_vm11 = vcmp.ne.s32.totalorder %v519_v15, %v1781_v31  ;;  %vm524_vm12 = vcmp.ne.s32.totalorder %v520_v16, %v1784_v32  ;;  %582 = vrot.lane.b32.xlu0 %v576_v19, %s1671_s22  ;;  %467 = vrot.lane.b32.xlu2 %v1529_v20, %s1670_s21  ;;  %v740_v31 = vunpack.c.h.b16 %v713_v0  ;;  %v724_v32 = vunpack.c.h.b16 %v697_v25 }
  0xa2   : > { %vm1841_vm13 = vmpackc.low %vm524_vm12, %vm523_vm11  ;;  %751 = vrot.lane.b32.xlu1 %v745_v22, %s1671_s22  ;;  %v493_v53 = vpack.c.b16 %v489_v46, %v487_v45  ;;  %v743_v54 = vpack.c.b16 %v737_v49, %v735_v47  ;;  %v574_v55 = vpack.c.b16 %v568_v51, %v566_v50  ;;  %v433_v56 = vsel %vm1856_vm1, %v1825_v7, 0  ;;  %v405_v45 = vld [vmem:[#allocation2 + $0x18] sm:$0xf]  ;;  %v404_v49 = vld [vmem:[#allocation2 + $0x10] sm:$0xf] }
  0xa3   : > { %v746_v36 = vpack.c.b16 %v742_v26, %v740_v31  ;;  %v1860_v38 = vpack.c.b16 %v726_v34, %v724_v32  ;;  %v434_v58 = vsel %vm1856_vm1, %v1827_v11, 0  ;;  %v567_v59 = vunpack.c.h.b16 %v542_v42  ;;  %v402_v51 = vld [vmem:[#allocation2] sm:$0xf] }
  0xa4   : > { %v569_v60 = vunpack.c.h.b16 %v543_v44  ;;  %v483_v61 = vunpack.c.h.b16 %v433_v56  ;;  %v485_v62 = vunpack.c.h.b16 %v434_v58  ;;  %v486_v1 = vunpack.c.l.b16 %v435_v40 }
  0xa5   : > { %v488_v2 = vunpack.c.l.b16 %v436_v41  ;;  %v482_v4 = vunpack.c.l.b16 %v433_v56  ;;  %v484_v5 = vunpack.c.l.b16 %v434_v58  ;;  %v723_v8 = vunpack.c.l.b16 %v697_v25 }
  0xa6   : > { %v575_v63 = vpack.c.b16 %v569_v60, %v567_v59  ;;  %v491_v0 = vpack.c.b16 %v485_v62, %v483_v61  ;;  %v725_v9 = vunpack.c.l.b16 %v698_v29  ;;  %vm502_vm5 = vcmask 1031168  }
  0xa7   : > { %v492_v3 = vpack.c.b16 %v488_v2, %v486_v1  ;;  %v490_v6 = vpack.c.b16 %v484_v5, %v482_v4  ;;  %v528_v34 = vsel %vm1841_vm13, %v1806_v57, 0  ;;  %v529_v35 = vsel %vm1841_vm13, %v1800_v48, 0 }
  0xa8   : > { %v729_v10 = vpack.c.b16 %v725_v9, %v723_v8  ;;  %v526_v48 = vsel %vm1841_vm13, %v1825_v7, 0  ;;  %v527_v44 = vsel %vm1841_vm13, %v1827_v11, 0  ;;  %v412_v50 = vsel %vm1755_vm3, %v405_v45, 0 }
  0xa9   : > { %753 = vrot.lane.b32.xlu2 %v746_v36, %s1671_s22  ;;  %749 = vrot.lane.b32.xlu0 %v744_v37, %s1671_s22  ;;  %v555_v36 = vunpack.c.h.b16 %v528_v34  ;;  %v557_v37 = vunpack.c.h.b16 %v529_v35  ;;  %v550_v46 = vunpack.c.l.b16 %v526_v48  ;;  %v552_v47 = vunpack.c.l.b16 %v527_v44 }
  0xaa   : > { %584 = vrot.lane.b32.xlu1 %v577_v39, %s1671_s22  ;;  %v695_v59 = vsel %vm1829_vm10, %v1825_v7, 0  ;;  %v696_v60 = vsel %vm1829_vm10, %v1827_v11, 0  ;;  %v409_v61 = vsel %vm1755_vm3, %v402_v51, 0  ;;  %v553_v8 = vunpack.c.h.b16 %v527_v44 }
  0xab   : > { %v561_v42 = vpack.c.b16 %v557_v37, %v555_v36  ;;  %v558_v58 = vpack.c.b16 %v552_v47, %v550_v46  ;;  %v719_v7 = vunpack.c.l.b16 %v695_v59  ;;  %v441_v2 = vunpack.c.l.b16 %v409_v61  ;;  %v507_v36 = vld [vmem:[%s2324_s1] sm:$0xff]  ;;  %v508_v37 = vld [vmem:[%s2324_s1 + $0x8] sm:$0xff]  ;;  %v509_v47 = vld [vmem:[%s2324_s1 + $0x10] sm:$0xff] }
  0xac   : > { %v554_v9 = vunpack.c.l.b16 %v528_v34  ;;  %vm632_vm6 = vcmask 785408   ;;  %vm619_vm7 = vcmask 916480   ;;  %v833_v61 = vld [vmem:[%s2325_s2 + $0x18] sm:$0xff] }
  0xb1   : > { %500 = vrot.lane.b32.xlu0 %v493_v53, %s1671_s22  ;;  %747 = vrot.lane.b32.xlu2 %v743_v54, %s1671_s22  ;;  %v403_v53 = vld [vmem:[#allocation2 + $0x8] sm:$0xf]  ;;  %v411_v54 = vsel %vm1755_vm3, %v404_v49, 0  ;;  %v510_v49 = vld [vmem:[%s2324_s1 + $0x18] sm:$0xff] }
  0xb2   : > { %578 = vrot.lane.b32.xlu1 %v574_v55, %s1671_s22  ;;  %v444_v55 = vunpack.c.l.b16 %v412_v50  ;;  %v410_v62 = vsel %vm1755_vm3, %v403_v53, 0  ;;  %v512_v51 = vpack.c.bf16 %v510_v49, %v509_v47 }
  0xb3   : > { %v442_v11 = vunpack.c.l.b16 %v410_v62 }
  0xb5   : > { %v445_v5 = vpack.c.b16 %v442_v11, %v441_v2  ;;  %v1539_v11 = vld [vmem:[%s2324_s1 + $0x28] sm:$0xff] }
  0xb9   : > { %580 = vrot.lane.b32.xlu2 %v575_v63, %s1671_s22  ;;  %496 = vrot.lane.b32.xlu0 %v491_v0, %s1671_s22  ;;  %v443_v63 = vunpack.c.l.b16 %v411_v54  ;;  %v721_v0 = vunpack.c.l.b16 %v696_v60 }
  0xbb   : > { %v446_v1 = vpack.c.b16 %v444_v55, %v443_v63 }
  0xc1   : > { %498 = vrot.lane.b32.xlu2 %v492_v3, %s1671_s22 }
  0xc9   : > { %494 = vrot.lane.b32.xlu2 %v490_v6, %s1671_s22  ;;  %v551_v6 = vunpack.c.h.b16 %v526_v48 }
  0xd1   : > { %768 = vrot.lane.b32.xlu2 %v729_v10, %s1672_s23  ;;  %v556_v10 = vunpack.c.l.b16 %v529_v35 }
  0xf3   : > { %v470_v12 = vpop.permute.xlu2 %469 }
  0xfb   : > { %v468_v14 = vpop.permute.xlu2 %467 }
  0xfc   : > { %774 = vrot.lane.b32.xlu2 %v468_v14, %s1672_s23 }
 0x103   : > { %v754_v15 = vpop.permute.xlu2 %753 }
 0x10b   : > { %v472_v16 = vpop.permute.xlu0 %471  ;;  %v748_v21 = vpop.permute.xlu2 %747 }
 0x10c   : > { %v466_v19 = vpop.permute.xlu1 %465  ;;  %778 = vrot.lane.b32.xlu1 %v472_v16, %s1672_s23  ;;  %609 = vrot.lane.b32.xlu0 %v472_v16, %s1673_s24  ;;  %v475_v20 = vsel %vm473_vm4, %v470_v12, %v472_v16  ;;  %v559_v12 = vpack.c.b16 %v553_v8, %v551_v6  ;;  %v722_v16 = vunpack.c.h.b16 %v696_v60  ;;  %v832_v60 = vld [vmem:[%s2325_s2 + $0x10] sm:$0xff] }
 0x10d   : > { %607 = vrot.lane.b32.xlu2 %v475_v20, %s1673_s24  ;;  %v474_v27 = vsel %vm473_vm4, %v466_v19, %v468_v14 }
 0x113   : > { %v583_v22 = vpop.permute.xlu0 %582  ;;  %v581_v25 = vpop.permute.xlu2 %580 }
 0x114   : > { %v752_v23 = vpop.permute.xlu1 %751  ;;  %605 = vrot.lane.b32.xlu1 %v468_v14, %s1673_s24  ;;  %776 = vrot.lane.b32.xlu0 %v475_v20, %s1672_s23  ;;  %v560_v14 = vpack.c.b16 %v556_v10, %v554_v9 }
 0x115   : > { %v756_v31 = vsel %vm502_vm5, %v752_v23, %v754_v15 }
 0x11b   : > { %v750_v26 = vpop.permute.xlu0 %749  ;;  %v499_v29 = vpop.permute.xlu2 %498 }
 0x11c   : > { %v585_v28 = vpop.permute.xlu1 %584  ;;  %603 = vrot.lane.b32.xlu0 %v474_v27, %s1673_s24  ;;  %772 = vrot.lane.b32.xlu1 %v474_v27, %s1672_s23  ;;  %v755_v41 = vsel %vm502_vm5, %v748_v21, %v750_v26 }
 0x11d   : > { %617 = vrot.lane.b32.xlu2 %v585_v28, %s1673_s24  ;;  %v587_v56 = vsel %vm502_vm5, %v583_v22, %v585_v28 }
 0x123   : > { %v501_v30 = vpop.permute.xlu0 %500  ;;  %v495_v39 = vpop.permute.xlu2 %494 }
 0x124   : > { %786 = vrot.lane.b32.xlu1 %v754_v15, %s1672_s23  ;;  %784 = vrot.lane.b32.xlu0 %v756_v31, %s1672_s23  ;;  %v504_v32 = vsel %vm502_vm5, %v499_v29, %v501_v30  ;;  %v579_v3 = vpop.permute.xlu1 %578  ;;  %v720_v15 = vunpack.c.h.b16 %v695_v59 }
 0x125   : > { %613 = vrot.lane.b32.xlu2 %v581_v25, %s1673_s24  ;;  %666 = vmatpush.bf16.msra.mxu1 %v504_v32  ;;  %v586_v4 = vsel %vm502_vm5, %v579_v3, %v581_v25  ;;  %v1546_v3 = vld [vmem:[%s2324_s1 + $0x40] sm:$0xff] }
 0x126   : > { %v728_v19 = vpack.c.b16 %v722_v16, %v720_v15  ;;  %v1548_v15 = vld [vmem:[%s2324_s1 + $0x50] sm:$0xff]  ;;  %v1549_v16 = vld [vmem:[%s2324_s1 + $0x58] sm:$0xff] }
 0x12b   : > { %v497_v40 = vpop.permute.xlu0 %496  ;;  %v769_v25 = vpop.permute.xlu2 %768 }
 0x12c   : > { %782 = vrot.lane.b32.xlu1 %v750_v26, %s1672_s23  ;;  %780 = vrot.lane.b32.xlu0 %v755_v41, %s1672_s23  ;;  %v503_v57 = vsel %vm502_vm5, %v495_v39, %v497_v40  ;;  %v511_v40 = vpack.c.bf16 %v508_v37, %v507_v36 }
 0x12d   : > { %601 = vrot.lane.b32.xlu2 %v561_v42, %s1673_s24  ;;  %667 = vmatpush.bf16.msra.mxu1 %v503_v57 }
 0x131   : > { %668 = vmatpush.bf16.msra.mxu1 %v475_v20 }
 0x134   : > { %770 = vrot.lane.b32.xlu0 %v1860_v38, %s1672_s23  ;;  %615 = vrot.lane.b32.xlu1 %v587_v56, %s1673_s24  ;;  %v727_v38 = vpack.c.b16 %v721_v0, %v719_v7  ;;  %v831_v7 = vld [vmem:[%s2325_s2 + $0x8] sm:$0xff] }
 0x135   : > { %595 = vrot.lane.b32.xlu2 %v558_v58, %s1673_s24  ;;  %669 = vmatpush.bf16.msra.mxu1 %v474_v27  ;;  %v830_v58 = vld [vmem:[%s2325_s2] sm:$0xff] }
 0x139   : > { %670 = vmatpush.bf16.msra.mxu1 %v446_v1  ;;  %v1538_v1 = vld [vmem:[%s2324_s1 + $0x20] sm:$0xff] }
 0x13a   : > { %v593_v9 = vpack.c.bf16 %v1539_v11, %v1538_v1 }
 0x13c   : > { %764 = vrot.lane.b32.xlu0 %v727_v38, %s1672_s23  ;;  %611 = vrot.lane.b32.xlu1 %v586_v4, %s1673_s24  ;;  %v1547_v38 = vld [vmem:[%s2324_s1 + $0x48] sm:$0xff] }
 0x13d   : > { %671 = vmatpush.bf16.msra.mxu1 %v445_v5  ;;  %851 = vperm.xlu2 %1631, %v833_v61   ;;  %v762_v10 = vpack.c.bf16 %v1547_v38, %v1546_v3 }
 0x140   : > { %1544 = vmatmul.msk.bf16.vlgmr.msra.gmra.mxu1 %vm632_vm6, %v511_v40 }
 0x144   : > { %597 = vrot.lane.b32.xlu0 %v559_v12, %s1673_s24  ;;  %599 = vrot.lane.b32.xlu1 %v560_v14, %s1673_s24  ;;  %v1540_v12 = vld [vmem:[%s2324_s1 + $0x30] sm:$0xff]  ;;  %v1541_v14 = vld [vmem:[%s2324_s1 + $0x38] sm:$0xff] }
 0x14c   : > { %766 = vrot.lane.b32.xlu1 %v728_v19, %s1672_s23  ;;  %836 = vperm.xlu0 %1632, %v830_v58   ;;  %v594_v19 = vpack.c.bf16 %v1541_v14, %v1540_v12 }
 0x150   : > { %1545 = vmatmul.msk.bf16.gmra.mxu1 %vm632_vm6, %v512_v51 }
 0x154   : > { %846 = vperm.xlu1 %1630, %v832_v60  }
 0x156   : > { %v775_v28 = vpop.permute.xlu2 %774 }
 0x15c   : > { %841 = vperm.xlu1 %1630, %v831_v7  }
 0x167   : > { %v608_v32 = vpop.permute.xlu2 %607 }
 0x177   : > { %v618_v41 = vpop.permute.xlu2 %617 }
 0x17e   : > { %v610_v20 = vpop.permute.xlu0 %609  ;;  %v779_v21 = vpop.permute.xlu1 %778 }
 0x17f   : > { %v614_v46 = vpop.permute.xlu2 %613  ;;  %v623_v56 = vsel %vm619_vm7, %v608_v32, %v610_v20  ;;  %v763_v20 = vpack.c.bf16 %v1549_v16, %v1548_v15 }
 0x186   : > { %v777_v22 = vpop.permute.xlu0 %776  ;;  %v606_v23 = vpop.permute.xlu1 %605 }
 0x187   : > { %v792_v42 = vsel %vm632_vm6, %v777_v22, %v779_v21  ;;  %v602_v59 = vpop.permute.xlu2 %601 }
 0x18e   : > { %v604_v26 = vpop.permute.xlu0 %603  ;;  %v773_v27 = vpop.permute.xlu1 %772 }
 0x18f   : > { %v791_v44 = vsel %vm632_vm6, %v773_v27, %v775_v28  ;;  %v622_v63 = vsel %vm619_vm7, %v604_v26, %v606_v23  ;;  %v596_v4 = vpop.permute.xlu2 %595 }
 0x196   : > { %v785_v29 = vpop.permute.xlu0 %784  ;;  %v787_v30 = vpop.permute.xlu1 %786 }
 0x197   : > { %v794_v31 = vsel %vm632_vm6, %v785_v29, %v787_v30 }
 0x198   : > { %809 = vmatpush.bf16.msra.mxu2 %v794_v31 }
 0x19e   : > { %v781_v34 = vpop.permute.xlu0 %780  ;;  %v783_v35 = vpop.permute.xlu1 %782 }
 0x19f   : > { %v793_v39 = vsel %vm632_vm6, %v781_v34, %v783_v35 }
 0x1a0   : > { %810 = vmatpush.bf16.msra.mxu2 %v793_v39 }
 0x1a4   : > { %811 = vmatpush.bf16.msra.mxu2 %v792_v42 }
 0x1a6   : > { %v616_v57 = vpop.permute.xlu1 %615  ;;  %v771_v45 = vpop.permute.xlu0 %770 }
 0x1a7   : > { %v625_v48 = vsel %vm619_vm7, %v616_v57, %v618_v41  ;;  %v790_v50 = vsel %vm632_vm6, %v769_v25, %v771_v45 }
 0x1a8   : > { %641 = vmatpush.bf16.msra.mxu0 %v625_v48  ;;  %812 = vmatpush.bf16.msra.mxu2 %v791_v44 }
 0x1ac   : > { %813 = vmatpush.bf16.msra.mxu2 %v790_v50 }
 0x1ae   : > { %v612_v53 = vpop.permute.xlu1 %611  ;;  %v765_v55 = vpop.permute.xlu0 %764 }
 0x1af   : > { %v624_v54 = vsel %vm619_vm7, %v612_v53, %v614_v46 }
 0x1b0   : > { %642 = vmatpush.bf16.msra.mxu0 %v624_v54  ;;  %v852_v54 = vpop.permute.xlu2 %851 }
 0x1b4   : > { %643 = vmatpush.bf16.msra.mxu0 %v623_v56 }
 0x1b6   : > { %v600_v62 = vpop.permute.xlu1 %599  ;;  %v598_v2 = vpop.permute.xlu0 %597 }
 0x1b7   : > { %v621_v0 = vsel %vm619_vm7, %v600_v62, %v602_v59  ;;  %v620_v6 = vsel %vm619_vm7, %v596_v4, %v598_v2 }
 0x1b8   : > { %644 = vmatpush.bf16.msra.mxu0 %v622_v63 }
 0x1bc   : > { %645 = vmatpush.bf16.msra.mxu0 %v621_v0 }
 0x1bd   : > { %v673_v21 = vpop.f32.mrf.mxu1 }
 0x1be   : > { %v767_v5 = vpop.permute.xlu1 %766  ;;  %v837_v44 = vpop.permute.xlu0 %836 }
 0x1bf   : > { %v789_v8 = vsel %vm632_vm6, %v765_v55, %v767_v5 }
 0x1c0   : > { %646 = vmatpush.bf16.msra.mxu0 %v620_v6  ;;  %814 = vmatpush.bf16.msra.mxu2 %v789_v8 }
 0x1c3   : > { %1542 = vmatmul.msk.bf16.vlgmr.msra.gmra.mxu0 %vm632_vm6, %v593_v9  ;;  %1550 = vmatmul.msk.bf16.vlgmr.msra.gmra.mxu2 %vm632_vm6, %v762_v10 }
 0x1c5   : > { %v675_v26 = vpop.f32.mrf.mxu1 }
 0x1c6   : > { %v847_v23 = vpop.permute.xlu1 %846 }
 0x1cd   : > { %v678_v35 = vpop.f32.mrf.mxu1 }
 0x1ce   : > { %v842_v30 = vpop.permute.xlu1 %841 }
 0x1d3   : > { %1543 = vmatmul.msk.bf16.gmra.mxu0 %vm632_vm6, %v594_v19  ;;  %1551 = vmatmul.msk.bf16.gmra.mxu2 %vm632_vm6, %v763_v20 }
 0x1d5   : > { %v680_v47 = vpop.f32.mrf.mxu1 }
 0x240   : > { %v648_v22 = vpop.f32.mrf.mxu0 }
 0x241   : > { %v674_v39 = vadd.f32 %v673_v21, %v648_v22 }
 0x246   : > { %v816_v25 = vpop.f32.mrf.mxu2 }
 0x247   : > { %v826_v57 = vadd.f32 %v816_v25, %v674_v39 }
 0x248   : > { %v650_v27 = vpop.f32.mrf.mxu0 }
 0x249   : > { %v676_v28 = vadd.f32 %v675_v26, %v650_v27  ;;  %v854_v49 = vadd.f32 %v837_v44, %v826_v57 }
 0x24b   : > { %v858_v56 = vmax.f32 %v854_v49, 0.0 }
 0x24d   : > { %v862_v60 = vpack.c.bf16 %v858_v56, %v858_v56 }
 0x24e   : > { %v818_v29 = vpop.f32.mrf.mxu2 }
 0x24f   : > { %v827_v31 = vadd.f32 %v818_v29, %v676_v28 }
 0x250   : > { %v653_v32 = vpop.f32.mrf.mxu0 }
 0x251   : > { %v855_v34 = vadd.f32 %v842_v30, %v827_v31  ;;  %v679_v36 = vadd.f32 %v678_v35, %v653_v32 }
 0x253   : > { %v859_v37 = vmax.f32 %v855_v34, 0.0 }
 0x255   : > { %v863_v40 = vpack.c.bf16 %v859_v37, %v859_v37 }
 0x256   : > { %v821_v41 = vpop.f32.mrf.mxu2 }
 0x257   : > { %v828_v42 = vadd.f32 %v821_v41, %v679_v36  ;;  %872 = vrot.lane.b32.xlu0 %v863_v40, %s1664_s15 }
 0x258   : > { %v655_v45 = vpop.f32.mrf.mxu0 }
 0x259   : > { %v856_v48 = vadd.f32 %v847_v23, %v828_v42  ;;  %v681_v51 = vadd.f32 %v680_v47, %v655_v45 }
 0x25b   : > { %v860_v46 = vmax.f32 %v856_v48, 0.0 }
 0x25d   : > { %v864_v50 = vpack.c.bf16 %v860_v46, %v860_v46 }
 0x25e   : > { %v823_v53 = vpop.f32.mrf.mxu2 }
 0x25f   : > { %v829_v55 = vadd.f32 %v823_v53, %v681_v51  ;;  %874 = vrot.lane.b32.xlu2 %v864_v50, %s1664_s15 }
 0x261   : > { %v857_v58 = vadd.f32 %v852_v54, %v829_v55 }
 0x263   : > { %v861_v59 = vmax.f32 %v857_v58, 0.0 }
 0x265   : > { %v865_v61 = vpack.c.bf16 %v861_v59, %v861_v59 }
 0x267   : > { %876 = vrot.lane.b32.xlu1 %v865_v61, %s1664_s15  ;;  %870 = vrot.lane.b32.xlu2 %v862_v60, %s1664_s15 }
 0x2b9   : > { %v875_v62 = vpop.permute.xlu2 %874 }
 0x2ba   : > { %v880_v63 = vrot.slane %v875_v62, 4 }
 0x2bc   : > { %v884_v7 = vsel %vm370_vm8, %v880_v63, %v875_v62 }
 0x2bd   : > { %892 = vst.msk [vmem:[#allocation2 + $0x10] sm:$0xff] %vm1770_vm9, %v884_v7 }
 0x2c1   : > { %v871_v0 = vpop.permute.xlu2 %870 }
 0x2c2   : > { %v878_v1 = vrot.slane %v871_v0, 4 }
 0x2c4   : > { %v882_v2 = vsel %vm370_vm8, %v878_v1, %v871_v0  ;;  %v904_v49 = vld [vmem:[#allocation2 + $0x10] sm:$0xff] }
 0x2c5   : > { %890 = vst.msk [vmem:[#allocation2] sm:$0xff] %vm1770_vm9, %v882_v2  ;;  %v990_v50 = vsel %vm1802_vm2, %v904_v49, 0  ;;  %v1562_v51 = vld [vmem:[#allocation2 + $0x10] sm:$0xf]  ;;  %v1596_v53 = vld [vmem:[#allocation2 + $0x14] sm:$0xf] }
 0x2c6   : > { %v2071_v54 = vsel %vm1841_vm13, %v904_v49, 0  ;;  %v908_v55 = vsel %vm1856_vm1, %v904_v49, 0  ;;  %v1016_v60 = vunpack.c.l.b16 %v990_v50  ;;  %v1017_v0 = vunpack.c.h.b16 %v990_v50 }
 0x2c7   : > { %v959_v1 = vunpack.c.h.b16 %v908_v55  ;;  %v1001_v2 = vunpack.c.h.b16 %v2071_v54  ;;  %v1129_v52 = vsel %vm1829_vm10, %v904_v49, 0 }
 0x2c8   : > { %v1144_v33 = vunpack.c.h.b16 %v1129_v52 }
 0x2c9   : > { %v873_v11 = vpop.permute.xlu0 %872 }
 0x2ca   : > { %v879_v3 = vrot.slane %v873_v11, 4 }
 0x2cc   : > { %v883_v38 = vsel %vm370_vm8, %v879_v3, %v873_v11  ;;  %v2028_v4 = vld [vmem:[#allocation2] sm:$0xff] }
 0x2cd   : > { %891 = vst.msk [vmem:[#allocation2 + $0x8] sm:$0xff] %vm1770_vm9, %v883_v38  ;;  %v988_v5 = vsel %vm1802_vm2, %v2028_v4, 0  ;;  %v984_v6 = vsel %vm1841_vm13, %v2028_v4, 0  ;;  %v906_v8 = vsel %vm1856_vm1, %v2028_v4, 0  ;;  %v1127_v15 = vsel %vm1829_vm10, %v2028_v4, 0 }
 0x2ce   : > { %v1013_v12 = vunpack.c.h.b16 %v988_v5  ;;  %v1012_v14 = vunpack.c.l.b16 %v988_v5  ;;  %v997_v20 = vunpack.c.h.b16 %v984_v6  ;;  %v955_v21 = vunpack.c.h.b16 %v906_v8 }
 0x2cf   : > { %v996_v25 = vunpack.c.l.b16 %v984_v6  ;;  %v954_v29 = vunpack.c.l.b16 %v906_v8  ;;  %v1139_v30 = vunpack.c.l.b16 %v1127_v15  ;;  %v1140_v40 = vunpack.c.h.b16 %v1127_v15 }
 0x2d0   : > { %v1131_v6 = vsel %vm1794_vm15, %v2028_v4, 0 }
 0x2d1   : > { %v1155_v43 = vunpack.c.l.b16 %v1131_v6 }
 0x2d4   : > { %v903_v9 = vld [vmem:[#allocation2 + $0x8] sm:$0xff] }
 0x2d5   : > { %v989_v10 = vsel %vm1802_vm2, %v903_v9, 0  ;;  %v985_v22 = vsel %vm1841_vm13, %v903_v9, 0  ;;  %v907_v23 = vsel %vm1856_vm1, %v903_v9, 0  ;;  %v1128_v26 = vsel %vm1829_vm10, %v903_v9, 0 }
 0x2d6   : > { %v1015_v16 = vunpack.c.h.b16 %v989_v10  ;;  %v1014_v19 = vunpack.c.l.b16 %v989_v10  ;;  %v999_v32 = vunpack.c.h.b16 %v985_v22  ;;  %v957_v34 = vunpack.c.h.b16 %v907_v23 }
 0x2d7   : > { %v998_v35 = vunpack.c.l.b16 %v985_v22  ;;  %v956_v36 = vunpack.c.l.b16 %v907_v23  ;;  %v1141_v39 = vunpack.c.l.b16 %v1128_v26  ;;  %v1142_v41 = vunpack.c.h.b16 %v1128_v26 }
 0x2d8   : > { %v1021_v27 = vpack.c.b16 %v1015_v16, %v1013_v12  ;;  %v1020_v28 = vpack.c.b16 %v1014_v19, %v1012_v14  ;;  %v2052_v42 = vpack.c.b16 %v999_v32, %v997_v20  ;;  %v2054_v57 = vpack.c.b16 %v957_v34, %v955_v21  ;;  %v1556_v34 = vld [vmem:[#allocation2 + $0x8] sm:$0xf0] }
 0x2d9   : > { %v877_v31 = vpop.permute.xlu1 %876  ;;  %v2056_v48 = vpack.c.b16 %v998_v35, %v996_v25  ;;  %v2058_v44 = vpack.c.b16 %v956_v36, %v954_v29  ;;  %v2061_v46 = vpack.c.b16 %v1141_v39, %v1139_v30  ;;  %v2063_v47 = vpack.c.b16 %v1142_v41, %v1140_v40  ;;  %v1554_v29 = vld [vmem:[#allocation2] sm:$0xf]  ;;  %v1594_v36 = vld [vmem:[#allocation2 + $0x4] sm:$0xf] }
 0x2da   : > { %v881_v37 = vrot.slane %v877_v31, 4  ;;  %1026 = vrot.lane.b32.xlu1 %v1021_v27, %s1671_s22  ;;  %1024 = vrot.lane.b32.xlu0 %v1020_v28, %s1671_s22  ;;  %v1132_v63 = vsel %vm1794_vm15, %v903_v9, 0  ;;  %v958_v9 = vunpack.c.l.b16 %v908_v55  ;;  %v1143_v16 = vunpack.c.l.b16 %v1129_v52  ;;  %v1595_v27 = vld [vmem:[#allocation2 + $0x4] sm:$0xf0]  ;;  %v1252_v52 = vld [vmem:[%s2327_s4 + $0x18] sm:$0xff] }
 0x2db   : > { %v1158_v8 = vunpack.c.h.b16 %v1132_v63  ;;  %v1156_v20 = vunpack.c.h.b16 %v1131_v6  ;;  %v1555_v30 = vor.u32 %v1595_v27, %v1554_v29  ;;  %v1559_v40 = vor.u32 %v1594_v36, %v1556_v34  ;;  %v1569_v29 = vld [vmem:[%s2326_s3 + $0x28] sm:$0xff] }
 0x2dc   : > { %v885_v45 = vsel %vm370_vm8, %v881_v37, %v877_v31  ;;  %v1133_v31 = vsel %vm1794_vm15, %v904_v49, 0  ;;  %v1157_v50 = vunpack.c.l.b16 %v1132_v63  ;;  %v1000_v49 = vunpack.c.l.b16 %v2071_v54 }
 0x2dd   : > { %893 = vst.msk [vmem:[#allocation2 + $0x18] sm:$0xff] %vm1770_vm9, %v885_v45  ;;  %v1164_v25 = vpack.c.b16 %v1158_v8, %v1156_v20  ;;  %v1159_v35 = vunpack.c.l.b16 %v1133_v31  ;;  %v1160_v41 = vunpack.c.h.b16 %v1133_v31  ;;  %vm1304_vm8 = vcmask 64512  }
 0x2e4   : > { %v1597_v56 = vld [vmem:[#allocation2 + $0x14] sm:$0xf0]  ;;  %v1564_v58 = vld [vmem:[#allocation2 + $0x18] sm:$0xf0] }
 0x2e5   : > { %v905_v59 = vld [vmem:[#allocation2 + $0x18] sm:$0xff]  ;;  %v1563_v61 = vor.u32 %v1597_v56, %v1562_v51  ;;  %v1567_v18 = vor.u32 %v1596_v53, %v1564_v58  ;;  %v1163_v53 = vpack.c.b16 %v1157_v50, %v1155_v43  ;;  %v894_v43 = vld [vmem:[#allocation2] sm:$0xf] }
 0x2e6   : > { %v991_v62 = vsel %vm1802_vm2, %v905_v59, 0  ;;  %v987_v11 = vsel %vm1841_vm13, %v905_v59, 0  ;;  %v909_v3 = vsel %vm1856_vm1, %v905_v59, 0  ;;  %v1130_v38 = vsel %vm1829_vm10, %v905_v59, 0 }
 0x2e7   : > { %v1018_v7 = vunpack.c.l.b16 %v991_v62  ;;  %942 = vrot.lane.b32.xlu2 %v1563_v61, %s1670_s21  ;;  %944 = vrot.lane.b32.xlu0 %v1567_v18, %s1670_s21  ;;  %v1019_v10 = vunpack.c.h.b16 %v991_v62  ;;  %v961_v12 = vunpack.c.h.b16 %v909_v3  ;;  %v1003_v24 = vunpack.c.h.b16 %v987_v11 }
 0x2e8   : > { %v960_v14 = vunpack.c.l.b16 %v909_v3  ;;  %v1146_v15 = vunpack.c.h.b16 %v1130_v38  ;;  %v1145_v19 = vunpack.c.l.b16 %v1130_v38  ;;  %v1134_v28 = vsel %vm1794_vm15, %v905_v59, 0  ;;  %v1251_v38 = vld [vmem:[%s2327_s4 + $0x10] sm:$0xff] }
 0x2e9   : > { %v1022_v5 = vpack.c.b16 %v1018_v7, %v1016_v60  ;;  %v965_v17 = vpack.c.b16 %v961_v12, %v959_v1  ;;  %v2094_v21 = vpack.c.b16 %v1003_v24, %v1001_v2  ;;  %v1023_v26 = vpack.c.b16 %v1019_v10, %v1017_v0 }
 0x2ea   : > { %v2096_v22 = vpack.c.b16 %v960_v14, %v958_v9  ;;  %v2098_v23 = vpack.c.b16 %v1146_v15, %v1144_v33  ;;  %v2100_v4 = vpack.c.b16 %v1145_v19, %v1143_v16  ;;  %v1161_v32 = vunpack.c.l.b16 %v1134_v28 }
 0x2eb   : > { %1028 = vrot.lane.b32.xlu1 %v1022_v5, %s1671_s22  ;;  %v1162_v37 = vunpack.c.h.b16 %v1134_v28  ;;  %v1002_v51 = vunpack.c.l.b16 %v987_v11  ;;  %v1568_v28 = vld [vmem:[%s2326_s3 + $0x20] sm:$0xff] }
 0x2ec   : > { %v1165_v39 = vpack.c.b16 %v1161_v32, %v1159_v35  ;;  %v1039_v32 = vpack.c.bf16 %v1569_v29, %v1568_v28  ;;  %v897_v35 = vld [vmem:[#allocation2 + $0x18] sm:$0xf] }
 0x2ed   : > { %v1166_v45 = vpack.c.b16 %v1162_v37, %v1160_v41  ;;  %v1006_v55 = vpack.c.b16 %v1002_v51, %v1000_v49  ;;  %v896_v37 = vld [vmem:[#allocation2 + $0x10] sm:$0xf]  ;;  %v895_v41 = vld [vmem:[#allocation2 + $0x8] sm:$0xf] }
 0x2ee   : > { %v899_v49 = vsel %vm1755_vm3, %v895_v41, 0 }
 0x2ef   : > { %1169 = vrot.lane.b32.xlu0 %v1164_v25, %s1671_s22  ;;  %1030 = vrot.lane.b32.xlu2 %v1023_v26, %s1671_s22 }
 0x2f3   : > { %938 = vrot.lane.b32.xlu1 %v1555_v30, %s1670_s21 }
 0x2f7   : > { %1171 = vrot.lane.b32.xlu0 %v1165_v39, %s1671_s22  ;;  %940 = vrot.lane.b32.xlu2 %v1559_v40, %s1670_s21  ;;  %v901_v40 = vsel %vm1755_vm3, %v897_v35, 0 }
 0x2f8   : > { %v917_v51 = vunpack.c.l.b16 %v901_v40 }
 0x2fb   : > { %1173 = vrot.lane.b32.xlu1 %v1166_v45, %s1671_s22  ;;  %v900_v45 = vsel %vm1755_vm3, %v896_v37, 0 }
 0x2ff   : > { %1167 = vrot.lane.b32.xlu2 %v1163_v53, %s1671_s22  ;;  %1045 = vrot.lane.b32.xlu0 %v1006_v55, %s1673_s24  ;;  %v916_v53 = vunpack.c.l.b16 %v900_v45  ;;  %v898_v55 = vsel %vm1755_vm3, %v894_v43, 0 }
 0x341   : > { %v943_v56 = vpop.permute.xlu2 %942 }
 0x349   : > { %v1031_v58 = vpop.permute.xlu2 %1030 }
 0x34c   : > { %v1025_v59 = vpop.permute.xlu0 %1024  ;;  %v1027_v60 = vpop.permute.xlu1 %1026 }
 0x34d   : > { %v1032_v61 = vsel %vm502_vm5, %v1025_v59, %v1027_v60  ;;  %v919_v59 = vpack.c.b16 %v917_v51, %v916_v53 }
 0x34e   : > { %1057 = vrot.lane.b32.xlu0 %v1032_v61, %s1673_s24 }
 0x351   : > { %v941_v18 = vpop.permute.xlu2 %940 }
 0x352   : > { %1051 = vrot.lane.b32.xlu2 %v941_v18, %s1673_s24 }
 0x359   : > { %v945_v62 = vpop.permute.xlu0 %944 }
 0x35a   : > { %1055 = vrot.lane.b32.xlu0 %v945_v62, %s1673_s24  ;;  %v2120_v54 = vsel %vm473_vm4, %v943_v56, %v945_v62 }
 0x35b   : > { %1053 = vrot.lane.b32.xlu2 %v2120_v54, %s1673_s24 }
 0x35d   : > { %v1029_v63 = vpop.permute.xlu1 %1028 }
 0x35e   : > { %v1033_v3 = vsel %vm502_vm5, %v1029_v63, %v1031_v58  ;;  %v979_v63 = vld [vmem:[%s2326_s3 + $0x8] sm:$0xff] }
 0x361   : > { %v1170_v1 = vpop.permute.xlu0 %1169 }
 0x362   : > { %1043 = vrot.lane.b32.xlu0 %v2052_v42, %s1673_s24 }
 0x363   : > { %1063 = vrot.lane.b32.xlu2 %v1031_v58, %s1673_s24 }
 0x365   : > { %v939_v7 = vpop.permute.xlu1 %938 }
 0x366   : > { %v2128_v0 = vsel %vm473_vm4, %v939_v7, %v941_v18  ;;  %v980_v7 = vld [vmem:[%s2326_s3 + $0x10] sm:$0xff] }
 0x367   : > { %1049 = vrot.lane.b32.xlu1 %v2128_v0, %s1673_s24 }
 0x369   : > { %v1172_v42 = vpop.permute.xlu0 %1171 }
 0x36a   : > { %968 = vrot.lane.b32.xlu0 %v2054_v57, %s1671_s22  ;;  %v1250_v57 = vld [vmem:[%s2327_s4 + $0x8] sm:$0xff] }
 0x36b   : > { %1041 = vrot.lane.b32.xlu2 %v2056_v48, %s1673_s24  ;;  %v1168_v48 = vpop.permute.xlu2 %1167 }
 0x36d   : > { %v1174_v2 = vpop.permute.xlu1 %1173 }
 0x36e   : > { %v1176_v11 = vsel %vm502_vm5, %v1172_v42, %v1174_v2  ;;  %v982_v42 = vpack.c.bf16 %v979_v63, %v978_v13  ;;  %v1297_v13 = vld [vmem:[%s2328_s5 + $0x8] sm:$0xff] }
 0x36f   : > { %1059 = vrot.lane.b32.xlu1 %v1027_v60, %s1673_s24  ;;  %v915_v60 = vunpack.c.l.b16 %v899_v49  ;;  %v1674_v49 = vmov 128.0  }
 0x370   : > { %1633 = vrcp.f32 %v1674_v49 }
 0x371   : > { %v1046_v6 = vpop.permute.xlu0 %1045 }
 0x372   : > { %1204 = vrot.lane.b32.xlu0 %v1176_v11, %s1672_s23 }
 0x373   : > { %972 = vrot.lane.b32.xlu2 %v965_v17, %s1671_s22 }
 0x376   : > { %v1634_v53 = vpop.eup %1633 }
 0x377   : > { %1061 = vrot.lane.b32.xlu1 %v1033_v3, %s1673_s24  ;;  %vm1290_vm3 = vweird.f32 %v1634_v53 }
 0x37a   : > { %1196 = vrot.lane.b32.xlu0 %v2120_v54, %s1672_s23 }
 0x37b   : > { %966 = vrot.lane.b32.xlu2 %v2058_v44, %s1671_s22  ;;  %v1175_v44 = vsel %vm502_vm5, %v1168_v48, %v1170_v1 }
 0x37f   : > { %1047 = vrot.lane.b32.xlu1 %v2094_v21, %s1673_s24 }
 0x382   : > { %1194 = vrot.lane.b32.xlu0 %v941_v18, %s1672_s23  ;;  %v1570_v18 = vld [vmem:[%s2326_s3 + $0x30] sm:$0xff] }
 0x383   : > { %1202 = vrot.lane.b32.xlu2 %v1170_v1, %s1672_s23 }
 0x387   : > { %970 = vrot.lane.b32.xlu1 %v2096_v22, %s1671_s22 }
 0x38a   : > { %1184 = vrot.lane.b32.xlu0 %v2061_v46, %s1672_s23  ;;  %v1249_v46 = vld [vmem:[%s2327_s4] sm:$0xff] }
 0x38b   : > { %1192 = vrot.lane.b32.xlu2 %v2128_v0, %s1672_s23 }
 0x38f   : > { %1206 = vrot.lane.b32.xlu1 %v1174_v2, %s1672_s23 }
 0x392   : > { %1260 = vperm.xlu0 %1632, %v1250_v57  }
 0x393   : > { %1190 = vrot.lane.b32.xlu2 %v2098_v23, %s1672_s23 }
 0x397   : > { %1200 = vrot.lane.b32.xlu1 %v1175_v44, %s1672_s23 }
 0x39b   : > { %1255 = vperm.xlu2 %1631, %v1249_v46  }
 0x39f   : > { %1198 = vrot.lane.b32.xlu1 %v945_v62, %s1672_s23  ;;  %v914_v62 = vunpack.c.l.b16 %v898_v55  ;;  %v1286_v55 = vmul.f32 128.0, %v1634_v53 }
 0x3a1   : > { %v918_v1 = vpack.c.b16 %v915_v60, %v914_v62  ;;  %v1296_v62 = vld [vmem:[%s2328_s5] sm:$0xff] }
 0x3a3   : > { %1270 = vperm.xlu2 %1631, %v1252_v52  }
 0x3a7   : > { %1188 = vrot.lane.b32.xlu1 %v2100_v4, %s1672_s23 }
 0x3ac   : > { %v1052_v5 = vpop.permute.xlu2 %1051 }
 0x3af   : > { %1186 = vrot.lane.b32.xlu1 %v2063_v47, %s1672_s23 }
 0x3b5   : > { %v1054_v8 = vpop.permute.xlu2 %1053 }
 0x3b7   : > { %1265 = vperm.xlu1 %1630, %v1251_v38  }
 0x3bd   : > { %v1064_v12 = vpop.permute.xlu2 %1063 }
 0x3c0   : > { %v1058_v9 = vpop.permute.xlu0 %1057 }
 0x3c5   : > { %v1042_v33 = vpop.permute.xlu2 %1041 }
 0x3cc   : > { %v1056_v24 = vpop.permute.xlu0 %1055 }
 0x3cd   : > { %v973_v20 = vpop.permute.xlu2 %972  ;;  %v1068_v21 = vsel %vm619_vm7, %v1054_v8, %v1056_v24  ;;  %v1577_v8 = vld [vmem:[%s2326_s3 + $0x48] sm:$0xff] }
 0x3d4   : > { %v1044_v19 = vpop.permute.xlu0 %1043 }
 0x3d5   : > { %v967_v27 = vpop.permute.xlu2 %966  ;;  %v1065_v30 = vsel %vm619_vm7, %v1042_v33, %v1044_v19 }
 0x3d9   : > { %v1050_v10 = vpop.permute.xlu1 %1049 }
 0x3da   : > { %v1067_v23 = vsel %vm619_vm7, %v1050_v10, %v1052_v5  ;;  %v1579_v10 = vld [vmem:[%s2326_s3 + $0x58] sm:$0xff] }
 0x3dc   : > { %v969_v22 = vpop.permute.xlu0 %968 }
 0x3dd   : > { %v974_v31 = vsel %vm502_vm5, %v967_v27, %v969_v22  ;;  %v1203_v50 = vpop.permute.xlu2 %1202 }
 0x3e1   : > { %v1060_v14 = vpop.permute.xlu1 %1059 }
 0x3e2   : > { %v1069_v47 = vsel %vm619_vm7, %v1058_v9, %v1060_v14  ;;  %v1578_v9 = vld [vmem:[%s2326_s3 + $0x50] sm:$0xff] }
 0x3e4   : > { %v1205_v34 = vpop.permute.xlu0 %1204 }
 0x3e5   : > { %v1193_v11 = vpop.permute.xlu2 %1192 }
 0x3e9   : > { %v1062_v15 = vpop.permute.xlu1 %1061 }
 0x3ea   : > { %v1070_v16 = vsel %vm619_vm7, %v1062_v15, %v1064_v12  ;;  %v1183_v15 = vpack.c.bf16 %v1579_v10, %v1578_v9 }
 0x3eb   : > { %1085 = vmatpush.bf16.msra.mxu3 %v1070_v16 }
 0x3ec   : > { %v1197_v56 = vpop.permute.xlu0 %1196 }
 0x3ed   : > { %v1191_v52 = vpop.permute.xlu2 %1190 }
 0x3ef   : > { %1086 = vmatpush.bf16.msra.mxu3 %v1069_v47 }
 0x3f1   : > { %v1048_v17 = vpop.permute.xlu1 %1047 }
 0x3f2   : > { %v1066_v25 = vsel %vm619_vm7, %v1046_v6, %v1048_v17  ;;  %v1576_v6 = vld [vmem:[%s2326_s3 + $0x40] sm:$0xff] }
 0x3f3   : > { %1087 = vmatpush.bf16.msra.mxu3 %v1068_v21  ;;  %v1182_v33 = vpack.c.bf16 %v1577_v8, %v1576_v6 }
 0x3f4   : > { %v1195_v44 = vpop.permute.xlu0 %1194 }
 0x3f5   : > { %v1210_v46 = vsel %vm632_vm6, %v1193_v11, %v1195_v44  ;;  %v1299_v44 = vld [vmem:[%s2328_s5 + $0x18] sm:$0xff] }
 0x3f7   : > { %1088 = vmatpush.bf16.msra.mxu3 %v1067_v23 }
 0x3f9   : > { %v971_v4 = vpop.permute.xlu1 %970 }
 0x3fa   : > { %v975_v26 = vsel %vm502_vm5, %v971_v4, %v973_v20 }
 0x3fb   : > { %1089 = vmatpush.bf16.msra.mxu3 %v1066_v25  ;;  %1110 = vmatpush.bf16.msrb.mxu0 %v975_v26  ;;  %v1256_v25 = vpop.permute.xlu2 %1255 }
 0x3fc   : > { %1598 = vmatpush.bf16.msrb.mxu2 %v975_v26  ;;  %v1185_v12 = vpop.permute.xlu0 %1184 }
 0x3ff   : > { %1090 = vmatpush.bf16.msra.mxu3 %v1065_v30  ;;  %1111 = vmatpush.bf16.msrb.mxu0 %v974_v31 }
 0x400   : > { %1599 = vmatpush.bf16.msrb.mxu2 %v974_v31 }
 0x401   : > { %v1207_v36 = vpop.permute.xlu1 %1206 }
 0x402   : > { %1572 = vmatmul.msk.bf16.vlgmr.msra.gmra.mxu3 %vm632_vm6, %v1039_v32  ;;  %v1213_v39 = vsel %vm632_vm6, %v1205_v34, %v1207_v36 }
 0x403   : > { %1112 = vmatpush.bf16.msrb.mxu0 %v2120_v54  ;;  %1228 = vmatpush.bf16.msrb.mxu1 %v1213_v39  ;;  %v1271_v51 = vpop.permute.xlu2 %1270 }
 0x404   : > { %1600 = vmatpush.bf16.msrb.mxu2 %v2120_v54  ;;  %1604 = vmatpush.bf16.msrb.mxu3 %v1213_v39  ;;  %v1571_v54 = vld [vmem:[%s2326_s3 + $0x38] sm:$0xff]  ;;  %v1261_v37 = vpop.permute.xlu0 %1260 }
 0x405   : > { %v1040_v2 = vpack.c.bf16 %v1571_v54, %v1570_v18 }
 0x407   : > { %1113 = vmatpush.bf16.msrb.mxu0 %v2128_v0 }
 0x408   : > { %1601 = vmatpush.bf16.msrb.mxu2 %v2128_v0  ;;  %v981_v0 = vld [vmem:[%s2326_s3 + $0x18] sm:$0xff] }
 0x409   : > { %v1201_v58 = vpop.permute.xlu1 %1200  ;;  %v983_v3 = vpack.c.bf16 %v981_v0, %v980_v7 }
 0x40a   : > { %v1212_v61 = vsel %vm632_vm6, %v1201_v58, %v1203_v50 }
 0x40b   : > { %1114 = vmatpush.bf16.msrb.mxu0 %v919_v59  ;;  %1229 = vmatpush.bf16.msrb.mxu1 %v1212_v61 }
 0x40c   : > { %1602 = vmatpush.bf16.msrb.mxu2 %v919_v59  ;;  %1605 = vmatpush.bf16.msrb.mxu3 %v1212_v61 }
 0x40f   : > { %1115 = vmatpush.bf16.msrb.mxu0 %v918_v1 }
 0x410   : > { %1603 = vmatpush.bf16.msrb.mxu2 %v918_v1 }
 0x411   : > { %v1199_v57 = vpop.permute.xlu1 %1198 }
 0x412   : > { %1573 = vmatmul.msk.bf16.gmra.mxu3 %vm632_vm6, %v1040_v2  ;;  %1574 = vmatmul.msk.bf16.vlgmr.msrb.gmra.mxu0 %vm632_vm6, %v982_v42  ;;  %v1211_v48 = vsel %vm632_vm6, %v1197_v56, %v1199_v57  ;;  %v1287_v56 = vsub.f32 1.0, %v1286_v55  ;;  %v1298_v2 = vld [vmem:[%s2328_s5 + $0x10] sm:$0xff] }
 0x413   : > { %1575 = vmatmul.msk.bf16.vlgmr.msrb.gmra.mxu2 %vm632_vm6, %v983_v3  ;;  %1230 = vmatpush.bf16.msrb.mxu1 %v1211_v48 }
 0x414   : > { %1606 = vmatpush.bf16.msrb.mxu3 %v1211_v48  ;;  %v1288_v58 = vmul.f32 %v1634_v53, %v1287_v56 }
 0x416   : > { %v1289_v59 = vadd.f32 %v1634_v53, %v1288_v58  ;;  %v1345_v58 = vld [vmem:[%s2331_s8 + $0x18] sm:$0xff] }
 0x417   : > { %1231 = vmatpush.bf16.msrb.mxu1 %v1210_v46 }
 0x418   : > { %1607 = vmatpush.bf16.msrb.mxu3 %v1210_v46  ;;  %v1291_v60 = vsel %vm1290_vm3, %v1634_v53, %v1289_v59 }
 0x419   : > { %v1189_v38 = vpop.permute.xlu1 %1188 }
 0x41a   : > { %v1209_v5 = vsel %vm632_vm6, %v1189_v38, %v1191_v52 }
 0x41b   : > { %1232 = vmatpush.bf16.msrb.mxu1 %v1209_v5 }
 0x41c   : > { %1608 = vmatpush.bf16.msrb.mxu3 %v1209_v5 }
 0x421   : > { %v1187_v24 = vpop.permute.xlu1 %1186 }
 0x422   : > { %v1208_v14 = vsel %vm632_vm6, %v1185_v12, %v1187_v24 }
 0x423   : > { %1233 = vmatpush.bf16.msrb.mxu1 %v1208_v14  ;;  %1609 = vmatpush.bf16.msrb.mxu3 %v1208_v14 }
 0x426   : > { %1580 = vmatmul.msk.bf16.vlgmr.msrb.gmra.mxu1 %vm632_vm6, %v1182_v33  ;;  %1581 = vmatmul.msk.bf16.vlgmr.msrb.gmra.mxu3 %vm632_vm6, %v1183_v15  ;;  %v1318_v15 = vld [vmem:[%s2329_s6] sm:$0x1] }
 0x429   : > { %v1266_v32 = vpop.permute.xlu1 %1265 }
 0x485   : > { %v1092_v16 = vpop.f32.mrf.mxu3 }
 0x48d   : > { %v1094_v19 = vpop.f32.mrf.mxu3 }
 0x48f   : > { %v1117_v20 = vpop.f32.mrf.mxu0 }
 0x490   : > { %v1118_v21 = vadd.f32 %v1117_v20, %v1092_v16  ;;  %v1323_v20 = vld [vmem:[%s2330_s7 + $0x10] sm:$0xff] }
 0x495   : > { %v1097_v47 = vpop.f32.mrf.mxu3 }
 0x496   : > { %v1122_v22 = vpop.f32.mrf.mxu2 }
 0x497   : > { %v1119_v27 = vpop.f32.mrf.mxu0  ;;  %v1123_v28 = vadd.f32 %v1122_v22, %v1097_v47 }
 0x498   : > { %v1120_v30 = vadd.f32 %v1119_v27, %v1094_v19 }
 0x49d   : > { %v1099_v17 = vpop.f32.mrf.mxu3 }
 0x49e   : > { %v1124_v39 = vpop.f32.mrf.mxu2 }
 0x49f   : > { %v1125_v41 = vadd.f32 %v1124_v39, %v1099_v17  ;;  %v1322_v17 = vld [vmem:[%s2330_s7 + $0x8] sm:$0xff] }
 0x4a3   : > { %v1235_v23 = vpop.f32.mrf.mxu1 }
 0x4a4   : > { %v1245_v4 = vadd.f32 %v1235_v23, %v1118_v21  ;;  %v1321_v21 = vld [vmem:[%s2330_s7] sm:$0xff] }
 0x4a6   : > { %v2246_v26 = vadd.f32 %v1256_v25, %v1245_v4 }
 0x4a8   : > { %1277 = vadd.xlane.f32.xlu0 %v2246_v26 }
 0x4a9   : > { %v1240_v29 = vpop.f32.mrf.mxu3 }
 0x4aa   : > { %v1247_v31 = vadd.f32 %v1240_v29, %v1123_v28 }
 0x4ab   : > { %v1237_v34 = vpop.f32.mrf.mxu1 }
 0x4ac   : > { %v1246_v35 = vadd.f32 %v1237_v34, %v1120_v30  ;;  %v2249_v36 = vadd.f32 %v1266_v32, %v1247_v31  ;;  %v1324_v30 = vld [vmem:[%s2330_s7 + $0x18] sm:$0xff]  ;;  %v1344_v34 = vld [vmem:[%s2331_s8 + $0x10] sm:$0xff] }
 0x4ae   : > { %1281 = vadd.xlane.f32.xlu2 %v2249_v36  ;;  %v2252_v40 = vadd.f32 %v1261_v37, %v1246_v35  ;;  %v1343_v35 = vld [vmem:[%s2331_s8 + $0x8] sm:$0xff]  ;;  %v1342_v37 = vld [vmem:[%s2331_s8] sm:$0xff] }
 0x4b0   : > { %1279 = vadd.xlane.f32.xlu1 %v2252_v40 }
 0x4b1   : > { %v1242_v45 = vpop.f32.mrf.mxu3 }
 0x4b2   : > { %v1248_v50 = vadd.f32 %v1242_v45, %v1125_v41 }
 0x4b4   : > { %v2255_v43 = vadd.f32 %v1271_v51, %v1248_v50 }
 0x4b6   : > { %1283 = vadd.xlane.f32.xlu2 %v2255_v43 }
 0x51b   : > { %v1278_v61 = vpop.xlane.xlu0 %1277 }
 0x51c   : > { %v1292_v18 = vmul.f32 %v1291_v60, %v1278_v61 }
 0x51e   : > { %v1300_v7 = vmul.f32 %v1296_v62, %v1292_v18 }
 0x520   : > { %v1305_v11 = vsel %vm1304_vm8, %v1300_v7, 0.0 }
 0x521   : > { %v1282_v54 = vpop.xlane.xlu2 %1281 }
 0x522   : > { %v1294_v0 = vmul.f32 %v1291_v60, %v1282_v54 }
 0x523   : > { %v1280_v63 = vpop.xlane.xlu1 %1279 }
 0x524   : > { %v1293_v1 = vmul.f32 %v1291_v60, %v1280_v63  ;;  %v1302_v3 = vmul.f32 %v1298_v2, %v1294_v0 }
 0x526   : > { %v1301_v42 = vmul.f32 %v1297_v13, %v1293_v1  ;;  %v1308_v38 = vsel %vm1304_vm8, %v1302_v3, 0.0 }
 0x528   : > { %v1306_v57 = vsel %vm1304_vm8, %v1301_v42, 0.0 }
 0x529   : > { %v1307_v48 = vadd.f32 %v1306_v57, %v1305_v11  ;;  %v1284_v46 = vpop.xlane.xlu2 %1283 }
 0x52a   : > { %v1295_v52 = vmul.f32 %v1291_v60, %v1284_v46 }
 0x52b   : > { %v1309_v6 = vadd.f32 %v1308_v38, %v1307_v48 }
 0x52c   : > { %v1303_v5 = vmul.f32 %v1299_v44, %v1295_v52 }
 0x52e   : > { %v1310_v8 = vsel %vm1304_vm8, %v1303_v5, 0.0 }
 0x52f   : > { %v1311_v9 = vadd.f32 %v1310_v8, %v1309_v6 }
 0x531   : > { %v1312_v10 = vrot.slane %v1311_v9, 4 }
 0x533   : > { %v1313_v12 = vadd.f32 %v1312_v10, %v1311_v9 }
 0x535   : > { %v1314_v24 = vrot.slane %v1313_v12, 2 }
 0x537   : > { %v1315_v14 = vadd.f32 %v1314_v24, %v1313_v12 }
 0x539   : > { %v1316_v33 = vrot.slane %v1315_v14, 1 }
 0x53b   : > { %v1317_v16 = vadd.f32 %v1316_v33, %v1315_v14 }
 0x53d   : > { %v1319_v19 = vadd.f32 %v1318_v15, %v1317_v16 }
 0x53f   : > { %v1320_v47 = vmax.f32 %v1319_v19, 0.0 }
 0x541   : > { %v1325_v22 = vperm.slane %v1320_v47, 0 }
 0x543   : > { %v1328_v23 = vmul.f32 %v1325_v22, %v1323_v20  ;;  %v1327_v4 = vmul.f32 %v1325_v22, %v1322_v17  ;;  %v1326_v25 = vmul.f32 %v1325_v22, %v1321_v21  ;;  %v1329_v31 = vmul.f32 %v1325_v22, %v1324_v30 }
 0x545   : > { %v1336_v27 = vsel %vm1304_vm8, %v1328_v23, 0.0  ;;  %v1333_v28 = vsel %vm1304_vm8, %v1327_v4, 0.0  ;;  %v1330_v29 = vsel %vm1304_vm8, %v1326_v25, 0.0  ;;  %v1339_v32 = vsel %vm1304_vm8, %v1329_v31, 0.0 }
 0x546   : > { %1337 = vadd.xlane.f32.xlu2 %v1336_v27  ;;  %1334 = vadd.xlane.f32.xlu1 %v1333_v28 }
 0x547   : > { %1331 = vadd.xlane.f32.xlu0 %v1330_v29 }
 0x54f   : > { %1340 = vadd.xlane.f32.xlu0 %v1339_v32 }
 0x5b9   : > { %v1338_v39 = vpop.xlane.xlu2 %1337  ;;  %v1335_v41 = vpop.xlane.xlu1 %1334 }
 0x5ba   : > { %v1348_v45 = vadd.f32 %v1344_v34, %v1338_v39  ;;  %v1347_v50 = vadd.f32 %v1343_v35, %v1335_v41  ;;  %v1332_v51 = vpop.xlane.xlu0 %1331 }
 0x5bb   : > { %v1346_v49 = vadd.f32 %v1342_v37, %v1332_v51 }
 0x5bc   : > { %v1584_v53 = vmul.f32 -1.442695, %v1348_v45  ;;  %v1583_v55 = vmul.f32 -1.442695, %v1347_v50  ;;  %v1651_v50 = vld [vmem:[%s1744_s14 + $0x8] sm:$0xff] }
 0x5bd   : > { %v1582_v56 = vmul.f32 -1.442695, %v1346_v49 }
 0x5be   : > { %1635 = vpow2.f32 %v1584_v53 }
 0x5bf   : > { %1637 = vpow2.f32 %v1583_v55 }
 0x5c0   : > { %1639 = vpow2.f32 %v1582_v56 }
 0x5c2   : > { %v1341_v59 = vpop.xlane.xlu0 %1340 }
 0x5c3   : > { %v1349_v60 = vadd.f32 %v1345_v58, %v1341_v59  ;;  %v1652_v58 = vld [vmem:[%s1744_s14 + $0x10] sm:$0xff] }
 0x5c4   : > { %v1636_v61 = vpop.eup %1635 }
 0x5c5   : > { %v1638_v18 = vpop.eup %1637  ;;  %v1364_v62 = vadd.f32 1.0, %v1636_v61  ;;  %v1585_v63 = vmul.f32 -1.442695, %v1349_v60  ;;  %v1653_v60 = vld [vmem:[%s1744_s14] sm:$0xff] }
 0x5c6   : > { %v1640_v54 = vpop.eup %1639  ;;  %v1363_v13 = vadd.f32 1.0, %v1638_v18 }
 0x5c7   : > { %1641 = vrcp.f32 %v1364_v62  ;;  %v1362_v7 = vadd.f32 1.0, %v1640_v54  ;;  %vm1401_vm9 = vweird.f32 %v1364_v62  ;;  %v1405_v48 = vand.u32 2147483647, %v1364_v62 }
 0x5c8   : > { %1643 = vrcp.f32 %v1363_v13  ;;  %v1390_v38 = vand.u32 2147483647, %v1363_v13  ;;  %v1407_v5 = vand.u32 2147483648, %v1364_v62  ;;  %v1392_v6 = vand.u32 2147483648, %v1363_v13 }
 0x5c9   : > { %1645 = vrcp.f32 %v1362_v7  ;;  %v1377_v12 = vand.u32 2147483648, %v1362_v7  ;;  %v1375_v33 = vand.u32 2147483647, %v1362_v7  ;;  %vm1386_vm11 = vweird.f32 %v1363_v13 }
 0x5ca   : > { %1647 = vpow2.f32 %v1585_v63  ;;  %vm1406_vm13 = vcmp.eq.f32.partialorder %v1405_v48, 8.507059e+37  ;;  %v1408_v16 = vor.u32 1.1754944e-38, %v1407_v5  ;;  %v1393_v19 = vor.u32 1.1754944e-38, %v1392_v6 }
 0x5cb   : > { %vm1371_vm0 = vweird.f32 %v1362_v7  ;;  %vm1391_vm1 = vcmp.eq.f32.partialorder %v1390_v38, 8.507059e+37  ;;  %v1378_v22 = vor.u32 1.1754944e-38, %v1377_v12  ;;  %vm1376_vm5 = vcmp.eq.f32.partialorder %v1375_v33, 8.507059e+37 }
 0x5cd   : > { %v1642_v0 = vpop.eup %1641 }
 0x5ce   : > { %v1644_v1 = vpop.eup %1643  ;;  %v1397_v2 = vmul.f32 %v1642_v0, %v1364_v62  ;;  %vm1402_vm15 = vweird.f32 %v1642_v0  ;;  %v1654_v62 = vld [vmem:[%s1744_s14 + $0x18] sm:$0xff] }
 0x5cf   : > { %v1646_v42 = vpop.eup %1645  ;;  %v1382_v11 = vmul.f32 %v1644_v1, %v1363_v13  ;;  %vm1387_vm2 = vweird.f32 %v1644_v1  ;;  %vm1403_vm12 = vmor %vm1401_vm9, %vm1402_vm15 }
 0x5d0   : > { %v1648_v3 = vpop.eup %1647  ;;  %v1398_v57 = vsub.f32 1.0, %v1397_v2  ;;  %v1367_v44 = vmul.f32 %v1646_v42, %v1362_v7  ;;  %vm1372_vm10 = vweird.f32 %v1646_v42  ;;  %vm1388_vm14 = vmor %vm1386_vm11, %vm1387_vm2 }
 0x5d1   : > { %v1365_v46 = vadd.f32 1.0, %v1648_v3  ;;  %v1383_v52 = vsub.f32 1.0, %v1382_v11  ;;  %vm1373_vm4 = vmor %vm1371_vm0, %vm1372_vm10 }
 0x5d2   : > { %v1399_v8 = vmul.f32 %v1642_v0, %v1398_v57  ;;  %v1368_v9 = vsub.f32 1.0, %v1367_v44 }
 0x5d3   : > { %1649 = vrcp.f32 %v1365_v46  ;;  %v1384_v10 = vmul.f32 %v1644_v1, %v1383_v52  ;;  %v1422_v30 = vand.u32 2147483648, %v1365_v46  ;;  %v1420_v32 = vand.u32 2147483647, %v1365_v46 }
 0x5d4   : > { %v1400_v24 = vadd.f32 %v1642_v0, %v1399_v8  ;;  %v1369_v14 = vmul.f32 %v1646_v42, %v1368_v9  ;;  %vm1416_vm7 = vweird.f32 %v1365_v46 }
 0x5d5   : > { %v1385_v15 = vadd.f32 %v1644_v1, %v1384_v10  ;;  %v1423_v35 = vor.u32 1.1754944e-38, %v1422_v30  ;;  %vm1421_vm8 = vcmp.eq.f32.partialorder %v1420_v32, 8.507059e+37 }
 0x5d6   : > { %v1404_v47 = vsel %vm1403_vm12, %v1642_v0, %v1400_v24  ;;  %v1370_v20 = vadd.f32 %v1646_v42, %v1369_v14 }
 0x5d7   : > { %v1389_v17 = vsel %vm1388_vm14, %v1644_v1, %v1385_v15  ;;  %v1409_v21 = vsel %vm1406_vm13, %v1408_v16, %v1404_v47 }
 0x5d8   : > { %v1394_v23 = vsel %vm1391_vm1, %v1393_v19, %v1389_v17  ;;  %1438 = vperm.xlu0 %1632, %v1409_v21   ;;  %v1374_v4 = vsel %vm1373_vm4, %v1646_v42, %v1370_v20 }
 0x5d9   : > { %v1650_v25 = vpop.eup %1649  ;;  %1433 = vperm.xlu2 %1631, %v1394_v23   ;;  %v1379_v27 = vsel %vm1376_vm5, %v1378_v22, %v1374_v4 }
 0x5da   : > { %1428 = vperm.xlu1 %1630, %v1379_v27   ;;  %v1412_v28 = vmul.f32 %v1650_v25, %v1365_v46  ;;  %vm1417_vm6 = vweird.f32 %v1650_v25 }
 0x5db   : > { %vm1418_vm3 = vmor %vm1416_vm7, %vm1417_vm6 }
 0x5dc   : > { %v1413_v29 = vsub.f32 1.0, %v1412_v28 }
 0x5de   : > { %v1414_v31 = vmul.f32 %v1650_v25, %v1413_v29 }
 0x5e0   : > { %v1415_v34 = vadd.f32 %v1650_v25, %v1414_v31 }
 0x5e2   : > { %v1419_v37 = vsel %vm1418_vm3, %v1650_v25, %v1415_v34 }
 0x5e3   : > { %v1424_v39 = vsel %vm1421_vm8, %v1423_v35, %v1419_v37 }
 0x5e4   : > { %1443 = vperm.xlu1 %1630, %v1424_v39  }
 0x633   : > { %v1434_v41 = vpop.permute.xlu2 %1433 }
 0x634   : > { %v1447_v45 = vmul.f32 %v1434_v41, %v2252_v40 }
 0x636   : > { %v1451_v51 = vadd.f32 %v1651_v50, %v1447_v45 }
 0x638   : > { %1455 = vst [vmem:[%s332_s25 + $0x8] sm:$0xff] %v1451_v51 }
 0x64a   : > { %v1439_v49 = vpop.permute.xlu0 %1438 }
 0x64b   : > { %v1448_v53 = vmul.f32 %v1439_v49, %v2249_v36 }
 0x64c   : > { %v1429_v55 = vpop.permute.xlu1 %1428 }
 0x64d   : > { %v1446_v56 = vmul.f32 %v1429_v55, %v2246_v26  ;;  %v1452_v59 = vadd.f32 %v1652_v58, %v1448_v53 }
 0x64f   : > { %v1450_v61 = vadd.f32 %v1653_v60, %v1446_v56  ;;  %1456 = vst [vmem:[%s332_s25 + $0x10] sm:$0xff] %v1452_v59 }
 0x651   : > { %1454 = vst [vmem:[%s332_s25] sm:$0xff] %v1450_v61 }
 0x656   : > { %v1444_v40 = vpop.permute.xlu1 %1443 }
 0x657   : > { %v1449_v18 = vmul.f32 %v1444_v40, %v2255_v43 }
 0x659   : > { %v1453_v54 = vadd.f32 %v1654_v62, %v1449_v18 }
 0x65b   : > { %1457 = vst [vmem:[%s332_s25 + $0x18] sm:$0xff] %v1453_v54 }
 0x65c PF: > { %s19_s30 = sadd.s32 1, %s1661_s30  }
 0x65d   : > { %p16_p4 = scmp.ge.s32.totalorder %s19_s30, 4  }
 0x65f   :  { %18 = sbr.rel (!%p16_p4) target bundleno = 1 (0x1), region = 90 }

// kernel: baseline_hr_forward.18
= control target key start
LH: loop header
LB: loop body
LE: loop exit
PB: predicated region body
PF: predicated region fallthrough
CT: control target
= control target key end

     0   :  { %s1229_s12 = smov 0   ;;  %s1799_s0 = inlined_call_operand.vmem [shape: f32[2,32,128], index: 0, kind: input, shape index: {}]   ;;  %s1800_s1 = inlined_call_operand.vmem [shape: f32[3,128,96], index: 1, kind: input, shape index: {}]   ;;  %s1801_s2 = inlined_call_operand.vmem [shape: f32[128,1], index: 2, kind: input, shape index: {}]   ;;  %s1802_s3 = inlined_call_operand.vmem [shape: f32[2,128,128], index: 3, kind: output, shape index: {}]  }
   0x1 LB: > { %s1061_s13 = sadd.s32 4294967295, %s1196_s12   ;;  %p1065_p0 = scmp.ge.s32.totalorder %s1196_s12, 1  ;;  %s1196_s12 = sphi %s1229_s12, %s13_s12  }
   0x2   : > { %p137_p1 = scmp.lt.s32.totalorder %s1196_s12, 3 }
   0x4   : > { %p138_p2 = pnand %p1065_p0, %p137_p1 }
   0x5   : > { %p161_p3 = scmp.lt.s32.totalorder (!%p138_p2), %s1061_s13, 1  ;;  %s1199_s18 = smov (!%p138_p2), 17  }
   0x6   : > { %141 = sbr.rel (%p138_p2) target bundleno = 677 (0x2a5), region = 32  ;;  %s1200_s19 = smov (!%p138_p2), 18  }
   0x7   : > { %s1201_s20 = smov (!%p138_p2), 34   ;;  %s1202_s21 = smov (!%p138_p2), 2  }
   0x8   : > { %s1203_s22 = smov (!%p138_p2), 32   ;;  %s1204_s23 = smov (!%p138_p2), 16  }
   0x9   : > { %s1205_s24 = smov (!%p138_p2), 127   ;;  %s1206_s25 = smov (!%p138_p2), 126  }
   0xa   : > { %s1207_s26 = smov (!%p138_p2), 112   ;;  %s1208_s27 = smov (!%p138_p2), 96  }
   0xb   : > { %v224_v0 = vlaneseq  ;;  %v1198_v1 = vmov 0   ;;  %s1822_s13 = smov (!%p161_p3, %s1061_s13), 1  ;;  %vm174_vm4 = vcmask 134144   ;;  %vm179_vm5 = vcmask 273544  }
   0xc   : > { %1187 = vset.pattern.permute.xlu1 %v1198_v1  ;;  %1189 = vset.pattern.permute.xlu0 %v1198_v1  ;;  %s1144_s14 = sshll.u32 %s1822_s13, 5  ;;  %177 = vst.msk [vmem:[#allocation2 + $0x10] sm:$0xf] %vm174_vm4, %v1198_v1  ;;  %vm217_vm6 = vcmask 1043592   ;;  %vm218_vm7 = vcmask 138244   ;;  %vm208_vm8 = vcmask 138240   ;;  %v1273_v31 = vunpack.c.l.b16 %v1198_v1 }
   0xd   : > { %v225_v2 = vand.u32 127, %v224_v0  ;;  %1188 = vset.pattern.permute.xlu2 %v1198_v1  ;;  %s165_s17 = scalar_lea.vmem %s1799_s0, %s1144_s14  ;;  %182 = vst.msk [vmem:[#allocation2 + $0x14] sm:$0xf] %vm179_vm5, %v1198_v1  ;;  %vm1262_vm9 = vmor %vm218_vm7, %vm217_vm6  ;;  %vm389_vm10 = vcmask 146432   ;;  %vm672_vm11 = vcmask 277504   ;;  %v1276_v32 = vunpack.c.h.b16 %v1198_v1  ;;  %s1145_s4 = sshll.u32 %s1822_s13, 7 }
   0xe   : > { %v186_v4 = vld [vmem:[%s165_s17 + $0x10] sm:$0xff]  ;;  %v184_v5 = vld [vmem:[%s165_s17] sm:$0xff]  ;;  %v187_v9 = vld [vmem:[%s165_s17 + $0x18] sm:$0xff]  ;;  %175 = vst.msk [vmem:[#allocation2] sm:$0xf] %vm174_vm4, %v1198_v1  ;;  %vm656_vm14 = vcmask 261120   ;;  %s1768_s7 = scalar_lea.vmem %s1802_s3, %s1145_s4 }
   0xf   : > { %v230_v3 = vand.u32 15, %v225_v2  ;;  %v190_v6 = vpack.c.bf16 %v186_v4, %v186_v4  ;;  %v188_v7 = vpack.c.bf16 %v184_v5, %v184_v5  ;;  %v185_v10 = vld [vmem:[%s165_s17 + $0x8] sm:$0xff]  ;;  %v191_v11 = vpack.c.bf16 %v187_v9, %v187_v9  ;;  %176 = vst.msk [vmem:[#allocation2 + $0x8] sm:$0xf] %vm174_vm4, %v1198_v1 }
  0x10   : > { %v189_v12 = vpack.c.bf16 %v185_v10, %v185_v10  ;;  %178 = vst.msk [vmem:[#allocation2 + $0x18] sm:$0xf] %vm174_vm4, %v1198_v1  ;;  %vm262_vm4 = vcmask 15360  }
  0x11   : > { %vm239_vm0 = vcmp.ne.s32.totalorder %v230_v3, 15  ;;  %200 = vrot.lane.b32.xlu0 %v190_v6, %s1199_s18  ;;  %196 = vrot.lane.b32.xlu1 %v188_v7, %s1199_s18  ;;  %vm238_vm2 = vcmp.ne.s32.totalorder %v230_v3, 0  ;;  %180 = vst.msk [vmem:[#allocation2 + $0x4] sm:$0xf] %vm179_vm5, %v1198_v1 }
  0x12   : > { %vm257_vm1 = vmpackc.low %vm239_vm0, %vm239_vm0  ;;  %181 = vst.msk [vmem:[#allocation2 + $0xc] sm:$0xf] %vm179_vm5, %v1198_v1 }
  0x13   : > { %v258_v8 = vsel %vm257_vm1, 65537, %v1198_v1  ;;  %vm1247_vm3 = vmpackc.low %vm238_vm2, %vm238_vm2  ;;  %183 = vst.msk [vmem:[#allocation2 + $0x1c] sm:$0xf] %vm179_vm5, %v1198_v1 }
  0x14   : > { %386 = vrot.lane.b32.xlu2 %v258_v8, %s1200_s19  ;;  %v369_v14 = vsel %vm1247_vm3, 65537, %v1198_v1 }
  0x19   : > { %202 = vrot.lane.b32.xlu0 %v191_v11, %s1199_s18  ;;  %198 = vrot.lane.b32.xlu1 %v189_v12, %s1199_s18 }
  0x1c   : > { %669 = vrot.lane.b32.xlu2 %v258_v8, %s1201_s20 }
  0x21   : > { %259 = vrot.lane.b32.xlu0 %v258_v8, %s1202_s21  ;;  %653 = vrot.lane.b32.xlu1 %v369_v14, %s1203_s22 }
  0x29   : > { %370 = vrot.lane.b32.xlu0 %v369_v14, %s1204_s23 }
  0x6e   : > { %v387_v15 = vpop.permute.xlu2 %386 }
  0x6f   : > { %v388_v21 = vrot.slane %v387_v15, 4 }
  0x71   : > { %v390_v25 = vsel %vm389_vm10, %v388_v21, %v387_v15 }
  0x72   : > { %v391_v33 = vunpack.c.l.b16 %v390_v25  ;;  %v392_v34 = vunpack.c.h.b16 %v390_v25 }
  0x74   : > { %vm395_vm12 = vcmp.ne.s32.totalorder %v391_v33, %v1273_v31  ;;  %vm396_vm13 = vcmp.ne.s32.totalorder %v392_v34, %v1276_v32 }
  0x75   : > { %vm1286_vm15 = vmpackc.low %vm396_vm13, %vm395_vm12 }
  0x76   : > { %v670_v24 = vpop.permute.xlu2 %669 }
  0x77   : > { %v671_v26 = vrot.slane %v670_v24, 4 }
  0x79   : > { %v673_v35 = vsel %vm672_vm11, %v671_v26, %v670_v24 }
  0x7a   : > { %v674_v38 = vunpack.c.l.b16 %v673_v35  ;;  %v675_v39 = vunpack.c.h.b16 %v673_v35 }
  0x7c   : > { %vm678_vm0 = vcmp.ne.s32.totalorder %v674_v38, %v1273_v31  ;;  %vm679_vm1 = vcmp.ne.s32.totalorder %v675_v39, %v1276_v32 }
  0x7d   : > { %vm1294_vm2 = vmpackc.low %vm679_vm1, %vm678_vm0  ;;  %vm340_vm0 = vcmask 1031168   ;;  %vm493_vm1 = vcmask 916480  }
  0x83   : > { %v201_v16 = vpop.permute.xlu0 %200  ;;  %v197_v17 = vpop.permute.xlu1 %196 }
  0x84   : > { %v206_v19 = vrot.slane %v201_v16, 4  ;;  %v204_v20 = vrot.slane %v197_v17, 4 }
  0x86   : > { %v211_v22 = vsel %vm208_vm8, %v206_v19, %v201_v16  ;;  %v209_v23 = vsel %vm208_vm8, %v204_v20, %v197_v17 }
  0x87   : > { %222 = vst.msk [vmem:[#allocation2 + $0x10] sm:$0xff] %vm1262_vm9, %v211_v22 }
  0x88   : > { %220 = vst.msk [vmem:[#allocation2] sm:$0xff] %vm1262_vm9, %v209_v23 }
  0x8b   : > { %v203_v27 = vpop.permute.xlu0 %202  ;;  %v199_v28 = vpop.permute.xlu1 %198 }
  0x8c   : > { %v207_v29 = vrot.slane %v203_v27, 4  ;;  %v205_v30 = vrot.slane %v199_v28, 4 }
  0x8e   : > { %v212_v36 = vsel %vm208_vm8, %v207_v29, %v203_v27  ;;  %v210_v37 = vsel %vm208_vm8, %v205_v30, %v199_v28  ;;  %v1080_v44 = vld [vmem:[#allocation2 + $0x10] sm:$0xf]  ;;  %v1148_v51 = vld [vmem:[#allocation2 + $0x14] sm:$0xf]  ;;  %vm373_vm8 = vcmask 130048  }
  0x8f   : > { %223 = vst.msk [vmem:[#allocation2 + $0x18] sm:$0xff] %vm1262_vm9, %v212_v36  ;;  %v1072_v52 = vld [vmem:[#allocation2] sm:$0xf]  ;;  %v1298_v59 = vld [vmem:[#allocation2 + $0x10] sm:$0xff]  ;;  %v1146_v17 = vld [vmem:[#allocation2 + $0x4] sm:$0xf] }
  0x90   : > { %221 = vst.msk [vmem:[#allocation2 + $0x8] sm:$0xff] %vm1262_vm9, %v210_v37  ;;  %v683_v0 = vsel %vm1294_vm2, %v1298_v59, 0  ;;  %v400_v1 = vsel %vm1286_vm15, %v1298_v59, 0  ;;  %v1321_v2 = vld [vmem:[#allocation2] sm:$0xff] }
  0x91   : > { %v709_v10 = vunpack.c.l.b16 %v683_v0  ;;  %v426_v11 = vunpack.c.l.b16 %v400_v1  ;;  %v1328_v12 = vsel %vm1286_vm15, %v1321_v2, 0  ;;  %v710_v27 = vunpack.c.h.b16 %v683_v0 }
  0x92   : > { %v427_v28 = vunpack.c.h.b16 %v400_v1  ;;  %v423_v30 = vunpack.c.h.b16 %v1328_v12  ;;  %v681_v33 = vsel %vm1294_vm2, %v1321_v2, 0 }
  0x93   : > { %v260_v40 = vpop.permute.xlu0 %259  ;;  %v654_v41 = vpop.permute.xlu1 %653 }
  0x94   : > { %v655_v42 = vrot.slane %v654_v41, 4  ;;  %v261_v55 = vrot.slane %v260_v40, 4 }
  0x96   : > { %v657_v45 = vsel %vm656_vm14, %v655_v42, %v654_v41  ;;  %v1149_v46 = vld [vmem:[#allocation2 + $0x14] sm:$0xf0]  ;;  %v1082_v47 = vld [vmem:[#allocation2 + $0x18] sm:$0xf0]  ;;  %v263_v3 = vsel %vm262_vm4, %v261_v55, %v260_v40 }
  0x97   : > { %v1292_v48 = vld [vmem:[#allocation2 + $0x18] sm:$0xff]  ;;  %v658_v49 = vunpack.c.l.b16 %v657_v45  ;;  %v659_v50 = vunpack.c.h.b16 %v657_v45  ;;  %v1147_v53 = vld [vmem:[#allocation2 + $0x4] sm:$0xf0]  ;;  %v1081_v56 = vor.u32 %v1149_v46, %v1080_v44  ;;  %v1085_v57 = vor.u32 %v1148_v51, %v1082_v47  ;;  %v1074_v8 = vld [vmem:[#allocation2 + $0x8] sm:$0xf0] }
  0x98   : > { %v1073_v58 = vor.u32 %v1147_v53, %v1072_v52  ;;  %v684_v60 = vsel %vm1294_vm2, %v1292_v48, 0  ;;  %v401_v61 = vsel %vm1286_vm15, %v1292_v48, 0  ;;  %v1323_v6 = vld [vmem:[#allocation2 + $0x8] sm:$0xff]  ;;  %v264_v14 = vunpack.c.l.b16 %v263_v3 }
  0x99   : > { %vm662_vm5 = vcmp.ne.s32.totalorder %v658_v49, %v1273_v31  ;;  %vm663_vm6 = vcmp.ne.s32.totalorder %v659_v50, %v1276_v32  ;;  %307 = vrot.lane.b32.xlu2 %v1081_v56, %s1205_s24  ;;  %309 = vrot.lane.b32.xlu0 %v1085_v57, %s1205_s24  ;;  %v711_v5 = vunpack.c.l.b16 %v684_v60  ;;  %v428_v7 = vunpack.c.l.b16 %v401_v61 }
  0x9a   : > { %vm1310_vm7 = vmpackc.low %vm663_vm6, %vm662_vm5  ;;  %303 = vrot.lane.b32.xlu1 %v1073_v58, %s1205_s24  ;;  %v1333_v18 = vsel %vm1286_vm15, %v1323_v6, 0  ;;  %v265_v19 = vunpack.c.h.b16 %v263_v3  ;;  %v1077_v21 = vor.u32 %v1146_v17, %v1074_v8  ;;  %v712_v22 = vunpack.c.h.b16 %v684_v60 }
  0x9b   : > { %v371_v63 = vpop.permute.xlu0 %370  ;;  %v715_v20 = vpack.c.b16 %v711_v5, %v709_v10  ;;  %v432_v23 = vpack.c.b16 %v428_v7, %v426_v11  ;;  %v429_v24 = vunpack.c.h.b16 %v401_v61  ;;  %v425_v25 = vunpack.c.h.b16 %v1333_v18 }
  0x9c   : > { %v372_v4 = vrot.slane %v371_v63, 4  ;;  %vm1346_vm12 = vcmp.ne.s32.totalorder %v264_v14, %v1273_v31  ;;  %vm1355_vm13 = vcmp.ne.s32.totalorder %v265_v19, %v1276_v32  ;;  %v716_v35 = vpack.c.b16 %v712_v22, %v710_v27 }
  0x9d   : > { %v433_v36 = vpack.c.b16 %v429_v24, %v427_v28  ;;  %v431_v37 = vpack.c.b16 %v425_v25, %v423_v30  ;;  %v668_v39 = vsel %vm1310_vm7, %v1292_v48, 0  ;;  %v665_v44 = vsel %vm1310_vm7, %v1321_v2, 0  ;;  %vm1413_vm14 = vmpackc.low %vm1355_vm13, %vm1346_vm12 }
  0x9e   : > { %v374_v9 = vsel %vm373_vm8, %v372_v4, %v371_v63  ;;  %v696_v41 = vunpack.c.h.b16 %v668_v39  ;;  %v695_v43 = vunpack.c.l.b16 %v668_v39  ;;  %v666_v45 = vsel %vm1310_vm7, %v1323_v6, 0 }
  0x9f   : > { %v375_v15 = vunpack.c.l.b16 %v374_v9  ;;  %v376_v16 = vunpack.c.h.b16 %v374_v9  ;;  %v689_v51 = vunpack.c.l.b16 %v665_v44  ;;  %v691_v52 = vunpack.c.l.b16 %v666_v45 }
  0xa0   : > { %v682_v53 = vsel %vm1294_vm2, %v1323_v6, 0  ;;  %v424_v60 = vunpack.c.l.b16 %v1333_v18  ;;  %v690_v1 = vunpack.c.h.b16 %v665_v44  ;;  %v692_v3 = vunpack.c.h.b16 %v666_v45 }
  0xa1   : > { %vm379_vm9 = vcmp.ne.s32.totalorder %v375_v15, %v1273_v31  ;;  %vm380_vm10 = vcmp.ne.s32.totalorder %v376_v16, %v1276_v32  ;;  %721 = vrot.lane.b32.xlu0 %v715_v20, %s1206_s25  ;;  %305 = vrot.lane.b32.xlu2 %v1077_v21, %s1205_s24  ;;  %v667_v31 = vsel %vm1310_vm7, %v1298_v59, 0  ;;  %v1399_v61 = vpack.c.b16 %v691_v52, %v689_v51 }
  0xa2   : > { %vm1340_vm11 = vmpackc.low %vm380_vm10, %vm379_vm9  ;;  %438 = vrot.lane.b32.xlu1 %v432_v23, %s1206_s25  ;;  %v694_v32 = vunpack.c.h.b16 %v667_v31  ;;  %v693_v42 = vunpack.c.l.b16 %v667_v31  ;;  %v707_v54 = vunpack.c.l.b16 %v682_v53  ;;  %v422_v5 = vunpack.c.l.b16 %v1328_v12 }
  0xa3   : > { %v1365_v38 = vsel %vm1340_vm11, %v1298_v59, 0  ;;  %v1373_v40 = vsel %vm1340_vm11, %v1292_v48, 0  ;;  %v382_v46 = vsel %vm1340_vm11, %v1321_v2, 0  ;;  %v383_v47 = vsel %vm1340_vm11, %v1323_v6, 0 }
  0xa4   : > { %v1387_v49 = vpack.c.b16 %v696_v41, %v694_v32  ;;  %v1389_v50 = vpack.c.b16 %v695_v43, %v693_v42  ;;  %v407_v55 = vunpack.c.h.b16 %v382_v46  ;;  %v409_v56 = vunpack.c.h.b16 %v383_v47 }
  0xa5   : > { %v406_v57 = vunpack.c.l.b16 %v382_v46  ;;  %v411_v58 = vunpack.c.h.b16 %v1365_v38  ;;  %v408_v62 = vunpack.c.l.b16 %v383_v47  ;;  %v413_v63 = vunpack.c.h.b16 %v1373_v40 }
  0xa6   : > { %v1402_v0 = vpack.c.b16 %v409_v56, %v407_v55  ;;  %v1407_v7 = vpack.c.b16 %v692_v3, %v690_v1  ;;  %v705_v9 = vunpack.c.l.b16 %v681_v33  ;;  %v430_v11 = vpack.c.b16 %v424_v60, %v422_v5  ;;  %v242_v60 = vld [vmem:[#allocation2 + $0x10] sm:$0xf]  ;;  %v240_v3 = vld [vmem:[#allocation2] sm:$0xf] }
  0xa7   : > { %v1404_v4 = vpack.c.b16 %v408_v62, %v406_v57  ;;  %v417_v10 = vpack.c.b16 %v413_v63, %v411_v58  ;;  %v273_v12 = vsel %vm1413_vm14, %v1298_v59, 0  ;;  %v274_v15 = vsel %vm1413_vm14, %v1292_v48, 0  ;;  %v241_v63 = vld [vmem:[#allocation2 + $0x8] sm:$0xf] }
  0xa8   : > { %v713_v14 = vpack.c.b16 %v707_v54, %v705_v9  ;;  %v708_v16 = vunpack.c.h.b16 %v682_v53  ;;  %v324_v17 = vunpack.c.l.b16 %v273_v12  ;;  %v326_v18 = vunpack.c.l.b16 %v274_v15 }
  0xa9   : > { %440 = vrot.lane.b32.xlu2 %v433_v36, %s1206_s25  ;;  %436 = vrot.lane.b32.xlu0 %v431_v37, %s1206_s25  ;;  %v706_v19 = vunpack.c.h.b16 %v681_v33  ;;  %v271_v22 = vsel %vm1413_vm14, %v1321_v2, 0  ;;  %v272_v59 = vsel %vm1413_vm14, %v1323_v6, 0  ;;  %v325_v48 = vunpack.c.h.b16 %v273_v12 }
  0xaa   : > { %723 = vrot.lane.b32.xlu1 %v716_v35, %s1206_s25  ;;  %v330_v21 = vpack.c.b16 %v326_v18, %v324_v17  ;;  %v327_v23 = vunpack.c.h.b16 %v274_v15  ;;  %v320_v24 = vunpack.c.l.b16 %v271_v22  ;;  %v322_v25 = vunpack.c.l.b16 %v272_v59 }
  0xab   : > { %v714_v20 = vpack.c.b16 %v708_v16, %v706_v19  ;;  %v321_v28 = vunpack.c.h.b16 %v271_v22  ;;  %v323_v29 = vunpack.c.h.b16 %v272_v59  ;;  %v410_v2 = vunpack.c.l.b16 %v1365_v38 }
  0xac   : > { %v331_v26 = vpack.c.b16 %v327_v23, %v325_v48  ;;  %v328_v27 = vpack.c.b16 %v322_v25, %v320_v24  ;;  %v412_v6 = vunpack.c.l.b16 %v1373_v40  ;;  %vm311_vm15 = vcmask 1039360   ;;  %v345_v24 = vld [vmem:[%s1800_s1] sm:$0xff]  ;;  %v346_v25 = vld [vmem:[%s1800_s1 + $0x8] sm:$0xff] }
  0xad   : > { %v329_v30 = vpack.c.b16 %v323_v29, %v321_v28  ;;  %v249_v1 = vsel %vm1247_vm3, %v242_v60, 0  ;;  %v248_v54 = vsel %vm1247_vm3, %v241_v63, 0  ;;  %v247_v8 = vsel %vm1247_vm3, %v240_v3, 0  ;;  %v349_v63 = vld [vmem:[%s1800_s1 + $0x20] sm:$0xff] }
  0xae   : > { %v416_v33 = vpack.c.b16 %v412_v6, %v410_v2  ;;  %v281_v5 = vunpack.c.l.b16 %v249_v1  ;;  %v361_v28 = vpack.c.bf16 %v346_v25, %v345_v24  ;;  %v1122_v24 = vld [vmem:[%s1800_s1 + $0x120] sm:$0xff]  ;;  %v1123_v25 = vld [vmem:[%s1800_s1 + $0x128] sm:$0xff] }
  0xb1   : > { %475 = vrot.lane.b32.xlu0 %v417_v10, %s1207_s26  ;;  %434 = vrot.lane.b32.xlu2 %v430_v11, %s1206_s25  ;;  %v280_v10 = vunpack.c.l.b16 %v248_v54  ;;  %v279_v11 = vunpack.c.l.b16 %v247_v8  ;;  %v881_v8 = vld [vmem:[%s1801_s2 + $0x18] sm:$0xff] }
  0xb2   : > { %717 = vrot.lane.b32.xlu1 %v713_v14, %s1206_s25 }
  0xb9   : > { %719 = vrot.lane.b32.xlu2 %v714_v20, %s1206_s25 }
  0xba   : > { %336 = vrot.lane.b32.xlu1 %v330_v21, %s1206_s25 }
  0xc1   : > { %338 = vrot.lane.b32.xlu2 %v331_v26, %s1206_s25 }
  0xc2   : > { %332 = vrot.lane.b32.xlu1 %v328_v27, %s1206_s25 }
  0xc9   : > { %334 = vrot.lane.b32.xlu2 %v329_v30, %s1206_s25 }
  0xd1   : > { %473 = vrot.lane.b32.xlu2 %v416_v33, %s1207_s26 }
  0xf3   : > { %v308_v34 = vpop.permute.xlu2 %307 }
  0xfb   : > { %v306_v35 = vpop.permute.xlu2 %305 }
  0xfc   : > { %479 = vrot.lane.b32.xlu2 %v306_v35, %s1207_s26 }
 0x103   : > { %v441_v31 = vpop.permute.xlu2 %440 }
 0x10b   : > { %v310_v36 = vpop.permute.xlu0 %309  ;;  %v435_v32 = vpop.permute.xlu2 %434 }
 0x10c   : > { %v304_v37 = vpop.permute.xlu1 %303  ;;  %766 = vrot.lane.b32.xlu0 %v310_v36, %s1208_s27  ;;  %483 = vrot.lane.b32.xlu1 %v310_v36, %s1207_s26  ;;  %v1443_v39 = vsel %vm311_vm15, %v308_v34, %v310_v36  ;;  %v347_v36 = vld [vmem:[%s1800_s1 + $0x10] sm:$0xff] }
 0x10d   : > { %764 = vrot.lane.b32.xlu2 %v1443_v39, %s1208_s27  ;;  %v1450_v40 = vsel %vm311_vm15, %v304_v37, %v306_v35 }
 0x113   : > { %v722_v41 = vpop.permute.xlu0 %721  ;;  %v720_v44 = vpop.permute.xlu2 %719 }
 0x114   : > { %v439_v38 = vpop.permute.xlu1 %438  ;;  %481 = vrot.lane.b32.xlu0 %v1443_v39, %s1207_s26  ;;  %762 = vrot.lane.b32.xlu1 %v306_v35, %s1208_s27 }
 0x115   : > { %v443_v55 = vsel %vm340_vm0, %v439_v38, %v441_v31 }
 0x11b   : > { %v339_v47 = vpop.permute.xlu2 %338  ;;  %v437_v51 = vpop.permute.xlu0 %436 }
 0x11c   : > { %v724_v42 = vpop.permute.xlu1 %723  ;;  %760 = vrot.lane.b32.xlu0 %v1450_v40, %s1208_s27  ;;  %477 = vrot.lane.b32.xlu1 %v1450_v40, %s1207_s26 }
 0x11d   : > { %v726_v43 = vsel %vm340_vm0, %v722_v41, %v724_v42 }
 0x11e   : > { %772 = vrot.lane.b32.xlu2 %v726_v43, %s1208_s27 }
 0x123   : > { %v335_v56 = vpop.permute.xlu2 %334  ;;  %v476_v14 = vpop.permute.xlu0 %475 }
 0x124   : > { %v718_v45 = vpop.permute.xlu1 %717  ;;  %491 = vrot.lane.b32.xlu1 %v441_v31, %s1207_s26  ;;  %774 = vrot.lane.b32.xlu0 %v724_v42, %s1208_s27  ;;  %v348_v31 = vld [vmem:[%s1800_s1 + $0x18] sm:$0xff]  ;;  %v878_v42 = vld [vmem:[%s1801_s2] sm:$0xff] }
 0x125   : > { %v725_v46 = vsel %vm340_vm0, %v718_v45, %v720_v44  ;;  %v362_v38 = vpack.c.bf16 %v348_v31, %v347_v36  ;;  %v888_v36 = vld [vmem:[%s1801_s2 + $0x50] sm:$0xff]  ;;  %v356_v31 = vld [vmem:[%s1800_s1 + $0x58] sm:$0xff] }
 0x126   : > { %768 = vrot.lane.b32.xlu2 %v725_v46, %s1208_s27  ;;  %v1086_v46 = vld [vmem:[%s1800_s1 + $0x80] sm:$0xff] }
 0x12b   : > { %v474_v12 = vpop.permute.xlu2 %473 }
 0x12c   : > { %v337_v52 = vpop.permute.xlu1 %336  ;;  %487 = vrot.lane.b32.xlu1 %v437_v51, %s1207_s26  ;;  %770 = vrot.lane.b32.xlu0 %v720_v44, %s1208_s27  ;;  %v495_v45 = vsel %vm493_vm1, %v474_v12, %v476_v14  ;;  %v351_v14 = vld [vmem:[%s1800_s1 + $0x30] sm:$0xff] }
 0x12d   : > { %v1465_v53 = vsel %vm340_vm0, %v337_v52, %v339_v47  ;;  %v1087_v47 = vld [vmem:[%s1800_s1 + $0x88] sm:$0xff]  ;;  %v1100_v12 = vld [vmem:[%s1800_s1 + $0xf0] sm:$0xff] }
 0x12e   : > { %758 = vrot.lane.b32.xlu2 %v1387_v49, %s1208_s27  ;;  %606 = vmatpush.bf16.msra.mxu1 %v1465_v53  ;;  %v243_v49 = vld [vmem:[#allocation2 + $0x18] sm:$0xf]  ;;  %v1099_v52 = vld [vmem:[%s1800_s1 + $0xe8] sm:$0xff] }
 0x12f   : > { %v250_v62 = vsel %vm1247_vm3, %v243_v49, 0  ;;  %vm506_vm3 = vcmask 785408  }
 0x134   : > { %v333_v57 = vpop.permute.xlu1 %332  ;;  %756 = vrot.lane.b32.xlu1 %v1389_v50, %s1208_s27  ;;  %489 = vrot.lane.b32.xlu0 %v443_v55, %s1207_s26  ;;  %v442_v50 = vsel %vm340_vm0, %v435_v32, %v437_v51  ;;  %v1098_v51 = vld [vmem:[%s1800_s1 + $0xe0] sm:$0xff] }
 0x135   : > { %v1475_v58 = vsel %vm340_vm0, %v333_v57, %v335_v56  ;;  %v1118_v56 = vld [vmem:[%s1800_s1 + $0x100] sm:$0xff]  ;;  %v1119_v57 = vld [vmem:[%s1800_s1 + $0x108] sm:$0xff]  ;;  %v467_v3 = vpack.c.bf16 %v1099_v52, %v1098_v51 }
 0x136   : > { %752 = vrot.lane.b32.xlu2 %v1399_v61, %s1208_s27  ;;  %607 = vmatpush.bf16.msra.mxu1 %v1475_v58  ;;  %v282_v61 = vunpack.c.l.b16 %v250_v62  ;;  %v461_v62 = vpack.c.bf16 %v1087_v47, %v1086_v46  ;;  %v891_v47 = vld [vmem:[%s1801_s2 + $0x68] sm:$0xff]  ;;  %v890_v51 = vld [vmem:[%s1801_s2 + $0x60] sm:$0xff] }
 0x137   : > { %v1094_v52 = vld [vmem:[%s1800_s1 + $0xc0] sm:$0xff] }
 0x138   : > { %v1494_v9 = vpack.c.b16 %v282_v61, %v281_v5  ;;  %v744_v5 = vpack.c.bf16 %v1119_v57, %v1118_v56  ;;  %v1130_v56 = vld [vmem:[%s1800_s1 + $0x160] sm:$0xff]  ;;  %v1131_v57 = vld [vmem:[%s1800_s1 + $0x168] sm:$0xff] }
 0x13a   : > { %608 = vmatpush.bf16.msra.mxu1 %v1443_v39 }
 0x13c   : > { %471 = vrot.lane.b32.xlu1 %v1402_v0, %s1207_s26  ;;  %485 = vrot.lane.b32.xlu0 %v442_v50, %s1207_s26  ;;  %v1499_v0 = vpack.c.b16 %v280_v10, %v279_v11  ;;  %v350_v50 = vld [vmem:[%s1800_s1 + $0x28] sm:$0xff]  ;;  %v880_v10 = vld [vmem:[%s1801_s2 + $0x10] sm:$0xff] }
 0x13d   : > { %v363_v54 = vpack.c.bf16 %v350_v50, %v349_v63  ;;  %v1088_v11 = vld [vmem:[%s1800_s1 + $0x90] sm:$0xff]  ;;  %v750_v50 = vpack.c.bf16 %v1131_v57, %v1130_v56 }
 0x13e   : > { %609 = vmatpush.bf16.msra.mxu1 %v1450_v40 }
 0x142   : > { %610 = vmatpush.bf16.msra.mxu1 %v1494_v9 }
 0x144   : > { %469 = vrot.lane.b32.xlu0 %v1404_v4, %s1207_s26  ;;  %896 = vperm.xlu1 %1187, %v878_v42   ;;  %v1125_v42 = vld [vmem:[%s1800_s1 + $0x138] sm:$0xff] }
 0x146   : > { %611 = vmatpush.bf16.msra.mxu1 %v1499_v0 }
 0x149   : > { %1110 = vmatmul.msk.bf16.vlgmr.msra.gmra.mxu1 %vm506_vm3, %v361_v28 }
 0x14c   : > { %754 = vrot.lane.b32.xlu0 %v1407_v7, %s1208_s27  ;;  %911 = vperm.xlu1 %1187, %v881_v8   ;;  %v1128_v8 = vld [vmem:[%s1800_s1 + $0x150] sm:$0xff] }
 0x154   : > { %906 = vperm.xlu0 %1189, %v880_v10   ;;  %v1129_v10 = vld [vmem:[%s1800_s1 + $0x158] sm:$0xff] }
 0x156   : > { %v480_v16 = vpop.permute.xlu2 %479 }
 0x159   : > { %1111 = vmatmul.msk.bf16.gmra.mxu1 %vm506_vm3, %v362_v38  ;;  %v360_v38 = vld [vmem:[%s1800_s1 + $0x78] sm:$0xff] }
 0x167   : > { %v765_v19 = vpop.permute.xlu2 %764 }
 0x169   : > { %1112 = vmatmul.msk.bf16.gmra.mxu1 %vm506_vm3, %v363_v54  ;;  %v1132_v54 = vld [vmem:[%s1800_s1 + $0x170] sm:$0xff] }
 0x178   : > { %v773_v22 = vpop.permute.xlu2 %772 }
 0x17e   : > { %v767_v13 = vpop.permute.xlu0 %766  ;;  %v484_v15 = vpop.permute.xlu1 %483 }
 0x17f   : > { %v1520_v29 = vsel %vm506_vm3, %v765_v19, %v767_v13  ;;  %v1101_v13 = vld [vmem:[%s1800_s1 + $0xf8] sm:$0xff] }
 0x180   : > { %v769_v7 = vpop.permute.xlu2 %768  ;;  %v468_v19 = vpack.c.bf16 %v1101_v13, %v1100_v12 }
 0x186   : > { %v482_v17 = vpop.permute.xlu0 %481  ;;  %v763_v18 = vpop.permute.xlu1 %762 }
 0x187   : > { %v497_v41 = vsel %vm493_vm1, %v482_v17, %v484_v15  ;;  %v1120_v15 = vld [vmem:[%s1800_s1 + $0x110] sm:$0xff] }
 0x188   : > { %v759_v34 = vpop.permute.xlu2 %758 }
 0x18e   : > { %v761_v20 = vpop.permute.xlu0 %760  ;;  %v478_v21 = vpop.permute.xlu1 %477 }
 0x18f   : > { %v1525_v6 = vsel %vm506_vm3, %v761_v20, %v763_v18  ;;  %v496_v44 = vsel %vm493_vm1, %v478_v21, %v480_v16  ;;  %v1121_v16 = vld [vmem:[%s1800_s1 + $0x118] sm:$0xff]  ;;  %v879_v21 = vld [vmem:[%s1801_s2 + $0x8] sm:$0xff] }
 0x190   : > { %v753_v55 = vpop.permute.xlu2 %752  ;;  %v745_v20 = vpack.c.bf16 %v1121_v16, %v1120_v15  ;;  %901 = vperm.xlu2 %1188, %v879_v21  }
 0x196   : > { %v775_v59 = vpop.permute.xlu0 %774  ;;  %v492_v4 = vpop.permute.xlu1 %491 }
 0x197   : > { %v1505_v48 = vsel %vm506_vm3, %v773_v22, %v775_v59  ;;  %v889_v22 = vld [vmem:[%s1801_s2 + $0x58] sm:$0xff]  ;;  %v882_v59 = vld [vmem:[%s1801_s2 + $0x20] sm:$0xff] }
 0x198   : > { %815 = vmatpush.bf16.msra.mxu2 %v1505_v48  ;;  %916 = vperm.xlu2 %1188, %v882_v59  }
 0x19e   : > { %v771_v23 = vpop.permute.xlu0 %770  ;;  %v488_v26 = vpop.permute.xlu1 %487 }
 0x19f   : > { %v1515_v27 = vsel %vm506_vm3, %v769_v7, %v771_v23  ;;  %v357_v7 = vld [vmem:[%s1800_s1 + $0x60] sm:$0xff]  ;;  %v358_v23 = vld [vmem:[%s1800_s1 + $0x68] sm:$0xff] }
 0x1a0   : > { %816 = vmatpush.bf16.msra.mxu2 %v1515_v27  ;;  %v367_v28 = vpack.c.bf16 %v358_v23, %v357_v7 }
 0x1a4   : > { %817 = vmatpush.bf16.msra.mxu2 %v1520_v29 }
 0x1a6   : > { %v490_v30 = vpop.permute.xlu0 %489  ;;  %v757_v33 = vpop.permute.xlu1 %756 }
 0x1a7   : > { %v499_v2 = vsel %vm493_vm1, %v490_v30, %v492_v4  ;;  %v1529_v35 = vsel %vm506_vm3, %v757_v33, %v759_v34  ;;  %v354_v4 = vld [vmem:[%s1800_s1 + $0x48] sm:$0xff]  ;;  %v746_v30 = vpack.c.bf16 %v1123_v25, %v1122_v24  ;;  %v1092_v33 = vld [vmem:[%s1800_s1 + $0xb0] sm:$0xff]  ;;  %v1093_v34 = vld [vmem:[%s1800_s1 + $0xb8] sm:$0xff] }
 0x1a8   : > { %533 = vmatpush.bf16.msra.mxu0 %v499_v2  ;;  %1150 = vmatpush.bf16.msra.mxu3 %v499_v2  ;;  %v892_v2 = vld [vmem:[%s1801_s2 + $0x70] sm:$0xff] }
 0x1a9   : > { %818 = vmatpush.bf16.msra.mxu2 %v1525_v6 }
 0x1ad   : > { %819 = vmatpush.bf16.msra.mxu2 %v1529_v35 }
 0x1ae   : > { %v486_v37 = vpop.permute.xlu0 %485  ;;  %v472_v49 = vpop.permute.xlu1 %471 }
 0x1af   : > { %v498_v32 = vsel %vm493_vm1, %v486_v37, %v488_v26  ;;  %v359_v37 = vld [vmem:[%s1800_s1 + $0x70] sm:$0xff] }
 0x1b0   : > { %534 = vmatpush.bf16.msra.mxu0 %v498_v32  ;;  %1151 = vmatpush.bf16.msra.mxu3 %v498_v32  ;;  %v887_v32 = vld [vmem:[%s1801_s2 + $0x48] sm:$0xff] }
 0x1b4   : > { %535 = vmatpush.bf16.msra.mxu0 %v497_v41  ;;  %1152 = vmatpush.bf16.msra.mxu3 %v497_v41  ;;  %v1124_v41 = vld [vmem:[%s1800_s1 + $0x130] sm:$0xff] }
 0x1b5   : > { %v747_v46 = vpack.c.bf16 %v1125_v42, %v1124_v41 }
 0x1b6   : > { %v470_v43 = vpop.permute.xlu0 %469 }
 0x1b7   : > { %v494_v1 = vsel %vm493_vm1, %v470_v43, %v472_v49  ;;  %v893_v49 = vld [vmem:[%s1801_s2 + $0x78] sm:$0xff] }
 0x1b8   : > { %536 = vmatpush.bf16.msra.mxu0 %v496_v44  ;;  %1153 = vmatpush.bf16.msra.mxu3 %v496_v44  ;;  %v464_v44 = vpack.c.bf16 %v1093_v34, %v1092_v33 }
 0x1bc   : > { %537 = vmatpush.bf16.msra.mxu0 %v495_v45  ;;  %1154 = vmatpush.bf16.msra.mxu3 %v495_v45  ;;  %v368_v45 = vpack.c.bf16 %v360_v38, %v359_v37 }
 0x1be   : > { %v755_v60 = vpop.permute.xlu0 %754 }
 0x1bf   : > { %v1572_v61 = vsel %vm506_vm3, %v753_v55, %v755_v60  ;;  %v1095_v55 = vld [vmem:[%s1800_s1 + $0xc8] sm:$0xff]  ;;  %v1126_v60 = vld [vmem:[%s1800_s1 + $0x140] sm:$0xff] }
 0x1c0   : > { %538 = vmatpush.bf16.msra.mxu0 %v494_v1  ;;  %1155 = vmatpush.bf16.msra.mxu3 %v494_v1  ;;  %v465_v63 = vpack.c.bf16 %v1095_v55, %v1094_v52 }
 0x1c1   : > { %820 = vmatpush.bf16.msra.mxu2 %v1572_v61 }
 0x1c3   : > { %1102 = vmatmul.msk.bf16.vlgmr.msra.gmra.mxu0 %vm506_vm3, %v461_v62  ;;  %1108 = vmatmul.msk.bf16.vlgmr.msra.gmra.mxu3 %vm506_vm3, %v467_v3  ;;  %v1127_v62 = vld [vmem:[%s1800_s1 + $0x148] sm:$0xff]  ;;  %v1097_v3 = vld [vmem:[%s1800_s1 + $0xd8] sm:$0xff] }
 0x1c4   : > { %1156 = vmatpush.bf16.msrb.mxu3 %v1465_v53  ;;  %1134 = vmatmul.msk.bf16.vlgmr.msra.gmra.mxu2 %vm506_vm3, %v744_v5  ;;  %v883_v53 = vld [vmem:[%s1801_s2 + $0x28] sm:$0xff]  ;;  %v748_v1 = vpack.c.bf16 %v1127_v62, %v1126_v60  ;;  %v1133_v5 = vld [vmem:[%s1800_s1 + $0x178] sm:$0xff] }
 0x1c5   : > { %921 = vperm.xlu1 %1187, %v883_v53  }
 0x1c6   : > { %v907_v25 = vpop.permute.xlu0 %906 }
 0x1c8   : > { %1157 = vmatpush.bf16.msrb.mxu3 %v1475_v58  ;;  %v352_v58 = vld [vmem:[%s1800_s1 + $0x38] sm:$0xff] }
 0x1c9   : > { %v364_v17 = vpack.c.bf16 %v352_v58, %v351_v14  ;;  %v749_v14 = vpack.c.bf16 %v1129_v10, %v1128_v8  ;;  %v613_v58 = vpop.f32.mrf.mxu1 }
 0x1cb   : > { %1113 = vmatmul.msk.bf16.gmra.mxu1 %vm506_vm3, %v364_v17 }
 0x1cc   : > { %1158 = vmatpush.bf16.msrb.mxu3 %v1443_v39  ;;  %v1089_v39 = vld [vmem:[%s1800_s1 + $0x98] sm:$0xff] }
 0x1cd   : > { %v462_v18 = vpack.c.bf16 %v1089_v39, %v1088_v11  ;;  %v751_v11 = vpack.c.bf16 %v1133_v5, %v1132_v54 }
 0x1d0   : > { %1159 = vmatpush.bf16.msrb.mxu3 %v1450_v40  ;;  %v886_v40 = vld [vmem:[%s1801_s2 + $0x40] sm:$0xff] }
 0x1d1   : > { %936 = vperm.xlu1 %1187, %v886_v40   ;;  %v615_v39 = vpop.f32.mrf.mxu1 }
 0x1d3   : > { %1103 = vmatmul.msk.bf16.gmra.mxu0 %vm506_vm3, %v462_v18  ;;  %1109 = vmatmul.msk.bf16.gmra.mxu3 %vm506_vm3, %v468_v19  ;;  %v897_v18 = vpop.permute.xlu1 %896 }
 0x1d4   : > { %1160 = vmatpush.bf16.msrb.mxu3 %v1494_v9  ;;  %1135 = vmatmul.msk.bf16.gmra.mxu2 %vm506_vm3, %v745_v20  ;;  %v1090_v9 = vld [vmem:[%s1800_s1 + $0xa0] sm:$0xff] }
 0x1d8   : > { %1161 = vmatpush.bf16.msrb.mxu3 %v1499_v0  ;;  %v353_v0 = vld [vmem:[%s1800_s1 + $0x40] sm:$0xff] }
 0x1d9   : > { %951 = vperm.xlu1 %1187, %v889_v22   ;;  %v365_v26 = vpack.c.bf16 %v354_v4, %v353_v0  ;;  %v618_v13 = vpop.f32.mrf.mxu1 }
 0x1db   : > { %1114 = vmatmul.msk.bf16.gmra.mxu1 %vm506_vm3, %v365_v26 }
 0x1dc   : > { %1162 = vmatpush.bf16.msra.mxu3 %v1505_v48  ;;  %v1091_v48 = vld [vmem:[%s1800_s1 + $0xa8] sm:$0xff] }
 0x1e0   : > { %1163 = vmatpush.bf16.msra.mxu3 %v1515_v27  ;;  %v463_v27 = vpack.c.bf16 %v1091_v48, %v1090_v9 }
 0x1e1   : > { %966 = vperm.xlu1 %1187, %v892_v2   ;;  %v620_v21 = vpop.f32.mrf.mxu1 }
 0x1e3   : > { %1104 = vmatmul.msk.bf16.gmra.mxu0 %vm506_vm3, %v463_v27  ;;  %1116 = vmatmul.msk.bf16.vlgmr.msrb.gmra.mxu3 %vm506_vm3, %v367_v28 }
 0x1e4   : > { %1164 = vmatpush.bf16.msra.mxu3 %v1520_v29  ;;  %1136 = vmatmul.msk.bf16.gmra.mxu2 %vm506_vm3, %v746_v30  ;;  %v885_v29 = vld [vmem:[%s1801_s2 + $0x38] sm:$0xff] }
 0x1e5   : > { %931 = vperm.xlu0 %1189, %v885_v29  }
 0x1e8   : > { %1165 = vmatpush.bf16.msra.mxu3 %v1525_v6  ;;  %v884_v6 = vld [vmem:[%s1801_s2 + $0x30] sm:$0xff] }
 0x1e9   : > { %926 = vperm.xlu2 %1188, %v884_v6   ;;  %v623_v27 = vpop.f32.mrf.mxu1 }
 0x1ea   : > { %v902_v0 = vpop.permute.xlu2 %901 }
 0x1ec   : > { %1166 = vmatpush.bf16.msra.mxu3 %v1529_v35  ;;  %v355_v35 = vld [vmem:[%s1800_s1 + $0x50] sm:$0xff] }
 0x1ed   : > { %946 = vperm.xlu0 %1189, %v888_v36   ;;  %v366_v43 = vpack.c.bf16 %v356_v31, %v355_v35  ;;  %v912_v35 = vpop.permute.xlu1 %911 }
 0x1ef   : > { %1115 = vmatmul.msk.bf16.gmra.mxu1 %vm506_vm3, %v366_v43 }
 0x1f0   : > { %1167 = vmatpush.bf16.msra.mxu3 %v1572_v61  ;;  %v1096_v61 = vld [vmem:[%s1800_s1 + $0xd0] sm:$0xff] }
 0x1f1   : > { %941 = vperm.xlu2 %1188, %v887_v32   ;;  %v466_v53 = vpack.c.bf16 %v1097_v3, %v1096_v61  ;;  %v625_v31 = vpop.f32.mrf.mxu1 }
 0x1f3   : > { %1105 = vmatmul.msk.bf16.gmra.mxu0 %vm506_vm3, %v464_v44  ;;  %1117 = vmatmul.msk.bf16.gmra.mxu3 %vm506_vm3, %v368_v45  ;;  %v917_v44 = vpop.permute.xlu2 %916 }
 0x1f4   : > { %1137 = vmatmul.msk.bf16.gmra.mxu2 %vm506_vm3, %v747_v46 }
 0x1f5   : > { %961 = vperm.xlu0 %1189, %v891_v47  }
 0x1f9   : > { %956 = vperm.xlu2 %1188, %v890_v51  }
 0x201   : > { %971 = vperm.xlu2 %1188, %v893_v49  }
 0x203   : > { %1106 = vmatmul.msk.bf16.gmra.mxu0 %vm506_vm3, %v465_v63  ;;  %1140 = vmatmul.msk.bf16.vlgmr.msra.gmra.mxu3 %vm506_vm3, %v750_v50 }
 0x204   : > { %1138 = vmatmul.msk.bf16.gmra.mxu2 %vm506_vm3, %v748_v1 }
 0x213   : > { %1107 = vmatmul.msk.bf16.gmra.mxu0 %vm506_vm3, %v466_v53  ;;  %1141 = vmatmul.msk.bf16.gmra.mxu3 %vm506_vm3, %v751_v11 }
 0x214   : > { %1139 = vmatmul.msk.bf16.gmra.mxu2 %vm506_vm3, %v749_v14 }
 0x237   : > { %v922_v57 = vpop.permute.xlu1 %921 }
 0x240   : > { %v540_v12 = vpop.f32.mrf.mxu0 }
 0x241   : > { %v614_v15 = vadd.f32 %v613_v58, %v540_v12 }
 0x243   : > { %v927_v60 = vpop.permute.xlu2 %926 }
 0x246   : > { %v1763_v16 = vpop.f32.mrf.mxu3 }
 0x247   : > { %v822_v17 = vpop.f32.mrf.mxu2 }
 0x248   : > { %v862_v19 = vadd.f32 %v822_v17, %v614_v15  ;;  %v542_v20 = vpop.f32.mrf.mxu0  ;;  %v628_v46 = vpop.f32.mrf.mxu1 }
 0x249   : > { %v616_v9 = vadd.f32 %v615_v39, %v542_v20 }
 0x24a   : > { %v974_v40 = vadd.f32 %v897_v18, %v862_v19 }
 0x24b   : > { %v942_v8 = vpop.permute.xlu2 %941 }
 0x24c   : > { %990 = vst [vmem:[%s1768_s7] sm:$0xff] %v974_v40 }
 0x24e   : > { %v1771_v22 = vpop.f32.mrf.mxu3 }
 0x24f   : > { %v824_v59 = vpop.f32.mrf.mxu2 }
 0x250   : > { %v863_v4 = vadd.f32 %v824_v59, %v616_v9  ;;  %v545_v48 = vpop.f32.mrf.mxu0  ;;  %v630_v63 = vpop.f32.mrf.mxu1 }
 0x251   : > { %v619_v23 = vadd.f32 %v618_v13, %v545_v48  ;;  %v937_v13 = vpop.permute.xlu1 %936 }
 0x252   : > { %v975_v7 = vadd.f32 %v902_v0, %v863_v4 }
 0x254   : > { %991 = vst [vmem:[%s1768_s7 + $0x8] sm:$0xff] %v975_v7 }
 0x256   : > { %v1774_v24 = vpop.f32.mrf.mxu3 }
 0x257   : > { %v827_v26 = vpop.f32.mrf.mxu2  ;;  %v932_v5 = vpop.permute.xlu0 %931 }
 0x258   : > { %v864_v28 = vadd.f32 %v827_v26, %v619_v23  ;;  %v547_v30 = vpop.f32.mrf.mxu0  ;;  %v633_v11 = vpop.f32.mrf.mxu1 }
 0x259   : > { %v621_v29 = vadd.f32 %v620_v21, %v547_v30  ;;  %v957_v21 = vpop.permute.xlu2 %956  ;;  %v952_v23 = vpop.permute.xlu1 %951 }
 0x25a   : > { %v976_v2 = vadd.f32 %v907_v25, %v864_v28 }
 0x25c   : > { %992 = vst [vmem:[%s1768_s7 + $0x10] sm:$0xff] %v976_v2 }
 0x25e   : > { %v1777_v6 = vpop.f32.mrf.mxu3 }
 0x25f   : > { %v829_v33 = vpop.f32.mrf.mxu2  ;;  %v947_v18 = vpop.permute.xlu0 %946 }
 0x260   : > { %v865_v34 = vadd.f32 %v829_v33, %v621_v29  ;;  %v550_v36 = vpop.f32.mrf.mxu0  ;;  %v635_v0 = vpop.f32.mrf.mxu1 }
 0x261   : > { %v624_v38 = vadd.f32 %v623_v27, %v550_v36 }
 0x262   : > { %v977_v37 = vadd.f32 %v912_v35, %v865_v34 }
 0x264   : > { %993 = vst [vmem:[%s1768_s7 + $0x18] sm:$0xff] %v977_v37 }
 0x266   : > { %v643_v32 = vpop.f32.mrf.mxu3 }
 0x267   : > { %v832_v41 = vpop.f32.mrf.mxu2  ;;  %v644_v17 = vadd.f32 %v643_v32, %v1763_v16  ;;  %v962_v28 = vpop.permute.xlu0 %961 }
 0x268   : > { %v866_v42 = vadd.f32 %v832_v41, %v624_v38  ;;  %v552_v43 = vpop.f32.mrf.mxu0  ;;  %v967_v38 = vpop.permute.xlu1 %966 }
 0x269   : > { %v626_v47 = vadd.f32 %v625_v31, %v552_v43 }
 0x26a   : > { %v978_v45 = vadd.f32 %v917_v44, %v866_v42 }
 0x26c   : > { %994 = vst [vmem:[%s1768_s7 + $0x20] sm:$0xff] %v978_v45  ;;  %v638_v34 = vpop.f32.mrf.mxu1 }
 0x26e   : > { %v645_v51 = vpop.f32.mrf.mxu3 }
 0x26f   : > { %v834_v52 = vpop.f32.mrf.mxu2  ;;  %v646_v7 = vadd.f32 %v645_v51, %v1771_v22 }
 0x270   : > { %v867_v55 = vadd.f32 %v834_v52, %v626_v47  ;;  %v555_v56 = vpop.f32.mrf.mxu0 }
 0x271   : > { %v629_v62 = vadd.f32 %v628_v46, %v555_v56 }
 0x272   : > { %v979_v49 = vadd.f32 %v922_v57, %v867_v55 }
 0x274   : > { %995 = vst [vmem:[%s1768_s7 + $0x28] sm:$0xff] %v979_v49  ;;  %v640_v45 = vpop.f32.mrf.mxu1 }
 0x276   : > { %v648_v50 = vpop.f32.mrf.mxu3 }
 0x277   : > { %v837_v1 = vpop.f32.mrf.mxu2  ;;  %v649_v35 = vadd.f32 %v648_v50, %v1774_v24  ;;  %v972_v24 = vpop.permute.xlu2 %971 }
 0x278   : > { %v868_v61 = vadd.f32 %v837_v1, %v629_v62  ;;  %v557_v3 = vpop.f32.mrf.mxu0 }
 0x279   : > { %v631_v10 = vadd.f32 %v630_v63, %v557_v3 }
 0x27a   : > { %v980_v54 = vadd.f32 %v927_v60, %v868_v61 }
 0x27c   : > { %996 = vst [vmem:[%s1768_s7 + $0x30] sm:$0xff] %v980_v54 }
 0x27e   : > { %v650_v53 = vpop.f32.mrf.mxu3 }
 0x27f   : > { %v839_v14 = vpop.f32.mrf.mxu2  ;;  %v651_v44 = vadd.f32 %v650_v53, %v1777_v6 }
 0x280   : > { %v869_v58 = vadd.f32 %v839_v14, %v631_v10  ;;  %v560_v39 = vpop.f32.mrf.mxu0 }
 0x281   : > { %v634_v15 = vadd.f32 %v633_v11, %v560_v39 }
 0x282   : > { %v981_v12 = vadd.f32 %v932_v5, %v869_v58 }
 0x284   : > { %997 = vst [vmem:[%s1768_s7 + $0x38] sm:$0xff] %v981_v12 }
 0x286   : > { %v852_v19 = vpop.f32.mrf.mxu3 }
 0x287   : > { %v842_v20 = vpop.f32.mrf.mxu2  ;;  %v874_v40 = vadd.f32 %v852_v19, %v644_v17 }
 0x288   : > { %v870_v9 = vadd.f32 %v842_v20, %v634_v15  ;;  %v562_v59 = vpop.f32.mrf.mxu0 }
 0x289   : > { %v986_v4 = vadd.f32 %v957_v21, %v874_v40  ;;  %v636_v25 = vadd.f32 %v635_v0, %v562_v59 }
 0x28a   : > { %v982_v48 = vadd.f32 %v937_v13, %v870_v9 }
 0x28b   : > { %1002 = vst [vmem:[%s1768_s7 + $0x60] sm:$0xff] %v986_v4 }
 0x28c   : > { %998 = vst [vmem:[%s1768_s7 + $0x40] sm:$0xff] %v982_v48 }
 0x28e   : > { %v854_v26 = vpop.f32.mrf.mxu3 }
 0x28f   : > { %v844_v16 = vpop.f32.mrf.mxu2  ;;  %v875_v27 = vadd.f32 %v854_v26, %v646_v7 }
 0x290   : > { %v871_v30 = vadd.f32 %v844_v16, %v636_v25  ;;  %v565_v29 = vpop.f32.mrf.mxu0 }
 0x291   : > { %v987_v2 = vadd.f32 %v962_v28, %v875_v27  ;;  %v639_v36 = vadd.f32 %v638_v34, %v565_v29 }
 0x292   : > { %v983_v33 = vadd.f32 %v942_v8, %v871_v30 }
 0x293   : > { %1003 = vst [vmem:[%s1768_s7 + $0x68] sm:$0xff] %v987_v2 }
 0x294   : > { %999 = vst [vmem:[%s1768_s7 + $0x48] sm:$0xff] %v983_v33 }
 0x296   : > { %v857_v31 = vpop.f32.mrf.mxu3 }
 0x297   : > { %v847_v22 = vpop.f32.mrf.mxu2  ;;  %v876_v37 = vadd.f32 %v857_v31, %v649_v35 }
 0x298   : > { %v872_v32 = vadd.f32 %v847_v22, %v639_v36  ;;  %v567_v43 = vpop.f32.mrf.mxu0 }
 0x299   : > { %v988_v41 = vadd.f32 %v967_v38, %v876_v37  ;;  %v641_v46 = vadd.f32 %v640_v45, %v567_v43 }
 0x29a   : > { %v984_v42 = vadd.f32 %v947_v18, %v872_v32 }
 0x29b   : > { %1004 = vst [vmem:[%s1768_s7 + $0x70] sm:$0xff] %v988_v41 }
 0x29c   : > { %1000 = vst [vmem:[%s1768_s7 + $0x50] sm:$0xff] %v984_v42 }
 0x29e   : > { %v859_v47 = vpop.f32.mrf.mxu3 }
 0x29f   : > { %v849_v51 = vpop.f32.mrf.mxu2  ;;  %v877_v52 = vadd.f32 %v859_v47, %v651_v44 }
 0x2a0   : > { %v873_v55 = vadd.f32 %v849_v51, %v641_v46 }
 0x2a1   : > { %v989_v56 = vadd.f32 %v972_v24, %v877_v52 }
 0x2a2   : > { %v985_v57 = vadd.f32 %v952_v23, %v873_v55 }
 0x2a3   : > { %1005 = vst [vmem:[%s1768_s7 + $0x78] sm:$0xff] %v989_v56 }
 0x2a4   : > { %1001 = vst [vmem:[%s1768_s7 + $0x58] sm:$0xff] %v985_v57 }
 0x2a5 PF: > { %s13_s12 = sadd.s32 1, %s1196_s12  }
 0x2a6   : > { %p10_p4 = scmp.ge.s32.totalorder %s13_s12, 4  }
 0x2a8   :  { %12 = sbr.rel (!%p10_p4) target bundleno = 1 (0x1), region = 64 }

// kernel: baseline_hr_forward.19
= control target key start
LH: loop header
LB: loop body
LE: loop exit
PB: predicated region body
PF: predicated region fallthrough
CT: control target
= control target key end

     0   :  { %s1637_s12 = smov 0   ;;  %s2781_s0 = inlined_call_operand.vmem [shape: f32[2,32,512], index: 0, kind: input, shape index: {}]   ;;  %s2782_s1 = inlined_call_operand.vmem [shape: f32[3,3,96], index: 1, kind: input, shape index: {}]   ;;  %s2783_s2 = inlined_call_operand.vmem [shape: f32[3,1], index: 2, kind: input, shape index: {}]   ;;  %s2784_s3 = inlined_call_operand.vmem [shape: f32[2,3,512], index: 3, kind: output, shape index: {}]  }
   0x1 LB: > { %s1496_s13 = sadd.s32 4294967295, %s1605_s12   ;;  %p1500_p0 = scmp.ge.s32.totalorder %s1605_s12, 1  ;;  %s1605_s12 = sphi %s1637_s12, %s13_s12  }
   0x2   : > { %p137_p1 = scmp.lt.s32.totalorder %s1605_s12, 3 }
   0x4   : > { %p138_p2 = pnand %p1500_p0, %p137_p1 }
   0x6   : > { %141 = sbr.rel (%p138_p2) target bundleno = 688 (0x2b0), region = 32 }
   0xb   : > { %p161_p3 = scmp.lt.s32.totalorder %s1496_s13, 1  ;;  %v281_v0 = vlaneseq  ;;  %v1607_v1 = vmov 0   ;;  %s1608_s18 = smov 33   ;;  %vm174_vm5 = vcmask 265216   ;;  %v2793_v36 = vmov 0 }
   0xc   : > { %1591 = vset.pattern.permute.xlu1 %v1607_v1  ;;  %1592 = vset.pattern.permute.xlu0 %v1607_v1  ;;  %s1609_s19 = smov 2   ;;  %177 = vst.msk [vmem:[#allocation2 + $0x28] sm:$0xf] %vm174_vm5, %v1607_v1  ;;  %s1610_s20 = smov 66   ;;  %v2795_v38 = vmov 0  ;;  %vm179_vm13 = vcmask 535816   ;;  %v1736_v62 = vunpack.c.l.b16 %v1607_v1  ;;  %v1739_v63 = vunpack.c.h.b16 %v1607_v1 }
   0xd   : > { %s2887_s13 = smov (!%p161_p3, %s1496_s13), 1  ;;  %v282_v2 = vand.u32 127, %v281_v0  ;;  %175 = vst.msk [vmem:[#allocation2] sm:$0xf] %vm174_vm5, %v1607_v1  ;;  %s1611_s21 = smov 34   ;;  %vm266_vm14 = vcmask 1043720  }
   0xe   : > { %s1561_s14 = sshll.u32 %s2887_s13, 7  ;;  %176 = vst.msk [vmem:[#allocation2 + $0x14] sm:$0xf] %vm174_vm5, %v1607_v1  ;;  %s1612_s22 = smov 32   ;;  %vm267_vm15 = vcmask 1047556  }
   0xf   : > { %s1653_s17 = scalar_lea.vmem %s2781_s0, %s1561_s14  ;;  %v283_v10 = vadd.s32 128, %v282_v2  ;;  %v290_v19 = vand.u32 31, %v282_v2  ;;  %v284_v24 = vadd.s32 256, %v282_v2  ;;  %v285_v25 = vadd.s32 384, %v282_v2  ;;  %178 = vst.msk [vmem:[#allocation2 + $0x3c] sm:$0xf] %vm174_vm5, %v1607_v1 }
  0x10   : > { %v192_v3 = vld [vmem:[%s1653_s17 + $0x40] sm:$0xff]  ;;  %v193_v4 = vld [vmem:[%s1653_s17 + $0x48] sm:$0xff]  ;;  %v194_v13 = vld [vmem:[%s1653_s17 + $0x50] sm:$0xff]  ;;  %s1613_s23 = smov 64   ;;  %182 = vst.msk [vmem:[#allocation2 + $0x38] sm:$0xf] %vm179_vm13, %v1607_v1 }
  0x11   : > { %v188_v5 = vld [vmem:[%s1653_s17 + $0x20] sm:$0xff]  ;;  %v204_v6 = vpack.c.bf16 %v193_v4, %v192_v3  ;;  %v189_v7 = vld [vmem:[%s1653_s17 + $0x28] sm:$0xff]  ;;  %v195_v14 = vld [vmem:[%s1653_s17 + $0x58] sm:$0xff]  ;;  %v297_v20 = vand.u32 31, %v283_v10  ;;  %vm338_vm0 = vcmp.ne.s32.totalorder %v290_v19, 31  ;;  %v304_v30 = vand.u32 31, %v284_v24 }
  0x12   : > { %v184_v8 = vld [vmem:[%s1653_s17] sm:$0xff]  ;;  %v185_v9 = vld [vmem:[%s1653_s17 + $0x8] sm:$0xff]  ;;  %v202_v11 = vpack.c.bf16 %v189_v7, %v188_v5  ;;  %v190_v15 = vld [vmem:[%s1653_s17 + $0x30] sm:$0xff]  ;;  %v205_v21 = vpack.c.bf16 %v195_v14, %v194_v13  ;;  %v311_v31 = vand.u32 31, %v285_v25  ;;  %vm334_vm7 = vcmp.ne.s32.totalorder %v290_v19, 0  ;;  %s1614_s24 = smov 127  }
  0x13   : > { %v200_v12 = vpack.c.bf16 %v185_v9, %v184_v8  ;;  %224 = vrot.lane.b32.xlu2 %v204_v6, %s1608_s18  ;;  %v191_v16 = vld [vmem:[%s1653_s17 + $0x38] sm:$0xff]  ;;  %v186_v17 = vld [vmem:[%s1653_s17 + $0x10] sm:$0xff]  ;;  %vm339_vm1 = vcmp.ne.s32.totalorder %v297_v20, 31  ;;  %v196_v28 = vld [vmem:[%s1653_s17 + $0x60] sm:$0xff]  ;;  %vm340_vm3 = vcmp.ne.s32.totalorder %v304_v30, 31  ;;  %vm335_vm8 = vcmp.ne.s32.totalorder %v297_v20, 0 }
  0x14   : > { %220 = vrot.lane.b32.xlu1 %v202_v11, %s1608_s18  ;;  %v187_v18 = vld [vmem:[%s1653_s17 + $0x18] sm:$0xff]  ;;  %v203_v22 = vpack.c.bf16 %v191_v16, %v190_v15  ;;  %vm380_vm2 = vmpackc.low %vm339_vm1, %vm338_vm0  ;;  %v198_v26 = vld [vmem:[%s1653_s17 + $0x70] sm:$0xff]  ;;  %vm341_vm4 = vcmp.ne.s32.totalorder %v311_v31, 31  ;;  %vm336_vm10 = vcmp.ne.s32.totalorder %v304_v30, 0  ;;  %vm337_vm11 = vcmp.ne.s32.totalorder %v311_v31, 0  ;;  %s1615_s25 = smov 126  }
  0x15   : > { %216 = vrot.lane.b32.xlu0 %v200_v12, %s1608_s18  ;;  %v201_v23 = vpack.c.bf16 %v187_v18, %v186_v17  ;;  %v199_v27 = vld [vmem:[%s1653_s17 + $0x78] sm:$0xff]  ;;  %v197_v29 = vld [vmem:[%s1653_s17 + $0x68] sm:$0xff]  ;;  %v382_v32 = vsel %vm380_vm2, 65537, %v1607_v1  ;;  %vm381_vm6 = vmpackc.low %vm341_vm4, %vm340_vm3  ;;  %180 = vst.msk [vmem:[#allocation2 + $0x10] sm:$0xf] %vm179_vm13, %v1607_v1  ;;  %vm240_vm0 = vcmask 269312  }
  0x16   : > { %v207_v33 = vpack.c.bf16 %v199_v27, %v198_v26  ;;  %v206_v34 = vpack.c.bf16 %v197_v29, %v196_v28  ;;  %v383_v35 = vsel %vm381_vm6, 65537, %v1607_v1  ;;  %vm1689_vm9 = vmpackc.low %vm335_vm8, %vm334_vm7  ;;  %181 = vst.msk [vmem:[#allocation2 + $0x24] sm:$0xf] %vm179_vm13, %v1607_v1  ;;  %vm2788_vm2 = vcmask 1043456   ;;  %s1616_s26 = smov 96   ;;  %s1562_s8 = sshll.u32 %s2887_s13, 4 }
  0x17   : > { %v2794_v36 = vsel %vm1689_vm9, 4294967295, %v2793_v36  ;;  %v627_v37 = vsel %vm1689_vm9, 65537, %v1607_v1  ;;  %vm1696_vm12 = vmpackc.low %vm337_vm11, %vm336_vm10  ;;  %183 = vst.msk [vmem:[#allocation2 + $0x4c] sm:$0xf] %vm179_vm13, %v1607_v1  ;;  %vm635_vm3 = vcmask 261120   ;;  %vm2787_vm8 = vcmask 523264   ;;  %s170_s11 = scalar_lea.vmem %s2784_s3, %s1562_s8 }
  0x18   : > { %v2796_v38 = vsel %vm1696_vm12, 4294967295, %v2795_v38  ;;  %v628_v39 = vsel %vm1696_vm12, 65537, %v1607_v1  ;;  %vm1709_vm1 = vmor %vm267_vm15, %vm266_vm14 }
  0x1b   : > { %226 = vrot.lane.b32.xlu2 %v205_v21, %s1608_s18 }
  0x1c   : > { %222 = vrot.lane.b32.xlu1 %v203_v22, %s1608_s18 }
  0x1d   : > { %218 = vrot.lane.b32.xlu0 %v201_v23, %s1608_s18 }
  0x23   : > { %384 = vrot.lane.b32.xlu2 %v382_v32, %s1609_s19 }
  0x24   : > { %230 = vrot.lane.b32.xlu1 %v207_v33, %s1608_s18 }
  0x25   : > { %228 = vrot.lane.b32.xlu0 %v206_v34, %s1608_s18 }
  0x2b   : > { %1095 = vrot.lane.b32.xlu2 %v383_v35, %s1610_s20 }
  0x2c   : > { %674 = vrot.lane.b32.xlu1 %v383_v35, %s1611_s21 }
  0x2d   : > { %386 = vrot.lane.b32.xlu0 %v383_v35, %s1609_s19 }
  0x33   : > { %629 = vrot.lane.b32.xlu2 %v627_v37, %s1612_s22 }
  0x34   : > { %1093 = vrot.lane.b32.xlu1 %v382_v32, %s1610_s20 }
  0x35   : > { %672 = vrot.lane.b32.xlu0 %v382_v32, %s1611_s21 }
  0x3b   : > { %1050 = vrot.lane.b32.xlu2 %v627_v37, %s1613_s23 }
  0x3d   : > { %631 = vrot.lane.b32.xlu0 %v628_v39, %s1612_s22 }
  0x45   : > { %1052 = vrot.lane.b32.xlu0 %v628_v39, %s1613_s23 }
  0x6d   : > { %v225_v40 = vpop.permute.xlu2 %224 }
  0x6e   : > { %v236_v41 = vrot.slane %v225_v40, 4 }
  0x70   : > { %v248_v43 = vsel %vm240_vm0, %v236_v41, %v225_v40 }
  0x71   : > { %275 = vst.msk [vmem:[#allocation2 + $0x28] sm:$0xff] %vm1709_vm1, %v248_v43 }
  0x75   : > { %v227_v44 = vpop.permute.xlu2 %226 }
  0x76   : > { %v237_v45 = vrot.slane %v227_v44, 4 }
  0x78   : > { %v249_v46 = vsel %vm2788_vm2, %v236_v41, %v237_v45  ;;  %277 = vst.msk [vmem:[#allocation2 + $0x38] sm:$0xf] %vm174_vm5, %v237_v45  ;;  %v1527_v37 = vld [vmem:[#allocation2 + $0x28] sm:$0xf] }
  0x79   : > { %v1719_v47 = vsel %vm240_vm0, %v249_v46, %v227_v44 }
  0x7a   : > { %276 = vst [vmem:[#allocation2 + $0x30] sm:$0xff] %v1719_v47 }
  0x7d   : > { %v1722_v48 = vpop.permute.xlu2 %384 }
  0x7e   : > { %v388_v44 = vrot.slane %v1722_v48, 4 }
  0x7f   : > { %v1543_v29 = vld [vmem:[#allocation2 + $0x38] sm:$0xf] }
  0x85   : > { %v1724_v49 = vpop.permute.xlu2 %1095 }
  0x86   : > { %v221_v50 = vpop.permute.xlu1 %220  ;;  %v1801_v45 = vrot.slane %v1724_v49, 4 }
  0x87   : > { %v217_v51 = vpop.permute.xlu0 %216  ;;  %v234_v52 = vrot.slane %v221_v50, 4 }
  0x88   : > { %v232_v53 = vrot.slane %v217_v51, 4 }
  0x89   : > { %v245_v54 = vsel %vm240_vm0, %v234_v52, %v221_v50 }
  0x8a   : > { %v241_v55 = vsel %vm240_vm0, %v232_v53, %v217_v51  ;;  %272 = vst.msk [vmem:[#allocation2 + $0x14] sm:$0xff] %vm1709_vm1, %v245_v54 }
  0x8b   : > { %269 = vst.msk [vmem:[#allocation2] sm:$0xff] %vm1709_vm1, %v241_v55 }
  0x8d   : > { %v1732_v56 = vpop.permute.xlu2 %629 }
  0x8e   : > { %v633_v57 = vrot.slane %v1732_v56, 4  ;;  %v223_v58 = vpop.permute.xlu1 %222 }
  0x8f   : > { %v219_v59 = vpop.permute.xlu0 %218  ;;  %v235_v60 = vrot.slane %v223_v58, 4 }
  0x90   : > { %v233_v61 = vrot.slane %v219_v59, 4  ;;  %v636_v0 = vsel %vm635_vm3, %v633_v57, %v1732_v56 }
  0x91   : > { %v639_v2 = vunpack.c.l.b16 %v636_v0  ;;  %v640_v3 = vunpack.c.h.b16 %v636_v0  ;;  %v246_v4 = vsel %vm2788_vm2, %v234_v52, %v235_v60  ;;  %274 = vst.msk [vmem:[#allocation2 + $0x24] sm:$0xf] %vm174_vm5, %v235_v60  ;;  %v1509_v6 = vld [vmem:[#allocation2 + $0x14] sm:$0xf0]  ;;  %v1565_v32 = vld [vmem:[#allocation2 + $0x10] sm:$0xf0] }
  0x92   : > { %v243_v5 = vsel %vm2788_vm2, %v232_v53, %v233_v61  ;;  %v1749_v7 = vsel %vm240_vm0, %v246_v4, %v223_v58  ;;  %271 = vst.msk [vmem:[#allocation2 + $0x10] sm:$0xf] %vm174_vm5, %v233_v61  ;;  %v1563_v8 = vld [vmem:[#allocation2 + $0x4] sm:$0xf]  ;;  %v1507_v31 = vld [vmem:[#allocation2] sm:$0xf]  ;;  %v1117_v61 = vunpack.c.l.b16 %v1801_v45 }
  0x93   : > { %v1752_v1 = vsel %vm240_vm0, %v243_v5, %v219_v59  ;;  %vm643_vm4 = vcmp.ne.s32.totalorder %v639_v2, %v1736_v62  ;;  %vm644_vm6 = vcmp.ne.s32.totalorder %v640_v3, %v1739_v63  ;;  %273 = vst [vmem:[#allocation2 + $0x1c] sm:$0xff] %v1749_v7  ;;  %v1512_v9 = vor.u32 %v1563_v8, %v1509_v6  ;;  %v1535_v5 = vld [vmem:[#allocation2 + $0x30] sm:$0xf]  ;;  %v1567_v6 = vld [vmem:[#allocation2 + $0x2c] sm:$0xf] }
  0x94   : > { %vm1758_vm7 = vmpackc.low %vm644_vm6, %vm643_vm4  ;;  %270 = vst [vmem:[#allocation2 + $0x8] sm:$0xff] %v1752_v1  ;;  %v1508_v42 = vor.u32 %v1565_v32, %v1507_v31  ;;  %vm2785_vm4 = vcmask 539648   ;;  %v1118_v8 = vunpack.c.h.b16 %v1801_v45 }
  0x95   : > { %511 = vrot.lane.b32.xlu2 %v1512_v9, %s1614_s24  ;;  %v1764_v11 = vpop.permute.xlu2 %1050 }
  0x96   : > { %v1054_v12 = vrot.slane %v1764_v11, 4  ;;  %v231_v13 = vpop.permute.xlu1 %230 }
  0x97   : > { %v229_v14 = vpop.permute.xlu0 %228  ;;  %v239_v15 = vrot.slane %v231_v13, 4 }
  0x98   : > { %v238_v16 = vrot.slane %v229_v14, 4  ;;  %v1057_v17 = vsel %vm2787_vm8, %v1054_v12, %v1764_v11  ;;  %v1571_v18 = vld [vmem:[#allocation2 + $0x20] sm:$0xf0] }
  0x99   : > { %v1060_v19 = vunpack.c.l.b16 %v1057_v17  ;;  %v1061_v20 = vunpack.c.h.b16 %v1057_v17  ;;  %280 = vst.msk [vmem:[#allocation2 + $0x4c] sm:$0xf] %vm174_vm5, %v239_v15  ;;  %v1523_v23 = vld [vmem:[#allocation2 + $0x10] sm:$0xf]  ;;  %vm390_vm5 = vcmask 15360  }
  0x9a   : > { %v251_v21 = vsel %vm240_vm0, %v238_v16, %v229_v14  ;;  %v252_v22 = vsel %vm2788_vm2, %v238_v16, %v239_v15  ;;  %v1524_v25 = vor.u32 %v1571_v18, %v1523_v23  ;;  %v1566_v54 = vld [vmem:[#allocation2 + $0x18] sm:$0xf0]  ;;  %v1817_v60 = vsel %vm390_vm5, %v388_v44, %v1722_v48  ;;  %v1840_v15 = vld [vmem:[#allocation2 + $0x10] sm:$0xf]  ;;  %v1842_v16 = vld [vmem:[#allocation2 + $0x24] sm:$0xf] }
  0x9b   : > { %v1775_v24 = vsel %vm240_vm0, %v252_v22, %v231_v13  ;;  %278 = vst.msk [vmem:[#allocation2 + $0x3c] sm:$0xff] %vm1709_vm1, %v251_v21  ;;  %vm1064_vm10 = vcmp.ne.s32.totalorder %v1060_v19, %v1736_v62  ;;  %vm1065_vm11 = vcmp.ne.s32.totalorder %v1061_v20, %v1739_v63  ;;  %vm2786_vm0 = vcmask 277504   ;;  %v1515_v53 = vld [vmem:[#allocation2 + $0x8] sm:$0xf]  ;;  %v1564_v19 = vld [vmem:[#allocation2 + $0xc] sm:$0xf] }
  0x9c   : > { %279 = vst [vmem:[#allocation2 + $0x44] sm:$0xff] %v1775_v24  ;;  %vm1782_vm13 = vmpackc.low %vm1065_vm11, %vm1064_vm10  ;;  %517 = vrot.lane.b32.xlu1 %v1524_v25, %s1614_s24  ;;  %v1516_v14 = vor.u32 %v1566_v54, %v1515_v53  ;;  %v1517_v20 = vld [vmem:[#allocation2 + $0x1c] sm:$0xf0]  ;;  %v394_v23 = vunpack.c.l.b16 %v1817_v60  ;;  %v1887_v54 = vld [vmem:[#allocation2 + $0x38] sm:$0xf] }
  0x9e   : > { %v1787_v27 = vpop.permute.xlu1 %674 }
  0x9f   : > { %v1789_v28 = vpop.permute.xlu0 %386  ;;  %v1795_v34 = vrot.slane %v1787_v27, 4 }
  0xa0   : > { %v1792_v30 = vrot.slane %v1789_v28, 4  ;;  %v1572_v33 = vld [vmem:[#allocation2 + $0x48] sm:$0xf0] }
  0xa1   : > { %v1544_v41 = vor.u32 %v1572_v33, %v1543_v29  ;;  %v696_v46 = vunpack.c.l.b16 %v1795_v34  ;;  %v697_v50 = vunpack.c.h.b16 %v1795_v34 }
  0xa2   : > { %v408_v35 = vunpack.c.l.b16 %v1792_v30  ;;  %v1569_v39 = vld [vmem:[#allocation2 + $0x38] sm:$0xf0]  ;;  %v409_v40 = vunpack.c.h.b16 %v1792_v30  ;;  %v1529_v59 = vld [vmem:[#allocation2 + $0x3c] sm:$0xf0] }
  0xa3   : > { %v1528_v43 = vor.u32 %v1569_v39, %v1527_v37  ;;  %527 = vrot.lane.b32.xlu0 %v1544_v41, %s1614_s24  ;;  %v1570_v58 = vld [vmem:[#allocation2 + $0x40] sm:$0xf0]  ;;  %vm1825_vm6 = vcmp.ne.s32.totalorder %v696_v46, %v1736_v62  ;;  %vm1830_vm10 = vcmp.ne.s32.totalorder %v697_v50, %v1739_v63  ;;  %v1532_v13 = vor.u32 %v1567_v6, %v1529_v59  ;;  %v1537_v29 = vld [vmem:[#allocation2 + $0x44] sm:$0xf0]  ;;  %v1568_v41 = vld [vmem:[#allocation2 + $0x34] sm:$0xf] }
  0xa4   : > { %509 = vrot.lane.b32.xlu1 %v1508_v42, %s1614_s24  ;;  %vm412_vm14 = vcmp.ne.s32.totalorder %v408_v35, %v1736_v62  ;;  %vm413_vm15 = vcmp.ne.s32.totalorder %v409_v40, %v1739_v63  ;;  %v1536_v9 = vor.u32 %v1570_v58, %v1535_v5  ;;  %vm1855_vm11 = vmpackc.low %vm1830_vm10, %vm1825_vm6  ;;  %vm1874_vm10 = vcmp.ne.s32.totalorder %v1118_v8, %v1739_v63  ;;  %v1889_v58 = vld [vmem:[#allocation2 + $0x4c] sm:$0xf]  ;;  %v1905_v8 = vld [vmem:[#allocation2 + $0x3c] sm:$0xff] }
  0xa5   : > { %519 = vrot.lane.b32.xlu2 %v1528_v43, %s1614_s24  ;;  %vm1820_vm1 = vmpackc.low %vm413_vm15, %vm412_vm14  ;;  %vm1862_vm14 = vcmp.ne.s32.totalorder %v1117_v61, %v1736_v62  ;;  %v1520_v37 = vor.u32 %v1564_v19, %v1517_v20  ;;  %v392_v42 = vsel %vm2788_vm2, %v388_v44, %v1792_v30  ;;  %v1540_v50 = vor.u32 %v1568_v41, %v1537_v29  ;;  %v1903_v6 = vld [vmem:[#allocation2 + $0x28] sm:$0xff] }
  0xa6   : > { %v1810_v51 = vpop.permute.xlu1 %1093  ;;  %v417_v21 = vsel %vm1820_vm1, %v1840_v15, 0  ;;  %v420_v22 = vsel %vm1820_vm1, %v1842_v16, 0  ;;  %v705_v53 = vsel %vm1855_vm11, %v1840_v15, 0  ;;  %v708_v61 = vsel %vm1855_vm11, %v1842_v16, 0 }
  0xa7   : > { %v1812_v52 = vpop.permute.xlu0 %672  ;;  %v1097_v48 = vrot.slane %v1810_v51, 4  ;;  %v562_v39 = vunpack.c.l.b16 %v417_v21  ;;  %v567_v40 = vunpack.c.l.b16 %v420_v22  ;;  %v711_v30 = vsel %vm1855_vm11, %v1887_v54, 0 }
  0xa8   : > { %v676_v55 = vrot.slane %v1812_v52, 4  ;;  %v714_v44 = vsel %vm1855_vm11, %v1889_v58, 0  ;;  %vm1922_vm11 = vmpackc.low %vm1874_vm10, %vm1862_vm14  ;;  %v395_v19 = vunpack.c.h.b16 %v1817_v60  ;;  %v393_v20 = vsel %vm390_vm5, %v392_v42, %v1789_v28  ;;  %v2033_v60 = vld [vmem:[#allocation2] sm:$0xff] }
  0xa9   : > { %v1100_v32 = vsel %vm2785_vm4, %v1097_v48, %v1810_v51  ;;  %v773_v22 = vunpack.c.l.b16 %v705_v53  ;;  %v778_v25 = vunpack.c.l.b16 %v708_v61  ;;  %v788_v33 = vunpack.c.l.b16 %v714_v44 }
  0xaa   : > { %v679_v4 = vsel %vm2786_vm0, %v676_v55, %v1812_v52  ;;  %v1103_v59 = vunpack.c.l.b16 %v1100_v32  ;;  %v1104_v2 = vunpack.c.h.b16 %v1100_v32  ;;  %v783_v32 = vunpack.c.l.b16 %v711_v30 }
  0xab   : > { %v682_v17 = vunpack.c.l.b16 %v679_v4  ;;  %v683_v18 = vunpack.c.h.b16 %v679_v4  ;;  %521 = vrot.lane.b32.xlu0 %v1532_v13, %s1614_s24  ;;  %v582_v13 = vpack.c.b16 %v567_v40, %v562_v39  ;;  %vm1957_vm0 = vcmp.ne.s32.totalorder %v394_v23, %v1736_v62 }
  0xac   : > { %523 = vrot.lane.b32.xlu1 %v1536_v9, %s1614_s24  ;;  %vm1938_vm14 = vcmp.ne.s32.totalorder %v1103_v59, %v1736_v62  ;;  %vm1943_vm10 = vcmp.ne.s32.totalorder %v1104_v2, %v1739_v63  ;;  %v1126_v41 = vsel %vm1922_vm11, %v1840_v15, 0  ;;  %v1132_v42 = vsel %vm1922_vm11, %v1887_v54, 0 }
  0xad   : > { %vm686_vm15 = vcmp.ne.s32.totalorder %v682_v17, %v1736_v62  ;;  %vm687_vm6 = vcmp.ne.s32.totalorder %v683_v18, %v1739_v63  ;;  %513 = vrot.lane.b32.xlu2 %v1516_v14, %s1614_s24  ;;  %v1129_v53 = vsel %vm1922_vm11, %v1842_v16, 0  ;;  %v1135_v23 = vsel %vm1922_vm11, %v1889_v58, 0 }
  0xae   : > { %vm1880_vm4 = vmpackc.low %vm687_vm6, %vm686_vm15  ;;  %v680_v61 = vsel %vm2788_vm2, %v676_v55, %v1795_v34 }
  0xaf   : > { %v632_v35 = vpop.permute.xlu0 %631  ;;  %v1911_v14 = vsel %vm1880_vm4, %v1903_v6, 0  ;;  %v1916_v56 = vsel %vm1880_vm4, %v1905_v8, 0 }
  0xb0   : > { %v634_v46 = vrot.slane %v632_v35, 4 }
  0xb2   : > { %v637_v3 = vsel %vm2788_vm2, %v633_v57, %v634_v46  ;;  %v653_v4 = vunpack.c.l.b16 %v634_v46  ;;  %v654_v5 = vunpack.c.h.b16 %v634_v46  ;;  %v401_v46 = vunpack.c.l.b16 %v393_v20 }
  0xb3   : > { %v638_v9 = vsel %vm635_vm3, %v637_v3, %v632_v35  ;;  %515 = vrot.lane.b32.xlu0 %v1520_v37, %s1614_s24  ;;  %v780_v35 = vunpack.c.h.b16 %v1911_v14  ;;  %v785_v37 = vunpack.c.h.b16 %v1916_v56 }
  0xb4   : > { %v646_v17 = vunpack.c.l.b16 %v638_v9  ;;  %v647_v18 = vunpack.c.h.b16 %v638_v9  ;;  %vm657_vm3 = vcmp.ne.s32.totalorder %v653_v4, %v1736_v62  ;;  %vm658_vm15 = vcmp.ne.s32.totalorder %v654_v5, %v1739_v63  ;;  %596 = vrot.lane.b32.xlu1 %v582_v13, %s1615_s25 }
  0xb5   : > { %vm1931_vm6 = vmpackc.low %vm658_vm15, %vm657_vm3  ;;  %525 = vrot.lane.b32.xlu2 %v1540_v50, %s1614_s24  ;;  %v402_v50 = vunpack.c.h.b16 %v393_v20  ;;  %v793_v4 = vpack.c.b16 %v778_v25, %v773_v22  ;;  %v798_v5 = vpack.c.b16 %v788_v33, %v783_v32  ;;  %v795_v9 = vpack.c.b16 %v785_v37, %v780_v35 }
  0xb6   : > { %vm650_vm5 = vcmp.ne.s32.totalorder %v646_v17, %v1736_v62  ;;  %vm651_vm3 = vcmp.ne.s32.totalorder %v647_v18, %v1739_v63  ;;  %v1194_v18 = vunpack.c.l.b16 %v1126_v41  ;;  %v1199_v20 = vunpack.c.l.b16 %v1129_v53 }
  0xb7   : > { %vm1950_vm15 = vmpackc.low %vm651_vm3, %vm650_vm5  ;;  %v1053_v31 = vpop.permute.xlu0 %1052  ;;  %vm406_vm9 = vcmp.ne.s32.totalorder %v402_v50, %v1739_v63  ;;  %v1209_v22 = vunpack.c.l.b16 %v1135_v23  ;;  %v2069_v53 = vsel %vm1880_vm4, %v2033_v60, 0 }
  0xb8   : > { %v1055_v40 = vrot.slane %v1053_v31, 4  ;;  %vm1977_vm5 = vmpackc.low %vm1943_vm10, %vm1938_vm14  ;;  %vm1992_vm10 = vcmp.ne.s32.totalorder %v395_v19, %v1739_v63  ;;  %v1214_v37 = vpack.c.b16 %v1199_v20, %v1194_v18  ;;  %v769_v43 = vunpack.c.l.b16 %v2069_v53 }
  0xb9   : > { %v2005_v52 = vsel %vm1977_vm5, %v1903_v6, 0  ;;  %v2010_v55 = vsel %vm1977_vm5, %v1905_v8, 0  ;;  %v426_v18 = vsel %vm1820_vm1, %v1889_v58, 0  ;;  %v667_v35 = vsel %vm1950_vm15, %v1719_v47, 0 }
  0xba   : > { %v1058_v30 = vsel %vm2788_vm2, %v1054_v12, %v1055_v40  ;;  %v1074_v44 = vunpack.c.l.b16 %v1055_v40  ;;  %v1075_v2 = vunpack.c.h.b16 %v1055_v40  ;;  %v1204_v12 = vunpack.c.l.b16 %v1132_v42 }
  0xbb   : > { %v1059_v3 = vsel %vm2787_vm8, %v1058_v30, %v1053_v31  ;;  %807 = vrot.lane.b32.xlu0 %v793_v4, %s1615_s25  ;;  %vm405_vm2 = vcmp.ne.s32.totalorder %v401_v46, %v1736_v62  ;;  %v1201_v25 = vunpack.c.h.b16 %v2005_v52  ;;  %v1206_v29 = vunpack.c.h.b16 %v2010_v55  ;;  %v2035_v31 = vld [vmem:[#allocation2 + $0x14] sm:$0xff] }
  0xbc   : > { %v1067_v13 = vunpack.c.l.b16 %v1059_v3  ;;  %v1068_v57 = vunpack.c.h.b16 %v1059_v3  ;;  %vm1078_vm11 = vcmp.ne.s32.totalorder %v1074_v44, %v1736_v62  ;;  %vm1079_vm14 = vcmp.ne.s32.totalorder %v1075_v2, %v1739_v63  ;;  %817 = vrot.lane.b32.xlu1 %v798_v5, %s1615_s25 }
  0xbd   : > { %vm1996_vm3 = vmpackc.low %vm1079_vm14, %vm1078_vm11  ;;  %vm2835_vm11 = vcmask 277504   ;;  %811 = vrot.lane.b32.xlu2 %v795_v9, %s1615_s25  ;;  %v1219_v39 = vpack.c.b16 %v1209_v22, %v1204_v12  ;;  %v1216_v46 = vpack.c.b16 %v1206_v29, %v1201_v25  ;;  %v2074_v23 = vsel %vm1880_vm4, %v2035_v31, 0 }
  0xbe   : > { %v681_v17 = vsel %vm2835_vm11, %v680_v61, %v1787_v27  ;;  %vm1071_vm14 = vcmp.ne.s32.totalorder %v1067_v13, %v1736_v62  ;;  %vm1072_vm8 = vcmp.ne.s32.totalorder %v1068_v57, %v1739_v63  ;;  %vm2027_vm11 = vmpackc.low %vm1992_vm10, %vm1957_vm0  ;;  %vm2842_vm0 = vcmask 1043456  }
  0xbf   : > { %vm2019_vm12 = vmpackc.low %vm1072_vm8, %vm1071_vm14  ;;  %v689_v32 = vunpack.c.l.b16 %v681_v17  ;;  %v690_v33 = vunpack.c.h.b16 %v681_v17  ;;  %v415_v40 = vsel %vm2027_vm11, %v2033_v60, 0  ;;  %v418_v41 = vsel %vm2027_vm11, %v2035_v31, 0 }
  0xc0   : > { %vm2037_vm8 = vmpackc.low %vm406_vm9, %vm405_vm2  ;;  %v1101_v42 = vsel %vm2842_vm0, %v1097_v48, %v1801_v45  ;;  %v558_v45 = vunpack.c.l.b16 %v415_v40  ;;  %v563_v48 = vunpack.c.l.b16 %v418_v41  ;;  %v559_v61 = vunpack.c.h.b16 %v415_v40 }
  0xc1   : > { %vm693_vm9 = vcmp.ne.s32.totalorder %v689_v32, %v1736_v62  ;;  %vm694_vm2 = vcmp.ne.s32.totalorder %v690_v33, %v1739_v63  ;;  %v2058_v50 = vsel %vm2037_vm8, %v1752_v1, 0  ;;  %v2063_v51 = vsel %vm2037_vm8, %v1749_v7, 0 }
  0xc2   : > { %v564_v30 = vunpack.c.h.b16 %v418_v41  ;;  %vm2843_vm10 = vcmask 539648   ;;  %vm2078_vm14 = vmpackc.low %vm694_vm2, %vm693_vm9  ;;  %v560_v3 = vunpack.c.l.b16 %v2058_v50  ;;  %v565_v4 = vunpack.c.l.b16 %v2063_v51 }
  0xc3   : > { %1228 = vrot.lane.b32.xlu0 %v1214_v37, %s1615_s25  ;;  %v1102_v44 = vsel %vm2843_vm10, %v1101_v42, %v1724_v49  ;;  %v779_v5 = vunpack.c.l.b16 %v1911_v14  ;;  %v784_v9 = vunpack.c.l.b16 %v1916_v56  ;;  %v774_v13 = vunpack.c.l.b16 %v2074_v23 }
  0xc4   : > { %1238 = vrot.lane.b32.xlu1 %v1219_v39, %s1615_s25  ;;  %v578_v57 = vpack.c.b16 %v563_v48, %v558_v45  ;;  %v423_v49 = vsel %vm1820_vm1, %v1887_v54, 0  ;;  %v1110_v34 = vunpack.c.l.b16 %v1102_v44  ;;  %v579_v12 = vpack.c.b16 %v564_v30, %v559_v61 }
  0xc5   : > { %1232 = vrot.lane.b32.xlu2 %v1216_v46, %s1615_s25  ;;  %v2094_v17 = vsel %vm2078_vm14, %v1719_v47, 0  ;;  %v2099_v14 = vsel %vm2078_vm14, %v1775_v24, 0  ;;  %v580_v56 = vpack.c.b16 %v565_v4, %v560_v3  ;;  %v2104_v20 = vunpack.c.l.b16 %v423_v49 }
  0xc6   : > { %v421_v22 = vsel %vm2027_vm11, %v1903_v6, 0  ;;  %v1111_v25 = vunpack.c.h.b16 %v1102_v44  ;;  %v794_v29 = vpack.c.b16 %v784_v9, %v779_v5  ;;  %v789_v32 = vpack.c.b16 %v774_v13, %v769_v43 }
  0xc7   : > { %v2111_v33 = vunpack.c.l.b16 %v426_v18  ;;  %v781_v0 = vunpack.c.l.b16 %v2094_v17  ;;  %v786_v37 = vunpack.c.l.b16 %v2099_v14  ;;  %v2119_v39 = vsel %vm1977_vm5, %v2033_v60, 0 }
  0xc8   : > { %v668_v40 = vsel %vm1931_vm6, %v1887_v54, 0  ;;  %vm2125_vm1 = vcmp.ne.s32.totalorder %v1110_v34, %v1736_v62  ;;  %v671_v46 = vsel %vm1931_vm6, %v1889_v58, 0  ;;  %v662_v48 = vsel %vm1931_vm6, %v1840_v15, 0 }
  0xc9   : > { %v587_v42 = vpack.c.b16 %v2111_v33, %v2104_v20  ;;  %v2134_v45 = vunpack.c.l.b16 %v668_v40  ;;  %v2142_v62 = vsel %vm1977_vm5, %v2035_v31, 0  ;;  %v2144_v61 = vunpack.c.l.b16 %v671_v46 }
  0xca   : > { %v665_v30 = vsel %vm1931_vm6, %v1842_v16, 0  ;;  %v2149_v44 = vunpack.c.l.b16 %v662_v48  ;;  %v2154_v3 = vsel %vm2078_vm14, %v1752_v1, 0  ;;  %v424_v59 = vsel %vm2027_vm11, %v1905_v8, 0 }
  0xcb   : > { %588 = vrot.lane.b32.xlu0 %v578_v57, %s1615_s25  ;;  %v2156_v4 = vunpack.c.l.b16 %v665_v30  ;;  %v666_v5 = vsel %vm1758_vm7, %v1903_v6, 0  ;;  %v756_v21 = vpack.c.b16 %v2144_v61, %v2134_v45  ;;  %v569_v9 = vunpack.c.h.b16 %v421_v22 }
  0xcc   : > { %590 = vrot.lane.b32.xlu1 %v579_v12, %s1615_s25  ;;  %v574_v43 = vunpack.c.h.b16 %v424_v59  ;;  %v669_v13 = vsel %vm1758_vm7, %v1905_v8, 0  ;;  %v2172_v57 = vsel %vm2078_vm14, %v1749_v7, 0  ;;  %v737_v49 = vunpack.c.l.b16 %v666_v5 }
  0xcd   : > { %592 = vrot.lane.b32.xlu2 %v580_v56, %s1615_s25  ;;  %v742_v34 = vunpack.c.l.b16 %v669_v13  ;;  %vm2177_vm4 = vcmp.ne.s32.totalorder %v1111_v25, %v1739_v63  ;;  %v796_v56 = vpack.c.b16 %v786_v37, %v781_v0  ;;  %v770_v18 = vunpack.c.h.b16 %v2069_v53 }
  0xce   : > { %v2182_v40 = vpack.c.b16 %v574_v43, %v569_v9  ;;  %v775_v2 = vunpack.c.h.b16 %v2074_v23  ;;  %v1190_v46 = vunpack.c.l.b16 %v2119_v39  ;;  %v1195_v48 = vunpack.c.l.b16 %v2142_v62  ;;  %vm2208_vm6 = vmpackc.low %vm2177_vm4, %vm2125_vm1 }
  0xcf   : > { %v2189_v30 = vpack.c.b16 %v742_v34, %v737_v49  ;;  %v772_v63 = vunpack.c.h.b16 %v2154_v3  ;;  %v777_v53 = vunpack.c.h.b16 %v2172_v57  ;;  %v568_v25 = vunpack.c.l.b16 %v421_v22 }
  0xd0   : > { %v573_v0 = vunpack.c.l.b16 %v424_v59  ;;  %v738_v37 = vunpack.c.h.b16 %v666_v5  ;;  %v1087_v23 = vsel %vm1782_vm13, %v1903_v6, 0  ;;  %v790_v59 = vpack.c.b16 %v775_v2, %v770_v18 }
  0xd1   : > { %v1158_v43 = vunpack.c.l.b16 %v1087_v23  ;;  %v792_v5 = vpack.c.b16 %v777_v53, %v772_v63  ;;  %v1092_v41 = vsel %vm1996_vm3, %v1889_v58, 0  ;;  %v1083_v12 = vsel %vm1996_vm3, %v1840_v15, 0 }
  0xd2   : > { %v2200_v9 = vpack.c.b16 %v573_v0, %v568_v25  ;;  %v1089_v25 = vsel %vm1996_vm3, %v1887_v54, 0  ;;  %v1086_v18 = vsel %vm1996_vm3, %v1842_v16, 0  ;;  %v1131_v54 = vsel %vm2208_vm6, %v1719_v47, 0 }
  0xd3   : > { %799 = vrot.lane.b32.xlu0 %v789_v32, %s1615_s25  ;;  %v1090_v32 = vsel %vm1782_vm13, %v1905_v8, 0  ;;  %v1210_v8 = vpack.c.b16 %v1195_v48, %v1190_v46  ;;  %v1134_v58 = vsel %vm2208_vm6, %v1775_v24, 0  ;;  %v2238_v2 = vunpack.c.l.b16 %v1092_v41 }
  0xd4   : > { %809 = vrot.lane.b32.xlu1 %v794_v29, %s1615_s25  ;;  %v743_v29 = vunpack.c.h.b16 %v669_v13  ;;  %v1163_v49 = vunpack.c.l.b16 %v1090_v32  ;;  %v1164_v27 = vunpack.c.h.b16 %v1090_v32  ;;  %v1200_v15 = vunpack.c.l.b16 %v2005_v52 }
  0xd5   : > { %813 = vrot.lane.b32.xlu2 %v796_v56, %s1615_s25  ;;  %v1159_v56 = vunpack.c.h.b16 %v1087_v23  ;;  %v1205_v16 = vunpack.c.l.b16 %v2010_v55  ;;  %v561_v11 = vunpack.c.h.b16 %v2058_v50  ;;  %v566_v46 = vunpack.c.h.b16 %v2063_v51 }
  0xd6   : > { %v2202_v34 = vpack.c.b16 %v743_v29, %v738_v37  ;;  %v2212_v6 = vpack.c.b16 %v1163_v49, %v1158_v43  ;;  %v2247_v63 = vunpack.c.l.b16 %v1083_v12  ;;  %v1202_v53 = vunpack.c.l.b16 %v1131_v54 }
  0xd7   : > { %v2214_v13 = vpack.c.b16 %v1164_v27, %v1159_v56  ;;  %v2236_v27 = vunpack.c.l.b16 %v1089_v25  ;;  %v1207_v0 = vunpack.c.l.b16 %v1134_v58  ;;  %v2249_v37 = vunpack.c.l.b16 %v1086_v18 }
  0xd8   : > { %v1215_v29 = vpack.c.b16 %v1205_v16, %v1200_v15  ;;  %v581_v23 = vpack.c.b16 %v566_v46, %v561_v11  ;;  %v1125_v55 = vsel %vm2208_vm6, %v1752_v1, 0  ;;  %v1128_v50 = vsel %vm2208_vm6, %v1749_v7, 0 }
  0xd9   : > { %v1177_v48 = vpack.c.b16 %v2238_v2, %v2236_v27  ;;  %v1172_v52 = vpack.c.b16 %v2249_v37, %v2247_v63  ;;  %v1217_v32 = vpack.c.b16 %v1207_v0, %v1202_v53  ;;  %v1191_v51 = vunpack.c.h.b16 %v2119_v39 }
  0xda   : > { %v1196_v43 = vunpack.c.h.b16 %v2142_v62  ;;  %v782_v49 = vunpack.c.h.b16 %v2094_v17  ;;  %v787_v56 = vunpack.c.h.b16 %v2099_v14  ;;  %v422_v22 = vsel %vm2037_vm8, %v1719_v47, 0 }
  0xdb   : > { %1220 = vrot.lane.b32.xlu0 %v1210_v8, %s1615_s25  ;;  %v1198_v8 = vunpack.c.h.b16 %v1128_v50  ;;  %v425_v39 = vsel %vm2037_vm8, %v1775_v24, 0  ;;  %v771_v17 = vunpack.c.l.b16 %v2154_v3  ;;  %v776_v14 = vunpack.c.l.b16 %v2172_v57 }
  0xdc   : > { %801 = vrot.lane.b32.xlu1 %v790_v59, %s1615_s25  ;;  %v1193_v59 = vunpack.c.h.b16 %v1125_v55  ;;  %v797_v25 = vpack.c.b16 %v787_v56, %v782_v49  ;;  %v1203_v62 = vunpack.c.h.b16 %v1131_v54  ;;  %v1208_v12 = vunpack.c.h.b16 %v1134_v58 }
  0xdd   : > { %805 = vrot.lane.b32.xlu2 %v792_v5, %s1615_s25  ;;  %v1211_v5 = vpack.c.b16 %v1196_v43, %v1191_v51  ;;  %v570_v18 = vunpack.c.l.b16 %v422_v22  ;;  %v575_v15 = vunpack.c.l.b16 %v425_v39  ;;  %v791_v16 = vpack.c.b16 %v776_v14, %v771_v17 }
  0xde   : > { %v1213_v41 = vpack.c.b16 %v1198_v8, %v1193_v59  ;;  %v1218_v11 = vpack.c.b16 %v1208_v12, %v1203_v62  ;;  %v670_v3 = vsel %vm1950_vm15, %v1775_v24, 0  ;;  %v1192_v57 = vunpack.c.l.b16 %v1125_v55 }
  0xdf   : > { %v585_v46 = vpack.c.b16 %v575_v15, %v570_v18  ;;  %v1197_v54 = vunpack.c.l.b16 %v1128_v50  ;;  %v571_v58 = vunpack.c.h.b16 %v422_v22  ;;  %v576_v53 = vunpack.c.h.b16 %v425_v39 }
  0xe0   : > { %v661_v47 = vsel %vm1950_vm15, %v1752_v1, 0  ;;  %v664_v55 = vsel %vm1950_vm15, %v1749_v7, 0  ;;  %v740_v50 = vunpack.c.h.b16 %v667_v35  ;;  %v745_v49 = vunpack.c.h.b16 %v670_v3 }
  0xe1   : > { %v586_v51 = vpack.c.b16 %v576_v53, %v571_v58  ;;  %v730_v59 = vunpack.c.h.b16 %v661_v47  ;;  %v735_v8 = vunpack.c.h.b16 %v664_v55  ;;  %v2852_v28 = vpack.c.b16 %v2156_v4, %v2149_v44 }
  0xe2   : > { %v660_v20 = vsel %vm1758_vm7, %v2033_v60, 0  ;;  %v663_v33 = vsel %vm1758_vm7, %v2035_v31, 0  ;;  %v729_v45 = vunpack.c.l.b16 %v661_v47  ;;  %v734_v61 = vunpack.c.l.b16 %v664_v55 }
  0xe3   : > { %594 = vrot.lane.b32.xlu0 %v581_v23, %s1615_s25  ;;  %v744_v23 = vunpack.c.l.b16 %v670_v3  ;;  %v732_v22 = vunpack.c.l.b16 %v663_v33  ;;  %v728_v17 = vunpack.c.h.b16 %v660_v20  ;;  %vm529_vm7 = vcmask 1039360  }
  0xe4   : > { %1230 = vrot.lane.b32.xlu1 %v1215_v29, %s1615_s25  ;;  %v739_v29 = vunpack.c.l.b16 %v667_v35  ;;  %v749_v44 = vpack.c.b16 %v734_v61, %v729_v45  ;;  %vm608_vm15 = vcmask 1031168   ;;  %vm2857_vm5 = vnez %v2796_v38 }
  0xe5   : > { %1234 = vrot.lane.b32.xlu2 %v1217_v32, %s1615_s25  ;;  %v1212_v32 = vpack.c.b16 %v1197_v54, %v1192_v57  ;;  %vm2858_vm3 = vnez %v2794_v36 }
  0xe6   : > { %v754_v43 = vpack.c.b16 %v744_v23, %v739_v29 }
  0xeb   : > { %815 = vrot.lane.b32.xlu0 %v797_v25, %s1615_s25  ;;  %v750_v25 = vpack.c.b16 %v735_v8, %v730_v59 }
  0xec   : > { %1222 = vrot.lane.b32.xlu1 %v1211_v5, %s1615_s25  ;;  %v755_v5 = vpack.c.b16 %v745_v49, %v740_v50 }
  0xed   : > { %1226 = vrot.lane.b32.xlu2 %v1213_v41, %s1615_s25  ;;  %v727_v41 = vunpack.c.l.b16 %v660_v20 }
  0xef   : > { %v2286_v0 = vpop.permute.xlu2 %511  ;;  %v747_v4 = vpack.c.b16 %v732_v22, %v727_v41 }
  0xf3   : > { %1236 = vrot.lane.b32.xlu0 %v1218_v11, %s1615_s25 }
  0xf4   : > { %803 = vrot.lane.b32.xlu1 %v791_v16, %s1615_s25 }
  0xf5   : > { %602 = vrot.lane.b32.xlu2 %v585_v46, %s1615_s25 }
  0xfb   : > { %604 = vrot.lane.b32.xlu0 %v586_v51, %s1615_s25 }
  0xfc   : > { %1224 = vrot.lane.b32.xlu1 %v1212_v32, %s1615_s25 }
  0xfd   : > { %844 = vrot.lane.b32.xlu2 %v754_v43, %s1616_s26 }
  0xff   : > { %v520_v56 = vpop.permute.xlu2 %519 }
 0x103   : > { %846 = vrot.lane.b32.xlu0 %v755_v5, %s1616_s26 }
 0x104   : > { %606 = vrot.lane.b32.xlu1 %v587_v42, %s1615_s25 }
 0x105   : > { %836 = vrot.lane.b32.xlu2 %v750_v25, %s1616_s26 }
 0x107   : > { %v514_v7 = vpop.permute.xlu2 %513 }
 0x108   : > { %v2371_v23 = vsel %vm529_vm7, %v2286_v0, %v514_v7 }
 0x10b   : > { %838 = vrot.lane.b32.xlu0 %v2852_v28, %s1616_s26 }
 0x10c   : > { %848 = vrot.lane.b32.xlu1 %v756_v21, %s1616_s26 }
 0x10d   : > { %600 = vrot.lane.b32.xlu2 %v2182_v40, %s1615_s25  ;;  %v733_v40 = vunpack.c.h.b16 %v663_v33 }
 0x10e   : > { %v2319_v42 = vpop.permute.xlu1 %517 }
 0x10f   : > { %v526_v21 = vpop.permute.xlu2 %525  ;;  %v748_v62 = vpack.c.b16 %v733_v40, %v728_v17 }
 0x113   : > { %840 = vrot.lane.b32.xlu0 %v2189_v30, %s1616_s26 }
 0x114   : > { %834 = vrot.lane.b32.xlu1 %v749_v44, %s1616_s26 }
 0x115   : > { %830 = vrot.lane.b32.xlu2 %v747_v4, %s1616_s26  ;;  %v528_v39 = vpop.permute.xlu0 %527 }
 0x116   : > { %v510_v10 = vpop.permute.xlu1 %509  ;;  %v2376_v32 = vsel %vm529_vm7, %v526_v21, %v528_v39 }
 0x117   : > { %v2325_v14 = vpop.permute.xlu2 %811  ;;  %v2349_v46 = vsel %vm529_vm7, %v510_v10, %v2286_v0 }
 0x11b   : > { %832 = vrot.lane.b32.xlu0 %v748_v62, %s1616_s26 }
 0x11c   : > { %598 = vrot.lane.b32.xlu1 %v2200_v9, %s1615_s25 }
 0x11d   : > { %858 = vrot.lane.b32.xlu2 %v2319_v42, %s1616_s26  ;;  %v522_v12 = vpop.permute.xlu0 %521 }
 0x11e   : > { %v524_v30 = vpop.permute.xlu1 %523  ;;  %v2343_v9 = vsel %vm529_vm7, %v520_v56, %v522_v12 }
 0x11f   : > { %v2332_v18 = vpop.permute.xlu2 %1232  ;;  %v2365_v53 = vsel %vm529_vm7, %v524_v30, %v526_v21  ;;  %v2393_v49 = vsel %vm529_vm7, %v522_v12, %v524_v30 }
 0x123   : > { %868 = vrot.lane.b32.xlu0 %v528_v39, %s1616_s26 }
 0x124   : > { %842 = vrot.lane.b32.xlu1 %v2202_v34, %s1616_s26 }
 0x125   : > { %1289 = vrot.lane.b32.xlu2 %v528_v39, %s1613_s23  ;;  %v516_v16 = vpop.permute.xlu0 %515 }
 0x126   : > { %v2338_v15 = vpop.permute.xlu1 %596  ;;  %v2355_v57 = vsel %vm529_vm7, %v514_v7, %v516_v16  ;;  %v2384_v47 = vsel %vm529_vm7, %v516_v16, %v2319_v42 }
 0x127   : > { %v2340_v11 = vpop.permute.xlu2 %592 }
 0x12b   : > { %860 = vrot.lane.b32.xlu0 %v2343_v9, %s1616_s26 }
 0x12d   : > { %850 = vrot.lane.b32.xlu2 %v2349_v46, %s1616_s26  ;;  %v808_v35 = vpop.permute.xlu0 %807 }
 0x12e   : > { %v818_v34 = vpop.permute.xlu1 %817  ;;  %878 = vrot.lane.b32.xlu1 %v808_v35, %s1616_s26 }
 0x12f   : > { %v814_v3 = vpop.permute.xlu2 %813 }
 0x133   : > { %854 = vrot.lane.b32.xlu0 %v2355_v57, %s1616_s26 }
 0x135   : > { %888 = vrot.lane.b32.xlu2 %v818_v34, %s1616_s26  ;;  %v2362_v58 = vpop.permute.xlu0 %1228 }
 0x136   : > { %v2360_v54 = vpop.permute.xlu1 %1238  ;;  %864 = vrot.lane.b32.xlu1 %v2365_v53, %s1616_s26 }
 0x137   : > { %v806_v29 = vpop.permute.xlu2 %805 }
 0x138   : > { %v822_v17 = vsel %vm608_vm15, %v806_v29, %v808_v35 }
 0x13b   : > { %852 = vrot.lane.b32.xlu0 %v2371_v23, %s1616_s26 }
 0x13d   : > { %866 = vrot.lane.b32.xlu2 %v2376_v32, %s1616_s26  ;;  %v589_v43 = vpop.permute.xlu0 %588 }
 0x13e   : > { %v2380_v51 = vpop.permute.xlu1 %590  ;;  %856 = vrot.lane.b32.xlu1 %v2384_v47, %s1616_s26 }
 0x13f   : > { %v2388_v0 = vpop.permute.xlu2 %1234  ;;  %v2412_v33 = vsel %vm608_vm15, %v589_v43, %v2380_v51 }
 0x143   : > { %1309 = vrot.lane.b32.xlu0 %v2360_v54, %s1613_s23 }
 0x145   : > { %v800_v50 = vpop.permute.xlu0 %799 }
 0x146   : > { %v810_v55 = vpop.permute.xlu1 %809  ;;  %862 = vrot.lane.b32.xlu1 %v2393_v49, %s1616_s26 }
 0x147   : > { %v823_v56 = vsel %vm608_vm15, %v810_v55, %v2325_v14  ;;  %v1227_v59 = vpop.permute.xlu2 %1226 }
 0x148   : > { %880 = vrot.lane.b32.xlu2 %v823_v56, %s1616_s26 }
 0x14b   : > { %1299 = vrot.lane.b32.xlu0 %v2362_v58, %s1613_s23 }
 0x14d   : > { %v1221_v5 = vpop.permute.xlu0 %1220 }
 0x14e   : > { %v802_v8 = vpop.permute.xlu1 %801  ;;  %1287 = vrot.lane.b32.xlu1 %v2376_v32, %s1613_s23 }
 0x14f   : > { %v819_v28 = vsel %vm608_vm15, %v800_v50, %v802_v8  ;;  %v603_v20 = vpop.permute.xlu2 %602 }
 0x153   : > { %1285 = vrot.lane.b32.xlu0 %v2365_v53, %s1613_s23 }
 0x155   : > { %v2406_v7 = vpop.permute.xlu0 %594 }
 0x156   : > { %v1231_v25 = vpop.permute.xlu1 %1230  ;;  %870 = vrot.lane.b32.xlu1 %v819_v28, %s1616_s26 }
 0x157   : > { %v1244_v21 = vsel %vm608_vm15, %v1231_v25, %v2332_v18  ;;  %v2419_v22 = vpop.permute.xlu2 %844  ;;  %v1243_v25 = vsel %vm608_vm15, %v1227_v59, %v2362_v58  ;;  %v1091_v58 = vsel %vm2019_vm12, %v1775_v24, 0 }
 0x15d   : > { %v816_v61 = vpop.permute.xlu0 %815 }
 0x15e   : > { %v1223_v45 = vpop.permute.xlu1 %1222  ;;  %1301 = vrot.lane.b32.xlu1 %v1244_v21, %s1613_s23  ;;  %v825_v41 = vsel %vm608_vm15, %v814_v3, %v816_v61  ;;  %v826_v10 = vsel %vm608_vm15, %v816_v61, %v818_v34  ;;  %v824_v34 = vsel %vm608_vm15, %v2325_v14, %v814_v3  ;;  %v2459_v61 = vld [vmem:[#allocation2 + $0x30] sm:$0xff]  ;;  %v1245_v21 = vsel %vm608_vm15, %v2332_v18, %v2388_v0  ;;  %v2488_v18 = vld [vmem:[#allocation2 + $0x1c] sm:$0xff] }
 0x15f   : > { %884 = vrot.lane.b32.xlu0 %v825_v41, %s1616_s26  ;;  %v2427_v40 = vpop.permute.xlu2 %836  ;;  %v1240_v50 = vsel %vm608_vm15, %v1221_v5, %v1223_v45 }
 0x165   : > { %v1237_v4 = vpop.permute.xlu0 %1236 }
 0x166   : > { %v804_v44 = vpop.permute.xlu1 %803  ;;  %886 = vrot.lane.b32.xlu1 %v826_v10, %s1616_s26  ;;  %v1246_v12 = vsel %vm608_vm15, %v2388_v0, %v1237_v4  ;;  %v1247_v56 = vsel %vm608_vm15, %v1237_v4, %v2360_v54  ;;  %v1085_v0 = vsel %vm2019_vm12, %v2488_v18, 0 }
 0x167   : > { %v821_v39 = vsel %vm608_vm15, %v804_v44, %v806_v29  ;;  %876 = vrot.lane.b32.xlu0 %v822_v17, %s1616_s26  ;;  %v820_v16 = vsel %vm608_vm15, %v802_v8, %v804_v44  ;;  %v2437_v35 = vpop.permute.xlu2 %600  ;;  %v1165_v44 = vunpack.c.l.b16 %v1091_v58  ;;  %v1156_v2 = vunpack.c.h.b16 %v1085_v0 }
 0x168   : > { %874 = vrot.lane.b32.xlu2 %v821_v39, %s1616_s26 }
 0x16d   : > { %v605_v30 = vpop.permute.xlu0 %604 }
 0x16e   : > { %v1225_v62 = vpop.permute.xlu1 %1224  ;;  %1305 = vrot.lane.b32.xlu1 %v1246_v12, %s1613_s23  ;;  %v2482_v10 = vsel %vm608_vm15, %v603_v20, %v605_v30 }
 0x16f   : > { %882 = vrot.lane.b32.xlu0 %v824_v34, %s1616_s26  ;;  %v1242_v55 = vsel %vm608_vm15, %v1225_v62, %v1227_v59  ;;  %v1241_v8 = vsel %vm608_vm15, %v1223_v45, %v1225_v62  ;;  %v2452_v28 = vpop.permute.xlu2 %830  ;;  %v1088_v45 = vsel %vm2019_vm12, %v2459_v61, 0  ;;  %v2469_v59 = vsel %vm608_vm15, %v2437_v35, %v603_v20 }
 0x170   : > { %872 = vrot.lane.b32.xlu2 %v820_v16, %s1616_s26  ;;  %v1160_v41 = vunpack.c.l.b16 %v1088_v45  ;;  %v1155_v62 = vunpack.c.l.b16 %v1085_v0 }
 0x172   : > { %v1175_v24 = vpack.c.b16 %v1165_v44, %v1160_v41 }
 0x175   : > { %v2439_v43 = vpop.permute.xlu0 %846 }
 0x176   : > { %v607_v29 = vpop.permute.xlu1 %606  ;;  %1295 = vrot.lane.b32.xlu1 %v1242_v55, %s1613_s23  ;;  %v1166_v55 = vunpack.c.h.b16 %v1091_v58 }
 0x177   : > { %1291 = vrot.lane.b32.xlu0 %v1240_v50, %s1613_s23  ;;  %v2479_v4 = vpop.permute.xlu2 %858 }
 0x178   : > { %1307 = vrot.lane.b32.xlu2 %v1247_v56, %s1613_s23 }
 0x17d   : > { %v839_v3 = vpop.permute.xlu0 %838 }
 0x17e   : > { %v849_v14 = vpop.permute.xlu1 %848  ;;  %1293 = vrot.lane.b32.xlu1 %v1241_v8, %s1613_s23 }
 0x17f   : > { %1277 = vrot.lane.b32.xlu0 %v2384_v47, %s1613_s23  ;;  %v2499_v12 = vpop.permute.xlu2 %1289 }
 0x180   : > { %1297 = vrot.lane.b32.xlu2 %v1243_v25, %s1613_s23  ;;  %2853 = vst [vmem:[#allocation3_spill] sm:$0xff] %v2499_v12 }
 0x185   : > { %v2457_v5 = vpop.permute.xlu0 %840 }
 0x186   : > { %v835_v54 = vpop.permute.xlu1 %834  ;;  %1279 = vrot.lane.b32.xlu1 %v2319_v42, %s1613_s23  ;;  %v1082_v42 = vsel %vm2019_vm12, %v1752_v1, 0  ;;  %v2502_v1 = vsel %vm608_vm15, %v605_v30, %v607_v29  ;;  %vm890_vm12 = vcmask 785408  }
 0x187   : > { %1283 = vrot.lane.b32.xlu0 %v2393_v49, %s1613_s23  ;;  %v1150_v20 = vunpack.c.l.b16 %v1082_v42  ;;  %v1151_v27 = vunpack.c.h.b16 %v1082_v42  ;;  %v2515_v29 = vsel %vm890_vm12, %v2439_v43, %v849_v14  ;;  %v2519_v50 = vsel %vm890_vm12, %v2427_v40, %v839_v3  ;;  %v2521_v56 = vpop.permute.xlu2 %850 }
 0x188   : > { %1303 = vrot.lane.b32.xlu2 %v1245_v21, %s1613_s23  ;;  %v1084_v14 = vsel %vm1782_vm13, %v2035_v31, 0  ;;  %v2537_v41 = vsel %vm890_vm12, %v835_v54, %v2427_v40 }
 0x189   : > { %v1170_v34 = vpack.c.b16 %v1155_v62, %v1150_v20  ;;  %v1171_v30 = vpack.c.b16 %v1156_v2, %v1151_v27  ;;  %v1154_v21 = vunpack.c.h.b16 %v1084_v14  ;;  %v1153_v27 = vunpack.c.l.b16 %v1084_v14 }
 0x18d   : > { %v833_v39 = vpop.permute.xlu0 %832 }
 0x18e   : > { %v599_v17 = vpop.permute.xlu1 %598  ;;  %1265 = vrot.lane.b32.xlu1 %v1175_v24, %s1613_s23  ;;  %v2550_v42 = vsel %vm890_vm12, %v2452_v28, %v833_v39  ;;  %v2553_v40 = vsel %vm890_vm12, %v833_v39, %v835_v54 }
 0x18f   : > { %1269 = vrot.lane.b32.xlu0 %v1177_v48, %s1613_s23  ;;  %v1161_v48 = vunpack.c.h.b16 %v1088_v45  ;;  %v1081_v45 = vsel %vm1782_vm13, %v2033_v60, 0  ;;  %v889_v26 = vpop.permute.xlu2 %888  ;;  %v2557_v0 = vsel %vm608_vm15, %v599_v17, %v2437_v35  ;;  %vm2856_vm13 = vcmask 523264  }
 0x190   : > { %1275 = vrot.lane.b32.xlu2 %v2355_v57, %s1613_s23  ;;  %v1149_v58 = vunpack.c.h.b16 %v1081_v45  ;;  %vm2859_vm11 = vmmov %vm2856_vm13 }
 0x191   : > { %v1176_v25 = vpack.c.b16 %v1166_v55, %v1161_v48  ;;  %vm2860_vm8 = vmmov %vm2859_vm11 }
 0x192   : > { %v1169_v24 = vpack.c.b16 %v1154_v21, %v1149_v58  ;;  %vm2861_vm0 = vmmov %vm2860_vm8 }
 0x193   : > { %vm2863_vm9 = vmmov %vm2861_vm0 }
 0x194   : > { %vm2865_vm2 = vmmov %vm2861_vm0 }
 0x195   : > { %v2504_v16 = vpop.permute.xlu0 %868  ;;  %vm2867_vm10 = vmmov %vm2861_vm0 }
 0x196   : > { %1271 = vrot.lane.b32.xlu1 %v2349_v46, %s1613_s23  ;;  %v2511_v19 = vpop.permute.xlu1 %842  ;;  %vm2868_vm14 = vmmov %vm2861_vm0 }
 0x197   : > { %1255 = vrot.lane.b32.xlu0 %v1170_v34, %s1613_s23  ;;  %v867_v62 = vpop.permute.xlu2 %866  ;;  %v1148_v34 = vunpack.c.l.b16 %v1081_v45  ;;  %v2568_v28 = vsel %vm890_vm12, %v2457_v5, %v2511_v19  ;;  %vm2869_vm1 = vmmov %vm2861_vm0 }
 0x198   : > { %1281 = vrot.lane.b32.xlu2 %v2343_v9, %s1613_s23  ;;  %vm2870_vm4 = vmmov %vm2861_vm0 }
 0x199   : > { %v1168_v35 = vpack.c.b16 %v1153_v27, %v1148_v34  ;;  %vm2871_vm6 = vmmov %vm2861_vm0 }
 0x19a   : > { %vm2872_vm7 = vmmov %vm2861_vm0 }
 0x19d   : > { %v2523_v8 = vpop.permute.xlu0 %860 }
 0x19e   : > { %1257 = vrot.lane.b32.xlu1 %v1171_v30, %s1613_s23 }
 0x19f   : > { %1261 = vrot.lane.b32.xlu0 %v2212_v6, %s1613_s23 }
 0x1a0   : > { %1267 = vrot.lane.b32.xlu2 %v1176_v25, %s1613_s23  ;;  %v879_v3 = vpop.permute.xlu1 %878 }
 0x1a2   : > { %v881_v17 = vpop.permute.xlu2 %880 }
 0x1a5   : > { %v2539_v44 = vpop.permute.xlu0 %854 }
 0x1a6   : > { %1263 = vrot.lane.b32.xlu1 %v2214_v13, %s1613_s23 }
 0x1a7   : > { %1253 = vrot.lane.b32.xlu0 %v1169_v24, %s1613_s23 }
 0x1a8   : > { %1273 = vrot.lane.b32.xlu2 %v2371_v23, %s1613_s23  ;;  %v2546_v6 = vpop.permute.xlu1 %864 }
 0x1ad   : > { %v2559_v13 = vpop.permute.xlu0 %852 }
 0x1b0   : > { %1259 = vrot.lane.b32.xlu2 %v1172_v52, %s1613_s23  ;;  %v857_v20 = vpop.permute.xlu1 %856 }
 0x1b5   : > { %v2570_v54 = vpop.permute.xlu0 %1309 }
 0x1b8   : > { %1251 = vrot.lane.b32.xlu2 %v1168_v35, %s1613_s23  ;;  %v863_v39 = vpop.permute.xlu1 %862 }
 0x1bd   : > { %v2573_v2 = vpop.permute.xlu0 %1299 }
 0x1be   : > { %2854 = vst [vmem:[#allocation4_spill] sm:$0xff] %v2573_v2  ;;  %v906_v2 = vsel %vm890_vm12, %v867_v62, %v2504_v16 }
 0x1c0   : > { %v2575_v63 = vpop.permute.xlu1 %1287 }
 0x1c2   : > { %v875_v37 = vpop.permute.xlu2 %874 }
 0x1c5   : > { %v2577_v48 = vpop.permute.xlu0 %1285 }
 0x1c8   : > { %v871_v52 = vpop.permute.xlu1 %870 }
 0x1ca   : > { %v873_v55 = vpop.permute.xlu2 %872 }
 0x1cb   : > { %v907_v16 = vsel %vm890_vm12, %v871_v52, %v873_v55 }
 0x1d0   : > { %v2579_v30 = vpop.permute.xlu1 %1301 }
 0x1d1   : > { %2855 = vst [vmem:[#allocation5_spill] sm:$0xff] %v2579_v30  ;;  %v885_v25 = vpop.permute.xlu0 %884  ;;  %v905_v30 = vsel %vm890_vm12, %v2546_v6, %v867_v62  ;;  %v908_v62 = vsel %vm890_vm12, %v873_v55, %v875_v37 }
 0x1d2   : > { %v2581_v5 = vpop.permute.xlu2 %1307 }
 0x1d8   : > { %v887_v45 = vpop.permute.xlu1 %886 }
 0x1d9   : > { %v877_v14 = vpop.permute.xlu0 %876  ;;  %v913_v58 = vsel %vm890_vm12, %v885_v25, %v887_v45  ;;  %v914_v21 = vsel %vm890_vm12, %v887_v45, %v889_v26 }
 0x1da   : > { %v2585_v24 = vpop.permute.xlu2 %1297  ;;  %971 = vmatpush.bf16.msra.mxu2 %v913_v58  ;;  %984 = vmatpush.bf16.msra.mxu3 %v914_v21  ;;  %v909_v34 = vsel %vm890_vm12, %v875_v37, %v877_v14  ;;  %v910_v27 = vsel %vm890_vm12, %v877_v14, %v879_v3  ;;  %v901_v3 = vsel %vm890_vm12, %v2539_v44, %v857_v20 }
 0x1db   : > { %v902_v14 = vsel %vm890_vm12, %v857_v20, %v2479_v4  ;;  %v903_v4 = vsel %vm890_vm12, %v2523_v8, %v863_v39  ;;  %v1545_v20 = vld [vmem:[%s2782_s1 + $0x4] sm:$0x7]  ;;  %v904_v37 = vsel %vm890_vm12, %v863_v39, %v2546_v6  ;;  %v900_v8 = vsel %vm890_vm12, %v2559_v13, %v2539_v44 }
 0x1dc   : > { %v829_v52 = vpack.c.bf16 %v1545_v20, %v1545_v20  ;;  %v1334_v20 = vsel %vm2860_vm8, %v2581_v5, %v2570_v54  ;;  %vm2878_vm8 = vmmov %vm2861_vm0 }
 0x1de   : > { %972 = vmatpush.bf16.msra.mxu2 %v909_v34  ;;  %985 = vmatpush.bf16.msra.mxu3 %v910_v27  ;;  %v1598_v34 = vld [vmem:[#allocation2 + $0x28] sm:$0xff] }
 0x1df   : > { %v364_v27 = vsel %vm2858_vm3, %v1598_v34, 0 }
 0x1e0   : > { %v2589_v35 = vpop.permute.xlu1 %1305 }
 0x1e1   : > { %v883_v12 = vpop.permute.xlu0 %882 }
 0x1e2   : > { %973 = vmatpush.bf16.msra.mxu2 %v905_v30  ;;  %986 = vmatpush.bf16.msra.mxu3 %v906_v2  ;;  %v911_v26 = vsel %vm890_vm12, %v881_v17, %v883_v12  ;;  %v912_v45 = vsel %vm890_vm12, %v883_v12, %v885_v25  ;;  %v2597_v58 = vpop.permute.xlu2 %1303  ;;  %v897_v2 = vsel %vm890_vm12, %v2419_v22, %v2439_v43 }
 0x1e3   : > { %945 = vmatpush.bf16.msra.mxu0 %v911_v26  ;;  %958 = vmatpush.bf16.msra.mxu1 %v912_v45  ;;  %v2623_v43 = vsel %vm2856_vm13, %v2577_v48, %v2575_v63  ;;  %vm2874_vm13 = vmmov %vm2861_vm0 }
 0x1e6   : > { %974 = vmatpush.bf16.msra.mxu2 %v901_v3  ;;  %987 = vmatpush.bf16.msra.mxu3 %v902_v14 }
 0x1e7   : > { %946 = vmatpush.bf16.msra.mxu0 %v907_v16  ;;  %959 = vmatpush.bf16.msra.mxu1 %v908_v62  ;;  %v1333_v62 = vsel %vm2859_vm11, %v2589_v35, %v2581_v5  ;;  %v2862_v5 = vld [vmem:[#allocation4_spill] sm:$0xff]  ;;  %vm2877_vm11 = vmmov %vm2861_vm0 }
 0x1e8   : > { %v2605_v17 = vpop.permute.xlu1 %1295 }
 0x1e9   : > { %v2607_v12 = vpop.permute.xlu0 %1291  ;;  %v1329_v36 = vsel %vm2861_vm0, %v2605_v17, %v2585_v24 }
 0x1ea   : > { %975 = vmatpush.bf16.msra.mxu2 %v897_v2  ;;  %988 = vmatpush.bf16.msra.mxu3 %v2515_v29  ;;  %v2625_v55 = vpop.permute.xlu2 %1275  ;;  %v899_v29 = vsel %vm890_vm12, %v2521_v56, %v2559_v13  ;;  %v1595_v56 = vld [vmem:[#allocation2 + $0x44] sm:$0xff]  ;;  %v444_v2 = vunpack.c.h.b16 %v364_v27 }
 0x1eb   : > { %947 = vmatpush.bf16.msra.mxu0 %v903_v4  ;;  %960 = vmatpush.bf16.msra.mxu1 %v904_v37  ;;  %v362_v4 = vsel %vm2858_vm3, %v2035_v31, 0 }
 0x1ec   : > { %v439_v31 = vunpack.c.l.b16 %v362_v4  ;;  %v440_v54 = vunpack.c.h.b16 %v362_v4 }
 0x1ee   : > { %976 = vmatpush.bf16.msra.mxu2 %v2537_v41  ;;  %989 = vmatpush.bf16.msra.mxu3 %v2519_v50  ;;  %v611_v50 = vsel %vm608_vm15, %v2340_v11, %v2406_v7  ;;  %v367_v41 = vsel %vm2857_vm5, %v1595_v56, 0 }
 0x1ef   : > { %948 = vmatpush.bf16.msra.mxu0 %v899_v29  ;;  %961 = vmatpush.bf16.msra.mxu1 %v900_v8  ;;  %v1418_v29 = vld [vmem:[%s2783_s2] sm:$0x7]  ;;  %v1330_v8 = vsel %vm2863_vm9, %v2585_v24, %v2862_v5  ;;  %v1332_v24 = vsel %vm2868_vm14, %v2597_v58, %v2589_v35  ;;  %vm2879_vm9 = vmmov %vm2861_vm0 }
 0x1f0   : > { %v2637_v6 = vpop.permute.xlu1 %1293  ;;  %1421 = vperm.xlu1 %1591, %v1418_v29   ;;  %vm2882_vm14 = vmmov %vm2861_vm0 }
 0x1f1   : > { %v2639_v39 = vpop.permute.xlu0 %1277  ;;  %1548 = vmatmul.msk.bf16.vlgmr.msra.gmra.mxu2 %vm890_vm12, %v829_v52  ;;  %1549 = vmatmul.msk.bf16.vlgmr.msra.gmra.mxu3 %vm890_vm12, %v829_v52  ;;  %v1327_v35 = vsel %vm2871_vm6, %v2607_v12, %v2637_v6  ;;  %v1554_v12 = vld [vmem:[%s2782_s1 + $0x8] sm:$0x7] }
 0x1f2   : > { %1026 = vmatpush.bf16.msrb.mxu2 %v2482_v10  ;;  %1039 = vmatpush.bf16.msrb.mxu3 %v2502_v1  ;;  %v896_v10 = vsel %vm890_vm12, %v2511_v19, %v2419_v22  ;;  %v612_v1 = vsel %vm608_vm15, %v2406_v7, %v2338_v15  ;;  %v2657_v44 = vpop.permute.xlu2 %1281  ;;  %v365_v15 = vsel %vm2857_vm5, %v2459_v61, 0  ;;  %v449_v19 = vunpack.c.l.b16 %v367_v41 }
 0x1f3   : > { %949 = vmatpush.bf16.msra.mxu0 %v2568_v28  ;;  %962 = vmatpush.bf16.msra.mxu1 %v896_v10  ;;  %v445_v61 = vunpack.c.l.b16 %v365_v15 }
 0x1f5   : > { %v457_v13 = vpack.c.b16 %v449_v19, %v445_v61  ;;  %v2866_v19 = vld [vmem:[#allocation3_spill] sm:$0xff] }
 0x1f6   : > { %1027 = vmatpush.bf16.msrb.mxu2 %v611_v50  ;;  %1040 = vmatpush.bf16.msrb.mxu3 %v612_v1 }
 0x1f7   : > { %950 = vmatpush.bf16.msra.mxu0 %v2550_v42  ;;  %963 = vmatpush.bf16.msra.mxu1 %v2553_v40  ;;  %v1596_v42 = vld [vmem:[#allocation2 + $0x8] sm:$0xff]  ;;  %v363_v40 = vsel %vm2857_vm5, %v2488_v18, 0 }
 0x1f8   : > { %v2661_v22 = vpop.permute.xlu1 %1279  ;;  %v441_v30 = vunpack.c.l.b16 %v363_v40  ;;  %v442_v25 = vunpack.c.h.b16 %v363_v40 }
 0x1f9   : > { %v2668_v7 = vpop.permute.xlu0 %1283 }
 0x1fa   : > { %1028 = vmatpush.bf16.msrb.mxu2 %v2365_v53  ;;  %1041 = vmatpush.bf16.msrb.mxu3 %v2376_v32  ;;  %v450_v53 = vunpack.c.h.b16 %v367_v41  ;;  %v361_v32 = vsel %vm2857_vm5, %v1596_v42, 0  ;;  %v1268_v26 = vpop.permute.xlu2 %1267  ;;  %v2864_v41 = vld [vmem:[#allocation5_spill] sm:$0xff]  ;;  %v1321_v42 = vsel %vm2869_vm1, %v2625_v55, %v2639_v39  ;;  %vm2875_vm5 = vmmov %vm2861_vm0 }
 0x1fb   : > { %1000 = vmatpush.bf16.msrb.mxu0 %v2557_v0  ;;  %1013 = vmatpush.bf16.msrb.mxu1 %v2469_v59  ;;  %v610_v59 = vsel %vm608_vm15, %v2380_v51, %v2340_v11  ;;  %v446_v0 = vunpack.c.h.b16 %v365_v15  ;;  %v437_v28 = vunpack.c.l.b16 %v361_v32  ;;  %v438_v18 = vunpack.c.h.b16 %v361_v32  ;;  %vm2873_vm15 = vmmov %vm2861_vm0 }
 0x1fc   : > { %1546 = vmatmul.msk.bf16.vlgmr.msra.gmra.mxu0 %vm890_vm12, %v829_v52  ;;  %1547 = vmatmul.msk.bf16.vlgmr.msra.gmra.mxu1 %vm890_vm12, %v829_v52  ;;  %v1331_v15 = vsel %vm2865_vm2, %v2864_v41, %v2597_v58  ;;  %v1328_v58 = vsel %vm2872_vm7, %v2637_v6, %v2605_v17  ;;  %vm2880_vm2 = vmmov %vm2861_vm0 }
 0x1fd   : > { %v458_v38 = vpack.c.b16 %v450_v53, %v446_v0  ;;  %v454_v45 = vpack.c.b16 %v442_v25, %v438_v18  ;;  %v1326_v53 = vsel %vm2867_vm10, %v2575_v63, %v2866_v19  ;;  %v1322_v63 = vsel %vm2870_vm4, %v2639_v39, %v2661_v22  ;;  %vm2881_vm10 = vmmov %vm2861_vm0 }
 0x1fe   : > { %1029 = vmatpush.bf16.msrb.mxu2 %v2355_v57  ;;  %1042 = vmatpush.bf16.msrb.mxu3 %v2384_v47  ;;  %v625_v57 = vld [vmem:[%s2782_s1] sm:$0x7]  ;;  %v1323_v39 = vsel %vm2875_vm5, %v2657_v44, %v2668_v7  ;;  %vm2883_vm1 = vmmov %vm2861_vm0 }
 0x1ff   : > { %1001 = vmatpush.bf16.msrb.mxu0 %v2412_v33  ;;  %1014 = vmatpush.bf16.msrb.mxu1 %v610_v59  ;;  %v1597_v47 = vld [vmem:[#allocation2 + $0x3c] sm:$0xff]  ;;  %v453_v33 = vpack.c.b16 %v441_v30, %v437_v28  ;;  %v626_v3 = vpack.c.bf16 %v625_v57, %v625_v57  ;;  %v1250_v59 = vpack.c.bf16 %v1554_v12, %v1554_v12 }
 0x200   : > { %v366_v21 = vsel %vm2858_vm3, %v1597_v47, 0  ;;  %v2688_v11 = vpop.permute.xlu1 %1265 }
 0x201   : > { %v2692_v51 = vpop.permute.xlu0 %1269  ;;  %v447_v14 = vunpack.c.l.b16 %v366_v21  ;;  %v448_v16 = vunpack.c.h.b16 %v366_v21  ;;  %v1317_v40 = vsel %vm2873_vm15, %v2688_v11, %v1268_v26 }
 0x202   : > { %1030 = vmatpush.bf16.msrb.mxu2 %v457_v13  ;;  %1043 = vmatpush.bf16.msrb.mxu3 %v458_v38  ;;  %v1274_v56 = vpop.permute.xlu2 %1273  ;;  %v1318_v61 = vsel %vm2874_vm13, %v1268_v26, %v2692_v51 }
 0x203   : > { %1002 = vmatpush.bf16.msrb.mxu0 %v2343_v9  ;;  %1015 = vmatpush.bf16.msrb.mxu1 %v2393_v49  ;;  %v360_v9 = vsel %vm2858_vm3, %v2033_v60, 0  ;;  %v443_v49 = vunpack.c.l.b16 %v364_v27  ;;  %v456_v37 = vpack.c.b16 %v448_v16, %v444_v2  ;;  %vm2876_vm3 = vmmov %vm2861_vm0  ;;  %v1320_v28 = vsel %vm2879_vm9, %v1274_v56, %v2625_v55 }
 0x204   : > { %v435_v52 = vunpack.c.l.b16 %v360_v9  ;;  %v1324_v17 = vsel %vm2876_vm3, %v2668_v7, %v2577_v48 }
 0x205   : > { %v455_v60 = vpack.c.b16 %v447_v14, %v443_v49 }
 0x206   : > { %1031 = vmatpush.bf16.msrb.mxu2 %v453_v33  ;;  %1044 = vmatpush.bf16.msrb.mxu3 %v454_v45  ;;  %v451_v10 = vpack.c.b16 %v439_v31, %v435_v52 }
 0x207   : > { %1003 = vmatpush.bf16.msrb.mxu0 %v2349_v46  ;;  %1016 = vmatpush.bf16.msrb.mxu1 %v2371_v23  ;;  %v436_v46 = vunpack.c.h.b16 %v360_v9 }
 0x208   : > { %v1272_v23 = vpop.permute.xlu1 %1271 }
 0x209   : > { %1552 = vmatmul.msk.bf16.vlgmr.msrb.gmra.mxu2 %vm890_vm12, %v626_v3  ;;  %1553 = vmatmul.msk.bf16.vlgmr.msrb.gmra.mxu3 %vm890_vm12, %v626_v3  ;;  %v1256_v50 = vpop.permute.xlu0 %1255  ;;  %v452_v1 = vpack.c.b16 %v440_v54, %v436_v46  ;;  %v1319_v44 = vsel %vm2861_vm0, %v1272_v23, %v1274_v56 }
 0x20a   : > { %1390 = vmatpush.bf16.msra.mxu2 %v1333_v62  ;;  %1403 = vmatpush.bf16.msra.mxu3 %v1334_v20  ;;  %v1260_v22 = vpop.permute.xlu2 %1259 }
 0x20b   : > { %1004 = vmatpush.bf16.msrb.mxu0 %v455_v60  ;;  %1017 = vmatpush.bf16.msrb.mxu1 %v456_v37 }
 0x20e   : > { %1391 = vmatpush.bf16.msra.mxu2 %v1329_v36  ;;  %1404 = vmatpush.bf16.msra.mxu3 %v1330_v8 }
 0x20f   : > { %1005 = vmatpush.bf16.msrb.mxu0 %v451_v10  ;;  %1018 = vmatpush.bf16.msrb.mxu1 %v452_v1 }
 0x211   : > { %v1262_v32 = vpop.permute.xlu0 %1261 }
 0x212   : > { %1392 = vmatpush.bf16.msra.mxu2 %v2623_v43  ;;  %1405 = vmatpush.bf16.msra.mxu3 %v1326_v53  ;;  %v1258_v43 = vpop.permute.xlu1 %1257  ;;  %v1252_v38 = vpop.permute.xlu2 %1251 }
 0x213   : > { %1364 = vmatpush.bf16.msra.mxu0 %v1331_v15  ;;  %1377 = vmatpush.bf16.msra.mxu1 %v1332_v24  ;;  %v1313_v6 = vsel %vm2877_vm11, %v1256_v50, %v1258_v43  ;;  %v1314_v0 = vsel %vm2878_vm8, %v1258_v43, %v1260_v22 }
 0x214   : > { %1550 = vmatmul.msk.bf16.vlgmr.msrb.gmra.mxu0 %vm890_vm12, %v626_v3  ;;  %1551 = vmatmul.msk.bf16.vlgmr.msrb.gmra.mxu1 %vm890_vm12, %v626_v3 }
 0x216   : > { %1393 = vmatpush.bf16.msra.mxu2 %v1321_v42  ;;  %1406 = vmatpush.bf16.msra.mxu3 %v1322_v63 }
 0x217   : > { %1365 = vmatpush.bf16.msra.mxu0 %v1327_v35  ;;  %1378 = vmatpush.bf16.msra.mxu1 %v1328_v58 }
 0x219   : > { %v1254_v7 = vpop.permute.xlu0 %1253 }
 0x21a   : > { %1394 = vmatpush.bf16.msra.mxu2 %v1317_v40  ;;  %1407 = vmatpush.bf16.msra.mxu3 %v1318_v61  ;;  %v1264_v13 = vpop.permute.xlu1 %1263  ;;  %v1311_v18 = vsel %vm2882_vm14, %v1252_v38, %v1254_v7  ;;  %v1312_v25 = vsel %vm2883_vm1, %v1254_v7, %v1256_v50 }
 0x21b   : > { %1366 = vmatpush.bf16.msra.mxu0 %v1323_v39  ;;  %1379 = vmatpush.bf16.msra.mxu1 %v1324_v17  ;;  %v1315_v48 = vsel %vm2880_vm2, %v1262_v32, %v1264_v13  ;;  %v1316_v30 = vsel %vm2881_vm10, %v1264_v13, %v2688_v11 }
 0x21e   : > { %1395 = vmatpush.bf16.msra.mxu2 %v1313_v6  ;;  %1408 = vmatpush.bf16.msra.mxu3 %v1314_v0 }
 0x21f   : > { %1367 = vmatpush.bf16.msra.mxu0 %v1319_v44  ;;  %1380 = vmatpush.bf16.msra.mxu1 %v1320_v28 }
 0x221   : > { %1557 = vmatmul.msk.bf16.vlgmr.msra.gmra.mxu2 %vm890_vm12, %v1250_v59  ;;  %1558 = vmatmul.msk.bf16.vlgmr.msra.gmra.mxu3 %vm890_vm12, %v1250_v59 }
 0x223   : > { %1368 = vmatpush.bf16.msra.mxu0 %v1315_v48  ;;  %1381 = vmatpush.bf16.msra.mxu1 %v1316_v30 }
 0x227   : > { %1369 = vmatpush.bf16.msra.mxu0 %v1311_v18  ;;  %1382 = vmatpush.bf16.msra.mxu1 %v1312_v25 }
 0x22a   : > { %1555 = vmatmul.msk.bf16.vlgmr.msra.gmra.mxu0 %vm890_vm12, %v1250_v59  ;;  %1556 = vmatmul.msk.bf16.vlgmr.msra.gmra.mxu1 %vm890_vm12, %v1250_v59  ;;  %vm2884_vm12 = vcmask 1043456  }
 0x22b   : > { %vm2885_vm4 = vmmov %vm2884_vm12 }
 0x262   : > { %v1422_v60 = vpop.permute.xlu1 %1421 }
 0x274   : > { %v978_v55 = vpop.f32.mrf.mxu2  ;;  %v991_v57 = vpop.f32.mrf.mxu3 }
 0x279   : > { %v952_v47 = vpop.f32.mrf.mxu0  ;;  %v965_v21 = vpop.f32.mrf.mxu1 }
 0x27c   : > { %v980_v51 = vpop.f32.mrf.mxu2  ;;  %v993_v33 = vpop.f32.mrf.mxu3 }
 0x281   : > { %v954_v34 = vpop.f32.mrf.mxu0  ;;  %v967_v11 = vpop.f32.mrf.mxu1 }
 0x28c   : > { %v1033_v27 = vpop.f32.mrf.mxu2  ;;  %v1046_v26 = vpop.f32.mrf.mxu3 }
 0x28d   : > { %v1034_v49 = vadd.f32 %v1033_v27, %v978_v55  ;;  %v1047_v2 = vadd.f32 %v1046_v26, %v991_v57 }
 0x291   : > { %v1007_v45 = vpop.f32.mrf.mxu0  ;;  %v1020_v3 = vpop.f32.mrf.mxu1 }
 0x292   : > { %v1008_v29 = vadd.f32 %v1007_v45, %v952_v47  ;;  %v1021_v36 = vadd.f32 %v1020_v3, %v965_v21 }
 0x294   : > { %v1035_v14 = vpop.f32.mrf.mxu2  ;;  %v1048_v16 = vpop.f32.mrf.mxu3 }
 0x299   : > { %v1009_v62 = vpop.f32.mrf.mxu0  ;;  %v1022_v9 = vpop.f32.mrf.mxu1 }
 0x2a4   : > { %v1397_v4 = vpop.f32.mrf.mxu2  ;;  %v1410_v20 = vpop.f32.mrf.mxu3 }
 0x2a5   : > { %v1416_v37 = vadd.f32 %v1397_v4, %v1034_v49  ;;  %v1417_v52 = vadd.f32 %v1410_v20, %v1047_v2 }
 0x2a7   : > { %v1371_v31 = vpop.f32.mrf.mxu0  ;;  %v1427_v46 = vadd.f32 %v1422_v60, %v1417_v52  ;;  %v1384_v54 = vpop.f32.mrf.mxu1  ;;  %v1426_v8 = vadd.f32 %v1422_v60, %v1416_v37 }
 0x2a8   : > { %v1414_v23 = vadd.f32 %v1371_v31, %v1008_v29  ;;  %v1415_v5 = vadd.f32 %v1384_v54, %v1021_v36 }
 0x2a9   : > { %v1433_v50 = vrot.slane %v1427_v46, 4 }
 0x2aa   : > { %v1425_v10 = vadd.f32 %v1422_v60, %v1415_v5  ;;  %v1424_v41 = vadd.f32 %v1422_v60, %v1414_v23 }
 0x2ab   : > { %v1436_v1 = vsel %vm2884_vm12, %v1426_v8, %v1433_v50 }
 0x2ac   : > { %v1399_v56 = vpop.f32.mrf.mxu2  ;;  %1440 = vst [vmem:[%s170_s11 + $0x8] sm:$0x77] %v1436_v1  ;;  %v1432_v15 = vrot.slane %v1425_v10, 4  ;;  %v1412_v19 = vpop.f32.mrf.mxu3 }
 0x2ae   : > { %v1435_v53 = vsel %vm2885_vm4, %v1424_v41, %v1432_v15 }
 0x2af   : > { %v1373_v24 = vpop.f32.mrf.mxu0  ;;  %1439 = vst [vmem:[%s170_s11] sm:$0x77] %v1435_v53  ;;  %v1386_v43 = vpop.f32.mrf.mxu1 }
 0x2b0 PF: > { %s13_s12 = sadd.s32 1, %s1605_s12  }
 0x2b1   : > { %p10_p4 = scmp.ge.s32.totalorder %s13_s12, 4  }
 0x2b3   :  { %12 = sbr.rel (!%p10_p4) target bundleno = 1 (0x1), region = 64 }

</bundles_post_ra>
